<compile_context>
chip_gen: v7x
topology: tpu7x:2x2x1
jax: 0.10.0
libtpu: 0.0.40
codegen_flags: <defaults>
</compile_context>

<pallas_src>
import jax
import jax.numpy as jnp
from jax.experimental import pallas as pl
from jax.experimental.pallas import tpu as pltpu

# ----------------------------- configuration -------------------------------
ENC_D_IN = 4          # cov_d (2) + feat_d (2)
DEC_D_IN = 4
EMB = 128             # emb_size (small stand-in for 512)
N_HEADS = 4
N_HIDDEN = 64         # total Q/K/V projection width
HEAD_DIM = N_HIDDEN // N_HEADS
FFN_HIDDEN = 256
NUM_LAYERS = 2
NORM_FIRST = True
BATCH = 2
SEQ = 8

MM_DTYPE = jnp.bfloat16      # MXU operand dtype (accumulation stays f32)
LN_EPS = 1e-5
ATTN_SCALE = 1.0 / float(HEAD_DIM) ** 0.5
NEG_INF = -1e9


# --------------------------- in-kernel primitives ---------------------------
def _mm(x, w):
    """bf16 MXU matmul with f32 accumulation (x cast exactly once)."""
    return jnp.dot(x.astype(w.dtype), w, preferred_element_type=jnp.float32)


def _ln(x, g, b):
    """LayerNorm over the last dim, f32 math."""
    mu = jnp.mean(x, axis=-1, keepdims=True)
    var = jnp.mean(jnp.square(x - mu), axis=-1, keepdims=True)
    return (x - mu) * jax.lax.rsqrt(var + LN_EPS) * g + b


def _embed(x, w, b, pe):
    """K=4 input embedding as VPU broadcast-FMAs (avoids a near-empty MXU push).

    x: (M, d_in) f32, w: (d_in, EMB) f32, b: (1, EMB), pe: (M, EMB).
    """
    acc = pe + b
    for kk in range(w.shape[0]):
        acc = acc + x[:, kk:kk + 1] * w[kk:kk + 1, :]
    return acc
    # TODO(synk): PositionalEncoding dropout omitted (eval-mode identity).


def _mha(q, k, v, mask, wo, bo):
    """Multi-head attention over flattened (B*S) rows.

    q : (Mq, N_HIDDEN) f32, k/v : (Mkv, N_HIDDEN) f32, heads folded on lanes.
    mask : (Mq, Mkv) additive f32 (block-diag batch mask [+ causal]).
    wo : (N_HIDDEN, EMB) bf16, bo : (1, EMB) f32.
    Casts hoisted out of the head loop; K transposed once per attention; head
    outputs lane-concatenated and projected by a single Wo matmul.
    """
    qb = q.astype(MM_DTYPE)                 # one cast
    vb = v.astype(MM_DTYPE)                 # one cast
    kT = k.T.astype(MM_DTYPE)               # (N_HIDDEN, Mkv): one transpose
    heads = []
    for h in range(N_HEADS):
        sl = slice(h * HEAD_DIM, (h + 1) * HEAD_DIM)
        s = jnp.dot(qb[:, sl], kT[sl, :],
                    preferred_element_type=jnp.float32) * ATTN_SCALE
        s = s + mask
        s = s - jnp.max(s, axis=-1, keepdims=True)
        p = jnp.exp(s)
        p = p * pl.reciprocal(jnp.sum(p, axis=-1, keepdims=True), approx=True)
        heads.append(jnp.dot(p.astype(MM_DTYPE), vb[:, sl],
                             preferred_element_type=jnp.float32))
    o = jnp.concatenate(heads, axis=-1).astype(MM_DTYPE)   # (Mq, N_HIDDEN)
    return jnp.dot(o, wo, preferred_element_type=jnp.float32) + bo
    # TODO(synk): attention_weight side-state (enc/dec_attn_weights) not returned.


def _enc_block(Y, mask, g1, be1, g2, be2, wqkv, bqkv, wo, bo, w1, bf1, w2, bf2):
    def sa(x):
        qkv = _mm(x, wqkv) + bqkv
        return _mha(qkv[:, :N_HIDDEN], qkv[:, N_HIDDEN:2 * N_HIDDEN],
                    qkv[:, 2 * N_HIDDEN:], mask, wo, bo)

    def ff(x):
        h = jnp.maximum(_mm(x, w1) + bf1, 0.0)
        return _mm(h, w2) + bf2

    if NORM_FIRST:
        Y = Y + sa(_ln(Y, g1, be1))
        Y = Y + ff(_ln(Y, g2, be2))
    else:
        Y = _ln(Y + sa(Y), g1, be1)
        Y = _ln(Y + ff(Y), g2, be2)
    return Y


def _dec_block(Z, Ymem, self_mask, cross_mask, g1, be1, g2, be2, g3, be3,
               wqkv1, bqkv1, wo1, bo1, wq2, bq2, wkv2, bkv2, wo2, bo2,
               w1, bf1, w2, bf2):
    def sa(x):
        qkv = _mm(x, wqkv1) + bqkv1
        return _mha(qkv[:, :N_HIDDEN], qkv[:, N_HIDDEN:2 * N_HIDDEN],
                    qkv[:, 2 * N_HIDDEN:], self_mask, wo1, bo1)

    def ca(x):
        q = _mm(x, wq2) + bq2
        kv = _mm(Ymem, wkv2) + bkv2
        return _mha(q, kv[:, :N_HIDDEN], kv[:, N_HIDDEN:], cross_mask, wo2, bo2)

    def ff(x):
        h = jnp.maximum(_mm(x, w1) + bf1, 0.0)
        return _mm(h, w2) + bf2

    if NORM_FIRST:
        Z = Z + sa(_ln(Z, g1, be1))
        Z = Z + ca(_ln(Z, g2, be2))
        Z = Z + ff(_ln(Z, g3, be3))
    else:
        Z = _ln(Z + sa(Z), g1, be1)
        Z = _ln(Z + ca(Z), g2, be2)
        Z = _ln(Z + ff(Z), g3, be3)
    return Z


# ------------------------------- fused kernel -------------------------------
def fused_forward_kernel(src_ref, tgt_ref, pe_src_ref, pe_tgt_ref,
                         enc_mask_ref, dec_mask_ref, cross_mask_ref,
                         enc_emb_w, enc_emb_b, dec_emb_w, dec_emb_b,
                         e_ln_g, e_ln_b, e_wqkv, e_bqkv, e_wo, e_bo,
                         e_w1, e_b1, e_w2, e_b2,
                         d_ln_g, d_ln_b, d_wqkv1, d_bqkv1, d_wo1, d_bo1,
                         d_wq2, d_bq2, d_wkv2, d_bkv2, d_wo2, d_bo2,
                         d_w1, d_b1, d_w2, d_b2,
                         out_ref):
    enc_mask = enc_mask_ref[...]
    dec_mask = dec_mask_ref[...]
    cross_mask = cross_mask_ref[...]

    # ------------------------------ encoder ------------------------------
    Y = _embed(src_ref[...], enc_emb_w[...], enc_emb_b[...], pe_src_ref[...])
    for l in range(NUM_LAYERS):
        eg, eb = e_ln_g[l], e_ln_b[l]                  # (2, EMB) each
        Y = _enc_block(
            Y, enc_mask,
            eg[0:1], eb[0:1], eg[1:2], eb[1:2],
            e_wqkv[l], e_bqkv[l], e_wo[l], e_bo[l],
            e_w1[l], e_b1[l], e_w2[l], e_b2[l])

    # ------------------------------ decoder ------------------------------
    Z = _embed(tgt_ref[...], dec_emb_w[...], dec_emb_b[...], pe_tgt_ref[...])
    for l in range(NUM_LAYERS):
        dg, db = d_ln_g[l], d_ln_b[l]                  # (3, EMB) each
        Z = _dec_block(
            Z, Y, dec_mask, cross_mask,
            dg[0:1], db[0:1], dg[1:2], db[1:2], dg[2:3], db[2:3],
            d_wqkv1[l], d_bqkv1[l], d_wo1[l], d_bo1[l],
            d_wq2[l], d_bq2[l], d_wkv2[l], d_bkv2[l], d_wo2[l], d_bo2[l],
            d_w1[l], d_b1[l], d_w2[l], d_b2[l])

    out_ref[...] = Z


# ------------------------------ host wrapper --------------------------------
def positional_encoding(seq_len, d):
    pos = jnp.arange(seq_len, dtype=jnp.float32)[:, None]
    i = jnp.arange(0, d, 2, dtype=jnp.float32)[None, :]
    angle = pos / jnp.power(10000.0, i / d)
    pe = jnp.zeros((seq_len, d), jnp.float32)
    pe = pe.at[:, 0::2].set(jnp.sin(angle))
    pe = pe.at[:, 1::2].set(jnp.cos(angle))
    return pe


def _flop_estimate(B, S_src, S_tgt):
    Ms, Mt = B * S_src, B * S_tgt
    flops = 2 * Ms * ENC_D_IN * EMB + 2 * Mt * DEC_D_IN * EMB
    flops += NUM_LAYERS * (
        2 * Ms * EMB * 3 * N_HIDDEN + 4 * Ms * Ms * N_HIDDEN
        + 2 * Ms * N_HIDDEN * EMB + 4 * Ms * EMB * FFN_HIDDEN)
    flops += NUM_LAYERS * (
        2 * Mt * EMB * 3 * N_HIDDEN + 4 * Mt * Mt * N_HIDDEN
        + 2 * Mt * N_HIDDEN * EMB
        + 2 * Mt * EMB * N_HIDDEN + 2 * Ms * EMB * 2 * N_HIDDEN
        + 4 * Mt * Ms * N_HIDDEN + 2 * Mt * N_HIDDEN * EMB
        + 4 * Mt * EMB * FFN_HIDDEN)
    trans = NUM_LAYERS * N_HEADS * (Ms * Ms + Mt * Mt + Mt * Ms)
    return int(flops), int(trans)


def transformer_forward(params, src_X, src_fX, tgt_X, tgt_fX, mask=None):
    B, S_src, _ = src_X.shape
    _, S_tgt, _ = tgt_X.shape

    # Host-side layout plumbing: concat + flatten batch*seq onto the matmul M
    # dimension; tile PE per batch; build block-diagonal batch masks so the
    # flattened attention never crosses batch boundaries.
    src2d = jnp.concatenate([src_X, src_fX], axis=-1).reshape(B * S_src, ENC_D_IN)
    tgt2d = jnp.concatenate([tgt_X, tgt_fX], axis=-1).reshape(B * S_tgt, DEC_D_IN)
    if mask is None:
        mask = jnp.zeros((S_tgt, S_tgt), jnp.float32)
    pe_src = jnp.tile(positional_encoding(S_src, EMB), (B, 1))
    pe_tgt = jnp.tile(positional_encoding(S_tgt, EMB), (B, 1))

    bid_src = jnp.repeat(jnp.arange(B), S_src)
    bid_tgt = jnp.repeat(jnp.arange(B), S_tgt)
    enc_mask = jnp.where(bid_src[:, None] == bid_src[None, :], 0.0, NEG_INF
                         ).astype(jnp.float32)
    dec_mask = jnp.where(bid_tgt[:, None] == bid_tgt[None, :],
                         jnp.tile(mask.astype(jnp.float32), (B, B)), NEG_INF
                         ).astype(jnp.float32)
    cross_mask = jnp.where(bid_tgt[:, None] == bid_src[None, :], 0.0, NEG_INF
                           ).astype(jnp.float32)

    e, d = params["enc"], params["dec"]
    operands = [
        src2d, tgt2d, pe_src, pe_tgt, enc_mask, dec_mask, cross_mask,
        params["enc_emb_w"], params["enc_emb_b"],
        params["dec_emb_w"], params["dec_emb_b"],
        e["ln_g"], e["ln_b"], e["wqkv"], e["bqkv"], e["wo"], e["bo"],
        e["w1"], e["b1"], e["w2"], e["b2"],
        d["ln_g"], d["ln_b"], d["wqkv1"], d["bqkv1"], d["wo1"], d["bo1"],
        d["wq2"], d["bq2"], d["wkv2"], d["bkv2"], d["wo2"], d["bo2"],
        d["w1"], d["b1"], d["w2"], d["b2"],
    ]

    flops, trans = _flop_estimate(B, S_src, S_tgt)
    bytes_accessed = int(sum(x.size * x.dtype.itemsize for x in operands)
                         + B * S_tgt * EMB * 4)

    # Gridless call: all operands land in VMEM once (no double-buffering),
    # the whole forward runs in a single invocation.
    out = pl.pallas_call(
        fused_forward_kernel,
        out_shape=jax.ShapeDtypeStruct((B * S_tgt, EMB), jnp.float32),
        compiler_params=pltpu.CompilerParams(
            vmem_limit_bytes=32 * 1024 * 1024,
        ),
        cost_estimate=pl.CostEstimate(flops=flops, transcendentals=trans,
                                      bytes_accessed=bytes_accessed),
    )(*operands)
    return out.reshape(B, S_tgt, EMB)


# --------------------------- parameter construction -------------------------
def init_params(key):
    keys = iter(jax.random.split(key, 256))

    def lin(fan_in, fan_out):
        k1, k2 = jax.random.split(next(keys))
        bound = 1.0 / float(fan_in) ** 0.5
        w = jax.random.uniform(k1, (fan_in, fan_out), jnp.float32, -bound, bound)
        b = jax.random.uniform(k2, (1, fan_out), jnp.float32, -bound, bound)
        return w, b

    def stack_lin(fan_in, fan_out):
        ws, bs = zip(*[lin(fan_in, fan_out) for _ in range(NUM_LAYERS)])
        return jnp.stack(ws).astype(MM_DTYPE), jnp.stack(bs)

    def stack_fused(n_parts):
        ws, bs = [], []
        for _ in range(NUM_LAYERS):
            parts = [lin(EMB, N_HIDDEN) for _ in range(n_parts)]
            ws.append(jnp.concatenate([p[0] for p in parts], axis=1))
            bs.append(jnp.concatenate([p[1] for p in parts], axis=1))
        return jnp.stack(ws).astype(MM_DTYPE), jnp.stack(bs)

    # Embedding weights stay f32: used via VPU broadcast-FMA, not the MXU.
    enc_emb_w, enc_emb_b = lin(ENC_D_IN, EMB)
    dec_emb_w, dec_emb_b = lin(DEC_D_IN, EMB)

    e_wqkv, e_bqkv = stack_fused(3)
    e_wo, e_bo = stack_lin(N_HIDDEN, EMB)
    e_w1, e_b1 = stack_lin(EMB, FFN_HIDDEN)
    e_w2, e_b2 = stack_lin(FFN_HIDDEN, EMB)

    d_wqkv1, d_bqkv1 = stack_fused(3)
    d_wo1, d_bo1 = stack_lin(N_HIDDEN, EMB)
    d_wq2, d_bq2 = stack_lin(EMB, N_HIDDEN)
    d_wkv2, d_bkv2 = stack_fused(2)
    d_wo2, d_bo2 = stack_lin(N_HIDDEN, EMB)
    d_w1, d_b1 = stack_lin(EMB, FFN_HIDDEN)
    d_w2, d_b2 = stack_lin(FFN_HIDDEN, EMB)

    return dict(
        enc_emb_w=enc_emb_w, enc_emb_b=enc_emb_b,
        dec_emb_w=dec_emb_w, dec_emb_b=dec_emb_b,
        enc=dict(ln_g=jnp.ones((NUM_LAYERS, 2, EMB), jnp.float32),
                 ln_b=jnp.zeros((NUM_LAYERS, 2, EMB), jnp.float32),
                 wqkv=e_wqkv, bqkv=e_bqkv, wo=e_wo, bo=e_bo,
                 w1=e_w1, b1=e_b1, w2=e_w2, b2=e_b2),
        dec=dict(ln_g=jnp.ones((NUM_LAYERS, 3, EMB), jnp.float32),
                 ln_b=jnp.zeros((NUM_LAYERS, 3, EMB), jnp.float32),
                 wqkv1=d_wqkv1, bqkv1=d_bqkv1, wo1=d_wo1, bo1=d_bo1,
                 wq2=d_wq2, bq2=d_bq2, wkv2=d_wkv2, bkv2=d_bkv2,
                 wo2=d_wo2, bo2=d_bo2,
                 w1=d_w1, b1=d_b1, w2=d_w2, b2=d_b2),
    )


# ---------------------------------- main -------------------------------------
if __name__ == "__main__":
    key = jax.random.PRNGKey(0)
    kp, kx = jax.random.split(key)
    params = init_params(kp)

    k1, k2, k3, k4 = jax.random.split(kx, 4)
    src_X = jax.random.normal(k1, (BATCH, SEQ, 2), jnp.float32)
    src_fX = jax.random.normal(k2, (BATCH, SEQ, 2), jnp.float32)
    tgt_X = jax.random.normal(k3, (BATCH, SEQ, 2), jnp.float32)
    tgt_fX = jax.random.normal(k4, (BATCH, SEQ, 2), jnp.float32)

    # causal mask for decoder self-attention, additive form
    causal = jnp.where(jnp.tril(jnp.ones((SEQ, SEQ), dtype=bool)),
                       0.0, NEG_INF).astype(jnp.float32)

    fwd = jax.jit(transformer_forward)
    out = fwd(params, src_X, src_fX, tgt_X, tgt_fX, causal)
    jax.block_until_ready(out)
    assert out.shape == (BATCH, SEQ, EMB)
    assert out.dtype == jnp.float32
    print("KERNEL_OK")
</pallas_src>

<mosaic_0001>
module attributes {stable_mosaic.version = 11 : i64} {
  func.func @fused_forward_kernel(%arg0: memref<16x4xf32, #tpu.memory_space<vmem>>, %arg1: memref<16x4xf32, #tpu.memory_space<vmem>>, %arg2: memref<16x128xf32, #tpu.memory_space<vmem>>, %arg3: memref<16x128xf32, #tpu.memory_space<vmem>>, %arg4: memref<16x16xf32, #tpu.memory_space<vmem>>, %arg5: memref<16x16xf32, #tpu.memory_space<vmem>>, %arg6: memref<16x16xf32, #tpu.memory_space<vmem>>, %arg7: memref<4x128xf32, #tpu.memory_space<vmem>>, %arg8: memref<1x128xf32, #tpu.memory_space<vmem>>, %arg9: memref<4x128xf32, #tpu.memory_space<vmem>>, %arg10: memref<1x128xf32, #tpu.memory_space<vmem>>, %arg11: memref<2x2x128xf32, #tpu.memory_space<vmem>>, %arg12: memref<2x2x128xf32, #tpu.memory_space<vmem>>, %arg13: memref<2x128x192xbf16, #tpu.memory_space<vmem>>, %arg14: memref<2x1x192xf32, #tpu.memory_space<vmem>>, %arg15: memref<2x64x128xbf16, #tpu.memory_space<vmem>>, %arg16: memref<2x1x128xf32, #tpu.memory_space<vmem>>, %arg17: memref<2x128x256xbf16, #tpu.memory_space<vmem>>, %arg18: memref<2x1x256xf32, #tpu.memory_space<vmem>>, %arg19: memref<2x256x128xbf16, #tpu.memory_space<vmem>>, %arg20: memref<2x1x128xf32, #tpu.memory_space<vmem>>, %arg21: memref<2x3x128xf32, #tpu.memory_space<vmem>>, %arg22: memref<2x3x128xf32, #tpu.memory_space<vmem>>, %arg23: memref<2x128x192xbf16, #tpu.memory_space<vmem>>, %arg24: memref<2x1x192xf32, #tpu.memory_space<vmem>>, %arg25: memref<2x64x128xbf16, #tpu.memory_space<vmem>>, %arg26: memref<2x1x128xf32, #tpu.memory_space<vmem>>, %arg27: memref<2x128x64xbf16, #tpu.memory_space<vmem>>, %arg28: memref<2x1x64xf32, #tpu.memory_space<vmem>>, %arg29: memref<2x128x128xbf16, #tpu.memory_space<vmem>>, %arg30: memref<2x1x128xf32, #tpu.memory_space<vmem>>, %arg31: memref<2x64x128xbf16, #tpu.memory_space<vmem>>, %arg32: memref<2x1x128xf32, #tpu.memory_space<vmem>>, %arg33: memref<2x128x256xbf16, #tpu.memory_space<vmem>>, %arg34: memref<2x1x256xf32, #tpu.memory_space<vmem>>, %arg35: memref<2x256x128xbf16, #tpu.memory_space<vmem>>, %arg36: memref<2x1x128xf32, #tpu.memory_space<vmem>>, %arg37: memref<16x128xf32, #tpu.memory_space<vmem>>) attributes {dimension_semantics = [], scalar_prefetch = 0 : i64, scratch_operands = 0 : i64, tpu.core_type = #tpu.core_type<tc>} {
    %c0 = arith.constant 0 : index
    %c0_0 = arith.constant 0 : index
    %0 = vector.load %arg4[%c0, %c0_0] : memref<16x16xf32, #tpu.memory_space<vmem>>, vector<16x16xf32>
    %c0_1 = arith.constant 0 : index
    %c0_2 = arith.constant 0 : index
    %1 = vector.load %arg5[%c0_1, %c0_2] : memref<16x16xf32, #tpu.memory_space<vmem>>, vector<16x16xf32>
    %c0_3 = arith.constant 0 : index
    %c0_4 = arith.constant 0 : index
    %2 = vector.load %arg6[%c0_3, %c0_4] : memref<16x16xf32, #tpu.memory_space<vmem>>, vector<16x16xf32>
    %c0_5 = arith.constant 0 : index
    %c0_6 = arith.constant 0 : index
    %3 = vector.load %arg0[%c0_5, %c0_6] : memref<16x4xf32, #tpu.memory_space<vmem>>, vector<16x4xf32>
    %c0_7 = arith.constant 0 : index
    %c0_8 = arith.constant 0 : index
    %4 = vector.load %arg7[%c0_7, %c0_8] : memref<4x128xf32, #tpu.memory_space<vmem>>, vector<4x128xf32>
    %c0_9 = arith.constant 0 : index
    %c0_10 = arith.constant 0 : index
    %5 = vector.load %arg8[%c0_9, %c0_10] : memref<1x128xf32, #tpu.memory_space<vmem>>, vector<1x128xf32>
    %c0_11 = arith.constant 0 : index
    %c0_12 = arith.constant 0 : index
    %6 = vector.load %arg2[%c0_11, %c0_12] : memref<16x128xf32, #tpu.memory_space<vmem>>, vector<16x128xf32>
    %7 = vector.broadcast %5 : vector<1x128xf32> to vector<16x128xf32>
    %8 = arith.addf %6, %7 : vector<16x128xf32>
    %9 = vector.extract_strided_slice %3 {offsets = [0, 0], sizes = [16, 1], strides = [1, 1]} : vector<16x4xf32> to vector<16x1xf32>
    %10 = vector.extract_strided_slice %4 {offsets = [0, 0], sizes = [1, 128], strides = [1, 1]} : vector<4x128xf32> to vector<1x128xf32>
    %11 = vector.broadcast %9 : vector<16x1xf32> to vector<16x128xf32>
    %12 = vector.broadcast %10 : vector<1x128xf32> to vector<16x128xf32>
    %13 = arith.mulf %11, %12 : vector<16x128xf32>
    %14 = arith.addf %8, %13 : vector<16x128xf32>
    %15 = vector.extract_strided_slice %3 {offsets = [0, 1], sizes = [16, 1], strides = [1, 1]} : vector<16x4xf32> to vector<16x1xf32>
    %16 = vector.extract_strided_slice %4 {offsets = [1, 0], sizes = [1, 128], strides = [1, 1]} : vector<4x128xf32> to vector<1x128xf32>
    %17 = vector.broadcast %15 : vector<16x1xf32> to vector<16x128xf32>
    %18 = vector.broadcast %16 : vector<1x128xf32> to vector<16x128xf32>
    %19 = arith.mulf %17, %18 : vector<16x128xf32>
    %20 = arith.addf %14, %19 : vector<16x128xf32>
    %21 = vector.extract_strided_slice %3 {offsets = [0, 2], sizes = [16, 1], strides = [1, 1]} : vector<16x4xf32> to vector<16x1xf32>
    %22 = vector.extract_strided_slice %4 {offsets = [2, 0], sizes = [1, 128], strides = [1, 1]} : vector<4x128xf32> to vector<1x128xf32>
    %23 = vector.broadcast %21 : vector<16x1xf32> to vector<16x128xf32>
    %24 = vector.broadcast %22 : vector<1x128xf32> to vector<16x128xf32>
    %25 = arith.mulf %23, %24 : vector<16x128xf32>
    %26 = arith.addf %20, %25 : vector<16x128xf32>
    %27 = vector.extract_strided_slice %3 {offsets = [0, 3], sizes = [16, 1], strides = [1, 1]} : vector<16x4xf32> to vector<16x1xf32>
    %28 = vector.extract_strided_slice %4 {offsets = [3, 0], sizes = [1, 128], strides = [1, 1]} : vector<4x128xf32> to vector<1x128xf32>
    %29 = vector.broadcast %27 : vector<16x1xf32> to vector<16x128xf32>
    %30 = vector.broadcast %28 : vector<1x128xf32> to vector<16x128xf32>
    %31 = arith.mulf %29, %30 : vector<16x128xf32>
    %32 = arith.addf %26, %31 : vector<16x128xf32>
    %c0_13 = arith.constant 0 : index
    %c0_14 = arith.constant 0 : index
    %c0_15 = arith.constant 0 : index
    %33 = vector.load %arg11[%c0_13, %c0_14, %c0_15] : memref<2x2x128xf32, #tpu.memory_space<vmem>>, vector<1x2x128xf32>
    %34 = vector.shape_cast %33 : vector<1x2x128xf32> to vector<2x128xf32>
    %c0_16 = arith.constant 0 : index
    %c0_17 = arith.constant 0 : index
    %c0_18 = arith.constant 0 : index
    %35 = vector.load %arg12[%c0_16, %c0_17, %c0_18] : memref<2x2x128xf32, #tpu.memory_space<vmem>>, vector<1x2x128xf32>
    %36 = vector.shape_cast %35 : vector<1x2x128xf32> to vector<2x128xf32>
    %37 = vector.extract_strided_slice %34 {offsets = [0, 0], sizes = [1, 128], strides = [1, 1]} : vector<2x128xf32> to vector<1x128xf32>
    %38 = vector.extract_strided_slice %36 {offsets = [0, 0], sizes = [1, 128], strides = [1, 1]} : vector<2x128xf32> to vector<1x128xf32>
    %39 = vector.extract_strided_slice %34 {offsets = [1, 0], sizes = [1, 128], strides = [1, 1]} : vector<2x128xf32> to vector<1x128xf32>
    %40 = vector.extract_strided_slice %36 {offsets = [1, 0], sizes = [1, 128], strides = [1, 1]} : vector<2x128xf32> to vector<1x128xf32>
    %c0_19 = arith.constant 0 : index
    %c0_20 = arith.constant 0 : index
    %c0_21 = arith.constant 0 : index
    %41 = vector.load %arg13[%c0_19, %c0_20, %c0_21] : memref<2x128x192xbf16, #tpu.memory_space<vmem>>, vector<1x128x192xbf16>
    %42 = vector.shape_cast %41 : vector<1x128x192xbf16> to vector<128x192xbf16>
    %c0_22 = arith.constant 0 : index
    %c0_23 = arith.constant 0 : index
    %c0_24 = arith.constant 0 : index
    %43 = vector.load %arg14[%c0_22, %c0_23, %c0_24] : memref<2x1x192xf32, #tpu.memory_space<vmem>>, vector<1x1x192xf32>
    %44 = vector.shape_cast %43 : vector<1x1x192xf32> to vector<1x192xf32>
    %c0_25 = arith.constant 0 : index
    %c0_26 = arith.constant 0 : index
    %c0_27 = arith.constant 0 : index
    %45 = vector.load %arg15[%c0_25, %c0_26, %c0_27] : memref<2x64x128xbf16, #tpu.memory_space<vmem>>, vector<1x64x128xbf16>
    %46 = vector.shape_cast %45 : vector<1x64x128xbf16> to vector<64x128xbf16>
    %c0_28 = arith.constant 0 : index
    %c0_29 = arith.constant 0 : index
    %c0_30 = arith.constant 0 : index
    %47 = vector.load %arg16[%c0_28, %c0_29, %c0_30] : memref<2x1x128xf32, #tpu.memory_space<vmem>>, vector<1x1x128xf32>
    %48 = vector.shape_cast %47 : vector<1x1x128xf32> to vector<1x128xf32>
    %c0_31 = arith.constant 0 : index
    %c0_32 = arith.constant 0 : index
    %c0_33 = arith.constant 0 : index
    %49 = vector.load %arg17[%c0_31, %c0_32, %c0_33] : memref<2x128x256xbf16, #tpu.memory_space<vmem>>, vector<1x128x256xbf16>
    %50 = vector.shape_cast %49 : vector<1x128x256xbf16> to vector<128x256xbf16>
    %c0_34 = arith.constant 0 : index
    %c0_35 = arith.constant 0 : index
    %c0_36 = arith.constant 0 : index
    %51 = vector.load %arg18[%c0_34, %c0_35, %c0_36] : memref<2x1x256xf32, #tpu.memory_space<vmem>>, vector<1x1x256xf32>
    %52 = vector.shape_cast %51 : vector<1x1x256xf32> to vector<1x256xf32>
    %c0_37 = arith.constant 0 : index
    %c0_38 = arith.constant 0 : index
    %c0_39 = arith.constant 0 : index
    %53 = vector.load %arg19[%c0_37, %c0_38, %c0_39] : memref<2x256x128xbf16, #tpu.memory_space<vmem>>, vector<1x256x128xbf16>
    %54 = vector.shape_cast %53 : vector<1x256x128xbf16> to vector<256x128xbf16>
    %c0_40 = arith.constant 0 : index
    %c0_41 = arith.constant 0 : index
    %c0_42 = arith.constant 0 : index
    %55 = vector.load %arg20[%c0_40, %c0_41, %c0_42] : memref<2x1x128xf32, #tpu.memory_space<vmem>>, vector<1x1x128xf32>
    %56 = vector.shape_cast %55 : vector<1x1x128xf32> to vector<1x128xf32>
    %cst = arith.constant dense<0.000000e+00> : vector<16xf32>
    %57 = vector.multi_reduction <add>, %32, %cst [1] : vector<16x128xf32> to vector<16xf32>
    %58 = vector.shape_cast %57 : vector<16xf32> to vector<16x1xf32>
    %cst_43 = arith.constant 1.280000e+02 : f32
    %59 = vector.broadcast %cst_43 : f32 to vector<16x1xf32>
    %60 = arith.divf %58, %59 : vector<16x1xf32>
    %61 = vector.broadcast %60 : vector<16x1xf32> to vector<16x128xf32>
    %62 = arith.subf %32, %61 : vector<16x128xf32>
    %63 = arith.mulf %62, %62 : vector<16x128xf32>
    %cst_44 = arith.constant dense<0.000000e+00> : vector<16xf32>
    %64 = vector.multi_reduction <add>, %63, %cst_44 [1] : vector<16x128xf32> to vector<16xf32>
    %65 = vector.shape_cast %64 : vector<16xf32> to vector<16x1xf32>
    %cst_45 = arith.constant 1.280000e+02 : f32
    %66 = vector.broadcast %cst_45 : f32 to vector<16x1xf32>
    %67 = arith.divf %65, %66 : vector<16x1xf32>
    %68 = vector.broadcast %60 : vector<16x1xf32> to vector<16x128xf32>
    %69 = arith.subf %32, %68 : vector<16x128xf32>
    %cst_46 = arith.constant 9.99999974E-6 : f32
    %70 = vector.broadcast %cst_46 : f32 to vector<16x1xf32>
    %71 = arith.addf %67, %70 : vector<16x1xf32>
    %72 = math.rsqrt %71 : vector<16x1xf32>
    %73 = vector.broadcast %72 : vector<16x1xf32> to vector<16x128xf32>
    %74 = arith.mulf %69, %73 : vector<16x128xf32>
    %75 = vector.broadcast %37 : vector<1x128xf32> to vector<16x128xf32>
    %76 = arith.mulf %74, %75 : vector<16x128xf32>
    %77 = vector.broadcast %38 : vector<1x128xf32> to vector<16x128xf32>
    %78 = arith.addf %76, %77 : vector<16x128xf32>
    %79 = arith.truncf %78 : vector<16x128xf32> to vector<16x128xbf16>
    %cst_47 = arith.constant dense<0.000000e+00> : vector<16x192xf32>
    %80 = tpu.matmul %79, %42, %cst_47 {dimension_numbers = #tpu.dot_dimension_numbers<[1], [0], [0], [1], [0, 0, 1, 1], [], []>} : vector<16x128xbf16>, vector<128x192xbf16>, vector<16x192xf32> -> vector<16x192xf32>
    %81 = vector.broadcast %44 : vector<1x192xf32> to vector<16x192xf32>
    %82 = arith.addf %80, %81 : vector<16x192xf32>
    %83 = vector.extract_strided_slice %82 {offsets = [0, 0], sizes = [16, 64], strides = [1, 1]} : vector<16x192xf32> to vector<16x64xf32>
    %84 = vector.extract_strided_slice %82 {offsets = [0, 64], sizes = [16, 64], strides = [1, 1]} : vector<16x192xf32> to vector<16x64xf32>
    %85 = vector.extract_strided_slice %82 {offsets = [0, 128], sizes = [16, 64], strides = [1, 1]} : vector<16x192xf32> to vector<16x64xf32>
    %86 = arith.truncf %83 : vector<16x64xf32> to vector<16x64xbf16>
    %87 = arith.truncf %85 : vector<16x64xf32> to vector<16x64xbf16>
    %88 = tpu.transpose %84, [1, 0] : vector<16x64xf32> -> vector<64x16xf32>
    %89 = arith.truncf %88 : vector<64x16xf32> to vector<64x16xbf16>
    %90 = vector.extract_strided_slice %86 {offsets = [0, 0], sizes = [16, 16], strides = [1, 1]} : vector<16x64xbf16> to vector<16x16xbf16>
    %91 = vector.extract_strided_slice %89 {offsets = [0, 0], sizes = [16, 16], strides = [1, 1]} : vector<64x16xbf16> to vector<16x16xbf16>
    %cst_48 = arith.constant dense<0.000000e+00> : vector<16x16xf32>
    %92 = tpu.matmul %90, %91, %cst_48 {dimension_numbers = #tpu.dot_dimension_numbers<[1], [0], [0], [1], [0, 0, 1, 1], [], []>} : vector<16x16xbf16>, vector<16x16xbf16>, vector<16x16xf32> -> vector<16x16xf32>
    %cst_49 = arith.constant 2.500000e-01 : f32
    %93 = vector.broadcast %cst_49 : f32 to vector<16x16xf32>
    %94 = arith.mulf %92, %93 : vector<16x16xf32>
    %95 = arith.addf %94, %0 : vector<16x16xf32>
    %cst_50 = arith.constant dense<0xFF800000> : vector<16xf32>
    %96 = vector.multi_reduction <maximumf>, %95, %cst_50 [1] : vector<16x16xf32> to vector<16xf32>
    %97 = vector.shape_cast %96 : vector<16xf32> to vector<16x1xf32>
    %98 = vector.broadcast %97 : vector<16x1xf32> to vector<16x16xf32>
    %99 = arith.subf %95, %98 : vector<16x16xf32>
    %100 = math.exp %99 : vector<16x16xf32>
    %cst_51 = arith.constant dense<0.000000e+00> : vector<16xf32>
    %101 = vector.multi_reduction <add>, %100, %cst_51 [1] : vector<16x16xf32> to vector<16xf32>
    %102 = vector.shape_cast %101 : vector<16xf32> to vector<16x1xf32>
    %103 = tpu.reciprocal %102 {approx = true} : vector<16x1xf32> -> vector<16x1xf32>
    %104 = vector.broadcast %103 : vector<16x1xf32> to vector<16x16xf32>
    %105 = arith.mulf %100, %104 : vector<16x16xf32>
    %106 = arith.truncf %105 : vector<16x16xf32> to vector<16x16xbf16>
    %107 = vector.extract_strided_slice %87 {offsets = [0, 0], sizes = [16, 16], strides = [1, 1]} : vector<16x64xbf16> to vector<16x16xbf16>
    %cst_52 = arith.constant dense<0.000000e+00> : vector<16x16xf32>
    %108 = tpu.matmul %106, %107, %cst_52 {dimension_numbers = #tpu.dot_dimension_numbers<[1], [0], [0], [1], [0, 0, 1, 1], [], []>} : vector<16x16xbf16>, vector<16x16xbf16>, vector<16x16xf32> -> vector<16x16xf32>
    %109 = vector.extract_strided_slice %86 {offsets = [0, 16], sizes = [16, 16], strides = [1, 1]} : vector<16x64xbf16> to vector<16x16xbf16>
    %110 = vector.extract_strided_slice %89 {offsets = [16, 0], sizes = [16, 16], strides = [1, 1]} : vector<64x16xbf16> to vector<16x16xbf16>
    %cst_53 = arith.constant dense<0.000000e+00> : vector<16x16xf32>
    %111 = tpu.matmul %109, %110, %cst_53 {dimension_numbers = #tpu.dot_dimension_numbers<[1], [0], [0], [1], [0, 0, 1, 1], [], []>} : vector<16x16xbf16>, vector<16x16xbf16>, vector<16x16xf32> -> vector<16x16xf32>
    %cst_54 = arith.constant 2.500000e-01 : f32
    %112 = vector.broadcast %cst_54 : f32 to vector<16x16xf32>
    %113 = arith.mulf %111, %112 : vector<16x16xf32>
    %114 = arith.addf %113, %0 : vector<16x16xf32>
    %cst_55 = arith.constant dense<0xFF800000> : vector<16xf32>
    %115 = vector.multi_reduction <maximumf>, %114, %cst_55 [1] : vector<16x16xf32> to vector<16xf32>
    %116 = vector.shape_cast %115 : vector<16xf32> to vector<16x1xf32>
    %117 = vector.broadcast %116 : vector<16x1xf32> to vector<16x16xf32>
    %118 = arith.subf %114, %117 : vector<16x16xf32>
    %119 = math.exp %118 : vector<16x16xf32>
    %cst_56 = arith.constant dense<0.000000e+00> : vector<16xf32>
    %120 = vector.multi_reduction <add>, %119, %cst_56 [1] : vector<16x16xf32> to vector<16xf32>
    %121 = vector.shape_cast %120 : vector<16xf32> to vector<16x1xf32>
    %122 = tpu.reciprocal %121 {approx = true} : vector<16x1xf32> -> vector<16x1xf32>
    %123 = vector.broadcast %122 : vector<16x1xf32> to vector<16x16xf32>
    %124 = arith.mulf %119, %123 : vector<16x16xf32>
    %125 = arith.truncf %124 : vector<16x16xf32> to vector<16x16xbf16>
    %126 = vector.extract_strided_slice %87 {offsets = [0, 16], sizes = [16, 16], strides = [1, 1]} : vector<16x64xbf16> to vector<16x16xbf16>
    %cst_57 = arith.constant dense<0.000000e+00> : vector<16x16xf32>
    %127 = tpu.matmul %125, %126, %cst_57 {dimension_numbers = #tpu.dot_dimension_numbers<[1], [0], [0], [1], [0, 0, 1, 1], [], []>} : vector<16x16xbf16>, vector<16x16xbf16>, vector<16x16xf32> -> vector<16x16xf32>
    %128 = vector.extract_strided_slice %86 {offsets = [0, 32], sizes = [16, 16], strides = [1, 1]} : vector<16x64xbf16> to vector<16x16xbf16>
    %129 = vector.extract_strided_slice %89 {offsets = [32, 0], sizes = [16, 16], strides = [1, 1]} : vector<64x16xbf16> to vector<16x16xbf16>
    %cst_58 = arith.constant dense<0.000000e+00> : vector<16x16xf32>
    %130 = tpu.matmul %128, %129, %cst_58 {dimension_numbers = #tpu.dot_dimension_numbers<[1], [0], [0], [1], [0, 0, 1, 1], [], []>} : vector<16x16xbf16>, vector<16x16xbf16>, vector<16x16xf32> -> vector<16x16xf32>
    %cst_59 = arith.constant 2.500000e-01 : f32
    %131 = vector.broadcast %cst_59 : f32 to vector<16x16xf32>
    %132 = arith.mulf %130, %131 : vector<16x16xf32>
    %133 = arith.addf %132, %0 : vector<16x16xf32>
    %cst_60 = arith.constant dense<0xFF800000> : vector<16xf32>
    %134 = vector.multi_reduction <maximumf>, %133, %cst_60 [1] : vector<16x16xf32> to vector<16xf32>
    %135 = vector.shape_cast %134 : vector<16xf32> to vector<16x1xf32>
    %136 = vector.broadcast %135 : vector<16x1xf32> to vector<16x16xf32>
    %137 = arith.subf %133, %136 : vector<16x16xf32>
    %138 = math.exp %137 : vector<16x16xf32>
    %cst_61 = arith.constant dense<0.000000e+00> : vector<16xf32>
    %139 = vector.multi_reduction <add>, %138, %cst_61 [1] : vector<16x16xf32> to vector<16xf32>
    %140 = vector.shape_cast %139 : vector<16xf32> to vector<16x1xf32>
    %141 = tpu.reciprocal %140 {approx = true} : vector<16x1xf32> -> vector<16x1xf32>
    %142 = vector.broadcast %141 : vector<16x1xf32> to vector<16x16xf32>
    %143 = arith.mulf %138, %142 : vector<16x16xf32>
    %144 = arith.truncf %143 : vector<16x16xf32> to vector<16x16xbf16>
    %145 = vector.extract_strided_slice %87 {offsets = [0, 32], sizes = [16, 16], strides = [1, 1]} : vector<16x64xbf16> to vector<16x16xbf16>
    %cst_62 = arith.constant dense<0.000000e+00> : vector<16x16xf32>
    %146 = tpu.matmul %144, %145, %cst_62 {dimension_numbers = #tpu.dot_dimension_numbers<[1], [0], [0], [1], [0, 0, 1, 1], [], []>} : vector<16x16xbf16>, vector<16x16xbf16>, vector<16x16xf32> -> vector<16x16xf32>
    %147 = vector.extract_strided_slice %86 {offsets = [0, 48], sizes = [16, 16], strides = [1, 1]} : vector<16x64xbf16> to vector<16x16xbf16>
    %148 = vector.extract_strided_slice %89 {offsets = [48, 0], sizes = [16, 16], strides = [1, 1]} : vector<64x16xbf16> to vector<16x16xbf16>
    %cst_63 = arith.constant dense<0.000000e+00> : vector<16x16xf32>
    %149 = tpu.matmul %147, %148, %cst_63 {dimension_numbers = #tpu.dot_dimension_numbers<[1], [0], [0], [1], [0, 0, 1, 1], [], []>} : vector<16x16xbf16>, vector<16x16xbf16>, vector<16x16xf32> -> vector<16x16xf32>
    %cst_64 = arith.constant 2.500000e-01 : f32
    %150 = vector.broadcast %cst_64 : f32 to vector<16x16xf32>
    %151 = arith.mulf %149, %150 : vector<16x16xf32>
    %152 = arith.addf %151, %0 : vector<16x16xf32>
    %cst_65 = arith.constant dense<0xFF800000> : vector<16xf32>
    %153 = vector.multi_reduction <maximumf>, %152, %cst_65 [1] : vector<16x16xf32> to vector<16xf32>
    %154 = vector.shape_cast %153 : vector<16xf32> to vector<16x1xf32>
    %155 = vector.broadcast %154 : vector<16x1xf32> to vector<16x16xf32>
    %156 = arith.subf %152, %155 : vector<16x16xf32>
    %157 = math.exp %156 : vector<16x16xf32>
    %cst_66 = arith.constant dense<0.000000e+00> : vector<16xf32>
    %158 = vector.multi_reduction <add>, %157, %cst_66 [1] : vector<16x16xf32> to vector<16xf32>
    %159 = vector.shape_cast %158 : vector<16xf32> to vector<16x1xf32>
    %160 = tpu.reciprocal %159 {approx = true} : vector<16x1xf32> -> vector<16x1xf32>
    %161 = vector.broadcast %160 : vector<16x1xf32> to vector<16x16xf32>
    %162 = arith.mulf %157, %161 : vector<16x16xf32>
    %163 = arith.truncf %162 : vector<16x16xf32> to vector<16x16xbf16>
    %164 = vector.extract_strided_slice %87 {offsets = [0, 48], sizes = [16, 16], strides = [1, 1]} : vector<16x64xbf16> to vector<16x16xbf16>
    %cst_67 = arith.constant dense<0.000000e+00> : vector<16x16xf32>
    %165 = tpu.matmul %163, %164, %cst_67 {dimension_numbers = #tpu.dot_dimension_numbers<[1], [0], [0], [1], [0, 0, 1, 1], [], []>} : vector<16x16xbf16>, vector<16x16xbf16>, vector<16x16xf32> -> vector<16x16xf32>
    %166 = tpu.concatenate %108, %127, %146, %165 in 1 : vector<16x16xf32>, vector<16x16xf32>, vector<16x16xf32>, vector<16x16xf32> -> vector<16x64xf32>
    %167 = arith.truncf %166 : vector<16x64xf32> to vector<16x64xbf16>
    %cst_68 = arith.constant dense<0.000000e+00> : vector<16x128xf32>
    %168 = tpu.matmul %167, %46, %cst_68 {dimension_numbers = #tpu.dot_dimension_numbers<[1], [0], [0], [1], [0, 0, 1, 1], [], []>} : vector<16x64xbf16>, vector<64x128xbf16>, vector<16x128xf32> -> vector<16x128xf32>
    %169 = vector.broadcast %48 : vector<1x128xf32> to vector<16x128xf32>
    %170 = arith.addf %168, %169 : vector<16x128xf32>
    %171 = arith.addf %32, %170 : vector<16x128xf32>
    %cst_69 = arith.constant dense<0.000000e+00> : vector<16xf32>
    %172 = vector.multi_reduction <add>, %171, %cst_69 [1] : vector<16x128xf32> to vector<16xf32>
    %173 = vector.shape_cast %172 : vector<16xf32> to vector<16x1xf32>
    %cst_70 = arith.constant 1.280000e+02 : f32
    %174 = vector.broadcast %cst_70 : f32 to vector<16x1xf32>
    %175 = arith.divf %173, %174 : vector<16x1xf32>
    %176 = vector.broadcast %175 : vector<16x1xf32> to vector<16x128xf32>
    %177 = arith.subf %171, %176 : vector<16x128xf32>
    %178 = arith.mulf %177, %177 : vector<16x128xf32>
    %cst_71 = arith.constant dense<0.000000e+00> : vector<16xf32>
    %179 = vector.multi_reduction <add>, %178, %cst_71 [1] : vector<16x128xf32> to vector<16xf32>
    %180 = vector.shape_cast %179 : vector<16xf32> to vector<16x1xf32>
    %cst_72 = arith.constant 1.280000e+02 : f32
    %181 = vector.broadcast %cst_72 : f32 to vector<16x1xf32>
    %182 = arith.divf %180, %181 : vector<16x1xf32>
    %183 = vector.broadcast %175 : vector<16x1xf32> to vector<16x128xf32>
    %184 = arith.subf %171, %183 : vector<16x128xf32>
    %cst_73 = arith.constant 9.99999974E-6 : f32
    %185 = vector.broadcast %cst_73 : f32 to vector<16x1xf32>
    %186 = arith.addf %182, %185 : vector<16x1xf32>
    %187 = math.rsqrt %186 : vector<16x1xf32>
    %188 = vector.broadcast %187 : vector<16x1xf32> to vector<16x128xf32>
    %189 = arith.mulf %184, %188 : vector<16x128xf32>
    %190 = vector.broadcast %39 : vector<1x128xf32> to vector<16x128xf32>
    %191 = arith.mulf %189, %190 : vector<16x128xf32>
    %192 = vector.broadcast %40 : vector<1x128xf32> to vector<16x128xf32>
    %193 = arith.addf %191, %192 : vector<16x128xf32>
    %194 = arith.truncf %193 : vector<16x128xf32> to vector<16x128xbf16>
    %cst_74 = arith.constant dense<0.000000e+00> : vector<16x256xf32>
    %195 = tpu.matmul %194, %50, %cst_74 {dimension_numbers = #tpu.dot_dimension_numbers<[1], [0], [0], [1], [0, 0, 1, 1], [], []>} : vector<16x128xbf16>, vector<128x256xbf16>, vector<16x256xf32> -> vector<16x256xf32>
    %196 = vector.broadcast %52 : vector<1x256xf32> to vector<16x256xf32>
    %197 = arith.addf %195, %196 : vector<16x256xf32>
    %cst_75 = arith.constant 0.000000e+00 : f32
    %198 = vector.broadcast %cst_75 : f32 to vector<16x256xf32>
    %199 = arith.maximumf %197, %198 : vector<16x256xf32>
    %200 = arith.truncf %199 : vector<16x256xf32> to vector<16x256xbf16>
    %cst_76 = arith.constant dense<0.000000e+00> : vector<16x128xf32>
    %201 = tpu.matmul %200, %54, %cst_76 {dimension_numbers = #tpu.dot_dimension_numbers<[1], [0], [0], [1], [0, 0, 1, 1], [], []>} : vector<16x256xbf16>, vector<256x128xbf16>, vector<16x128xf32> -> vector<16x128xf32>
    %202 = vector.broadcast %56 : vector<1x128xf32> to vector<16x128xf32>
    %203 = arith.addf %201, %202 : vector<16x128xf32>
    %204 = arith.addf %171, %203 : vector<16x128xf32>
    %c1 = arith.constant 1 : index
    %c0_77 = arith.constant 0 : index
    %c0_78 = arith.constant 0 : index
    %205 = vector.load %arg11[%c1, %c0_77, %c0_78] : memref<2x2x128xf32, #tpu.memory_space<vmem>>, vector<1x2x128xf32>
    %206 = vector.shape_cast %205 : vector<1x2x128xf32> to vector<2x128xf32>
    %c1_79 = arith.constant 1 : index
    %c0_80 = arith.constant 0 : index
    %c0_81 = arith.constant 0 : index
    %207 = vector.load %arg12[%c1_79, %c0_80, %c0_81] : memref<2x2x128xf32, #tpu.memory_space<vmem>>, vector<1x2x128xf32>
    %208 = vector.shape_cast %207 : vector<1x2x128xf32> to vector<2x128xf32>
    %209 = vector.extract_strided_slice %206 {offsets = [0, 0], sizes = [1, 128], strides = [1, 1]} : vector<2x128xf32> to vector<1x128xf32>
    %210 = vector.extract_strided_slice %208 {offsets = [0, 0], sizes = [1, 128], strides = [1, 1]} : vector<2x128xf32> to vector<1x128xf32>
    %211 = vector.extract_strided_slice %206 {offsets = [1, 0], sizes = [1, 128], strides = [1, 1]} : vector<2x128xf32> to vector<1x128xf32>
    %212 = vector.extract_strided_slice %208 {offsets = [1, 0], sizes = [1, 128], strides = [1, 1]} : vector<2x128xf32> to vector<1x128xf32>
    %c1_82 = arith.constant 1 : index
    %c0_83 = arith.constant 0 : index
    %c0_84 = arith.constant 0 : index
    %213 = vector.load %arg13[%c1_82, %c0_83, %c0_84] : memref<2x128x192xbf16, #tpu.memory_space<vmem>>, vector<1x128x192xbf16>
    %214 = vector.shape_cast %213 : vector<1x128x192xbf16> to vector<128x192xbf16>
    %c1_85 = arith.constant 1 : index
    %c0_86 = arith.constant 0 : index
    %c0_87 = arith.constant 0 : index
    %215 = vector.load %arg14[%c1_85, %c0_86, %c0_87] : memref<2x1x192xf32, #tpu.memory_space<vmem>>, vector<1x1x192xf32>
    %216 = vector.shape_cast %215 : vector<1x1x192xf32> to vector<1x192xf32>
    %c1_88 = arith.constant 1 : index
    %c0_89 = arith.constant 0 : index
    %c0_90 = arith.constant 0 : index
    %217 = vector.load %arg15[%c1_88, %c0_89, %c0_90] : memref<2x64x128xbf16, #tpu.memory_space<vmem>>, vector<1x64x128xbf16>
    %218 = vector.shape_cast %217 : vector<1x64x128xbf16> to vector<64x128xbf16>
    %c1_91 = arith.constant 1 : index
    %c0_92 = arith.constant 0 : index
    %c0_93 = arith.constant 0 : index
    %219 = vector.load %arg16[%c1_91, %c0_92, %c0_93] : memref<2x1x128xf32, #tpu.memory_space<vmem>>, vector<1x1x128xf32>
    %220 = vector.shape_cast %219 : vector<1x1x128xf32> to vector<1x128xf32>
    %c1_94 = arith.constant 1 : index
    %c0_95 = arith.constant 0 : index
    %c0_96 = arith.constant 0 : index
    %221 = vector.load %arg17[%c1_94, %c0_95, %c0_96] : memref<2x128x256xbf16, #tpu.memory_space<vmem>>, vector<1x128x256xbf16>
    %222 = vector.shape_cast %221 : vector<1x128x256xbf16> to vector<128x256xbf16>
    %c1_97 = arith.constant 1 : index
    %c0_98 = arith.constant 0 : index
    %c0_99 = arith.constant 0 : index
    %223 = vector.load %arg18[%c1_97, %c0_98, %c0_99] : memref<2x1x256xf32, #tpu.memory_space<vmem>>, vector<1x1x256xf32>
    %224 = vector.shape_cast %223 : vector<1x1x256xf32> to vector<1x256xf32>
    %c1_100 = arith.constant 1 : index
    %c0_101 = arith.constant 0 : index
    %c0_102 = arith.constant 0 : index
    %225 = vector.load %arg19[%c1_100, %c0_101, %c0_102] : memref<2x256x128xbf16, #tpu.memory_space<vmem>>, vector<1x256x128xbf16>
    %226 = vector.shape_cast %225 : vector<1x256x128xbf16> to vector<256x128xbf16>
    %c1_103 = arith.constant 1 : index
    %c0_104 = arith.constant 0 : index
    %c0_105 = arith.constant 0 : index
    %227 = vector.load %arg20[%c1_103, %c0_104, %c0_105] : memref<2x1x128xf32, #tpu.memory_space<vmem>>, vector<1x1x128xf32>
    %228 = vector.shape_cast %227 : vector<1x1x128xf32> to vector<1x128xf32>
    %cst_106 = arith.constant dense<0.000000e+00> : vector<16xf32>
    %229 = vector.multi_reduction <add>, %204, %cst_106 [1] : vector<16x128xf32> to vector<16xf32>
    %230 = vector.shape_cast %229 : vector<16xf32> to vector<16x1xf32>
    %cst_107 = arith.constant 1.280000e+02 : f32
    %231 = vector.broadcast %cst_107 : f32 to vector<16x1xf32>
    %232 = arith.divf %230, %231 : vector<16x1xf32>
    %233 = vector.broadcast %232 : vector<16x1xf32> to vector<16x128xf32>
    %234 = arith.subf %204, %233 : vector<16x128xf32>
    %235 = arith.mulf %234, %234 : vector<16x128xf32>
    %cst_108 = arith.constant dense<0.000000e+00> : vector<16xf32>
    %236 = vector.multi_reduction <add>, %235, %cst_108 [1] : vector<16x128xf32> to vector<16xf32>
    %237 = vector.shape_cast %236 : vector<16xf32> to vector<16x1xf32>
    %cst_109 = arith.constant 1.280000e+02 : f32
    %238 = vector.broadcast %cst_109 : f32 to vector<16x1xf32>
    %239 = arith.divf %237, %238 : vector<16x1xf32>
    %240 = vector.broadcast %232 : vector<16x1xf32> to vector<16x128xf32>
    %241 = arith.subf %204, %240 : vector<16x128xf32>
    %cst_110 = arith.constant 9.99999974E-6 : f32
    %242 = vector.broadcast %cst_110 : f32 to vector<16x1xf32>
    %243 = arith.addf %239, %242 : vector<16x1xf32>
    %244 = math.rsqrt %243 : vector<16x1xf32>
    %245 = vector.broadcast %244 : vector<16x1xf32> to vector<16x128xf32>
    %246 = arith.mulf %241, %245 : vector<16x128xf32>
    %247 = vector.broadcast %209 : vector<1x128xf32> to vector<16x128xf32>
    %248 = arith.mulf %246, %247 : vector<16x128xf32>
    %249 = vector.broadcast %210 : vector<1x128xf32> to vector<16x128xf32>
    %250 = arith.addf %248, %249 : vector<16x128xf32>
    %251 = arith.truncf %250 : vector<16x128xf32> to vector<16x128xbf16>
    %cst_111 = arith.constant dense<0.000000e+00> : vector<16x192xf32>
    %252 = tpu.matmul %251, %214, %cst_111 {dimension_numbers = #tpu.dot_dimension_numbers<[1], [0], [0], [1], [0, 0, 1, 1], [], []>} : vector<16x128xbf16>, vector<128x192xbf16>, vector<16x192xf32> -> vector<16x192xf32>
    %253 = vector.broadcast %216 : vector<1x192xf32> to vector<16x192xf32>
    %254 = arith.addf %252, %253 : vector<16x192xf32>
    %255 = vector.extract_strided_slice %254 {offsets = [0, 0], sizes = [16, 64], strides = [1, 1]} : vector<16x192xf32> to vector<16x64xf32>
    %256 = vector.extract_strided_slice %254 {offsets = [0, 64], sizes = [16, 64], strides = [1, 1]} : vector<16x192xf32> to vector<16x64xf32>
    %257 = vector.extract_strided_slice %254 {offsets = [0, 128], sizes = [16, 64], strides = [1, 1]} : vector<16x192xf32> to vector<16x64xf32>
    %258 = arith.truncf %255 : vector<16x64xf32> to vector<16x64xbf16>
    %259 = arith.truncf %257 : vector<16x64xf32> to vector<16x64xbf16>
    %260 = tpu.transpose %256, [1, 0] : vector<16x64xf32> -> vector<64x16xf32>
    %261 = arith.truncf %260 : vector<64x16xf32> to vector<64x16xbf16>
    %262 = vector.extract_strided_slice %258 {offsets = [0, 0], sizes = [16, 16], strides = [1, 1]} : vector<16x64xbf16> to vector<16x16xbf16>
    %263 = vector.extract_strided_slice %261 {offsets = [0, 0], sizes = [16, 16], strides = [1, 1]} : vector<64x16xbf16> to vector<16x16xbf16>
    %cst_112 = arith.constant dense<0.000000e+00> : vector<16x16xf32>
    %264 = tpu.matmul %262, %263, %cst_112 {dimension_numbers = #tpu.dot_dimension_numbers<[1], [0], [0], [1], [0, 0, 1, 1], [], []>} : vector<16x16xbf16>, vector<16x16xbf16>, vector<16x16xf32> -> vector<16x16xf32>
    %cst_113 = arith.constant 2.500000e-01 : f32
    %265 = vector.broadcast %cst_113 : f32 to vector<16x16xf32>
    %266 = arith.mulf %264, %265 : vector<16x16xf32>
    %267 = arith.addf %266, %0 : vector<16x16xf32>
    %cst_114 = arith.constant dense<0xFF800000> : vector<16xf32>
    %268 = vector.multi_reduction <maximumf>, %267, %cst_114 [1] : vector<16x16xf32> to vector<16xf32>
    %269 = vector.shape_cast %268 : vector<16xf32> to vector<16x1xf32>
    %270 = vector.broadcast %269 : vector<16x1xf32> to vector<16x16xf32>
    %271 = arith.subf %267, %270 : vector<16x16xf32>
    %272 = math.exp %271 : vector<16x16xf32>
    %cst_115 = arith.constant dense<0.000000e+00> : vector<16xf32>
    %273 = vector.multi_reduction <add>, %272, %cst_115 [1] : vector<16x16xf32> to vector<16xf32>
    %274 = vector.shape_cast %273 : vector<16xf32> to vector<16x1xf32>
    %275 = tpu.reciprocal %274 {approx = true} : vector<16x1xf32> -> vector<16x1xf32>
    %276 = vector.broadcast %275 : vector<16x1xf32> to vector<16x16xf32>
    %277 = arith.mulf %272, %276 : vector<16x16xf32>
    %278 = arith.truncf %277 : vector<16x16xf32> to vector<16x16xbf16>
    %279 = vector.extract_strided_slice %259 {offsets = [0, 0], sizes = [16, 16], strides = [1, 1]} : vector<16x64xbf16> to vector<16x16xbf16>
    %cst_116 = arith.constant dense<0.000000e+00> : vector<16x16xf32>
    %280 = tpu.matmul %278, %279, %cst_116 {dimension_numbers = #tpu.dot_dimension_numbers<[1], [0], [0], [1], [0, 0, 1, 1], [], []>} : vector<16x16xbf16>, vector<16x16xbf16>, vector<16x16xf32> -> vector<16x16xf32>
    %281 = vector.extract_strided_slice %258 {offsets = [0, 16], sizes = [16, 16], strides = [1, 1]} : vector<16x64xbf16> to vector<16x16xbf16>
    %282 = vector.extract_strided_slice %261 {offsets = [16, 0], sizes = [16, 16], strides = [1, 1]} : vector<64x16xbf16> to vector<16x16xbf16>
    %cst_117 = arith.constant dense<0.000000e+00> : vector<16x16xf32>
    %283 = tpu.matmul %281, %282, %cst_117 {dimension_numbers = #tpu.dot_dimension_numbers<[1], [0], [0], [1], [0, 0, 1, 1], [], []>} : vector<16x16xbf16>, vector<16x16xbf16>, vector<16x16xf32> -> vector<16x16xf32>
    %cst_118 = arith.constant 2.500000e-01 : f32
    %284 = vector.broadcast %cst_118 : f32 to vector<16x16xf32>
    %285 = arith.mulf %283, %284 : vector<16x16xf32>
    %286 = arith.addf %285, %0 : vector<16x16xf32>
    %cst_119 = arith.constant dense<0xFF800000> : vector<16xf32>
    %287 = vector.multi_reduction <maximumf>, %286, %cst_119 [1] : vector<16x16xf32> to vector<16xf32>
    %288 = vector.shape_cast %287 : vector<16xf32> to vector<16x1xf32>
    %289 = vector.broadcast %288 : vector<16x1xf32> to vector<16x16xf32>
    %290 = arith.subf %286, %289 : vector<16x16xf32>
    %291 = math.exp %290 : vector<16x16xf32>
    %cst_120 = arith.constant dense<0.000000e+00> : vector<16xf32>
    %292 = vector.multi_reduction <add>, %291, %cst_120 [1] : vector<16x16xf32> to vector<16xf32>
    %293 = vector.shape_cast %292 : vector<16xf32> to vector<16x1xf32>
    %294 = tpu.reciprocal %293 {approx = true} : vector<16x1xf32> -> vector<16x1xf32>
    %295 = vector.broadcast %294 : vector<16x1xf32> to vector<16x16xf32>
    %296 = arith.mulf %291, %295 : vector<16x16xf32>
    %297 = arith.truncf %296 : vector<16x16xf32> to vector<16x16xbf16>
    %298 = vector.extract_strided_slice %259 {offsets = [0, 16], sizes = [16, 16], strides = [1, 1]} : vector<16x64xbf16> to vector<16x16xbf16>
    %cst_121 = arith.constant dense<0.000000e+00> : vector<16x16xf32>
    %299 = tpu.matmul %297, %298, %cst_121 {dimension_numbers = #tpu.dot_dimension_numbers<[1], [0], [0], [1], [0, 0, 1, 1], [], []>} : vector<16x16xbf16>, vector<16x16xbf16>, vector<16x16xf32> -> vector<16x16xf32>
    %300 = vector.extract_strided_slice %258 {offsets = [0, 32], sizes = [16, 16], strides = [1, 1]} : vector<16x64xbf16> to vector<16x16xbf16>
    %301 = vector.extract_strided_slice %261 {offsets = [32, 0], sizes = [16, 16], strides = [1, 1]} : vector<64x16xbf16> to vector<16x16xbf16>
    %cst_122 = arith.constant dense<0.000000e+00> : vector<16x16xf32>
    %302 = tpu.matmul %300, %301, %cst_122 {dimension_numbers = #tpu.dot_dimension_numbers<[1], [0], [0], [1], [0, 0, 1, 1], [], []>} : vector<16x16xbf16>, vector<16x16xbf16>, vector<16x16xf32> -> vector<16x16xf32>
    %cst_123 = arith.constant 2.500000e-01 : f32
    %303 = vector.broadcast %cst_123 : f32 to vector<16x16xf32>
    %304 = arith.mulf %302, %303 : vector<16x16xf32>
    %305 = arith.addf %304, %0 : vector<16x16xf32>
    %cst_124 = arith.constant dense<0xFF800000> : vector<16xf32>
    %306 = vector.multi_reduction <maximumf>, %305, %cst_124 [1] : vector<16x16xf32> to vector<16xf32>
    %307 = vector.shape_cast %306 : vector<16xf32> to vector<16x1xf32>
    %308 = vector.broadcast %307 : vector<16x1xf32> to vector<16x16xf32>
    %309 = arith.subf %305, %308 : vector<16x16xf32>
    %310 = math.exp %309 : vector<16x16xf32>
    %cst_125 = arith.constant dense<0.000000e+00> : vector<16xf32>
    %311 = vector.multi_reduction <add>, %310, %cst_125 [1] : vector<16x16xf32> to vector<16xf32>
    %312 = vector.shape_cast %311 : vector<16xf32> to vector<16x1xf32>
    %313 = tpu.reciprocal %312 {approx = true} : vector<16x1xf32> -> vector<16x1xf32>
    %314 = vector.broadcast %313 : vector<16x1xf32> to vector<16x16xf32>
    %315 = arith.mulf %310, %314 : vector<16x16xf32>
    %316 = arith.truncf %315 : vector<16x16xf32> to vector<16x16xbf16>
    %317 = vector.extract_strided_slice %259 {offsets = [0, 32], sizes = [16, 16], strides = [1, 1]} : vector<16x64xbf16> to vector<16x16xbf16>
    %cst_126 = arith.constant dense<0.000000e+00> : vector<16x16xf32>
    %318 = tpu.matmul %316, %317, %cst_126 {dimension_numbers = #tpu.dot_dimension_numbers<[1], [0], [0], [1], [0, 0, 1, 1], [], []>} : vector<16x16xbf16>, vector<16x16xbf16>, vector<16x16xf32> -> vector<16x16xf32>
    %319 = vector.extract_strided_slice %258 {offsets = [0, 48], sizes = [16, 16], strides = [1, 1]} : vector<16x64xbf16> to vector<16x16xbf16>
    %320 = vector.extract_strided_slice %261 {offsets = [48, 0], sizes = [16, 16], strides = [1, 1]} : vector<64x16xbf16> to vector<16x16xbf16>
    %cst_127 = arith.constant dense<0.000000e+00> : vector<16x16xf32>
    %321 = tpu.matmul %319, %320, %cst_127 {dimension_numbers = #tpu.dot_dimension_numbers<[1], [0], [0], [1], [0, 0, 1, 1], [], []>} : vector<16x16xbf16>, vector<16x16xbf16>, vector<16x16xf32> -> vector<16x16xf32>
    %cst_128 = arith.constant 2.500000e-01 : f32
    %322 = vector.broadcast %cst_128 : f32 to vector<16x16xf32>
    %323 = arith.mulf %321, %322 : vector<16x16xf32>
    %324 = arith.addf %323, %0 : vector<16x16xf32>
    %cst_129 = arith.constant dense<0xFF800000> : vector<16xf32>
    %325 = vector.multi_reduction <maximumf>, %324, %cst_129 [1] : vector<16x16xf32> to vector<16xf32>
    %326 = vector.shape_cast %325 : vector<16xf32> to vector<16x1xf32>
    %327 = vector.broadcast %326 : vector<16x1xf32> to vector<16x16xf32>
    %328 = arith.subf %324, %327 : vector<16x16xf32>
    %329 = math.exp %328 : vector<16x16xf32>
    %cst_130 = arith.constant dense<0.000000e+00> : vector<16xf32>
    %330 = vector.multi_reduction <add>, %329, %cst_130 [1] : vector<16x16xf32> to vector<16xf32>
    %331 = vector.shape_cast %330 : vector<16xf32> to vector<16x1xf32>
    %332 = tpu.reciprocal %331 {approx = true} : vector<16x1xf32> -> vector<16x1xf32>
    %333 = vector.broadcast %332 : vector<16x1xf32> to vector<16x16xf32>
    %334 = arith.mulf %329, %333 : vector<16x16xf32>
    %335 = arith.truncf %334 : vector<16x16xf32> to vector<16x16xbf16>
    %336 = vector.extract_strided_slice %259 {offsets = [0, 48], sizes = [16, 16], strides = [1, 1]} : vector<16x64xbf16> to vector<16x16xbf16>
    %cst_131 = arith.constant dense<0.000000e+00> : vector<16x16xf32>
    %337 = tpu.matmul %335, %336, %cst_131 {dimension_numbers = #tpu.dot_dimension_numbers<[1], [0], [0], [1], [0, 0, 1, 1], [], []>} : vector<16x16xbf16>, vector<16x16xbf16>, vector<16x16xf32> -> vector<16x16xf32>
    %338 = tpu.concatenate %280, %299, %318, %337 in 1 : vector<16x16xf32>, vector<16x16xf32>, vector<16x16xf32>, vector<16x16xf32> -> vector<16x64xf32>
    %339 = arith.truncf %338 : vector<16x64xf32> to vector<16x64xbf16>
    %cst_132 = arith.constant dense<0.000000e+00> : vector<16x128xf32>
    %340 = tpu.matmul %339, %218, %cst_132 {dimension_numbers = #tpu.dot_dimension_numbers<[1], [0], [0], [1], [0, 0, 1, 1], [], []>} : vector<16x64xbf16>, vector<64x128xbf16>, vector<16x128xf32> -> vector<16x128xf32>
    %341 = vector.broadcast %220 : vector<1x128xf32> to vector<16x128xf32>
    %342 = arith.addf %340, %341 : vector<16x128xf32>
    %343 = arith.addf %204, %342 : vector<16x128xf32>
    %cst_133 = arith.constant dense<0.000000e+00> : vector<16xf32>
    %344 = vector.multi_reduction <add>, %343, %cst_133 [1] : vector<16x128xf32> to vector<16xf32>
    %345 = vector.shape_cast %344 : vector<16xf32> to vector<16x1xf32>
    %cst_134 = arith.constant 1.280000e+02 : f32
    %346 = vector.broadcast %cst_134 : f32 to vector<16x1xf32>
    %347 = arith.divf %345, %346 : vector<16x1xf32>
    %348 = vector.broadcast %347 : vector<16x1xf32> to vector<16x128xf32>
    %349 = arith.subf %343, %348 : vector<16x128xf32>
    %350 = arith.mulf %349, %349 : vector<16x128xf32>
    %cst_135 = arith.constant dense<0.000000e+00> : vector<16xf32>
    %351 = vector.multi_reduction <add>, %350, %cst_135 [1] : vector<16x128xf32> to vector<16xf32>
    %352 = vector.shape_cast %351 : vector<16xf32> to vector<16x1xf32>
    %cst_136 = arith.constant 1.280000e+02 : f32
    %353 = vector.broadcast %cst_136 : f32 to vector<16x1xf32>
    %354 = arith.divf %352, %353 : vector<16x1xf32>
    %355 = vector.broadcast %347 : vector<16x1xf32> to vector<16x128xf32>
    %356 = arith.subf %343, %355 : vector<16x128xf32>
    %cst_137 = arith.constant 9.99999974E-6 : f32
    %357 = vector.broadcast %cst_137 : f32 to vector<16x1xf32>
    %358 = arith.addf %354, %357 : vector<16x1xf32>
    %359 = math.rsqrt %358 : vector<16x1xf32>
    %360 = vector.broadcast %359 : vector<16x1xf32> to vector<16x128xf32>
    %361 = arith.mulf %356, %360 : vector<16x128xf32>
    %362 = vector.broadcast %211 : vector<1x128xf32> to vector<16x128xf32>
    %363 = arith.mulf %361, %362 : vector<16x128xf32>
    %364 = vector.broadcast %212 : vector<1x128xf32> to vector<16x128xf32>
    %365 = arith.addf %363, %364 : vector<16x128xf32>
    %366 = arith.truncf %365 : vector<16x128xf32> to vector<16x128xbf16>
    %cst_138 = arith.constant dense<0.000000e+00> : vector<16x256xf32>
    %367 = tpu.matmul %366, %222, %cst_138 {dimension_numbers = #tpu.dot_dimension_numbers<[1], [0], [0], [1], [0, 0, 1, 1], [], []>} : vector<16x128xbf16>, vector<128x256xbf16>, vector<16x256xf32> -> vector<16x256xf32>
    %368 = vector.broadcast %224 : vector<1x256xf32> to vector<16x256xf32>
    %369 = arith.addf %367, %368 : vector<16x256xf32>
    %cst_139 = arith.constant 0.000000e+00 : f32
    %370 = vector.broadcast %cst_139 : f32 to vector<16x256xf32>
    %371 = arith.maximumf %369, %370 : vector<16x256xf32>
    %372 = arith.truncf %371 : vector<16x256xf32> to vector<16x256xbf16>
    %cst_140 = arith.constant dense<0.000000e+00> : vector<16x128xf32>
    %373 = tpu.matmul %372, %226, %cst_140 {dimension_numbers = #tpu.dot_dimension_numbers<[1], [0], [0], [1], [0, 0, 1, 1], [], []>} : vector<16x256xbf16>, vector<256x128xbf16>, vector<16x128xf32> -> vector<16x128xf32>
    %374 = vector.broadcast %228 : vector<1x128xf32> to vector<16x128xf32>
    %375 = arith.addf %373, %374 : vector<16x128xf32>
    %376 = arith.addf %343, %375 : vector<16x128xf32>
    %c0_141 = arith.constant 0 : index
    %c0_142 = arith.constant 0 : index
    %377 = vector.load %arg1[%c0_141, %c0_142] : memref<16x4xf32, #tpu.memory_space<vmem>>, vector<16x4xf32>
    %c0_143 = arith.constant 0 : index
    %c0_144 = arith.constant 0 : index
    %378 = vector.load %arg9[%c0_143, %c0_144] : memref<4x128xf32, #tpu.memory_space<vmem>>, vector<4x128xf32>
    %c0_145 = arith.constant 0 : index
    %c0_146 = arith.constant 0 : index
    %379 = vector.load %arg10[%c0_145, %c0_146] : memref<1x128xf32, #tpu.memory_space<vmem>>, vector<1x128xf32>
    %c0_147 = arith.constant 0 : index
    %c0_148 = arith.constant 0 : index
    %380 = vector.load %arg3[%c0_147, %c0_148] : memref<16x128xf32, #tpu.memory_space<vmem>>, vector<16x128xf32>
    %381 = vector.broadcast %379 : vector<1x128xf32> to vector<16x128xf32>
    %382 = arith.addf %380, %381 : vector<16x128xf32>
    %383 = vector.extract_strided_slice %377 {offsets = [0, 0], sizes = [16, 1], strides = [1, 1]} : vector<16x4xf32> to vector<16x1xf32>
    %384 = vector.extract_strided_slice %378 {offsets = [0, 0], sizes = [1, 128], strides = [1, 1]} : vector<4x128xf32> to vector<1x128xf32>
    %385 = vector.broadcast %383 : vector<16x1xf32> to vector<16x128xf32>
    %386 = vector.broadcast %384 : vector<1x128xf32> to vector<16x128xf32>
    %387 = arith.mulf %385, %386 : vector<16x128xf32>
    %388 = arith.addf %382, %387 : vector<16x128xf32>
    %389 = vector.extract_strided_slice %377 {offsets = [0, 1], sizes = [16, 1], strides = [1, 1]} : vector<16x4xf32> to vector<16x1xf32>
    %390 = vector.extract_strided_slice %378 {offsets = [1, 0], sizes = [1, 128], strides = [1, 1]} : vector<4x128xf32> to vector<1x128xf32>
    %391 = vector.broadcast %389 : vector<16x1xf32> to vector<16x128xf32>
    %392 = vector.broadcast %390 : vector<1x128xf32> to vector<16x128xf32>
    %393 = arith.mulf %391, %392 : vector<16x128xf32>
    %394 = arith.addf %388, %393 : vector<16x128xf32>
    %395 = vector.extract_strided_slice %377 {offsets = [0, 2], sizes = [16, 1], strides = [1, 1]} : vector<16x4xf32> to vector<16x1xf32>
    %396 = vector.extract_strided_slice %378 {offsets = [2, 0], sizes = [1, 128], strides = [1, 1]} : vector<4x128xf32> to vector<1x128xf32>
    %397 = vector.broadcast %395 : vector<16x1xf32> to vector<16x128xf32>
    %398 = vector.broadcast %396 : vector<1x128xf32> to vector<16x128xf32>
    %399 = arith.mulf %397, %398 : vector<16x128xf32>
    %400 = arith.addf %394, %399 : vector<16x128xf32>
    %401 = vector.extract_strided_slice %377 {offsets = [0, 3], sizes = [16, 1], strides = [1, 1]} : vector<16x4xf32> to vector<16x1xf32>
    %402 = vector.extract_strided_slice %378 {offsets = [3, 0], sizes = [1, 128], strides = [1, 1]} : vector<4x128xf32> to vector<1x128xf32>
    %403 = vector.broadcast %401 : vector<16x1xf32> to vector<16x128xf32>
    %404 = vector.broadcast %402 : vector<1x128xf32> to vector<16x128xf32>
    %405 = arith.mulf %403, %404 : vector<16x128xf32>
    %406 = arith.addf %400, %405 : vector<16x128xf32>
    %c0_149 = arith.constant 0 : index
    %c0_150 = arith.constant 0 : index
    %c0_151 = arith.constant 0 : index
    %407 = vector.load %arg21[%c0_149, %c0_150, %c0_151] : memref<2x3x128xf32, #tpu.memory_space<vmem>>, vector<1x3x128xf32>
    %408 = vector.shape_cast %407 : vector<1x3x128xf32> to vector<3x128xf32>
    %c0_152 = arith.constant 0 : index
    %c0_153 = arith.constant 0 : index
    %c0_154 = arith.constant 0 : index
    %409 = vector.load %arg22[%c0_152, %c0_153, %c0_154] : memref<2x3x128xf32, #tpu.memory_space<vmem>>, vector<1x3x128xf32>
    %410 = vector.shape_cast %409 : vector<1x3x128xf32> to vector<3x128xf32>
    %411 = vector.extract_strided_slice %408 {offsets = [0, 0], sizes = [1, 128], strides = [1, 1]} : vector<3x128xf32> to vector<1x128xf32>
    %412 = vector.extract_strided_slice %410 {offsets = [0, 0], sizes = [1, 128], strides = [1, 1]} : vector<3x128xf32> to vector<1x128xf32>
    %413 = vector.extract_strided_slice %408 {offsets = [1, 0], sizes = [1, 128], strides = [1, 1]} : vector<3x128xf32> to vector<1x128xf32>
    %414 = vector.extract_strided_slice %410 {offsets = [1, 0], sizes = [1, 128], strides = [1, 1]} : vector<3x128xf32> to vector<1x128xf32>
    %415 = vector.extract_strided_slice %408 {offsets = [2, 0], sizes = [1, 128], strides = [1, 1]} : vector<3x128xf32> to vector<1x128xf32>
    %416 = vector.extract_strided_slice %410 {offsets = [2, 0], sizes = [1, 128], strides = [1, 1]} : vector<3x128xf32> to vector<1x128xf32>
    %c0_155 = arith.constant 0 : index
    %c0_156 = arith.constant 0 : index
    %c0_157 = arith.constant 0 : index
    %417 = vector.load %arg23[%c0_155, %c0_156, %c0_157] : memref<2x128x192xbf16, #tpu.memory_space<vmem>>, vector<1x128x192xbf16>
    %418 = vector.shape_cast %417 : vector<1x128x192xbf16> to vector<128x192xbf16>
    %c0_158 = arith.constant 0 : index
    %c0_159 = arith.constant 0 : index
    %c0_160 = arith.constant 0 : index
    %419 = vector.load %arg24[%c0_158, %c0_159, %c0_160] : memref<2x1x192xf32, #tpu.memory_space<vmem>>, vector<1x1x192xf32>
    %420 = vector.shape_cast %419 : vector<1x1x192xf32> to vector<1x192xf32>
    %c0_161 = arith.constant 0 : index
    %c0_162 = arith.constant 0 : index
    %c0_163 = arith.constant 0 : index
    %421 = vector.load %arg25[%c0_161, %c0_162, %c0_163] : memref<2x64x128xbf16, #tpu.memory_space<vmem>>, vector<1x64x128xbf16>
    %422 = vector.shape_cast %421 : vector<1x64x128xbf16> to vector<64x128xbf16>
    %c0_164 = arith.constant 0 : index
    %c0_165 = arith.constant 0 : index
    %c0_166 = arith.constant 0 : index
    %423 = vector.load %arg26[%c0_164, %c0_165, %c0_166] : memref<2x1x128xf32, #tpu.memory_space<vmem>>, vector<1x1x128xf32>
    %424 = vector.shape_cast %423 : vector<1x1x128xf32> to vector<1x128xf32>
    %c0_167 = arith.constant 0 : index
    %c0_168 = arith.constant 0 : index
    %c0_169 = arith.constant 0 : index
    %425 = vector.load %arg27[%c0_167, %c0_168, %c0_169] : memref<2x128x64xbf16, #tpu.memory_space<vmem>>, vector<1x128x64xbf16>
    %426 = vector.shape_cast %425 : vector<1x128x64xbf16> to vector<128x64xbf16>
    %c0_170 = arith.constant 0 : index
    %c0_171 = arith.constant 0 : index
    %c0_172 = arith.constant 0 : index
    %427 = vector.load %arg28[%c0_170, %c0_171, %c0_172] : memref<2x1x64xf32, #tpu.memory_space<vmem>>, vector<1x1x64xf32>
    %428 = vector.shape_cast %427 : vector<1x1x64xf32> to vector<1x64xf32>
    %c0_173 = arith.constant 0 : index
    %c0_174 = arith.constant 0 : index
    %c0_175 = arith.constant 0 : index
    %429 = vector.load %arg29[%c0_173, %c0_174, %c0_175] : memref<2x128x128xbf16, #tpu.memory_space<vmem>>, vector<1x128x128xbf16>
    %430 = vector.shape_cast %429 : vector<1x128x128xbf16> to vector<128x128xbf16>
    %c0_176 = arith.constant 0 : index
    %c0_177 = arith.constant 0 : index
    %c0_178 = arith.constant 0 : index
    %431 = vector.load %arg30[%c0_176, %c0_177, %c0_178] : memref<2x1x128xf32, #tpu.memory_space<vmem>>, vector<1x1x128xf32>
    %432 = vector.shape_cast %431 : vector<1x1x128xf32> to vector<1x128xf32>
    %c0_179 = arith.constant 0 : index
    %c0_180 = arith.constant 0 : index
    %c0_181 = arith.constant 0 : index
    %433 = vector.load %arg31[%c0_179, %c0_180, %c0_181] : memref<2x64x128xbf16, #tpu.memory_space<vmem>>, vector<1x64x128xbf16>
    %434 = vector.shape_cast %433 : vector<1x64x128xbf16> to vector<64x128xbf16>
    %c0_182 = arith.constant 0 : index
    %c0_183 = arith.constant 0 : index
    %c0_184 = arith.constant 0 : index
    %435 = vector.load %arg32[%c0_182, %c0_183, %c0_184] : memref<2x1x128xf32, #tpu.memory_space<vmem>>, vector<1x1x128xf32>
    %436 = vector.shape_cast %435 : vector<1x1x128xf32> to vector<1x128xf32>
    %c0_185 = arith.constant 0 : index
    %c0_186 = arith.constant 0 : index
    %c0_187 = arith.constant 0 : index
    %437 = vector.load %arg33[%c0_185, %c0_186, %c0_187] : memref<2x128x256xbf16, #tpu.memory_space<vmem>>, vector<1x128x256xbf16>
    %438 = vector.shape_cast %437 : vector<1x128x256xbf16> to vector<128x256xbf16>
    %c0_188 = arith.constant 0 : index
    %c0_189 = arith.constant 0 : index
    %c0_190 = arith.constant 0 : index
    %439 = vector.load %arg34[%c0_188, %c0_189, %c0_190] : memref<2x1x256xf32, #tpu.memory_space<vmem>>, vector<1x1x256xf32>
    %440 = vector.shape_cast %439 : vector<1x1x256xf32> to vector<1x256xf32>
    %c0_191 = arith.constant 0 : index
    %c0_192 = arith.constant 0 : index
    %c0_193 = arith.constant 0 : index
    %441 = vector.load %arg35[%c0_191, %c0_192, %c0_193] : memref<2x256x128xbf16, #tpu.memory_space<vmem>>, vector<1x256x128xbf16>
    %442 = vector.shape_cast %441 : vector<1x256x128xbf16> to vector<256x128xbf16>
    %c0_194 = arith.constant 0 : index
    %c0_195 = arith.constant 0 : index
    %c0_196 = arith.constant 0 : index
    %443 = vector.load %arg36[%c0_194, %c0_195, %c0_196] : memref<2x1x128xf32, #tpu.memory_space<vmem>>, vector<1x1x128xf32>
    %444 = vector.shape_cast %443 : vector<1x1x128xf32> to vector<1x128xf32>
    %cst_197 = arith.constant dense<0.000000e+00> : vector<16xf32>
    %445 = vector.multi_reduction <add>, %406, %cst_197 [1] : vector<16x128xf32> to vector<16xf32>
    %446 = vector.shape_cast %445 : vector<16xf32> to vector<16x1xf32>
    %cst_198 = arith.constant 1.280000e+02 : f32
    %447 = vector.broadcast %cst_198 : f32 to vector<16x1xf32>
    %448 = arith.divf %446, %447 : vector<16x1xf32>
    %449 = vector.broadcast %448 : vector<16x1xf32> to vector<16x128xf32>
    %450 = arith.subf %406, %449 : vector<16x128xf32>
    %451 = arith.mulf %450, %450 : vector<16x128xf32>
    %cst_199 = arith.constant dense<0.000000e+00> : vector<16xf32>
    %452 = vector.multi_reduction <add>, %451, %cst_199 [1] : vector<16x128xf32> to vector<16xf32>
    %453 = vector.shape_cast %452 : vector<16xf32> to vector<16x1xf32>
    %cst_200 = arith.constant 1.280000e+02 : f32
    %454 = vector.broadcast %cst_200 : f32 to vector<16x1xf32>
    %455 = arith.divf %453, %454 : vector<16x1xf32>
    %456 = vector.broadcast %448 : vector<16x1xf32> to vector<16x128xf32>
    %457 = arith.subf %406, %456 : vector<16x128xf32>
    %cst_201 = arith.constant 9.99999974E-6 : f32
    %458 = vector.broadcast %cst_201 : f32 to vector<16x1xf32>
    %459 = arith.addf %455, %458 : vector<16x1xf32>
    %460 = math.rsqrt %459 : vector<16x1xf32>
    %461 = vector.broadcast %460 : vector<16x1xf32> to vector<16x128xf32>
    %462 = arith.mulf %457, %461 : vector<16x128xf32>
    %463 = vector.broadcast %411 : vector<1x128xf32> to vector<16x128xf32>
    %464 = arith.mulf %462, %463 : vector<16x128xf32>
    %465 = vector.broadcast %412 : vector<1x128xf32> to vector<16x128xf32>
    %466 = arith.addf %464, %465 : vector<16x128xf32>
    %467 = arith.truncf %466 : vector<16x128xf32> to vector<16x128xbf16>
    %cst_202 = arith.constant dense<0.000000e+00> : vector<16x192xf32>
    %468 = tpu.matmul %467, %418, %cst_202 {dimension_numbers = #tpu.dot_dimension_numbers<[1], [0], [0], [1], [0, 0, 1, 1], [], []>} : vector<16x128xbf16>, vector<128x192xbf16>, vector<16x192xf32> -> vector<16x192xf32>
    %469 = vector.broadcast %420 : vector<1x192xf32> to vector<16x192xf32>
    %470 = arith.addf %468, %469 : vector<16x192xf32>
    %471 = vector.extract_strided_slice %470 {offsets = [0, 0], sizes = [16, 64], strides = [1, 1]} : vector<16x192xf32> to vector<16x64xf32>
    %472 = vector.extract_strided_slice %470 {offsets = [0, 64], sizes = [16, 64], strides = [1, 1]} : vector<16x192xf32> to vector<16x64xf32>
    %473 = vector.extract_strided_slice %470 {offsets = [0, 128], sizes = [16, 64], strides = [1, 1]} : vector<16x192xf32> to vector<16x64xf32>
    %474 = arith.truncf %471 : vector<16x64xf32> to vector<16x64xbf16>
    %475 = arith.truncf %473 : vector<16x64xf32> to vector<16x64xbf16>
    %476 = tpu.transpose %472, [1, 0] : vector<16x64xf32> -> vector<64x16xf32>
    %477 = arith.truncf %476 : vector<64x16xf32> to vector<64x16xbf16>
    %478 = vector.extract_strided_slice %474 {offsets = [0, 0], sizes = [16, 16], strides = [1, 1]} : vector<16x64xbf16> to vector<16x16xbf16>
    %479 = vector.extract_strided_slice %477 {offsets = [0, 0], sizes = [16, 16], strides = [1, 1]} : vector<64x16xbf16> to vector<16x16xbf16>
    %cst_203 = arith.constant dense<0.000000e+00> : vector<16x16xf32>
    %480 = tpu.matmul %478, %479, %cst_203 {dimension_numbers = #tpu.dot_dimension_numbers<[1], [0], [0], [1], [0, 0, 1, 1], [], []>} : vector<16x16xbf16>, vector<16x16xbf16>, vector<16x16xf32> -> vector<16x16xf32>
    %cst_204 = arith.constant 2.500000e-01 : f32
    %481 = vector.broadcast %cst_204 : f32 to vector<16x16xf32>
    %482 = arith.mulf %480, %481 : vector<16x16xf32>
    %483 = arith.addf %482, %1 : vector<16x16xf32>
    %cst_205 = arith.constant dense<0xFF800000> : vector<16xf32>
    %484 = vector.multi_reduction <maximumf>, %483, %cst_205 [1] : vector<16x16xf32> to vector<16xf32>
    %485 = vector.shape_cast %484 : vector<16xf32> to vector<16x1xf32>
    %486 = vector.broadcast %485 : vector<16x1xf32> to vector<16x16xf32>
    %487 = arith.subf %483, %486 : vector<16x16xf32>
    %488 = math.exp %487 : vector<16x16xf32>
    %cst_206 = arith.constant dense<0.000000e+00> : vector<16xf32>
    %489 = vector.multi_reduction <add>, %488, %cst_206 [1] : vector<16x16xf32> to vector<16xf32>
    %490 = vector.shape_cast %489 : vector<16xf32> to vector<16x1xf32>
    %491 = tpu.reciprocal %490 {approx = true} : vector<16x1xf32> -> vector<16x1xf32>
    %492 = vector.broadcast %491 : vector<16x1xf32> to vector<16x16xf32>
    %493 = arith.mulf %488, %492 : vector<16x16xf32>
    %494 = arith.truncf %493 : vector<16x16xf32> to vector<16x16xbf16>
    %495 = vector.extract_strided_slice %475 {offsets = [0, 0], sizes = [16, 16], strides = [1, 1]} : vector<16x64xbf16> to vector<16x16xbf16>
    %cst_207 = arith.constant dense<0.000000e+00> : vector<16x16xf32>
    %496 = tpu.matmul %494, %495, %cst_207 {dimension_numbers = #tpu.dot_dimension_numbers<[1], [0], [0], [1], [0, 0, 1, 1], [], []>} : vector<16x16xbf16>, vector<16x16xbf16>, vector<16x16xf32> -> vector<16x16xf32>
    %497 = vector.extract_strided_slice %474 {offsets = [0, 16], sizes = [16, 16], strides = [1, 1]} : vector<16x64xbf16> to vector<16x16xbf16>
    %498 = vector.extract_strided_slice %477 {offsets = [16, 0], sizes = [16, 16], strides = [1, 1]} : vector<64x16xbf16> to vector<16x16xbf16>
    %cst_208 = arith.constant dense<0.000000e+00> : vector<16x16xf32>
    %499 = tpu.matmul %497, %498, %cst_208 {dimension_numbers = #tpu.dot_dimension_numbers<[1], [0], [0], [1], [0, 0, 1, 1], [], []>} : vector<16x16xbf16>, vector<16x16xbf16>, vector<16x16xf32> -> vector<16x16xf32>
    %cst_209 = arith.constant 2.500000e-01 : f32
    %500 = vector.broadcast %cst_209 : f32 to vector<16x16xf32>
    %501 = arith.mulf %499, %500 : vector<16x16xf32>
    %502 = arith.addf %501, %1 : vector<16x16xf32>
    %cst_210 = arith.constant dense<0xFF800000> : vector<16xf32>
    %503 = vector.multi_reduction <maximumf>, %502, %cst_210 [1] : vector<16x16xf32> to vector<16xf32>
    %504 = vector.shape_cast %503 : vector<16xf32> to vector<16x1xf32>
    %505 = vector.broadcast %504 : vector<16x1xf32> to vector<16x16xf32>
    %506 = arith.subf %502, %505 : vector<16x16xf32>
    %507 = math.exp %506 : vector<16x16xf32>
    %cst_211 = arith.constant dense<0.000000e+00> : vector<16xf32>
    %508 = vector.multi_reduction <add>, %507, %cst_211 [1] : vector<16x16xf32> to vector<16xf32>
    %509 = vector.shape_cast %508 : vector<16xf32> to vector<16x1xf32>
    %510 = tpu.reciprocal %509 {approx = true} : vector<16x1xf32> -> vector<16x1xf32>
    %511 = vector.broadcast %510 : vector<16x1xf32> to vector<16x16xf32>
    %512 = arith.mulf %507, %511 : vector<16x16xf32>
    %513 = arith.truncf %512 : vector<16x16xf32> to vector<16x16xbf16>
    %514 = vector.extract_strided_slice %475 {offsets = [0, 16], sizes = [16, 16], strides = [1, 1]} : vector<16x64xbf16> to vector<16x16xbf16>
    %cst_212 = arith.constant dense<0.000000e+00> : vector<16x16xf32>
    %515 = tpu.matmul %513, %514, %cst_212 {dimension_numbers = #tpu.dot_dimension_numbers<[1], [0], [0], [1], [0, 0, 1, 1], [], []>} : vector<16x16xbf16>, vector<16x16xbf16>, vector<16x16xf32> -> vector<16x16xf32>
    %516 = vector.extract_strided_slice %474 {offsets = [0, 32], sizes = [16, 16], strides = [1, 1]} : vector<16x64xbf16> to vector<16x16xbf16>
    %517 = vector.extract_strided_slice %477 {offsets = [32, 0], sizes = [16, 16], strides = [1, 1]} : vector<64x16xbf16> to vector<16x16xbf16>
    %cst_213 = arith.constant dense<0.000000e+00> : vector<16x16xf32>
    %518 = tpu.matmul %516, %517, %cst_213 {dimension_numbers = #tpu.dot_dimension_numbers<[1], [0], [0], [1], [0, 0, 1, 1], [], []>} : vector<16x16xbf16>, vector<16x16xbf16>, vector<16x16xf32> -> vector<16x16xf32>
    %cst_214 = arith.constant 2.500000e-01 : f32
    %519 = vector.broadcast %cst_214 : f32 to vector<16x16xf32>
    %520 = arith.mulf %518, %519 : vector<16x16xf32>
    %521 = arith.addf %520, %1 : vector<16x16xf32>
    %cst_215 = arith.constant dense<0xFF800000> : vector<16xf32>
    %522 = vector.multi_reduction <maximumf>, %521, %cst_215 [1] : vector<16x16xf32> to vector<16xf32>
    %523 = vector.shape_cast %522 : vector<16xf32> to vector<16x1xf32>
    %524 = vector.broadcast %523 : vector<16x1xf32> to vector<16x16xf32>
    %525 = arith.subf %521, %524 : vector<16x16xf32>
    %526 = math.exp %525 : vector<16x16xf32>
    %cst_216 = arith.constant dense<0.000000e+00> : vector<16xf32>
    %527 = vector.multi_reduction <add>, %526, %cst_216 [1] : vector<16x16xf32> to vector<16xf32>
    %528 = vector.shape_cast %527 : vector<16xf32> to vector<16x1xf32>
    %529 = tpu.reciprocal %528 {approx = true} : vector<16x1xf32> -> vector<16x1xf32>
    %530 = vector.broadcast %529 : vector<16x1xf32> to vector<16x16xf32>
    %531 = arith.mulf %526, %530 : vector<16x16xf32>
    %532 = arith.truncf %531 : vector<16x16xf32> to vector<16x16xbf16>
    %533 = vector.extract_strided_slice %475 {offsets = [0, 32], sizes = [16, 16], strides = [1, 1]} : vector<16x64xbf16> to vector<16x16xbf16>
    %cst_217 = arith.constant dense<0.000000e+00> : vector<16x16xf32>
    %534 = tpu.matmul %532, %533, %cst_217 {dimension_numbers = #tpu.dot_dimension_numbers<[1], [0], [0], [1], [0, 0, 1, 1], [], []>} : vector<16x16xbf16>, vector<16x16xbf16>, vector<16x16xf32> -> vector<16x16xf32>
    %535 = vector.extract_strided_slice %474 {offsets = [0, 48], sizes = [16, 16], strides = [1, 1]} : vector<16x64xbf16> to vector<16x16xbf16>
    %536 = vector.extract_strided_slice %477 {offsets = [48, 0], sizes = [16, 16], strides = [1, 1]} : vector<64x16xbf16> to vector<16x16xbf16>
    %cst_218 = arith.constant dense<0.000000e+00> : vector<16x16xf32>
    %537 = tpu.matmul %535, %536, %cst_218 {dimension_numbers = #tpu.dot_dimension_numbers<[1], [0], [0], [1], [0, 0, 1, 1], [], []>} : vector<16x16xbf16>, vector<16x16xbf16>, vector<16x16xf32> -> vector<16x16xf32>
    %cst_219 = arith.constant 2.500000e-01 : f32
    %538 = vector.broadcast %cst_219 : f32 to vector<16x16xf32>
    %539 = arith.mulf %537, %538 : vector<16x16xf32>
    %540 = arith.addf %539, %1 : vector<16x16xf32>
    %cst_220 = arith.constant dense<0xFF800000> : vector<16xf32>
    %541 = vector.multi_reduction <maximumf>, %540, %cst_220 [1] : vector<16x16xf32> to vector<16xf32>
    %542 = vector.shape_cast %541 : vector<16xf32> to vector<16x1xf32>
    %543 = vector.broadcast %542 : vector<16x1xf32> to vector<16x16xf32>
    %544 = arith.subf %540, %543 : vector<16x16xf32>
    %545 = math.exp %544 : vector<16x16xf32>
    %cst_221 = arith.constant dense<0.000000e+00> : vector<16xf32>
    %546 = vector.multi_reduction <add>, %545, %cst_221 [1] : vector<16x16xf32> to vector<16xf32>
    %547 = vector.shape_cast %546 : vector<16xf32> to vector<16x1xf32>
    %548 = tpu.reciprocal %547 {approx = true} : vector<16x1xf32> -> vector<16x1xf32>
    %549 = vector.broadcast %548 : vector<16x1xf32> to vector<16x16xf32>
    %550 = arith.mulf %545, %549 : vector<16x16xf32>
    %551 = arith.truncf %550 : vector<16x16xf32> to vector<16x16xbf16>
    %552 = vector.extract_strided_slice %475 {offsets = [0, 48], sizes = [16, 16], strides = [1, 1]} : vector<16x64xbf16> to vector<16x16xbf16>
    %cst_222 = arith.constant dense<0.000000e+00> : vector<16x16xf32>
    %553 = tpu.matmul %551, %552, %cst_222 {dimension_numbers = #tpu.dot_dimension_numbers<[1], [0], [0], [1], [0, 0, 1, 1], [], []>} : vector<16x16xbf16>, vector<16x16xbf16>, vector<16x16xf32> -> vector<16x16xf32>
    %554 = tpu.concatenate %496, %515, %534, %553 in 1 : vector<16x16xf32>, vector<16x16xf32>, vector<16x16xf32>, vector<16x16xf32> -> vector<16x64xf32>
    %555 = arith.truncf %554 : vector<16x64xf32> to vector<16x64xbf16>
    %cst_223 = arith.constant dense<0.000000e+00> : vector<16x128xf32>
    %556 = tpu.matmul %555, %422, %cst_223 {dimension_numbers = #tpu.dot_dimension_numbers<[1], [0], [0], [1], [0, 0, 1, 1], [], []>} : vector<16x64xbf16>, vector<64x128xbf16>, vector<16x128xf32> -> vector<16x128xf32>
    %557 = vector.broadcast %424 : vector<1x128xf32> to vector<16x128xf32>
    %558 = arith.addf %556, %557 : vector<16x128xf32>
    %559 = arith.addf %406, %558 : vector<16x128xf32>
    %cst_224 = arith.constant dense<0.000000e+00> : vector<16xf32>
    %560 = vector.multi_reduction <add>, %559, %cst_224 [1] : vector<16x128xf32> to vector<16xf32>
    %561 = vector.shape_cast %560 : vector<16xf32> to vector<16x1xf32>
    %cst_225 = arith.constant 1.280000e+02 : f32
    %562 = vector.broadcast %cst_225 : f32 to vector<16x1xf32>
    %563 = arith.divf %561, %562 : vector<16x1xf32>
    %564 = vector.broadcast %563 : vector<16x1xf32> to vector<16x128xf32>
    %565 = arith.subf %559, %564 : vector<16x128xf32>
    %566 = arith.mulf %565, %565 : vector<16x128xf32>
    %cst_226 = arith.constant dense<0.000000e+00> : vector<16xf32>
    %567 = vector.multi_reduction <add>, %566, %cst_226 [1] : vector<16x128xf32> to vector<16xf32>
    %568 = vector.shape_cast %567 : vector<16xf32> to vector<16x1xf32>
    %cst_227 = arith.constant 1.280000e+02 : f32
    %569 = vector.broadcast %cst_227 : f32 to vector<16x1xf32>
    %570 = arith.divf %568, %569 : vector<16x1xf32>
    %571 = vector.broadcast %563 : vector<16x1xf32> to vector<16x128xf32>
    %572 = arith.subf %559, %571 : vector<16x128xf32>
    %cst_228 = arith.constant 9.99999974E-6 : f32
    %573 = vector.broadcast %cst_228 : f32 to vector<16x1xf32>
    %574 = arith.addf %570, %573 : vector<16x1xf32>
    %575 = math.rsqrt %574 : vector<16x1xf32>
    %576 = vector.broadcast %575 : vector<16x1xf32> to vector<16x128xf32>
    %577 = arith.mulf %572, %576 : vector<16x128xf32>
    %578 = vector.broadcast %413 : vector<1x128xf32> to vector<16x128xf32>
    %579 = arith.mulf %577, %578 : vector<16x128xf32>
    %580 = vector.broadcast %414 : vector<1x128xf32> to vector<16x128xf32>
    %581 = arith.addf %579, %580 : vector<16x128xf32>
    %582 = arith.truncf %581 : vector<16x128xf32> to vector<16x128xbf16>
    %cst_229 = arith.constant dense<0.000000e+00> : vector<16x64xf32>
    %583 = tpu.matmul %582, %426, %cst_229 {dimension_numbers = #tpu.dot_dimension_numbers<[1], [0], [0], [1], [0, 0, 1, 1], [], []>} : vector<16x128xbf16>, vector<128x64xbf16>, vector<16x64xf32> -> vector<16x64xf32>
    %584 = vector.broadcast %428 : vector<1x64xf32> to vector<16x64xf32>
    %585 = arith.addf %583, %584 : vector<16x64xf32>
    %586 = arith.truncf %376 : vector<16x128xf32> to vector<16x128xbf16>
    %cst_230 = arith.constant dense<0.000000e+00> : vector<16x128xf32>
    %587 = tpu.matmul %586, %430, %cst_230 {dimension_numbers = #tpu.dot_dimension_numbers<[1], [0], [0], [1], [0, 0, 1, 1], [], []>} : vector<16x128xbf16>, vector<128x128xbf16>, vector<16x128xf32> -> vector<16x128xf32>
    %588 = vector.broadcast %432 : vector<1x128xf32> to vector<16x128xf32>
    %589 = arith.addf %587, %588 : vector<16x128xf32>
    %590 = vector.extract_strided_slice %589 {offsets = [0, 0], sizes = [16, 64], strides = [1, 1]} : vector<16x128xf32> to vector<16x64xf32>
    %591 = vector.extract_strided_slice %589 {offsets = [0, 64], sizes = [16, 64], strides = [1, 1]} : vector<16x128xf32> to vector<16x64xf32>
    %592 = arith.truncf %585 : vector<16x64xf32> to vector<16x64xbf16>
    %593 = arith.truncf %591 : vector<16x64xf32> to vector<16x64xbf16>
    %594 = tpu.transpose %590, [1, 0] : vector<16x64xf32> -> vector<64x16xf32>
    %595 = arith.truncf %594 : vector<64x16xf32> to vector<64x16xbf16>
    %596 = vector.extract_strided_slice %592 {offsets = [0, 0], sizes = [16, 16], strides = [1, 1]} : vector<16x64xbf16> to vector<16x16xbf16>
    %597 = vector.extract_strided_slice %595 {offsets = [0, 0], sizes = [16, 16], strides = [1, 1]} : vector<64x16xbf16> to vector<16x16xbf16>
    %cst_231 = arith.constant dense<0.000000e+00> : vector<16x16xf32>
    %598 = tpu.matmul %596, %597, %cst_231 {dimension_numbers = #tpu.dot_dimension_numbers<[1], [0], [0], [1], [0, 0, 1, 1], [], []>} : vector<16x16xbf16>, vector<16x16xbf16>, vector<16x16xf32> -> vector<16x16xf32>
    %cst_232 = arith.constant 2.500000e-01 : f32
    %599 = vector.broadcast %cst_232 : f32 to vector<16x16xf32>
    %600 = arith.mulf %598, %599 : vector<16x16xf32>
    %601 = arith.addf %600, %2 : vector<16x16xf32>
    %cst_233 = arith.constant dense<0xFF800000> : vector<16xf32>
    %602 = vector.multi_reduction <maximumf>, %601, %cst_233 [1] : vector<16x16xf32> to vector<16xf32>
    %603 = vector.shape_cast %602 : vector<16xf32> to vector<16x1xf32>
    %604 = vector.broadcast %603 : vector<16x1xf32> to vector<16x16xf32>
    %605 = arith.subf %601, %604 : vector<16x16xf32>
    %606 = math.exp %605 : vector<16x16xf32>
    %cst_234 = arith.constant dense<0.000000e+00> : vector<16xf32>
    %607 = vector.multi_reduction <add>, %606, %cst_234 [1] : vector<16x16xf32> to vector<16xf32>
    %608 = vector.shape_cast %607 : vector<16xf32> to vector<16x1xf32>
    %609 = tpu.reciprocal %608 {approx = true} : vector<16x1xf32> -> vector<16x1xf32>
    %610 = vector.broadcast %609 : vector<16x1xf32> to vector<16x16xf32>
    %611 = arith.mulf %606, %610 : vector<16x16xf32>
    %612 = arith.truncf %611 : vector<16x16xf32> to vector<16x16xbf16>
    %613 = vector.extract_strided_slice %593 {offsets = [0, 0], sizes = [16, 16], strides = [1, 1]} : vector<16x64xbf16> to vector<16x16xbf16>
    %cst_235 = arith.constant dense<0.000000e+00> : vector<16x16xf32>
    %614 = tpu.matmul %612, %613, %cst_235 {dimension_numbers = #tpu.dot_dimension_numbers<[1], [0], [0], [1], [0, 0, 1, 1], [], []>} : vector<16x16xbf16>, vector<16x16xbf16>, vector<16x16xf32> -> vector<16x16xf32>
    %615 = vector.extract_strided_slice %592 {offsets = [0, 16], sizes = [16, 16], strides = [1, 1]} : vector<16x64xbf16> to vector<16x16xbf16>
    %616 = vector.extract_strided_slice %595 {offsets = [16, 0], sizes = [16, 16], strides = [1, 1]} : vector<64x16xbf16> to vector<16x16xbf16>
    %cst_236 = arith.constant dense<0.000000e+00> : vector<16x16xf32>
    %617 = tpu.matmul %615, %616, %cst_236 {dimension_numbers = #tpu.dot_dimension_numbers<[1], [0], [0], [1], [0, 0, 1, 1], [], []>} : vector<16x16xbf16>, vector<16x16xbf16>, vector<16x16xf32> -> vector<16x16xf32>
    %cst_237 = arith.constant 2.500000e-01 : f32
    %618 = vector.broadcast %cst_237 : f32 to vector<16x16xf32>
    %619 = arith.mulf %617, %618 : vector<16x16xf32>
    %620 = arith.addf %619, %2 : vector<16x16xf32>
    %cst_238 = arith.constant dense<0xFF800000> : vector<16xf32>
    %621 = vector.multi_reduction <maximumf>, %620, %cst_238 [1] : vector<16x16xf32> to vector<16xf32>
    %622 = vector.shape_cast %621 : vector<16xf32> to vector<16x1xf32>
    %623 = vector.broadcast %622 : vector<16x1xf32> to vector<16x16xf32>
    %624 = arith.subf %620, %623 : vector<16x16xf32>
    %625 = math.exp %624 : vector<16x16xf32>
    %cst_239 = arith.constant dense<0.000000e+00> : vector<16xf32>
    %626 = vector.multi_reduction <add>, %625, %cst_239 [1] : vector<16x16xf32> to vector<16xf32>
    %627 = vector.shape_cast %626 : vector<16xf32> to vector<16x1xf32>
    %628 = tpu.reciprocal %627 {approx = true} : vector<16x1xf32> -> vector<16x1xf32>
    %629 = vector.broadcast %628 : vector<16x1xf32> to vector<16x16xf32>
    %630 = arith.mulf %625, %629 : vector<16x16xf32>
    %631 = arith.truncf %630 : vector<16x16xf32> to vector<16x16xbf16>
    %632 = vector.extract_strided_slice %593 {offsets = [0, 16], sizes = [16, 16], strides = [1, 1]} : vector<16x64xbf16> to vector<16x16xbf16>
    %cst_240 = arith.constant dense<0.000000e+00> : vector<16x16xf32>
    %633 = tpu.matmul %631, %632, %cst_240 {dimension_numbers = #tpu.dot_dimension_numbers<[1], [0], [0], [1], [0, 0, 1, 1], [], []>} : vector<16x16xbf16>, vector<16x16xbf16>, vector<16x16xf32> -> vector<16x16xf32>
    %634 = vector.extract_strided_slice %592 {offsets = [0, 32], sizes = [16, 16], strides = [1, 1]} : vector<16x64xbf16> to vector<16x16xbf16>
    %635 = vector.extract_strided_slice %595 {offsets = [32, 0], sizes = [16, 16], strides = [1, 1]} : vector<64x16xbf16> to vector<16x16xbf16>
    %cst_241 = arith.constant dense<0.000000e+00> : vector<16x16xf32>
    %636 = tpu.matmul %634, %635, %cst_241 {dimension_numbers = #tpu.dot_dimension_numbers<[1], [0], [0], [1], [0, 0, 1, 1], [], []>} : vector<16x16xbf16>, vector<16x16xbf16>, vector<16x16xf32> -> vector<16x16xf32>
    %cst_242 = arith.constant 2.500000e-01 : f32
    %637 = vector.broadcast %cst_242 : f32 to vector<16x16xf32>
    %638 = arith.mulf %636, %637 : vector<16x16xf32>
    %639 = arith.addf %638, %2 : vector<16x16xf32>
    %cst_243 = arith.constant dense<0xFF800000> : vector<16xf32>
    %640 = vector.multi_reduction <maximumf>, %639, %cst_243 [1] : vector<16x16xf32> to vector<16xf32>
    %641 = vector.shape_cast %640 : vector<16xf32> to vector<16x1xf32>
    %642 = vector.broadcast %641 : vector<16x1xf32> to vector<16x16xf32>
    %643 = arith.subf %639, %642 : vector<16x16xf32>
    %644 = math.exp %643 : vector<16x16xf32>
    %cst_244 = arith.constant dense<0.000000e+00> : vector<16xf32>
    %645 = vector.multi_reduction <add>, %644, %cst_244 [1] : vector<16x16xf32> to vector<16xf32>
    %646 = vector.shape_cast %645 : vector<16xf32> to vector<16x1xf32>
    %647 = tpu.reciprocal %646 {approx = true} : vector<16x1xf32> -> vector<16x1xf32>
    %648 = vector.broadcast %647 : vector<16x1xf32> to vector<16x16xf32>
    %649 = arith.mulf %644, %648 : vector<16x16xf32>
    %650 = arith.truncf %649 : vector<16x16xf32> to vector<16x16xbf16>
    %651 = vector.extract_strided_slice %593 {offsets = [0, 32], sizes = [16, 16], strides = [1, 1]} : vector<16x64xbf16> to vector<16x16xbf16>
    %cst_245 = arith.constant dense<0.000000e+00> : vector<16x16xf32>
    %652 = tpu.matmul %650, %651, %cst_245 {dimension_numbers = #tpu.dot_dimension_numbers<[1], [0], [0], [1], [0, 0, 1, 1], [], []>} : vector<16x16xbf16>, vector<16x16xbf16>, vector<16x16xf32> -> vector<16x16xf32>
    %653 = vector.extract_strided_slice %592 {offsets = [0, 48], sizes = [16, 16], strides = [1, 1]} : vector<16x64xbf16> to vector<16x16xbf16>
    %654 = vector.extract_strided_slice %595 {offsets = [48, 0], sizes = [16, 16], strides = [1, 1]} : vector<64x16xbf16> to vector<16x16xbf16>
    %cst_246 = arith.constant dense<0.000000e+00> : vector<16x16xf32>
    %655 = tpu.matmul %653, %654, %cst_246 {dimension_numbers = #tpu.dot_dimension_numbers<[1], [0], [0], [1], [0, 0, 1, 1], [], []>} : vector<16x16xbf16>, vector<16x16xbf16>, vector<16x16xf32> -> vector<16x16xf32>
    %cst_247 = arith.constant 2.500000e-01 : f32
    %656 = vector.broadcast %cst_247 : f32 to vector<16x16xf32>
    %657 = arith.mulf %655, %656 : vector<16x16xf32>
    %658 = arith.addf %657, %2 : vector<16x16xf32>
    %cst_248 = arith.constant dense<0xFF800000> : vector<16xf32>
    %659 = vector.multi_reduction <maximumf>, %658, %cst_248 [1] : vector<16x16xf32> to vector<16xf32>
    %660 = vector.shape_cast %659 : vector<16xf32> to vector<16x1xf32>
    %661 = vector.broadcast %660 : vector<16x1xf32> to vector<16x16xf32>
    %662 = arith.subf %658, %661 : vector<16x16xf32>
    %663 = math.exp %662 : vector<16x16xf32>
    %cst_249 = arith.constant dense<0.000000e+00> : vector<16xf32>
    %664 = vector.multi_reduction <add>, %663, %cst_249 [1] : vector<16x16xf32> to vector<16xf32>
    %665 = vector.shape_cast %664 : vector<16xf32> to vector<16x1xf32>
    %666 = tpu.reciprocal %665 {approx = true} : vector<16x1xf32> -> vector<16x1xf32>
    %667 = vector.broadcast %666 : vector<16x1xf32> to vector<16x16xf32>
    %668 = arith.mulf %663, %667 : vector<16x16xf32>
    %669 = arith.truncf %668 : vector<16x16xf32> to vector<16x16xbf16>
    %670 = vector.extract_strided_slice %593 {offsets = [0, 48], sizes = [16, 16], strides = [1, 1]} : vector<16x64xbf16> to vector<16x16xbf16>
    %cst_250 = arith.constant dense<0.000000e+00> : vector<16x16xf32>
    %671 = tpu.matmul %669, %670, %cst_250 {dimension_numbers = #tpu.dot_dimension_numbers<[1], [0], [0], [1], [0, 0, 1, 1], [], []>} : vector<16x16xbf16>, vector<16x16xbf16>, vector<16x16xf32> -> vector<16x16xf32>
    %672 = tpu.concatenate %614, %633, %652, %671 in 1 : vector<16x16xf32>, vector<16x16xf32>, vector<16x16xf32>, vector<16x16xf32> -> vector<16x64xf32>
    %673 = arith.truncf %672 : vector<16x64xf32> to vector<16x64xbf16>
    %cst_251 = arith.constant dense<0.000000e+00> : vector<16x128xf32>
    %674 = tpu.matmul %673, %434, %cst_251 {dimension_numbers = #tpu.dot_dimension_numbers<[1], [0], [0], [1], [0, 0, 1, 1], [], []>} : vector<16x64xbf16>, vector<64x128xbf16>, vector<16x128xf32> -> vector<16x128xf32>
    %675 = vector.broadcast %436 : vector<1x128xf32> to vector<16x128xf32>
    %676 = arith.addf %674, %675 : vector<16x128xf32>
    %677 = arith.addf %559, %676 : vector<16x128xf32>
    %cst_252 = arith.constant dense<0.000000e+00> : vector<16xf32>
    %678 = vector.multi_reduction <add>, %677, %cst_252 [1] : vector<16x128xf32> to vector<16xf32>
    %679 = vector.shape_cast %678 : vector<16xf32> to vector<16x1xf32>
    %cst_253 = arith.constant 1.280000e+02 : f32
    %680 = vector.broadcast %cst_253 : f32 to vector<16x1xf32>
    %681 = arith.divf %679, %680 : vector<16x1xf32>
    %682 = vector.broadcast %681 : vector<16x1xf32> to vector<16x128xf32>
    %683 = arith.subf %677, %682 : vector<16x128xf32>
    %684 = arith.mulf %683, %683 : vector<16x128xf32>
    %cst_254 = arith.constant dense<0.000000e+00> : vector<16xf32>
    %685 = vector.multi_reduction <add>, %684, %cst_254 [1] : vector<16x128xf32> to vector<16xf32>
    %686 = vector.shape_cast %685 : vector<16xf32> to vector<16x1xf32>
    %cst_255 = arith.constant 1.280000e+02 : f32
    %687 = vector.broadcast %cst_255 : f32 to vector<16x1xf32>
    %688 = arith.divf %686, %687 : vector<16x1xf32>
    %689 = vector.broadcast %681 : vector<16x1xf32> to vector<16x128xf32>
    %690 = arith.subf %677, %689 : vector<16x128xf32>
    %cst_256 = arith.constant 9.99999974E-6 : f32
    %691 = vector.broadcast %cst_256 : f32 to vector<16x1xf32>
    %692 = arith.addf %688, %691 : vector<16x1xf32>
    %693 = math.rsqrt %692 : vector<16x1xf32>
    %694 = vector.broadcast %693 : vector<16x1xf32> to vector<16x128xf32>
    %695 = arith.mulf %690, %694 : vector<16x128xf32>
    %696 = vector.broadcast %415 : vector<1x128xf32> to vector<16x128xf32>
    %697 = arith.mulf %695, %696 : vector<16x128xf32>
    %698 = vector.broadcast %416 : vector<1x128xf32> to vector<16x128xf32>
    %699 = arith.addf %697, %698 : vector<16x128xf32>
    %700 = arith.truncf %699 : vector<16x128xf32> to vector<16x128xbf16>
    %cst_257 = arith.constant dense<0.000000e+00> : vector<16x256xf32>
    %701 = tpu.matmul %700, %438, %cst_257 {dimension_numbers = #tpu.dot_dimension_numbers<[1], [0], [0], [1], [0, 0, 1, 1], [], []>} : vector<16x128xbf16>, vector<128x256xbf16>, vector<16x256xf32> -> vector<16x256xf32>
    %702 = vector.broadcast %440 : vector<1x256xf32> to vector<16x256xf32>
    %703 = arith.addf %701, %702 : vector<16x256xf32>
    %cst_258 = arith.constant 0.000000e+00 : f32
    %704 = vector.broadcast %cst_258 : f32 to vector<16x256xf32>
    %705 = arith.maximumf %703, %704 : vector<16x256xf32>
    %706 = arith.truncf %705 : vector<16x256xf32> to vector<16x256xbf16>
    %cst_259 = arith.constant dense<0.000000e+00> : vector<16x128xf32>
    %707 = tpu.matmul %706, %442, %cst_259 {dimension_numbers = #tpu.dot_dimension_numbers<[1], [0], [0], [1], [0, 0, 1, 1], [], []>} : vector<16x256xbf16>, vector<256x128xbf16>, vector<16x128xf32> -> vector<16x128xf32>
    %708 = vector.broadcast %444 : vector<1x128xf32> to vector<16x128xf32>
    %709 = arith.addf %707, %708 : vector<16x128xf32>
    %710 = arith.addf %677, %709 : vector<16x128xf32>
    %c1_260 = arith.constant 1 : index
    %c0_261 = arith.constant 0 : index
    %c0_262 = arith.constant 0 : index
    %711 = vector.load %arg21[%c1_260, %c0_261, %c0_262] : memref<2x3x128xf32, #tpu.memory_space<vmem>>, vector<1x3x128xf32>
    %712 = vector.shape_cast %711 : vector<1x3x128xf32> to vector<3x128xf32>
    %c1_263 = arith.constant 1 : index
    %c0_264 = arith.constant 0 : index
    %c0_265 = arith.constant 0 : index
    %713 = vector.load %arg22[%c1_263, %c0_264, %c0_265] : memref<2x3x128xf32, #tpu.memory_space<vmem>>, vector<1x3x128xf32>
    %714 = vector.shape_cast %713 : vector<1x3x128xf32> to vector<3x128xf32>
    %715 = vector.extract_strided_slice %712 {offsets = [0, 0], sizes = [1, 128], strides = [1, 1]} : vector<3x128xf32> to vector<1x128xf32>
    %716 = vector.extract_strided_slice %714 {offsets = [0, 0], sizes = [1, 128], strides = [1, 1]} : vector<3x128xf32> to vector<1x128xf32>
    %717 = vector.extract_strided_slice %712 {offsets = [1, 0], sizes = [1, 128], strides = [1, 1]} : vector<3x128xf32> to vector<1x128xf32>
    %718 = vector.extract_strided_slice %714 {offsets = [1, 0], sizes = [1, 128], strides = [1, 1]} : vector<3x128xf32> to vector<1x128xf32>
    %719 = vector.extract_strided_slice %712 {offsets = [2, 0], sizes = [1, 128], strides = [1, 1]} : vector<3x128xf32> to vector<1x128xf32>
    %720 = vector.extract_strided_slice %714 {offsets = [2, 0], sizes = [1, 128], strides = [1, 1]} : vector<3x128xf32> to vector<1x128xf32>
    %c1_266 = arith.constant 1 : index
    %c0_267 = arith.constant 0 : index
    %c0_268 = arith.constant 0 : index
    %721 = vector.load %arg23[%c1_266, %c0_267, %c0_268] : memref<2x128x192xbf16, #tpu.memory_space<vmem>>, vector<1x128x192xbf16>
    %722 = vector.shape_cast %721 : vector<1x128x192xbf16> to vector<128x192xbf16>
    %c1_269 = arith.constant 1 : index
    %c0_270 = arith.constant 0 : index
    %c0_271 = arith.constant 0 : index
    %723 = vector.load %arg24[%c1_269, %c0_270, %c0_271] : memref<2x1x192xf32, #tpu.memory_space<vmem>>, vector<1x1x192xf32>
    %724 = vector.shape_cast %723 : vector<1x1x192xf32> to vector<1x192xf32>
    %c1_272 = arith.constant 1 : index
    %c0_273 = arith.constant 0 : index
    %c0_274 = arith.constant 0 : index
    %725 = vector.load %arg25[%c1_272, %c0_273, %c0_274] : memref<2x64x128xbf16, #tpu.memory_space<vmem>>, vector<1x64x128xbf16>
    %726 = vector.shape_cast %725 : vector<1x64x128xbf16> to vector<64x128xbf16>
    %c1_275 = arith.constant 1 : index
    %c0_276 = arith.constant 0 : index
    %c0_277 = arith.constant 0 : index
    %727 = vector.load %arg26[%c1_275, %c0_276, %c0_277] : memref<2x1x128xf32, #tpu.memory_space<vmem>>, vector<1x1x128xf32>
    %728 = vector.shape_cast %727 : vector<1x1x128xf32> to vector<1x128xf32>
    %c1_278 = arith.constant 1 : index
    %c0_279 = arith.constant 0 : index
    %c0_280 = arith.constant 0 : index
    %729 = vector.load %arg27[%c1_278, %c0_279, %c0_280] : memref<2x128x64xbf16, #tpu.memory_space<vmem>>, vector<1x128x64xbf16>
    %730 = vector.shape_cast %729 : vector<1x128x64xbf16> to vector<128x64xbf16>
    %c1_281 = arith.constant 1 : index
    %c0_282 = arith.constant 0 : index
    %c0_283 = arith.constant 0 : index
    %731 = vector.load %arg28[%c1_281, %c0_282, %c0_283] : memref<2x1x64xf32, #tpu.memory_space<vmem>>, vector<1x1x64xf32>
    %732 = vector.shape_cast %731 : vector<1x1x64xf32> to vector<1x64xf32>
    %c1_284 = arith.constant 1 : index
    %c0_285 = arith.constant 0 : index
    %c0_286 = arith.constant 0 : index
    %733 = vector.load %arg29[%c1_284, %c0_285, %c0_286] : memref<2x128x128xbf16, #tpu.memory_space<vmem>>, vector<1x128x128xbf16>
    %734 = vector.shape_cast %733 : vector<1x128x128xbf16> to vector<128x128xbf16>
    %c1_287 = arith.constant 1 : index
    %c0_288 = arith.constant 0 : index
    %c0_289 = arith.constant 0 : index
    %735 = vector.load %arg30[%c1_287, %c0_288, %c0_289] : memref<2x1x128xf32, #tpu.memory_space<vmem>>, vector<1x1x128xf32>
    %736 = vector.shape_cast %735 : vector<1x1x128xf32> to vector<1x128xf32>
    %c1_290 = arith.constant 1 : index
    %c0_291 = arith.constant 0 : index
    %c0_292 = arith.constant 0 : index
    %737 = vector.load %arg31[%c1_290, %c0_291, %c0_292] : memref<2x64x128xbf16, #tpu.memory_space<vmem>>, vector<1x64x128xbf16>
    %738 = vector.shape_cast %737 : vector<1x64x128xbf16> to vector<64x128xbf16>
    %c1_293 = arith.constant 1 : index
    %c0_294 = arith.constant 0 : index
    %c0_295 = arith.constant 0 : index
    %739 = vector.load %arg32[%c1_293, %c0_294, %c0_295] : memref<2x1x128xf32, #tpu.memory_space<vmem>>, vector<1x1x128xf32>
    %740 = vector.shape_cast %739 : vector<1x1x128xf32> to vector<1x128xf32>
    %c1_296 = arith.constant 1 : index
    %c0_297 = arith.constant 0 : index
    %c0_298 = arith.constant 0 : index
    %741 = vector.load %arg33[%c1_296, %c0_297, %c0_298] : memref<2x128x256xbf16, #tpu.memory_space<vmem>>, vector<1x128x256xbf16>
    %742 = vector.shape_cast %741 : vector<1x128x256xbf16> to vector<128x256xbf16>
    %c1_299 = arith.constant 1 : index
    %c0_300 = arith.constant 0 : index
    %c0_301 = arith.constant 0 : index
    %743 = vector.load %arg34[%c1_299, %c0_300, %c0_301] : memref<2x1x256xf32, #tpu.memory_space<vmem>>, vector<1x1x256xf32>
    %744 = vector.shape_cast %743 : vector<1x1x256xf32> to vector<1x256xf32>
    %c1_302 = arith.constant 1 : index
    %c0_303 = arith.constant 0 : index
    %c0_304 = arith.constant 0 : index
    %745 = vector.load %arg35[%c1_302, %c0_303, %c0_304] : memref<2x256x128xbf16, #tpu.memory_space<vmem>>, vector<1x256x128xbf16>
    %746 = vector.shape_cast %745 : vector<1x256x128xbf16> to vector<256x128xbf16>
    %c1_305 = arith.constant 1 : index
    %c0_306 = arith.constant 0 : index
    %c0_307 = arith.constant 0 : index
    %747 = vector.load %arg36[%c1_305, %c0_306, %c0_307] : memref<2x1x128xf32, #tpu.memory_space<vmem>>, vector<1x1x128xf32>
    %748 = vector.shape_cast %747 : vector<1x1x128xf32> to vector<1x128xf32>
    %cst_308 = arith.constant dense<0.000000e+00> : vector<16xf32>
    %749 = vector.multi_reduction <add>, %710, %cst_308 [1] : vector<16x128xf32> to vector<16xf32>
    %750 = vector.shape_cast %749 : vector<16xf32> to vector<16x1xf32>
    %cst_309 = arith.constant 1.280000e+02 : f32
    %751 = vector.broadcast %cst_309 : f32 to vector<16x1xf32>
    %752 = arith.divf %750, %751 : vector<16x1xf32>
    %753 = vector.broadcast %752 : vector<16x1xf32> to vector<16x128xf32>
    %754 = arith.subf %710, %753 : vector<16x128xf32>
    %755 = arith.mulf %754, %754 : vector<16x128xf32>
    %cst_310 = arith.constant dense<0.000000e+00> : vector<16xf32>
    %756 = vector.multi_reduction <add>, %755, %cst_310 [1] : vector<16x128xf32> to vector<16xf32>
    %757 = vector.shape_cast %756 : vector<16xf32> to vector<16x1xf32>
    %cst_311 = arith.constant 1.280000e+02 : f32
    %758 = vector.broadcast %cst_311 : f32 to vector<16x1xf32>
    %759 = arith.divf %757, %758 : vector<16x1xf32>
    %760 = vector.broadcast %752 : vector<16x1xf32> to vector<16x128xf32>
    %761 = arith.subf %710, %760 : vector<16x128xf32>
    %cst_312 = arith.constant 9.99999974E-6 : f32
    %762 = vector.broadcast %cst_312 : f32 to vector<16x1xf32>
    %763 = arith.addf %759, %762 : vector<16x1xf32>
    %764 = math.rsqrt %763 : vector<16x1xf32>
    %765 = vector.broadcast %764 : vector<16x1xf32> to vector<16x128xf32>
    %766 = arith.mulf %761, %765 : vector<16x128xf32>
    %767 = vector.broadcast %715 : vector<1x128xf32> to vector<16x128xf32>
    %768 = arith.mulf %766, %767 : vector<16x128xf32>
    %769 = vector.broadcast %716 : vector<1x128xf32> to vector<16x128xf32>
    %770 = arith.addf %768, %769 : vector<16x128xf32>
    %771 = arith.truncf %770 : vector<16x128xf32> to vector<16x128xbf16>
    %cst_313 = arith.constant dense<0.000000e+00> : vector<16x192xf32>
    %772 = tpu.matmul %771, %722, %cst_313 {dimension_numbers = #tpu.dot_dimension_numbers<[1], [0], [0], [1], [0, 0, 1, 1], [], []>} : vector<16x128xbf16>, vector<128x192xbf16>, vector<16x192xf32> -> vector<16x192xf32>
    %773 = vector.broadcast %724 : vector<1x192xf32> to vector<16x192xf32>
    %774 = arith.addf %772, %773 : vector<16x192xf32>
    %775 = vector.extract_strided_slice %774 {offsets = [0, 0], sizes = [16, 64], strides = [1, 1]} : vector<16x192xf32> to vector<16x64xf32>
    %776 = vector.extract_strided_slice %774 {offsets = [0, 64], sizes = [16, 64], strides = [1, 1]} : vector<16x192xf32> to vector<16x64xf32>
    %777 = vector.extract_strided_slice %774 {offsets = [0, 128], sizes = [16, 64], strides = [1, 1]} : vector<16x192xf32> to vector<16x64xf32>
    %778 = arith.truncf %775 : vector<16x64xf32> to vector<16x64xbf16>
    %779 = arith.truncf %777 : vector<16x64xf32> to vector<16x64xbf16>
    %780 = tpu.transpose %776, [1, 0] : vector<16x64xf32> -> vector<64x16xf32>
    %781 = arith.truncf %780 : vector<64x16xf32> to vector<64x16xbf16>
    %782 = vector.extract_strided_slice %778 {offsets = [0, 0], sizes = [16, 16], strides = [1, 1]} : vector<16x64xbf16> to vector<16x16xbf16>
    %783 = vector.extract_strided_slice %781 {offsets = [0, 0], sizes = [16, 16], strides = [1, 1]} : vector<64x16xbf16> to vector<16x16xbf16>
    %cst_314 = arith.constant dense<0.000000e+00> : vector<16x16xf32>
    %784 = tpu.matmul %782, %783, %cst_314 {dimension_numbers = #tpu.dot_dimension_numbers<[1], [0], [0], [1], [0, 0, 1, 1], [], []>} : vector<16x16xbf16>, vector<16x16xbf16>, vector<16x16xf32> -> vector<16x16xf32>
    %cst_315 = arith.constant 2.500000e-01 : f32
    %785 = vector.broadcast %cst_315 : f32 to vector<16x16xf32>
    %786 = arith.mulf %784, %785 : vector<16x16xf32>
    %787 = arith.addf %786, %1 : vector<16x16xf32>
    %cst_316 = arith.constant dense<0xFF800000> : vector<16xf32>
    %788 = vector.multi_reduction <maximumf>, %787, %cst_316 [1] : vector<16x16xf32> to vector<16xf32>
    %789 = vector.shape_cast %788 : vector<16xf32> to vector<16x1xf32>
    %790 = vector.broadcast %789 : vector<16x1xf32> to vector<16x16xf32>
    %791 = arith.subf %787, %790 : vector<16x16xf32>
    %792 = math.exp %791 : vector<16x16xf32>
    %cst_317 = arith.constant dense<0.000000e+00> : vector<16xf32>
    %793 = vector.multi_reduction <add>, %792, %cst_317 [1] : vector<16x16xf32> to vector<16xf32>
    %794 = vector.shape_cast %793 : vector<16xf32> to vector<16x1xf32>
    %795 = tpu.reciprocal %794 {approx = true} : vector<16x1xf32> -> vector<16x1xf32>
    %796 = vector.broadcast %795 : vector<16x1xf32> to vector<16x16xf32>
    %797 = arith.mulf %792, %796 : vector<16x16xf32>
    %798 = arith.truncf %797 : vector<16x16xf32> to vector<16x16xbf16>
    %799 = vector.extract_strided_slice %779 {offsets = [0, 0], sizes = [16, 16], strides = [1, 1]} : vector<16x64xbf16> to vector<16x16xbf16>
    %cst_318 = arith.constant dense<0.000000e+00> : vector<16x16xf32>
    %800 = tpu.matmul %798, %799, %cst_318 {dimension_numbers = #tpu.dot_dimension_numbers<[1], [0], [0], [1], [0, 0, 1, 1], [], []>} : vector<16x16xbf16>, vector<16x16xbf16>, vector<16x16xf32> -> vector<16x16xf32>
    %801 = vector.extract_strided_slice %778 {offsets = [0, 16], sizes = [16, 16], strides = [1, 1]} : vector<16x64xbf16> to vector<16x16xbf16>
    %802 = vector.extract_strided_slice %781 {offsets = [16, 0], sizes = [16, 16], strides = [1, 1]} : vector<64x16xbf16> to vector<16x16xbf16>
    %cst_319 = arith.constant dense<0.000000e+00> : vector<16x16xf32>
    %803 = tpu.matmul %801, %802, %cst_319 {dimension_numbers = #tpu.dot_dimension_numbers<[1], [0], [0], [1], [0, 0, 1, 1], [], []>} : vector<16x16xbf16>, vector<16x16xbf16>, vector<16x16xf32> -> vector<16x16xf32>
    %cst_320 = arith.constant 2.500000e-01 : f32
    %804 = vector.broadcast %cst_320 : f32 to vector<16x16xf32>
    %805 = arith.mulf %803, %804 : vector<16x16xf32>
    %806 = arith.addf %805, %1 : vector<16x16xf32>
    %cst_321 = arith.constant dense<0xFF800000> : vector<16xf32>
    %807 = vector.multi_reduction <maximumf>, %806, %cst_321 [1] : vector<16x16xf32> to vector<16xf32>
    %808 = vector.shape_cast %807 : vector<16xf32> to vector<16x1xf32>
    %809 = vector.broadcast %808 : vector<16x1xf32> to vector<16x16xf32>
    %810 = arith.subf %806, %809 : vector<16x16xf32>
    %811 = math.exp %810 : vector<16x16xf32>
    %cst_322 = arith.constant dense<0.000000e+00> : vector<16xf32>
    %812 = vector.multi_reduction <add>, %811, %cst_322 [1] : vector<16x16xf32> to vector<16xf32>
    %813 = vector.shape_cast %812 : vector<16xf32> to vector<16x1xf32>
    %814 = tpu.reciprocal %813 {approx = true} : vector<16x1xf32> -> vector<16x1xf32>
    %815 = vector.broadcast %814 : vector<16x1xf32> to vector<16x16xf32>
    %816 = arith.mulf %811, %815 : vector<16x16xf32>
    %817 = arith.truncf %816 : vector<16x16xf32> to vector<16x16xbf16>
    %818 = vector.extract_strided_slice %779 {offsets = [0, 16], sizes = [16, 16], strides = [1, 1]} : vector<16x64xbf16> to vector<16x16xbf16>
    %cst_323 = arith.constant dense<0.000000e+00> : vector<16x16xf32>
    %819 = tpu.matmul %817, %818, %cst_323 {dimension_numbers = #tpu.dot_dimension_numbers<[1], [0], [0], [1], [0, 0, 1, 1], [], []>} : vector<16x16xbf16>, vector<16x16xbf16>, vector<16x16xf32> -> vector<16x16xf32>
    %820 = vector.extract_strided_slice %778 {offsets = [0, 32], sizes = [16, 16], strides = [1, 1]} : vector<16x64xbf16> to vector<16x16xbf16>
    %821 = vector.extract_strided_slice %781 {offsets = [32, 0], sizes = [16, 16], strides = [1, 1]} : vector<64x16xbf16> to vector<16x16xbf16>
    %cst_324 = arith.constant dense<0.000000e+00> : vector<16x16xf32>
    %822 = tpu.matmul %820, %821, %cst_324 {dimension_numbers = #tpu.dot_dimension_numbers<[1], [0], [0], [1], [0, 0, 1, 1], [], []>} : vector<16x16xbf16>, vector<16x16xbf16>, vector<16x16xf32> -> vector<16x16xf32>
    %cst_325 = arith.constant 2.500000e-01 : f32
    %823 = vector.broadcast %cst_325 : f32 to vector<16x16xf32>
    %824 = arith.mulf %822, %823 : vector<16x16xf32>
    %825 = arith.addf %824, %1 : vector<16x16xf32>
    %cst_326 = arith.constant dense<0xFF800000> : vector<16xf32>
    %826 = vector.multi_reduction <maximumf>, %825, %cst_326 [1] : vector<16x16xf32> to vector<16xf32>
    %827 = vector.shape_cast %826 : vector<16xf32> to vector<16x1xf32>
    %828 = vector.broadcast %827 : vector<16x1xf32> to vector<16x16xf32>
    %829 = arith.subf %825, %828 : vector<16x16xf32>
    %830 = math.exp %829 : vector<16x16xf32>
    %cst_327 = arith.constant dense<0.000000e+00> : vector<16xf32>
    %831 = vector.multi_reduction <add>, %830, %cst_327 [1] : vector<16x16xf32> to vector<16xf32>
    %832 = vector.shape_cast %831 : vector<16xf32> to vector<16x1xf32>
    %833 = tpu.reciprocal %832 {approx = true} : vector<16x1xf32> -> vector<16x1xf32>
    %834 = vector.broadcast %833 : vector<16x1xf32> to vector<16x16xf32>
    %835 = arith.mulf %830, %834 : vector<16x16xf32>
    %836 = arith.truncf %835 : vector<16x16xf32> to vector<16x16xbf16>
    %837 = vector.extract_strided_slice %779 {offsets = [0, 32], sizes = [16, 16], strides = [1, 1]} : vector<16x64xbf16> to vector<16x16xbf16>
    %cst_328 = arith.constant dense<0.000000e+00> : vector<16x16xf32>
    %838 = tpu.matmul %836, %837, %cst_328 {dimension_numbers = #tpu.dot_dimension_numbers<[1], [0], [0], [1], [0, 0, 1, 1], [], []>} : vector<16x16xbf16>, vector<16x16xbf16>, vector<16x16xf32> -> vector<16x16xf32>
    %839 = vector.extract_strided_slice %778 {offsets = [0, 48], sizes = [16, 16], strides = [1, 1]} : vector<16x64xbf16> to vector<16x16xbf16>
    %840 = vector.extract_strided_slice %781 {offsets = [48, 0], sizes = [16, 16], strides = [1, 1]} : vector<64x16xbf16> to vector<16x16xbf16>
    %cst_329 = arith.constant dense<0.000000e+00> : vector<16x16xf32>
    %841 = tpu.matmul %839, %840, %cst_329 {dimension_numbers = #tpu.dot_dimension_numbers<[1], [0], [0], [1], [0, 0, 1, 1], [], []>} : vector<16x16xbf16>, vector<16x16xbf16>, vector<16x16xf32> -> vector<16x16xf32>
    %cst_330 = arith.constant 2.500000e-01 : f32
    %842 = vector.broadcast %cst_330 : f32 to vector<16x16xf32>
    %843 = arith.mulf %841, %842 : vector<16x16xf32>
    %844 = arith.addf %843, %1 : vector<16x16xf32>
    %cst_331 = arith.constant dense<0xFF800000> : vector<16xf32>
    %845 = vector.multi_reduction <maximumf>, %844, %cst_331 [1] : vector<16x16xf32> to vector<16xf32>
    %846 = vector.shape_cast %845 : vector<16xf32> to vector<16x1xf32>
    %847 = vector.broadcast %846 : vector<16x1xf32> to vector<16x16xf32>
    %848 = arith.subf %844, %847 : vector<16x16xf32>
    %849 = math.exp %848 : vector<16x16xf32>
    %cst_332 = arith.constant dense<0.000000e+00> : vector<16xf32>
    %850 = vector.multi_reduction <add>, %849, %cst_332 [1] : vector<16x16xf32> to vector<16xf32>
    %851 = vector.shape_cast %850 : vector<16xf32> to vector<16x1xf32>
    %852 = tpu.reciprocal %851 {approx = true} : vector<16x1xf32> -> vector<16x1xf32>
    %853 = vector.broadcast %852 : vector<16x1xf32> to vector<16x16xf32>
    %854 = arith.mulf %849, %853 : vector<16x16xf32>
    %855 = arith.truncf %854 : vector<16x16xf32> to vector<16x16xbf16>
    %856 = vector.extract_strided_slice %779 {offsets = [0, 48], sizes = [16, 16], strides = [1, 1]} : vector<16x64xbf16> to vector<16x16xbf16>
    %cst_333 = arith.constant dense<0.000000e+00> : vector<16x16xf32>
    %857 = tpu.matmul %855, %856, %cst_333 {dimension_numbers = #tpu.dot_dimension_numbers<[1], [0], [0], [1], [0, 0, 1, 1], [], []>} : vector<16x16xbf16>, vector<16x16xbf16>, vector<16x16xf32> -> vector<16x16xf32>
    %858 = tpu.concatenate %800, %819, %838, %857 in 1 : vector<16x16xf32>, vector<16x16xf32>, vector<16x16xf32>, vector<16x16xf32> -> vector<16x64xf32>
    %859 = arith.truncf %858 : vector<16x64xf32> to vector<16x64xbf16>
    %cst_334 = arith.constant dense<0.000000e+00> : vector<16x128xf32>
    %860 = tpu.matmul %859, %726, %cst_334 {dimension_numbers = #tpu.dot_dimension_numbers<[1], [0], [0], [1], [0, 0, 1, 1], [], []>} : vector<16x64xbf16>, vector<64x128xbf16>, vector<16x128xf32> -> vector<16x128xf32>
    %861 = vector.broadcast %728 : vector<1x128xf32> to vector<16x128xf32>
    %862 = arith.addf %860, %861 : vector<16x128xf32>
    %863 = arith.addf %710, %862 : vector<16x128xf32>
    %cst_335 = arith.constant dense<0.000000e+00> : vector<16xf32>
    %864 = vector.multi_reduction <add>, %863, %cst_335 [1] : vector<16x128xf32> to vector<16xf32>
    %865 = vector.shape_cast %864 : vector<16xf32> to vector<16x1xf32>
    %cst_336 = arith.constant 1.280000e+02 : f32
    %866 = vector.broadcast %cst_336 : f32 to vector<16x1xf32>
    %867 = arith.divf %865, %866 : vector<16x1xf32>
    %868 = vector.broadcast %867 : vector<16x1xf32> to vector<16x128xf32>
    %869 = arith.subf %863, %868 : vector<16x128xf32>
    %870 = arith.mulf %869, %869 : vector<16x128xf32>
    %cst_337 = arith.constant dense<0.000000e+00> : vector<16xf32>
    %871 = vector.multi_reduction <add>, %870, %cst_337 [1] : vector<16x128xf32> to vector<16xf32>
    %872 = vector.shape_cast %871 : vector<16xf32> to vector<16x1xf32>
    %cst_338 = arith.constant 1.280000e+02 : f32
    %873 = vector.broadcast %cst_338 : f32 to vector<16x1xf32>
    %874 = arith.divf %872, %873 : vector<16x1xf32>
    %875 = vector.broadcast %867 : vector<16x1xf32> to vector<16x128xf32>
    %876 = arith.subf %863, %875 : vector<16x128xf32>
    %cst_339 = arith.constant 9.99999974E-6 : f32
    %877 = vector.broadcast %cst_339 : f32 to vector<16x1xf32>
    %878 = arith.addf %874, %877 : vector<16x1xf32>
    %879 = math.rsqrt %878 : vector<16x1xf32>
    %880 = vector.broadcast %879 : vector<16x1xf32> to vector<16x128xf32>
    %881 = arith.mulf %876, %880 : vector<16x128xf32>
    %882 = vector.broadcast %717 : vector<1x128xf32> to vector<16x128xf32>
    %883 = arith.mulf %881, %882 : vector<16x128xf32>
    %884 = vector.broadcast %718 : vector<1x128xf32> to vector<16x128xf32>
    %885 = arith.addf %883, %884 : vector<16x128xf32>
    %886 = arith.truncf %885 : vector<16x128xf32> to vector<16x128xbf16>
    %cst_340 = arith.constant dense<0.000000e+00> : vector<16x64xf32>
    %887 = tpu.matmul %886, %730, %cst_340 {dimension_numbers = #tpu.dot_dimension_numbers<[1], [0], [0], [1], [0, 0, 1, 1], [], []>} : vector<16x128xbf16>, vector<128x64xbf16>, vector<16x64xf32> -> vector<16x64xf32>
    %888 = vector.broadcast %732 : vector<1x64xf32> to vector<16x64xf32>
    %889 = arith.addf %887, %888 : vector<16x64xf32>
    %890 = arith.truncf %376 : vector<16x128xf32> to vector<16x128xbf16>
    %cst_341 = arith.constant dense<0.000000e+00> : vector<16x128xf32>
    %891 = tpu.matmul %890, %734, %cst_341 {dimension_numbers = #tpu.dot_dimension_numbers<[1], [0], [0], [1], [0, 0, 1, 1], [], []>} : vector<16x128xbf16>, vector<128x128xbf16>, vector<16x128xf32> -> vector<16x128xf32>
    %892 = vector.broadcast %736 : vector<1x128xf32> to vector<16x128xf32>
    %893 = arith.addf %891, %892 : vector<16x128xf32>
    %894 = vector.extract_strided_slice %893 {offsets = [0, 0], sizes = [16, 64], strides = [1, 1]} : vector<16x128xf32> to vector<16x64xf32>
    %895 = vector.extract_strided_slice %893 {offsets = [0, 64], sizes = [16, 64], strides = [1, 1]} : vector<16x128xf32> to vector<16x64xf32>
    %896 = arith.truncf %889 : vector<16x64xf32> to vector<16x64xbf16>
    %897 = arith.truncf %895 : vector<16x64xf32> to vector<16x64xbf16>
    %898 = tpu.transpose %894, [1, 0] : vector<16x64xf32> -> vector<64x16xf32>
    %899 = arith.truncf %898 : vector<64x16xf32> to vector<64x16xbf16>
    %900 = vector.extract_strided_slice %896 {offsets = [0, 0], sizes = [16, 16], strides = [1, 1]} : vector<16x64xbf16> to vector<16x16xbf16>
    %901 = vector.extract_strided_slice %899 {offsets = [0, 0], sizes = [16, 16], strides = [1, 1]} : vector<64x16xbf16> to vector<16x16xbf16>
    %cst_342 = arith.constant dense<0.000000e+00> : vector<16x16xf32>
    %902 = tpu.matmul %900, %901, %cst_342 {dimension_numbers = #tpu.dot_dimension_numbers<[1], [0], [0], [1], [0, 0, 1, 1], [], []>} : vector<16x16xbf16>, vector<16x16xbf16>, vector<16x16xf32> -> vector<16x16xf32>
    %cst_343 = arith.constant 2.500000e-01 : f32
    %903 = vector.broadcast %cst_343 : f32 to vector<16x16xf32>
    %904 = arith.mulf %902, %903 : vector<16x16xf32>
    %905 = arith.addf %904, %2 : vector<16x16xf32>
    %cst_344 = arith.constant dense<0xFF800000> : vector<16xf32>
    %906 = vector.multi_reduction <maximumf>, %905, %cst_344 [1] : vector<16x16xf32> to vector<16xf32>
    %907 = vector.shape_cast %906 : vector<16xf32> to vector<16x1xf32>
    %908 = vector.broadcast %907 : vector<16x1xf32> to vector<16x16xf32>
    %909 = arith.subf %905, %908 : vector<16x16xf32>
    %910 = math.exp %909 : vector<16x16xf32>
    %cst_345 = arith.constant dense<0.000000e+00> : vector<16xf32>
    %911 = vector.multi_reduction <add>, %910, %cst_345 [1] : vector<16x16xf32> to vector<16xf32>
    %912 = vector.shape_cast %911 : vector<16xf32> to vector<16x1xf32>
    %913 = tpu.reciprocal %912 {approx = true} : vector<16x1xf32> -> vector<16x1xf32>
    %914 = vector.broadcast %913 : vector<16x1xf32> to vector<16x16xf32>
    %915 = arith.mulf %910, %914 : vector<16x16xf32>
    %916 = arith.truncf %915 : vector<16x16xf32> to vector<16x16xbf16>
    %917 = vector.extract_strided_slice %897 {offsets = [0, 0], sizes = [16, 16], strides = [1, 1]} : vector<16x64xbf16> to vector<16x16xbf16>
    %cst_346 = arith.constant dense<0.000000e+00> : vector<16x16xf32>
    %918 = tpu.matmul %916, %917, %cst_346 {dimension_numbers = #tpu.dot_dimension_numbers<[1], [0], [0], [1], [0, 0, 1, 1], [], []>} : vector<16x16xbf16>, vector<16x16xbf16>, vector<16x16xf32> -> vector<16x16xf32>
    %919 = vector.extract_strided_slice %896 {offsets = [0, 16], sizes = [16, 16], strides = [1, 1]} : vector<16x64xbf16> to vector<16x16xbf16>
    %920 = vector.extract_strided_slice %899 {offsets = [16, 0], sizes = [16, 16], strides = [1, 1]} : vector<64x16xbf16> to vector<16x16xbf16>
    %cst_347 = arith.constant dense<0.000000e+00> : vector<16x16xf32>
    %921 = tpu.matmul %919, %920, %cst_347 {dimension_numbers = #tpu.dot_dimension_numbers<[1], [0], [0], [1], [0, 0, 1, 1], [], []>} : vector<16x16xbf16>, vector<16x16xbf16>, vector<16x16xf32> -> vector<16x16xf32>
    %cst_348 = arith.constant 2.500000e-01 : f32
    %922 = vector.broadcast %cst_348 : f32 to vector<16x16xf32>
    %923 = arith.mulf %921, %922 : vector<16x16xf32>
    %924 = arith.addf %923, %2 : vector<16x16xf32>
    %cst_349 = arith.constant dense<0xFF800000> : vector<16xf32>
    %925 = vector.multi_reduction <maximumf>, %924, %cst_349 [1] : vector<16x16xf32> to vector<16xf32>
    %926 = vector.shape_cast %925 : vector<16xf32> to vector<16x1xf32>
    %927 = vector.broadcast %926 : vector<16x1xf32> to vector<16x16xf32>
    %928 = arith.subf %924, %927 : vector<16x16xf32>
    %929 = math.exp %928 : vector<16x16xf32>
    %cst_350 = arith.constant dense<0.000000e+00> : vector<16xf32>
    %930 = vector.multi_reduction <add>, %929, %cst_350 [1] : vector<16x16xf32> to vector<16xf32>
    %931 = vector.shape_cast %930 : vector<16xf32> to vector<16x1xf32>
    %932 = tpu.reciprocal %931 {approx = true} : vector<16x1xf32> -> vector<16x1xf32>
    %933 = vector.broadcast %932 : vector<16x1xf32> to vector<16x16xf32>
    %934 = arith.mulf %929, %933 : vector<16x16xf32>
    %935 = arith.truncf %934 : vector<16x16xf32> to vector<16x16xbf16>
    %936 = vector.extract_strided_slice %897 {offsets = [0, 16], sizes = [16, 16], strides = [1, 1]} : vector<16x64xbf16> to vector<16x16xbf16>
    %cst_351 = arith.constant dense<0.000000e+00> : vector<16x16xf32>
    %937 = tpu.matmul %935, %936, %cst_351 {dimension_numbers = #tpu.dot_dimension_numbers<[1], [0], [0], [1], [0, 0, 1, 1], [], []>} : vector<16x16xbf16>, vector<16x16xbf16>, vector<16x16xf32> -> vector<16x16xf32>
    %938 = vector.extract_strided_slice %896 {offsets = [0, 32], sizes = [16, 16], strides = [1, 1]} : vector<16x64xbf16> to vector<16x16xbf16>
    %939 = vector.extract_strided_slice %899 {offsets = [32, 0], sizes = [16, 16], strides = [1, 1]} : vector<64x16xbf16> to vector<16x16xbf16>
    %cst_352 = arith.constant dense<0.000000e+00> : vector<16x16xf32>
    %940 = tpu.matmul %938, %939, %cst_352 {dimension_numbers = #tpu.dot_dimension_numbers<[1], [0], [0], [1], [0, 0, 1, 1], [], []>} : vector<16x16xbf16>, vector<16x16xbf16>, vector<16x16xf32> -> vector<16x16xf32>
    %cst_353 = arith.constant 2.500000e-01 : f32
    %941 = vector.broadcast %cst_353 : f32 to vector<16x16xf32>
    %942 = arith.mulf %940, %941 : vector<16x16xf32>
    %943 = arith.addf %942, %2 : vector<16x16xf32>
    %cst_354 = arith.constant dense<0xFF800000> : vector<16xf32>
    %944 = vector.multi_reduction <maximumf>, %943, %cst_354 [1] : vector<16x16xf32> to vector<16xf32>
    %945 = vector.shape_cast %944 : vector<16xf32> to vector<16x1xf32>
    %946 = vector.broadcast %945 : vector<16x1xf32> to vector<16x16xf32>
    %947 = arith.subf %943, %946 : vector<16x16xf32>
    %948 = math.exp %947 : vector<16x16xf32>
    %cst_355 = arith.constant dense<0.000000e+00> : vector<16xf32>
    %949 = vector.multi_reduction <add>, %948, %cst_355 [1] : vector<16x16xf32> to vector<16xf32>
    %950 = vector.shape_cast %949 : vector<16xf32> to vector<16x1xf32>
    %951 = tpu.reciprocal %950 {approx = true} : vector<16x1xf32> -> vector<16x1xf32>
    %952 = vector.broadcast %951 : vector<16x1xf32> to vector<16x16xf32>
    %953 = arith.mulf %948, %952 : vector<16x16xf32>
    %954 = arith.truncf %953 : vector<16x16xf32> to vector<16x16xbf16>
    %955 = vector.extract_strided_slice %897 {offsets = [0, 32], sizes = [16, 16], strides = [1, 1]} : vector<16x64xbf16> to vector<16x16xbf16>
    %cst_356 = arith.constant dense<0.000000e+00> : vector<16x16xf32>
    %956 = tpu.matmul %954, %955, %cst_356 {dimension_numbers = #tpu.dot_dimension_numbers<[1], [0], [0], [1], [0, 0, 1, 1], [], []>} : vector<16x16xbf16>, vector<16x16xbf16>, vector<16x16xf32> -> vector<16x16xf32>
    %957 = vector.extract_strided_slice %896 {offsets = [0, 48], sizes = [16, 16], strides = [1, 1]} : vector<16x64xbf16> to vector<16x16xbf16>
    %958 = vector.extract_strided_slice %899 {offsets = [48, 0], sizes = [16, 16], strides = [1, 1]} : vector<64x16xbf16> to vector<16x16xbf16>
    %cst_357 = arith.constant dense<0.000000e+00> : vector<16x16xf32>
    %959 = tpu.matmul %957, %958, %cst_357 {dimension_numbers = #tpu.dot_dimension_numbers<[1], [0], [0], [1], [0, 0, 1, 1], [], []>} : vector<16x16xbf16>, vector<16x16xbf16>, vector<16x16xf32> -> vector<16x16xf32>
    %cst_358 = arith.constant 2.500000e-01 : f32
    %960 = vector.broadcast %cst_358 : f32 to vector<16x16xf32>
    %961 = arith.mulf %959, %960 : vector<16x16xf32>
    %962 = arith.addf %961, %2 : vector<16x16xf32>
    %cst_359 = arith.constant dense<0xFF800000> : vector<16xf32>
    %963 = vector.multi_reduction <maximumf>, %962, %cst_359 [1] : vector<16x16xf32> to vector<16xf32>
    %964 = vector.shape_cast %963 : vector<16xf32> to vector<16x1xf32>
    %965 = vector.broadcast %964 : vector<16x1xf32> to vector<16x16xf32>
    %966 = arith.subf %962, %965 : vector<16x16xf32>
    %967 = math.exp %966 : vector<16x16xf32>
    %cst_360 = arith.constant dense<0.000000e+00> : vector<16xf32>
    %968 = vector.multi_reduction <add>, %967, %cst_360 [1] : vector<16x16xf32> to vector<16xf32>
    %969 = vector.shape_cast %968 : vector<16xf32> to vector<16x1xf32>
    %970 = tpu.reciprocal %969 {approx = true} : vector<16x1xf32> -> vector<16x1xf32>
    %971 = vector.broadcast %970 : vector<16x1xf32> to vector<16x16xf32>
    %972 = arith.mulf %967, %971 : vector<16x16xf32>
    %973 = arith.truncf %972 : vector<16x16xf32> to vector<16x16xbf16>
    %974 = vector.extract_strided_slice %897 {offsets = [0, 48], sizes = [16, 16], strides = [1, 1]} : vector<16x64xbf16> to vector<16x16xbf16>
    %cst_361 = arith.constant dense<0.000000e+00> : vector<16x16xf32>
    %975 = tpu.matmul %973, %974, %cst_361 {dimension_numbers = #tpu.dot_dimension_numbers<[1], [0], [0], [1], [0, 0, 1, 1], [], []>} : vector<16x16xbf16>, vector<16x16xbf16>, vector<16x16xf32> -> vector<16x16xf32>
    %976 = tpu.concatenate %918, %937, %956, %975 in 1 : vector<16x16xf32>, vector<16x16xf32>, vector<16x16xf32>, vector<16x16xf32> -> vector<16x64xf32>
    %977 = arith.truncf %976 : vector<16x64xf32> to vector<16x64xbf16>
    %cst_362 = arith.constant dense<0.000000e+00> : vector<16x128xf32>
    %978 = tpu.matmul %977, %738, %cst_362 {dimension_numbers = #tpu.dot_dimension_numbers<[1], [0], [0], [1], [0, 0, 1, 1], [], []>} : vector<16x64xbf16>, vector<64x128xbf16>, vector<16x128xf32> -> vector<16x128xf32>
    %979 = vector.broadcast %740 : vector<1x128xf32> to vector<16x128xf32>
    %980 = arith.addf %978, %979 : vector<16x128xf32>
    %981 = arith.addf %863, %980 : vector<16x128xf32>
    %cst_363 = arith.constant dense<0.000000e+00> : vector<16xf32>
    %982 = vector.multi_reduction <add>, %981, %cst_363 [1] : vector<16x128xf32> to vector<16xf32>
    %983 = vector.shape_cast %982 : vector<16xf32> to vector<16x1xf32>
    %cst_364 = arith.constant 1.280000e+02 : f32
    %984 = vector.broadcast %cst_364 : f32 to vector<16x1xf32>
    %985 = arith.divf %983, %984 : vector<16x1xf32>
    %986 = vector.broadcast %985 : vector<16x1xf32> to vector<16x128xf32>
    %987 = arith.subf %981, %986 : vector<16x128xf32>
    %988 = arith.mulf %987, %987 : vector<16x128xf32>
    %cst_365 = arith.constant dense<0.000000e+00> : vector<16xf32>
    %989 = vector.multi_reduction <add>, %988, %cst_365 [1] : vector<16x128xf32> to vector<16xf32>
    %990 = vector.shape_cast %989 : vector<16xf32> to vector<16x1xf32>
    %cst_366 = arith.constant 1.280000e+02 : f32
    %991 = vector.broadcast %cst_366 : f32 to vector<16x1xf32>
    %992 = arith.divf %990, %991 : vector<16x1xf32>
    %993 = vector.broadcast %985 : vector<16x1xf32> to vector<16x128xf32>
    %994 = arith.subf %981, %993 : vector<16x128xf32>
    %cst_367 = arith.constant 9.99999974E-6 : f32
    %995 = vector.broadcast %cst_367 : f32 to vector<16x1xf32>
    %996 = arith.addf %992, %995 : vector<16x1xf32>
    %997 = math.rsqrt %996 : vector<16x1xf32>
    %998 = vector.broadcast %997 : vector<16x1xf32> to vector<16x128xf32>
    %999 = arith.mulf %994, %998 : vector<16x128xf32>
    %1000 = vector.broadcast %719 : vector<1x128xf32> to vector<16x128xf32>
    %1001 = arith.mulf %999, %1000 : vector<16x128xf32>
    %1002 = vector.broadcast %720 : vector<1x128xf32> to vector<16x128xf32>
    %1003 = arith.addf %1001, %1002 : vector<16x128xf32>
    %1004 = arith.truncf %1003 : vector<16x128xf32> to vector<16x128xbf16>
    %cst_368 = arith.constant dense<0.000000e+00> : vector<16x256xf32>
    %1005 = tpu.matmul %1004, %742, %cst_368 {dimension_numbers = #tpu.dot_dimension_numbers<[1], [0], [0], [1], [0, 0, 1, 1], [], []>} : vector<16x128xbf16>, vector<128x256xbf16>, vector<16x256xf32> -> vector<16x256xf32>
    %1006 = vector.broadcast %744 : vector<1x256xf32> to vector<16x256xf32>
    %1007 = arith.addf %1005, %1006 : vector<16x256xf32>
    %cst_369 = arith.constant 0.000000e+00 : f32
    %1008 = vector.broadcast %cst_369 : f32 to vector<16x256xf32>
    %1009 = arith.maximumf %1007, %1008 : vector<16x256xf32>
    %1010 = arith.truncf %1009 : vector<16x256xf32> to vector<16x256xbf16>
    %cst_370 = arith.constant dense<0.000000e+00> : vector<16x128xf32>
    %1011 = tpu.matmul %1010, %746, %cst_370 {dimension_numbers = #tpu.dot_dimension_numbers<[1], [0], [0], [1], [0, 0, 1, 1], [], []>} : vector<16x256xbf16>, vector<256x128xbf16>, vector<16x128xf32> -> vector<16x128xf32>
    %1012 = vector.broadcast %748 : vector<1x128xf32> to vector<16x128xf32>
    %1013 = arith.addf %1011, %1012 : vector<16x128xf32>
    %1014 = arith.addf %981, %1013 : vector<16x128xf32>
    %c0_371 = arith.constant 0 : index
    %c0_372 = arith.constant 0 : index
    %1015 = vector.load %arg37[%c0_371, %c0_372] : memref<16x128xf32, #tpu.memory_space<vmem>>, vector<16x128xf32>
    tpu.vector_store %arg37[%c0_371, %c0_372], %1014 {strides = array<i32>} : memref<16x128xf32, #tpu.memory_space<vmem>>, vector<16x128xf32>,
    return
  }
}

</mosaic_0001>

<bundles_post_ra>
// kernel: eq.22
= control target key start
LH: loop header
LB: loop body
LE: loop exit
PB: predicated region body
PF: predicated region fallthrough
CT: control target
= control target key end

     0   :  { %vm7_vm0 = vcmask 64512   ;;  %vm13_vm1 = vcmask 130112   ;;  %s39_s0 = inlined_call_operand.vmem [shape: s32[2,8], index: 0, kind: input, shape index: {}]   ;;  %s40_s1 = inlined_call_operand.vmem [shape: s32[16], index: 1, kind: output, shape index: {}]  }
   0x1   :  { %v4_v0 = vld [vmem:[%s39_s0] sm:$0x3]  ;;  %s22_s0 = smov 8  }
   0x2   :  { %5 = vst [vmem:[#allocation1] sm:$0x3] %v4_v0 }
   0x9   :  { %v10_v1 = vld [vmem:[#allocation1 + $0x1] sm:$0x1]   ;;  %v6_v2 = vld [vmem:[#allocation1] sm:$0x1]  }
   0xa   :  { %11 = vrot.lane.b32.xlu0 %v10_v1, %s22_s0  ;;  %8 = vst.msk [vmem:[#allocation0] sm:$0x1] %vm7_vm0, %v6_v2  }
  0x7c   :  { %v12_v3 = vpop.permute.xlu0 %11  }
  0x7d   :  { %14 = vst.msk [vmem:[#allocation0] sm:$0x1] %vm13_vm1, %v12_v3  }
  0x84   :  { %v18_v4 = vld [vmem:[#allocation0] sm:$0x1] }
  0x85   :  { %20 = vst [vmem:[%s40_s1] sm:$0x1] %v18_v4 }

// kernel: tile.28
= control target key start
LH: loop header
LB: loop body
LE: loop exit
PB: predicated region body
PF: predicated region fallthrough
CT: control target
= control target key end

     0   :  { %s154_s0 = inlined_call_operand.vmem [shape: f32[8,8], index: 0, kind: input, shape index: {}]   ;;  %s155_s1 = inlined_call_operand.vmem [shape: f32[2,8,2,8], index: 1, kind: output, shape index: {}]  }
   0x1   :  { %v4_v0 = vld [vmem:[%s154_s0] ss:$0 sm:$0xff]  ;;  %v51_v1 = vld [vmem:[%s154_s0 + $0x1] ss:$0 sm:$0xff]  ;;  %v54_v2 = vld [vmem:[%s154_s0 + $0x2] ss:$0 sm:$0xff] }
   0x2   :  { %5 = vst [vmem:[%s155_s1] sm:$0x3] %v4_v0  ;;  %50 = vst [vmem:[%s155_s1 + $0x10] sm:$0x3] %v4_v0  ;;  %v57_v3 = vld [vmem:[%s154_s0 + $0x3] ss:$0 sm:$0xff] }
   0x3   :  { %52 = vst [vmem:[%s155_s1 + $0x2] sm:$0x3] %v51_v1  ;;  %53 = vst [vmem:[%s155_s1 + $0x12] sm:$0x3] %v51_v1  ;;  %v60_v4 = vld [vmem:[%s154_s0 + $0x4] ss:$0 sm:$0xff] }
   0x4   :  { %55 = vst [vmem:[%s155_s1 + $0x4] sm:$0x3] %v54_v2  ;;  %56 = vst [vmem:[%s155_s1 + $0x14] sm:$0x3] %v54_v2  ;;  %v63_v5 = vld [vmem:[%s154_s0 + $0x5] ss:$0 sm:$0xff] }
   0x5   :  { %58 = vst [vmem:[%s155_s1 + $0x6] sm:$0x3] %v57_v3  ;;  %59 = vst [vmem:[%s155_s1 + $0x16] sm:$0x3] %v57_v3  ;;  %v66_v6 = vld [vmem:[%s154_s0 + $0x6] ss:$0 sm:$0xff] }
   0x6   :  { %61 = vst [vmem:[%s155_s1 + $0x8] sm:$0x3] %v60_v4  ;;  %62 = vst [vmem:[%s155_s1 + $0x18] sm:$0x3] %v60_v4  ;;  %v69_v7 = vld [vmem:[%s154_s0 + $0x7] ss:$0 sm:$0xff] }
   0x7   :  { %64 = vst [vmem:[%s155_s1 + $0xa] sm:$0x3] %v63_v5  ;;  %65 = vst [vmem:[%s155_s1 + $0x1a] sm:$0x3] %v63_v5 }
   0x8   :  { %67 = vst [vmem:[%s155_s1 + $0xc] sm:$0x3] %v66_v6  ;;  %68 = vst [vmem:[%s155_s1 + $0x1c] sm:$0x3] %v66_v6 }
   0x9   :  { %70 = vst [vmem:[%s155_s1 + $0xe] sm:$0x3] %v69_v7  ;;  %71 = vst [vmem:[%s155_s1 + $0x1e] sm:$0x3] %v69_v7 }

// kernel: tile.29
= control target key start
LH: loop header
LB: loop body
LE: loop exit
PB: predicated region body
PF: predicated region fallthrough
CT: control target
= control target key end

     0   :  { %vm82_vm0 = vcmask 1047556   ;;  %vm84_vm1 = vcmask 64512   ;;  %vm103_vm2 = vcmask 130112   ;;  %s225_s0 = inlined_call_operand.vmem [shape: f32[2,8,2,8], index: 0, kind: input, shape index: {}]   ;;  %s226_s1 = inlined_call_operand.vmem [shape: f32[16,16], index: 1, kind: output, shape index: {}]  }
   0x1   :  { %v138_v0 = vld [vmem:[%s225_s0 + $0xe] sm:$0x3]  ;;  %v139_v1 = vld [vmem:[%s225_s0 + $0xc] sm:$0x3]  ;;  %v140_v2 = vld [vmem:[%s225_s0 + $0xa] sm:$0x3] }
   0x2   :  { %48 = vst [vmem:[#allocation0 + $0x38] sm:$0x3] %v138_v0  ;;  %53 = vst [vmem:[#allocation0 + $0x30] sm:$0x3] %v139_v1  ;;  %v141_v3 = vld [vmem:[%s225_s0 + $0x8] sm:$0x3] }
   0x3   :  { %58 = vst [vmem:[#allocation0 + $0x28] sm:$0x3] %v140_v2  ;;  %v142_v4 = vld [vmem:[%s225_s0 + $0x6] sm:$0x3]  ;;  %v143_v5 = vld [vmem:[%s225_s0 + $0x4] sm:$0x3] }
   0x4   :  { %63 = vst [vmem:[#allocation0 + $0x20] sm:$0x3] %v141_v3  ;;  %68 = vst [vmem:[#allocation0 + $0x18] sm:$0x3] %v142_v4  ;;  %v144_v6 = vld [vmem:[%s225_s0 + $0x2] sm:$0x3] }
   0x5   :  { %73 = vst [vmem:[#allocation0 + $0x10] sm:$0x3] %v143_v5  ;;  %v78_v7 = vld [vmem:[%s225_s0] sm:$0x3]  ;;  %77 = vst [vmem:[#allocation0 + $0x8] sm:$0x3] %v144_v6 }
   0x6   :  { %79 = vst [vmem:[#allocation0] sm:$0x3] %v78_v7  ;;  %v130_v8 = vld [vmem:[%s225_s0 + $0x1e] sm:$0x3]  ;;  %v131_v9 = vld [vmem:[%s225_s0 + $0x1c] sm:$0x3] }
   0x7   :  { %v132_v10 = vld [vmem:[%s225_s0 + $0x1a] sm:$0x3]  ;;  %8 = vst [vmem:[#allocation0 + $0x78] sm:$0x3] %v130_v8  ;;  %13 = vst [vmem:[#allocation0 + $0x70] sm:$0x3] %v131_v9 }
   0x8   :  { %18 = vst [vmem:[#allocation0 + $0x68] sm:$0x3] %v132_v10  ;;  %v133_v11 = vld [vmem:[%s225_s0 + $0x18] sm:$0x3]  ;;  %v134_v12 = vld [vmem:[%s225_s0 + $0x16] sm:$0x3] }
   0x9   :  { %v135_v13 = vld [vmem:[%s225_s0 + $0x14] sm:$0x3]  ;;  %23 = vst [vmem:[#allocation0 + $0x60] sm:$0x3] %v133_v11  ;;  %28 = vst [vmem:[#allocation0 + $0x58] sm:$0x3] %v134_v12 }
   0xa   :  { %33 = vst [vmem:[#allocation0 + $0x50] sm:$0x3] %v135_v13  ;;  %v136_v14 = vld [vmem:[%s225_s0 + $0x12] sm:$0x3]  ;;  %v137_v15 = vld [vmem:[%s225_s0 + $0x10] sm:$0x3] }
   0xb   :  { %38 = vst [vmem:[#allocation0 + $0x48] sm:$0x3] %v136_v14  ;;  %43 = vst [vmem:[#allocation0 + $0x40] sm:$0x3] %v137_v15  ;;  %s148_s0 = smov 8  }
   0xc   :  { %v98_v16 = vld [vmem:[#allocation0 + $0x1] ss:$8 sm:$0xf0]   ;;  %v81_v17 = vld [vmem:[#allocation0] ss:$8 sm:$0xf0]  }
   0xd   :  { %v96_v18 = vld [vmem:[#allocation0 + $0x1] ss:$8 sm:$0xf]   ;;  %v80_v19 = vld [vmem:[#allocation0] ss:$8 sm:$0xf]  }
   0xe   :  { %v100_v20 = vsel %vm82_vm0, %v98_v16, %v96_v18  ;;  %v83_v21 = vsel %vm82_vm0, %v81_v17, %v80_v19 }
   0xf   :  { %101 = vrot.lane.b32.xlu0 %v100_v20, %s148_s0  ;;  %85 = vst.msk [vmem:[%s226_s1] sm:$0xff] %vm84_vm1, %v83_v21  }
  0x10   :  { %v108_v22 = vld [vmem:[#allocation0 + $0x41] ss:$8 sm:$0xf0]   ;;  %v89_v23 = vld [vmem:[#allocation0 + $0x40] ss:$8 sm:$0xf0]  }
  0x12   :  { %v106_v24 = vld [vmem:[#allocation0 + $0x41] ss:$8 sm:$0xf]   ;;  %v87_v25 = vld [vmem:[#allocation0 + $0x40] ss:$8 sm:$0xf]  }
  0x13   :  { %v110_v26 = vsel %vm82_vm0, %v108_v22, %v106_v24  ;;  %v91_v27 = vsel %vm82_vm0, %v89_v23, %v87_v25 }
  0x14   :  { %145 = vst.msk [vmem:[%s226_s1 + $0x8] sm:$0xff] %vm84_vm1, %v91_v27   ;;  %111 = vrot.lane.b32.xlu0 %v110_v26, %s148_s0 }
  0x81   :  { %v102_v28 = vpop.permute.xlu0 %101  }
  0x82   :  { %104 = vst.msk [vmem:[%s226_s1] sm:$0xff] %vm103_vm2, %v102_v28  }
  0x86   :  { %v112_v29 = vpop.permute.xlu0 %111  }
  0x87   :  { %146 = vst.msk [vmem:[%s226_s1 + $0x8] sm:$0xff] %vm103_vm2, %v112_v29  }

// kernel: transformer_forward.1
= control target key start
LH: loop header
LB: loop body
LE: loop exit
PB: predicated region body
PF: predicated region fallthrough
CT: control target
= control target key end

     0   :  { %s9260_s6 = smov 1   ;;  %s9261_s10 = smov 2   ;;  %s10737_s0 = inlined_call_operand.smem [shape: u32[38], index: -1, kind: input, shape index: {}] }
   0x1   :  { %s9332_s5 = sld [smem:[%s10737_s0]]   ;;  %s9262_s14 = smov 3  }
   0x2   :  { %s9337_s9 = sld [smem:[%s10737_s0 + %s9260_s6]]   ;;  %s9263_s18 = smov 4  }
   0x3   :  { %s9342_s13 = sld [smem:[%s10737_s0 + %s9261_s10]]   ;;  %s9264_s22 = smov 5  }
   0x4   :  { %s9347_s17 = sld [smem:[%s10737_s0 + %s9262_s14]]   ;;  %s9265_s26 = smov 6  }
   0x5   :  { %s9352_s21 = sld [smem:[%s10737_s0 + %s9263_s18]]   ;;  %s9266_s30 = smov 7  }
   0x6   :  { %s9357_s25 = sld [smem:[%s10737_s0 + %s9264_s22]]   ;;  %s9267_s4 = smov 8  }
   0x7   :  { %s9362_s29 = sld [smem:[%s10737_s0 + %s9265_s26]]   ;;  %s9268_s10 = smov 9  }
   0x8   :  { %10757 = sst [smem:[#allocation24_spill]] %s9337_s9  ;;  %s9269_s15 = smov 10  }
   0x9   :  { %s9367_s3 = sld [smem:[%s10737_s0 + %s9266_s30]]   ;;  %s9270_s20 = smov 11  }
   0xa   :  { %10758 = sst [smem:[#allocation25_spill]] %s9347_s17  ;;  %s9271_s26 = smov 12  }
   0xb   :  { %10759 = sst [smem:[#allocation26_spill]] %s9352_s21  ;;  %s9272_s1 = smov 13  }
   0xc   :  { %10760 = sst [smem:[#allocation27_spill]] %s9357_s25  ;;  %s9273_s7 = smov 14  }
   0xd   :  { %10761 = sst [smem:[#allocation28_spill]] %s9362_s29  ;;  %s9275_s22 = smov 16  }
   0xe   :  { %s9372_s8 = sld [smem:[%s10737_s0 + %s9267_s4]]   ;;  %s9276_s28 = smov 17  }
   0xf   :  { %s9377_s14 = sld [smem:[%s10737_s0 + %s9268_s10]]  }
  0x10   :  { %s9382_s19 = sld [smem:[%s10737_s0 + %s9269_s15]]   ;;  %s9274_s15 = smov 15  }
  0x11   :  { %s9387_s24 = sld [smem:[%s10737_s0 + %s9270_s20]]  }
  0x12   :  { %s9392_s30 = sld [smem:[%s10737_s0 + %s9271_s26]]  }
  0x13   :  { %s9397_s6 = sld [smem:[%s10737_s0 + %s9272_s1]]  }
  0x14   :  { %s9402_s12 = sld [smem:[%s10737_s0 + %s9273_s7]]   ;;  %s9277_s7 = smov 18  }
  0x15   :  { %10762 = sst [smem:[#allocation29_spill]] %s9377_s14 }
  0x16   :  { %s9407_s20 = sld [smem:[%s10737_s0 + %s9274_s15]]   ;;  %s9278_s15 = smov 19  }
  0x17   :  { %s9412_s27 = sld [smem:[%s10737_s0 + %s9275_s22]]   ;;  %s9279_s22 = smov 20  }
  0x18   :  { %s9417_s4 = sld [smem:[%s10737_s0 + %s9276_s28]]   ;;  %s9280_s28 = smov 21  }
  0x19   :  { %s9422_s29 = sld [smem:[%s10737_s0 + %s9277_s7]]   ;;  %s9281_s7 = smov 22  }
  0x1a   :  { %10763 = sst [smem:[#allocation30_spill]] %s9402_s12 }
  0x1b   :  { %s9427_s25 = sld [smem:[%s10737_s0 + %s9278_s15]]   ;;  %s9282_s15 = smov 23  }
  0x1c   :  { %10764 = sst [smem:[#allocation31_spill]] %s9407_s20 }
  0x1d   :  { %10765 = sst [smem:[#allocation32_spill]] %s9412_s27 }
  0x1e   :  { %10766 = sst [smem:[#allocation33_spill]] %s9417_s4 }
  0x1f   :  { %10767 = sst [smem:[#allocation34_spill]] %s9422_s29 }
  0x20   :  { %s9432_s17 = sld [smem:[%s10737_s0 + %s9279_s22]]   ;;  %s9283_s22 = smov 24  }
  0x21   :  { %10768 = sst [smem:[#allocation35_spill]] %s9427_s25 }
  0x22   :  { %s9437_s14 = sld [smem:[%s10737_s0 + %s9280_s28]]   ;;  %s9284_s28 = smov 25  }
  0x23   :  { %s9442_s9 = sld [smem:[%s10737_s0 + %s9281_s7]]   ;;  %s9285_s7 = smov 26  }
  0x24   :  { %s9447_s29 = sld [smem:[%s10737_s0 + %s9282_s15]]   ;;  %s9286_s15 = smov 27  }
  0x25   :  { %s9452_s25 = sld [smem:[%s10737_s0 + %s9283_s22]]   ;;  %s9287_s22 = smov 28  }
  0x26   :  { %s9472_s4 = sld [smem:[%s10737_s0 + %s9287_s22]]   ;;  %s9291_s22 = smov 32  }
  0x27   :  { %s9492_s20 = sld [smem:[%s10737_s0 + %s9291_s22]]   ;;  %s9295_s22 = smov 36  }
  0x28   :  { %10769 = sst [smem:[#allocation36_spill]] %s9437_s14 }
  0x29   :  { %10770 = sst [smem:[#allocation37_spill]] %s9442_s9 }
  0x2a   :  { %10771 = sst [smem:[#allocation38_spill]] %s9447_s29 }
  0x2b   :  { %s9457_s14 = sld [smem:[%s10737_s0 + %s9284_s28]]   ;;  %s9288_s28 = smov 29  }
  0x2c   :  { %s9462_s9 = sld [smem:[%s10737_s0 + %s9285_s7]]   ;;  %s9289_s7 = smov 30  }
  0x2d   :  { %s9467_s29 = sld [smem:[%s10737_s0 + %s9286_s15]]   ;;  %s9290_s15 = smov 31  }
  0x2e   :  { %s9482_s27 = sld [smem:[%s10737_s0 + %s9289_s7]]   ;;  %s9293_s7 = smov 34  }
  0x2f   :  { %s9502_s21 = sld [smem:[%s10737_s0 + %s9293_s7]]  }
  0x30   :  { %s9512_s12 = sld [smem:[%s10737_s0 + %s9295_s22]]  }
  0x31   :  { %10772 = sst [smem:[#allocation39_spill]] %s9457_s14 }
  0x32   :  { %s9477_s14 = sld [smem:[%s10737_s0 + %s9288_s28]]   ;;  %s9292_s28 = smov 33  }
  0x33   :  { %10773 = sst [smem:[#allocation40_spill]] %s9467_s29 }
  0x34   :  { %s9487_s29 = sld [smem:[%s10737_s0 + %s9290_s15]]   ;;  %s9294_s15 = smov 35  }
  0x38   :  { %10774 = sst [smem:[#allocation41_spill]] %s9477_s14 }
  0x39   :  { %s9497_s14 = sld [smem:[%s10737_s0 + %s9292_s28]]   ;;  %s9296_s28 = smov 37  }
  0x3a   :  { %10775 = sst [smem:[#allocation42_spill]] %s9487_s29 }
  0x3b   :  { %s9507_s29 = sld [smem:[%s10737_s0 + %s9294_s15]]  }
  0x3f   :  { %10776 = sst [smem:[#allocation43_spill]] %s9497_s14 }
  0x40   :  { %s9517_s14 = sld [smem:[%s10737_s0 + %s9296_s28]]  }
  0x41   :  { %80 = vsyncpa [#allocation3], 0 }
  0x42   :  { %81 = vsyncpa [#allocation6], 0 }
  0x43   :  { %82 = vsyncpa [#allocation9], 0 }
  0x44   :  { %83 = vsyncpa [#allocation12], 0 }
  0x45   :  { %84 = vsyncpa [#allocation15], 0 }
  0x46   :  { %85 = vsyncpa [#allocation4], 0  ;;  %s9297_s7 = smov [#allocation5]   ;;  %s9028_s11 = scalar_lea.hbm %s9432_s17, 32 }
  0x47   :  { %s139_s10 = sshll.u32 %s9297_s7, 4  ;;  %p9029_p0 = scmp.ne.s32.totalorder %s9432_s17, %s9028_s11  ;;  %s140_s10 = int_to_ptr.vmem [resolvable:$true] %s139_s10 }
  0x48   :  { %p9032_p1 = scmp.lt.u32.totalorder %s9028_s11, %s9432_s17 }
  0x4a   :  { %p9034_p2 = pnand %p9032_p1, %p9029_p0 }
  0x4c   :  { %9037 = shalt.err (!%p9034_p2)
}
  0x4d   :  { %s9038_s15 = scalar_lea.vmem %s140_s10, 32  ;;  %p9043_p4 = scmp.lt.s32.totalorder %s140_s10, %s140_s10 }
  0x4e   :  { %p9039_p3 = scmp.ne.s32.totalorder %s140_s10, %s9038_s15  ;;  %p9044_p5 = scmp.lt.s32.totalorder %s9038_s15, %s9038_s15 }
  0x50   :  { %p9045_p6 = por %p9044_p5, %p9043_p4 }
  0x52   :  { %p9046_p7 = pnand %p9045_p6, %p9039_p3 }
  0x54   :  { %9049 = shalt.err (!%p9046_p7)
}
  0x55   :  { %s9298_s0 = smov 16   ;;  %s9299_s16 = smov 1  }
  0x56   :  { %145 = dma.hbm_to_vmem [thread:$0]  %s9432_s17, 32, %s140_s10, [#allocation6], %s9298_s0, %s9298_s0, %s9299_s16  }
  0x57   :  { %s9300_s18 = smov [#allocation8]   ;;  %s9301_s23 = smov [#allocation11]  }
  0x58   :  { %s171_s22 = sshll.u32 %s9300_s18, 4  ;;  %s199_s26 = sshll.u32 %s9301_s23, 4  ;;  %s172_s22 = int_to_ptr.vmem [resolvable:$true] %s171_s22  ;;  %s200_s26 = int_to_ptr.vmem [resolvable:$true] %s199_s26 }
  0x59   :  { %s9050_s28 = scalar_lea.hbm %s9462_s9, 32 }
  0x5a   :  { %p9051_p8 = scmp.ne.s32.totalorder %s9462_s9, %s9050_s28  ;;  %p9054_p9 = scmp.lt.u32.totalorder %s9050_s28, %s9462_s9 }
  0x5c   :  { %p9056_p10 = pnand %p9054_p9, %p9051_p8 }
  0x5e   :  { %9059 = shalt.err (!%p9056_p10)
}
  0x5f   :  { %s9060_s1 = scalar_lea.vmem %s172_s22, 32  ;;  %p9065_p12 = scmp.lt.s32.totalorder %s172_s22, %s172_s22 }
  0x60   :  { %p9061_p11 = scmp.ne.s32.totalorder %s172_s22, %s9060_s1  ;;  %p9066_p13 = scmp.lt.s32.totalorder %s9060_s1, %s9060_s1 }
  0x62   :  { %p9067_p0 = por %p9066_p13, %p9065_p12 }
  0x64   :  { %p9068_p1 = pnand %p9067_p0, %p9061_p11 }
  0x66   :  { %9071 = shalt.err (!%p9068_p1)
}
  0x67   :  { %177 = dma.hbm_to_vmem [thread:$0]  %s9462_s9, 32, %s172_s22, [#allocation9], %s9298_s0, %s9298_s0, %s9299_s16  }
  0x68   :  { %s9072_s17 = scalar_lea.hbm %s9482_s27, 32 }
  0x69   :  { %p9073_p2 = scmp.ne.s32.totalorder %s9482_s27, %s9072_s17  ;;  %p9076_p3 = scmp.lt.u32.totalorder %s9072_s17, %s9482_s27 }
  0x6b   :  { %p9078_p4 = pnand %p9076_p3, %p9073_p2 }
  0x6d   :  { %9081 = shalt.err (!%p9078_p4)
}
  0x6e   :  { %s9082_s2 = scalar_lea.vmem %s200_s26, 32  ;;  %p9087_p6 = scmp.lt.s32.totalorder %s200_s26, %s200_s26 }
  0x6f   :  { %p9083_p5 = scmp.ne.s32.totalorder %s200_s26, %s9082_s2  ;;  %p9088_p7 = scmp.lt.s32.totalorder %s9082_s2, %s9082_s2 }
  0x71   :  { %p9089_p8 = por %p9088_p7, %p9087_p6 }
  0x73   :  { %p9090_p9 = pnand %p9089_p8, %p9083_p5 }
  0x75   :  { %9093 = shalt.err (!%p9090_p9)
}
  0x76   :  { %205 = dma.hbm_to_vmem [thread:$0]  %s9482_s27, 32, %s200_s26, [#allocation12], %s9298_s0, %s9298_s0, %s9299_s16  }
  0x77   :  { %s9302_s9 = smov [#allocation14]   ;;  %s9303_s10 = smov [#allocation2]  }
  0x78   :  { %s227_s7 = sshll.u32 %s9302_s9, 4  ;;  %s112_s11 = sshll.u32 %s9303_s10, 4  ;;  %s228_s7 = int_to_ptr.vmem [resolvable:$true] %s227_s7  ;;  %s113_s11 = int_to_ptr.vmem [resolvable:$true] %s112_s11 }
  0x79   :  { %s9094_s15 = scalar_lea.hbm %s9502_s21, 64 }
  0x7a   :  { %p9095_p10 = scmp.ne.s32.totalorder %s9502_s21, %s9094_s15  ;;  %p9098_p11 = scmp.lt.u32.totalorder %s9094_s15, %s9502_s21 }
  0x7c   :  { %p9100_p12 = pnand %p9098_p11, %p9095_p10 }
  0x7e   :  { %9103 = shalt.err (!%p9100_p12)
}
  0x7f   :  { %s9104_s18 = scalar_lea.vmem %s228_s7, 64  ;;  %p9109_p0 = scmp.lt.s32.totalorder %s228_s7, %s228_s7 }
  0x80   :  { %p9105_p13 = scmp.ne.s32.totalorder %s228_s7, %s9104_s18  ;;  %p9110_p1 = scmp.lt.s32.totalorder %s9104_s18, %s9104_s18 }
  0x82   :  { %p9111_p2 = por %p9110_p1, %p9109_p0 }
  0x84   :  { %p9112_p3 = pnand %p9111_p2, %p9105_p13 }
  0x86   :  { %9115 = shalt.err (!%p9112_p3)
}
  0x87   :  { %s9304_s22 = smov 32   ;;  %s9305_s27 = smov 2  }
  0x88   :  { %233 = dma.hbm_to_vmem [thread:$0]  %s9502_s21, 64, %s228_s7, [#allocation15], %s9304_s22, %s9304_s22, %s9305_s27  }
  0x89   :  { %s9116_s23 = scalar_lea.hbm %s9382_s19, 16 }
  0x8a   :  { %p9117_p4 = scmp.ne.s32.totalorder %s9382_s19, %s9116_s23  ;;  %p9120_p5 = scmp.lt.u32.totalorder %s9116_s23, %s9382_s19 }
  0x8c   :  { %p9122_p6 = pnand %p9120_p5, %p9117_p4 }
  0x8e   :  { %9125 = shalt.err (!%p9122_p6)
}
  0x8f   :  { %s9126_s26 = scalar_lea.vmem %s113_s11, 16  ;;  %s9130_s28 = scalar_lea.vmem %s113_s11, 32 }
  0x90   :  { %p9127_p7 = scmp.ne.s32.totalorder %s113_s11, %s9126_s26  ;;  %p9131_p8 = scmp.lt.s32.totalorder %s113_s11, %s113_s11 }
  0x91   :  { %p9132_p9 = scmp.lt.s32.totalorder %s9130_s28, %s9126_s26 }
  0x93   :  { %p9133_p10 = por %p9132_p9, %p9131_p8 }
  0x95   :  { %p9134_p11 = pnand %p9133_p10, %p9127_p7 }
  0x97   :  { %9137 = shalt.err (!%p9134_p11)
}
  0x98   :  { %115 = dma.hbm_to_vmem [thread:$0]  %s9382_s19, 16, %s113_s11, [#allocation3]  }
  0x99   :  { %s9306_s21 = smov [#allocation7]   ;;  %s9307_s17 = smov [#allocation10]  }
  0x9a   :  { %s157_s1 = sshll.u32 %s9306_s21, 4  ;;  %s185_s2 = sshll.u32 %s9307_s17, 4  ;;  %s158_s1 = int_to_ptr.vmem [resolvable:$true] %s157_s1  ;;  %s186_s2 = int_to_ptr.vmem [resolvable:$true] %s185_s2 }
  0x9b   :  { %s9138_s9 = scalar_lea.hbm %s9452_s25, 64 }
  0x9c   :  { %p9139_p12 = scmp.ne.s32.totalorder %s9452_s25, %s9138_s9  ;;  %p9142_p13 = scmp.lt.u32.totalorder %s9138_s9, %s9452_s25 }
  0x9e   :  { %p9144_p0 = pnand %p9142_p13, %p9139_p12 }
  0xa0   :  { %9147 = shalt.err (!%p9144_p0)
}
  0xa1   :  { %s9148_s7 = scalar_lea.vmem %s158_s1, 64  ;;  %p9153_p2 = scmp.lt.s32.totalorder %s158_s1, %s158_s1 }
  0xa2   :  { %p9149_p1 = scmp.ne.s32.totalorder %s158_s1, %s9148_s7  ;;  %p9154_p3 = scmp.lt.s32.totalorder %s9148_s7, %s9148_s7 }
  0xa4   :  { %p9155_p4 = por %p9154_p3, %p9153_p2 }
  0xa6   :  { %p9156_p5 = pnand %p9155_p4, %p9149_p1 }
  0xa8   :  { %9159 = shalt.err (!%p9156_p5)
}
  0xa9   :  { %163 = dma.hbm_to_vmem [thread:$0]  %s9452_s25, 64, %s158_s1, [#allocation6], %s9304_s22, %s9304_s22, %s9305_s27  }
  0xaa   :  { %s9160_s19 = scalar_lea.hbm %s9472_s4, 32 }
  0xab   :  { %p9161_p6 = scmp.ne.s32.totalorder %s9472_s4, %s9160_s19  ;;  %p9164_p7 = scmp.lt.u32.totalorder %s9160_s19, %s9472_s4 }
  0xad   :  { %p9166_p8 = pnand %p9164_p7, %p9161_p6 }
  0xaf   :  { %9169 = shalt.err (!%p9166_p8)
}
  0xb0   :  { %s9170_s10 = scalar_lea.vmem %s186_s2, 32  ;;  %p9175_p10 = scmp.lt.s32.totalorder %s186_s2, %s186_s2 }
  0xb1   :  { %p9171_p9 = scmp.ne.s32.totalorder %s186_s2, %s9170_s10  ;;  %p9176_p11 = scmp.lt.s32.totalorder %s9170_s10, %s9170_s10 }
  0xb3   :  { %p9177_p12 = por %p9176_p11, %p9175_p10 }
  0xb5   :  { %p9178_p13 = pnand %p9177_p12, %p9171_p9 }
  0xb7   :  { %9181 = shalt.err (!%p9178_p13)
}
  0xb8   :  { %191 = dma.hbm_to_vmem [thread:$0]  %s9472_s4, 32, %s186_s2, [#allocation9], %s9298_s0, %s9298_s0, %s9299_s16  }
  0xb9   :  { %s9308_s25 = smov [#allocation13]   ;;  %s9309_s15 = smov [#allocation16]  }
  0xba   :  { %s213_s11 = sshll.u32 %s9308_s25, 4  ;;  %s241_s18 = sshll.u32 %s9309_s15, 4  ;;  %s214_s11 = int_to_ptr.vmem [resolvable:$true] %s213_s11  ;;  %s242_s18 = int_to_ptr.vmem [resolvable:$true] %s241_s18 }
  0xbb   :  { %s9182_s27 = scalar_lea.hbm %s9492_s20, 32 }
  0xbc   :  { %p9183_p0 = scmp.ne.s32.totalorder %s9492_s20, %s9182_s27  ;;  %p9186_p1 = scmp.lt.u32.totalorder %s9182_s27, %s9492_s20 }
  0xbe   :  { %p9188_p2 = pnand %p9186_p1, %p9183_p0 }
  0xc0   :  { %9191 = shalt.err (!%p9188_p2)
}
  0xc1   :  { %s9192_s23 = scalar_lea.vmem %s214_s11, 32  ;;  %p9197_p4 = scmp.lt.s32.totalorder %s214_s11, %s214_s11 }
  0xc2   :  { %p9193_p3 = scmp.ne.s32.totalorder %s214_s11, %s9192_s23  ;;  %p9198_p5 = scmp.lt.s32.totalorder %s9192_s23, %s9192_s23 }
  0xc4   :  { %p9199_p6 = por %p9198_p5, %p9197_p4 }
  0xc6   :  { %p9200_p7 = pnand %p9199_p6, %p9193_p3 }
  0xc8   :  { %9203 = shalt.err (!%p9200_p7)
}
  0xc9   :  { %219 = dma.hbm_to_vmem [thread:$0]  %s9492_s20, 32, %s214_s11, [#allocation12], %s9298_s0, %s9298_s0, %s9299_s16  }
  0xca   :  { %s9204_s4 = scalar_lea.hbm %s9512_s12, 32 }
  0xcb   :  { %p9205_p8 = scmp.ne.s32.totalorder %s9512_s12, %s9204_s4  ;;  %p9208_p9 = scmp.lt.u32.totalorder %s9204_s4, %s9512_s12 }
  0xcd   :  { %p9210_p10 = pnand %p9208_p9, %p9205_p8 }
  0xcf   :  { %9213 = shalt.err (!%p9210_p10)
}
  0xd0   :  { %s9214_s26 = scalar_lea.vmem %s242_s18, 32  ;;  %p9219_p12 = scmp.lt.s32.totalorder %s242_s18, %s242_s18 }
  0xd1   :  { %p9215_p11 = scmp.ne.s32.totalorder %s242_s18, %s9214_s26  ;;  %p9220_p13 = scmp.lt.s32.totalorder %s9214_s26, %s9214_s26 }
  0xd3   :  { %p9221_p0 = por %p9220_p13, %p9219_p12 }
  0xd5   :  { %p9222_p1 = pnand %p9221_p0, %p9215_p11 }
  0xd7   :  { %9225 = shalt.err (!%p9222_p1)
}
  0xd8   :  { %247 = dma.hbm_to_vmem [thread:$0]  %s9512_s12, 32, %s242_s18, [#allocation15], %s9298_s0, %s9298_s0, %s9299_s16  }
  0xd9   :  { %9248 = dma.done.wait [#allocation3], 16  }
  0xda   :  { %9249 = vsyncadd [#allocation3], 4294967280 }
  0xdb   :  { %9250 = dma.done.wait [#allocation6], 96  }
  0xdc   :  { %9251 = vsyncadd [#allocation6], 4294967200 }
  0xdd   :  { %9252 = dma.done.wait [#allocation9], 64  }
  0xde   :  { %9253 = vsyncadd [#allocation9], 4294967232 }
  0xdf   :  { %9254 = dma.done.wait [#allocation12], 64  }
  0xe0   :  { %9255 = vsyncadd [#allocation12], 4294967232 }
  0xe1   :  { %9256 = dma.done.wait [#allocation15], 96  }
  0xe2   :  { %9257 = vsyncadd [#allocation15], 4294967200  ;;  %v9310_v0 = vmov 1   ;;  %v9311_v1 = vmov 0   ;;  %v282_v2 = vld [vmem:[%s9332_s5] sm:$0xff]  ;;  %v283_v3 = vld [vmem:[%s9332_s5 + $0x8] sm:$0xff]  ;;  %v306_v6 = vlaneseq }
  0xe3   :  { %8372 = vset.pattern.permute.xlu1 %v9310_v0  ;;  %8371 = vset.pattern.permute.xlu0 %v9311_v1  ;;  %v9312_v4 = vmov 2   ;;  %v9313_v5 = vmov 3   ;;  %v284_v9 = vld [vmem:[%s9367_s3] sm:$0xf]  ;;  %v287_v12 = vld [vmem:[%s9342_s13 + $0x8] sm:$0xff]  ;;  %s10777_s5 = sld [smem:[#allocation30_spill]] }
  0xe4   :  { %599 = vmatprep.mubr.bf16.mxu0 %v9311_v1  ;;  %315 = vperm.xlu1 %8372, %v282_v2   ;;  %v9589_v7 = vshrl.u32 %v306_v6, 7  ;;  %v7108_v14 = vld [vmem:[%s9372_s8] ss:$0 sm:$0xff]  ;;  %v8474_v46 = vld [vmem:[%s9397_s6 + $0x4] ss:$8 sps:$4 sm:$0xff]   ;;  %s10778_s3 = sld [smem:[#allocation26_spill]] }
  0xe5   :  { %298 = vperm.xlu0 %8371, %v282_v2   ;;  %v286_v15 = vld [vmem:[%s9342_s13] sm:$0xff]  ;;  %v295_v17 = vadd.f32 %v7108_v14, %v287_v12  ;;  %v8477_v48 = vld [vmem:[%s9397_s6 + $0x14] ss:$8 sps:$4 sm:$0xff]   ;;  %567 = vmatprep.subr.bf16.mxu0 %v8474_v46  ;;  %v8479_v49 = vld [vmem:[%s9397_s6 + $0x10] ss:$8 sps:$4 sm:$0xff]   ;;  %s9315_s13 = smov 64  }
  0xe6   :  { %v9592_v8 = vsub.s32 0, %v9589_v7  ;;  %v9600_v16 = vsub.s32 1, %v9589_v7  ;;  %v9603_v18 = vsub.s32 2, %v9589_v7  ;;  %v294_v21 = vadd.f32 %v7108_v14, %v286_v15  ;;  %v8476_v47 = vld [vmem:[%s9397_s6] ss:$8 sps:$4 sm:$0xff]   ;;  %s9317_s8 = smov 112  }
  0xe7   :  { %v356_v24 = vsub.s32 3, %v9589_v7  ;;  %568 = vmatpush1.bf16.msra.mxu0 %v8476_v47  ;;  %v8480_v50 = vld [vmem:[%s9397_s6 + $0x24] ss:$8 sps:$4 sm:$0xff]   ;;  %v8482_v59 = vld [vmem:[%s9397_s6 + $0x20] ss:$8 sps:$4 sm:$0xff]   ;;  %vm9316_vm0 = vmmov 0  }
  0xe8   :  { %319 = vperm.xlu1 %8372, %v283_v3   ;;  %v309_v13 = vrot.slane %v284_v9, %v9592_v8  ;;  %v325_v25 = vrot.slane %v284_v9, %v9600_v16  ;;  %v341_v27 = vrot.slane %v284_v9, %v9603_v18  ;;  %569 = vmatprep.subr.bf16.mxu0 %v8477_v48  ;;  %v8483_v60 = vld [vmem:[%s9397_s6 + $0x34] ss:$8 sps:$4 sm:$0xff]   ;;  %v8485_v61 = vld [vmem:[%s9397_s6 + $0x30] ss:$8 sps:$4 sm:$0xff]   ;;  %v8486_v62 = vld [vmem:[%s9397_s6 + $0x44] ss:$8 sps:$4 sm:$0xff]  }
  0xe9   :  { %303 = vperm.xlu0 %8371, %v283_v3   ;;  %v357_v32 = vrot.slane %v284_v9, %v356_v24  ;;  %v8488_v63 = vld [vmem:[%s9397_s6 + $0x40] ss:$8 sps:$4 sm:$0xff]   ;;  %v8492_v6 = vld [vmem:[%s9397_s6 + $0x64] ss:$8 sps:$4 sm:$0xff]   ;;  %vm656_vm1 = vcmask 130048   ;;  %s9318_s12 = smov 80  }
  0xea   :  { %v8494_v9 = vld [vmem:[%s9397_s6 + $0x60] ss:$8 sps:$4 sm:$0xff]   ;;  %s9319_s20 = smov 96   ;;  %s10779_s16 = sld [smem:[#allocation31_spill]]  ;;  %vm1160_vm2 = vcmask 261120   ;;  %vm1163_vm3 = vcmask 392192  }
  0xeb   :  { %570 = vmatpush1.bf16.msra.mxu0 %v8479_v49  ;;  %s9320_s28 = smov 48   ;;  %s10780_s21 = sld [smem:[#allocation32_spill]]  ;;  %vm1197_vm4 = vcmask 523264  }
  0xec   :  { %8374 = vset.pattern.permute.xlu1 %v9312_v4  ;;  %571 = vmatprep.subr.bf16.mxu0 %v8480_v50  ;;  %s10781_s1 = sld [smem:[#allocation33_spill]]  ;;  %s10782_s17 = sld [smem:[#allocation35_spill]] }
  0xed   :  { %8373 = vset.pattern.permute.xlu0 %v9312_v4  ;;  %335 = vperm.xlu1 %8374, %v283_v3   ;;  %s10783_s2 = sld [smem:[#allocation34_spill]]  ;;  %s10787_s9 = sld [smem:[#allocation38_spill]] }
  0xee   :  { %331 = vperm.xlu0 %8373, %v282_v2   ;;  %s10788_s7 = sld [smem:[#allocation36_spill]]  ;;  %s10789_s19 = sld [smem:[#allocation37_spill]] }
  0xef   :  { %572 = vmatpush1.bf16.msra.mxu0 %v8482_v59  ;;  %s10790_s10 = sld [smem:[#allocation27_spill]]  ;;  %s10791_s25 = sld [smem:[#allocation39_spill]] }
  0xf0   :  { %573 = vmatprep.subr.bf16.mxu0 %v8483_v60  ;;  %v9670_v60 = vld [vmem:[%s10778_s3 + $0x8] sm:$0xff]  ;;  %s10792_s11 = sld [smem:[#allocation41_spill]]  ;;  %s10793_s15 = sld [smem:[#allocation40_spill]] }
  0xf1   :  { %8375 = vset.pattern.permute.xlu1 %v9313_v5  ;;  %s10794_s18 = sld [smem:[#allocation28_spill]]  ;;  %s10795_s27 = sld [smem:[#allocation42_spill]] }
  0xf2   :  { %8376 = vset.pattern.permute.xlu0 %v9313_v5  ;;  %347 = vperm.xlu1 %8375, %v282_v2   ;;  %v8489_v2 = vld [vmem:[%s9397_s6 + $0x54] ss:$8 sps:$4 sm:$0xff]   ;;  %s10796_s23 = sld [smem:[#allocation43_spill]] }
  0xf3   :  { %351 = vperm.xlu0 %8376, %v283_v3   ;;  %574 = vmatpush1.bf16.msra.mxu0 %v8485_v61  ;;  %v8491_v3 = vld [vmem:[%s9397_s6 + $0x50] ss:$8 sps:$4 sm:$0xff]  }
  0xf4   :  { %575 = vmatprep.subr.bf16.mxu0 %v8486_v62 }
  0xf7   :  { %8408 = vset.pattern.permute.xlu0 %v9311_v1  ;;  %576 = vmatpush1.bf16.msra.mxu0 %v8488_v63 }
  0xf8   :  { %577 = vmatprep.subr.bf16.mxu0 %v8489_v2 }
  0xfb   :  { %578 = vmatpush1.bf16.msra.mxu0 %v8491_v3 }
  0xfc   :  { %579 = vmatprep.subr.bf16.mxu0 %v8492_v6 }
  0xff   :  { %580 = vmatpush1.bf16.msra.mxu0 %v8494_v9 }
 0x163   :  { %v316_v10 = vpop.permute.xlu1 %315 }
 0x164   :  { %v299_v11 = vpop.permute.xlu0 %298  ;;  %v326_v33 = vmul.f32 %v325_v25, %v316_v10  ;;  %v8495_v10 = vld [vmem:[%s9397_s6 + $0x74] ss:$8 sps:$4 sm:$0xff]  }
 0x165   :  { %v310_v22 = vmul.f32 %v309_v13, %v299_v11  ;;  %v8497_v11 = vld [vmem:[%s9397_s6 + $0x70] ss:$8 sps:$4 sm:$0xff]   ;;  %581 = vmatprep.subr.bf16.mxu0 %v8495_v10 }
 0x166   :  { %582 = vmatpush1.bf16.msra.mxu0 %v8497_v11 }
 0x167   :  { %v320_v19 = vpop.permute.xlu1 %319  ;;  %v312_v28 = vadd.f32 %v310_v22, %v294_v21  ;;  %v9638_v21 = vld [vmem:[%s9392_s30] sm:$0x3] }
 0x168   :  { %v304_v20 = vpop.permute.xlu0 %303  ;;  %v327_v29 = vmul.f32 %v325_v25, %v320_v19 }
 0x169   :  { %v311_v23 = vmul.f32 %v309_v13, %v304_v20  ;;  %v328_v37 = vadd.f32 %v326_v33, %v312_v28  ;;  %v9635_v20 = vld [vmem:[%s9387_s24] sm:$0x3] }
 0x16a   :  { %v466_v22 = vrot.slane %v9635_v20, %v9592_v8 }
 0x16b   :  { %v313_v26 = vadd.f32 %v311_v23, %v295_v17 }
 0x16c   :  { %v336_v30 = vpop.permute.xlu1 %335 }
 0x16d   :  { %v332_v31 = vpop.permute.xlu0 %331  ;;  %v329_v34 = vadd.f32 %v327_v29, %v313_v26  ;;  %v343_v35 = vmul.f32 %v341_v27, %v336_v30 }
 0x16e   :  { %v342_v36 = vmul.f32 %v341_v27, %v332_v31  ;;  %v472_v27 = vrot.slane %v9638_v21, %v9592_v8 }
 0x16f   :  { %v345_v40 = vadd.f32 %v343_v35, %v329_v34  ;;  %v9314_v34 = vmov 0.0   ;;  %v380_v35 = vld [vmem:[%s10777_s5] sm:$0x3] }
 0x170   :  { %v344_v41 = vadd.f32 %v342_v36, %v328_v37  ;;  %7873 = vmatprep.subr.bf16.mxu1 %v9314_v34  ;;  %7867 = vmatprep.subr.bf16.mxu0 %v9314_v34  ;;  %v480_v36 = vrot.slane %v380_v35, %v9592_v8 }
 0x171   :  { %v348_v38 = vpop.permute.xlu1 %347  ;;  %7875 = vmatprep.mubr.msk.bf16.mxu1 %vm9316_vm0, %v9314_v34 }
 0x172   :  { %v352_v39 = vpop.permute.xlu0 %351  ;;  %v358_v42 = vmul.f32 %v357_v32, %v348_v38  ;;  %v484_v38 = vrot.slane %v380_v35, %v9600_v16 }
 0x173   :  { %v359_v43 = vmul.f32 %v357_v32, %v352_v39 }
 0x174   :  { %v9610_v44 = vadd.f32 %v358_v42, %v344_v41 }
 0x175   :  { %v9612_v45 = vadd.f32 %v359_v43, %v345_v40 }
 0x176   :  { %440 = vadd.xlane.f32.xlu1 %v9610_v44 }
 0x177   :  { %442 = vadd.xlane.f32.xlu0 %v9612_v45 }
 0x203   :  { %v441_v51 = vpop.xlane.xlu1 %440 }
 0x204   :  { %v443_v52 = vpop.xlane.xlu0 %442  ;;  %v445_v53 = vmul.f32 0.0078125, %v441_v51 }
 0x205   :  { %v446_v54 = vmul.f32 0.0078125, %v443_v52 }
 0x206   :  { %v447_v55 = vsub.f32 %v9610_v44, %v445_v53 }
 0x207   :  { %v448_v56 = vsub.f32 %v9612_v45, %v446_v54 }
 0x208   :  { %v449_v57 = vmul.f32 %v447_v55, %v447_v55 }
 0x209   :  { %v450_v58 = vmul.f32 %v448_v56, %v448_v56 }
 0x20a   :  { %451 = vadd.xlane.f32.xlu1 %v449_v57 }
 0x20b   :  { %453 = vadd.xlane.f32.xlu0 %v450_v58 }
 0x297   :  { %v452_v12 = vpop.xlane.xlu1 %451 }
 0x298   :  { %v454_v13 = vpop.xlane.xlu0 %453  ;;  %v455_v14 = vmul.f32 0.0078125, %v452_v12 }
 0x299   :  { %v456_v15 = vmul.f32 0.0078125, %v454_v13 }
 0x29a   :  { %v457_v17 = vadd.f32 1e-05, %v455_v14 }
 0x29b   :  { %v458_v19 = vadd.f32 1e-05, %v456_v15 }
 0x29c   :  { %8786 = vrsqrt.f32 %v457_v17 }
 0x29d   :  { %8788 = vrsqrt.f32 %v458_v19 }
 0x2a6   :  { %v8787_v23 = vpop.eup %8786 }
 0x2a7   :  { %v8789_v25 = vpop.eup %8788  ;;  %v461_v26 = vmul.f32 %v8787_v23, %v447_v55 }
 0x2a8   :  { %v462_v28 = vmul.f32 %v8789_v25, %v448_v56  ;;  %v9667_v56 = vld [vmem:[%s10778_s3] sm:$0xff] }
 0x2a9   :  { %v467_v29 = vmul.f32 %v466_v22, %v461_v26 }
 0x2aa   :  { %v468_v30 = vmul.f32 %v466_v22, %v462_v28 }
 0x2ab   :  { %v473_v31 = vadd.f32 %v472_v27, %v467_v29 }
 0x2ac   :  { %v474_v32 = vadd.f32 %v472_v27, %v468_v30 }
 0x2ae   :  { %v475_v33 = vpack.c.bf16 %v474_v32, %v473_v31 }
 0x2b0   :  { %600 = vmatmul.mubr.bf16.vlgmr.msra.gmra.mrb[0].mxu0 %v475_v33 }
 0x2b1   :  { %7869 = vmatprep.mubr.msk.bf16.mxu0 %vm9316_vm0, %v9314_v34 }
 0x383   :  { %v601_v37 = vpop.f32.mrb[0].mxu0 }
 0x384   :  { %v602_v39 = vadd.f32 %v601_v37, %v480_v36  ;;  %v603_v40 = vpop.f32.mrb[1].mxu0 }
 0x385   :  { %v605_v41 = vpop.f32.mrb[2].mxu0  ;;  %v604_v46 = vadd.f32 %v603_v40, %v484_v38 }
 0x386   :  { %v606_v42 = vadd.f32 %v605_v41, %v480_v36  ;;  %v607_v43 = vpop.f32.mrb[3].mxu0  ;;  %614 = vrot.lane.b32.xlu1 %v602_v39, %s9315_s13 }
 0x387   :  { %v608_v47 = vadd.f32 %v607_v43, %v484_v38 }
 0x388   :  { %v9650_v48 = vpack.c.bf16 %v606_v42, %v602_v39  ;;  %616 = vrot.lane.b32.xlu0 %v606_v42, %s9315_s13 }
 0x389   :  { %v9653_v49 = vpack.c.bf16 %v608_v47, %v604_v46 }
 0x38b   :  { %7874 = vmatpush3.bf16.msra.mxu1 %v9653_v49 }
 0x38c   :  { %7879 = vmatprep.subr.bf16.mxu1 %v9314_v34 }
 0x3f8   :  { %v615_v50 = vpop.permute.xlu1 %614 }
 0x3f9   :  { %620 = vxpose.xlu1.b32.start [1/2] (short) (narrow) %v615_v50, 64 }
 0x3fa   :  { %v617_v51 = vpop.permute.xlu0 %616 }
 0x3fd   :  { %621 = vxpose.xlu1.b32.end [2/2] (short) (narrow) %v617_v51, 64 }
 0x479   :  { %v636_v52 = vpop.trf.xlu1 }
 0x47d   :  { %v637_v53 = vpop.trf.xlu1 }
 0x47e   :  { %v652_v54 = vpack.c.bf16 %v637_v53, %v636_v52 }
 0x480   :  { %7868 = vmatpush3.bf16.msra.mxu0 %v652_v54 }
 0x481   :  { %7897 = vmatprep.subr.bf16.mxu0 %v9314_v34  ;;  %v638_v9 = vpop.trf.xlu1 }
 0x483   :  { %7870 = vmatmul.mubr.msk.bf16.vlgmr.msra.gmra.mrb[4].mxu0 %vm656_vm1, %v9650_v48 }
 0x484   :  { %7899 = vmatprep.mubr.msk.bf16.mxu0 %vm9316_vm0, %v9314_v34 }
 0x485   :  { %v639_v10 = vpop.trf.xlu1 }
 0x486   :  { %v653_v39 = vpack.c.bf16 %v639_v10, %v638_v9 }
 0x489   :  { %v9676_v11 = vpop.trf.xlu1 }
 0x48d   :  { %v9678_v12 = vpop.trf.xlu1 }
 0x48e   :  { %v654_v13 = vpack.c.bf16 %v9678_v12, %v9676_v11 }
 0x491   :  { %v9690_v29 = vpop.trf.xlu1 }
 0x495   :  { %v9692_v30 = vpop.trf.xlu1 }
 0x556   :  { %v694_v55 = vpop.f32.mrb[4].mxu0 }
 0x557   :  { %v701_v57 = vmul.f32 0.25, %v694_v55  ;;  %v7871_v58 = vpop.f32.mrb[5].mxu0 }
 0x558   :  { %v697_v59 = vpop.f32.mrb[6].mxu0 }
 0x559   :  { %v702_v61 = vmul.f32 0.25, %v697_v59  ;;  %v7872_v62 = vpop.f32.mrb[7].mxu0  ;;  %v703_v63 = vadd.f32 %v701_v57, %v9667_v56 }
 0x55b   :  { %v705_v2 = vsel %vm656_vm1, %v703_v63, -inf  ;;  %v704_v3 = vadd.f32 %v702_v61, %v9670_v60 }
 0x55c   :  { %706 = vmax.xlane.f32.xlu0 %v705_v2 }
 0x55d   :  { %v708_v6 = vsel %vm656_vm1, %v704_v3, -inf }
 0x560   :  { %709 = vmax.xlane.f32.xlu0 %v708_v6 }
 0x5e9   :  { %v707_v14 = vpop.xlane.xlu0 %706 }
 0x5ea   :  { %v711_v15 = vsub.f32 %v703_v63, %v707_v14 }
 0x5ec   :  { %v713_v17 = vmul.f32 1.442695, %v711_v15 }
 0x5ed   :  { %v710_v19 = vpop.xlane.xlu0 %709 }
 0x5ee   :  { %8790 = vpow2.f32 %v713_v17  ;;  %v712_v22 = vsub.f32 %v704_v3, %v710_v19 }
 0x5f0   :  { %v715_v23 = vmul.f32 1.442695, %v712_v22 }
 0x5f2   :  { %8792 = vpow2.f32 %v715_v23 }
 0x5f8   :  { %v8791_v25 = vpop.eup %8790 }
 0x5f9   :  { %v717_v26 = vsel %vm656_vm1, %v8791_v25, 0.0 }
 0x5fa   :  { %718 = vadd.xlane.f32.xlu0 %v717_v26 }
 0x5fc   :  { %v8793_v27 = vpop.eup %8792 }
 0x5fd   :  { %v720_v28 = vsel %vm656_vm1, %v8793_v27, 0.0 }
 0x5fe   :  { %721 = vadd.xlane.f32.xlu1 %v720_v28 }
 0x60f   :  { %847 = vrot.lane.b32.xlu1 %v9653_v49, %s9317_s8 }
 0x610   :  { %773 = vrot.lane.b32.xlu0 %v9650_v48, %s9317_s8 }
 0x613   :  { %1014 = vrot.lane.b32.xlu1 %v9650_v48, %s9318_s12 }
 0x687   :  { %v719_v31 = vpop.xlane.xlu0 %718 }
 0x688   :  { %8794 = vrcp.f32 %v719_v31 }
 0x68b   :  { %v722_v32 = vpop.xlane.xlu1 %721  ;;  %v774_v40 = vpop.permute.xlu0 %773 }
 0x68c   :  { %8796 = vrcp.f32 %v722_v32 }
 0x68f   :  { %v848_v41 = vpop.permute.xlu1 %847 }
 0x692   :  { %v8795_v33 = vpop.eup %8794 }
 0x693   :  { %v725_v36 = vmul.f32 %v8795_v33, %v8791_v25  ;;  %v1015_v32 = vpop.permute.xlu1 %1014 }
 0x696   :  { %v8797_v35 = vpop.eup %8796 }
 0x697   :  { %v726_v37 = vmul.f32 %v8797_v35, %v8793_v27 }
 0x699   :  { %v727_v38 = vpack.c.bf16 %v726_v37, %v725_v36 }
 0x69b   :  { %7876 = vmatmul.mubr.msk.bf16.vlgmr.msra.gmra.mrb[0].mxu1 %vm656_vm1, %v727_v38 }
 0x69c   :  { %7880 = vmatpush3.bf16.msra.mxu1 %v653_v39  ;;  %7881 = vmatprep.mubr.msk.bf16.mxu1 %vm9316_vm0, %v9314_v34 }
 0x69d   :  { %7885 = vmatprep.subr.bf16.mxu1 %v9314_v34 }
 0x6a3   :  { %7882 = vmatmul.mubr.msk.bf16.vlgmr.msra.gmra.mrb[4].mxu1 %vm656_vm1, %v774_v40 }
 0x6a4   :  { %7886 = vmatpush3.bf16.msra.mxu1 %v848_v41  ;;  %7887 = vmatprep.mubr.msk.bf16.mxu1 %vm9316_vm0, %v9314_v34 }
 0x6a5   :  { %7891 = vmatprep.subr.bf16.mxu1 %v9314_v34 }
 0x76e   :  { %v9702_v42 = vpop.f32.mrb[0].mxu1 }
 0x76f   :  { %v7877_v43 = vpop.f32.mrb[1].mxu1 }
 0x770   :  { %v9704_v46 = vpop.f32.mrb[2].mxu1 }
 0x771   :  { %v7878_v47 = vpop.f32.mrb[3].mxu1 }
 0x776   :  { %v812_v50 = vpop.f32.mrb[4].mxu1 }
 0x777   :  { %v819_v51 = vmul.f32 0.25, %v812_v50  ;;  %v7883_v52 = vpop.f32.mrb[5].mxu1 }
 0x778   :  { %v815_v53 = vpop.f32.mrb[6].mxu1 }
 0x779   :  { %v820_v54 = vmul.f32 0.25, %v815_v53  ;;  %v7884_v55 = vpop.f32.mrb[7].mxu1  ;;  %v821_v57 = vadd.f32 %v819_v51, %v9667_v56 }
 0x77b   :  { %v823_v58 = vsel %vm656_vm1, %v821_v57, -inf  ;;  %v822_v59 = vadd.f32 %v820_v54, %v9670_v60 }
 0x77c   :  { %824 = vmax.xlane.f32.xlu0 %v823_v58 }
 0x77d   :  { %v826_v61 = vsel %vm656_vm1, %v822_v59, -inf }
 0x780   :  { %827 = vmax.xlane.f32.xlu0 %v826_v61 }
 0x809   :  { %v825_v62 = vpop.xlane.xlu0 %824 }
 0x80a   :  { %v829_v63 = vsub.f32 %v821_v57, %v825_v62 }
 0x80c   :  { %v831_v2 = vmul.f32 1.442695, %v829_v63 }
 0x80d   :  { %v828_v3 = vpop.xlane.xlu0 %827 }
 0x80e   :  { %8798 = vpow2.f32 %v831_v2  ;;  %v830_v6 = vsub.f32 %v822_v59, %v828_v3 }
 0x810   :  { %v833_v9 = vmul.f32 1.442695, %v830_v6 }
 0x812   :  { %8800 = vpow2.f32 %v833_v9 }
 0x818   :  { %v8799_v10 = vpop.eup %8798 }
 0x819   :  { %v835_v14 = vsel %vm656_vm1, %v8799_v10, 0.0 }
 0x81a   :  { %836 = vadd.xlane.f32.xlu0 %v835_v14 }
 0x81c   :  { %v8801_v15 = vpop.eup %8800 }
 0x81d   :  { %v838_v17 = vsel %vm656_vm1, %v8801_v15, 0.0 }
 0x81e   :  { %839 = vadd.xlane.f32.xlu0 %v838_v17 }
 0x834   :  { %894 = vrot.lane.b32.xlu0 %v9650_v48, %s9319_s20  ;;  %v655_v48 = vpack.c.bf16 %v9692_v30, %v9690_v29 }
 0x8a7   :  { %v837_v19 = vpop.xlane.xlu0 %836 }
 0x8a8   :  { %8802 = vrcp.f32 %v837_v19 }
 0x8ab   :  { %v840_v22 = vpop.xlane.xlu0 %839 }
 0x8ac   :  { %8804 = vrcp.f32 %v840_v22 }
 0x8af   :  { %v895_v31 = vpop.permute.xlu0 %894 }
 0x8b2   :  { %v8803_v23 = vpop.eup %8802 }
 0x8b3   :  { %v843_v26 = vmul.f32 %v8803_v23, %v8799_v10 }
 0x8b6   :  { %v8805_v25 = vpop.eup %8804 }
 0x8b7   :  { %v844_v27 = vmul.f32 %v8805_v25, %v8801_v15 }
 0x8b9   :  { %v845_v28 = vpack.c.bf16 %v844_v27, %v843_v26 }
 0x8bb   :  { %7888 = vmatmul.mubr.msk.bf16.vlgmr.msra.gmra.mrb[8].mxu1 %vm656_vm1, %v845_v28 }
 0x8bc   :  { %7892 = vmatpush3.bf16.msra.mxu1 %v654_v13  ;;  %7893 = vmatprep.mubr.msk.bf16.mxu1 %vm9316_vm0, %v9314_v34 }
 0x8bd   :  { %7903 = vmatprep.subr.bf16.mxu1 %v9314_v34 }
 0x8c3   :  { %7894 = vmatmul.mubr.msk.bf16.vlgmr.msra.gmra.mrb[12].mxu1 %vm656_vm1, %v895_v31 }
 0x8c4   :  { %7904 = vmatpush3.bf16.msra.mxu1 %v655_v48  ;;  %7905 = vmatprep.mubr.msk.bf16.mxu1 %vm9316_vm0, %v9314_v34 }
 0x8c5   :  { %7915 = vmatprep.subr.bf16.mxu1 %v9314_v34 }
 0x8cb   :  { %7906 = vmatmul.mubr.msk.bf16.vlgmr.msra.gmra.mrb[16].mxu1 %vm656_vm1, %v1015_v32 }
 0x8cc   :  { %7923 = vmatprep.mubr.msk.bf16.mxu1 %vm9316_vm0, %v9314_v34 }
 0x98e   :  { %v887_v11 = vpop.f32.mrb[8].mxu1 }
 0x98f   :  { %v7889_v12 = vpop.f32.mrb[9].mxu1 }
 0x990   :  { %v890_v13 = vpop.f32.mrb[10].mxu1 }
 0x991   :  { %v8377_v33 = vpack.i.bf16 %v890_v13, %v887_v11  ;;  %v7890_v29 = vpop.f32.mrb[11].mxu1 }
 0x996   :  { %v933_v30 = vpop.f32.mrb[12].mxu1 }
 0x997   :  { %v940_v35 = vmul.f32 0.25, %v933_v30  ;;  %v7895_v36 = vpop.f32.mrb[13].mxu1 }
 0x998   :  { %v936_v37 = vpop.f32.mrb[14].mxu1 }
 0x999   :  { %v941_v38 = vmul.f32 0.25, %v936_v37  ;;  %v7896_v39 = vpop.f32.mrb[15].mxu1  ;;  %v942_v40 = vadd.f32 %v940_v35, %v9667_v56 }
 0x99b   :  { %v944_v41 = vsel %vm656_vm1, %v942_v40, -inf  ;;  %v943_v43 = vadd.f32 %v941_v38, %v9670_v60 }
 0x99c   :  { %945 = vmax.xlane.f32.xlu1 %v944_v41 }
 0x99d   :  { %v947_v47 = vsel %vm656_vm1, %v943_v43, -inf }
 0x99e   :  { %948 = vmax.xlane.f32.xlu0 %v947_v47  ;;  %v1053_v50 = vpop.f32.mrb[16].mxu1 }
 0x99f   :  { %v1060_v51 = vmul.f32 0.25, %v1053_v50  ;;  %v7907_v52 = vpop.f32.mrb[17].mxu1  ;;  %v8498_v50 = vld [vmem:[%s10779_s16] sm:$0xff]  }
 0x9a0   :  { %v1056_v53 = vpop.f32.mrb[18].mxu1  ;;  %7916 = vmatpush3.bf16.msra.mxu1 %v8498_v50  ;;  %v8500_v52 = vld [vmem:[%s10779_s16 + $0x10] sm:$0xff]  }
 0x9a1   :  { %v1061_v54 = vmul.f32 0.25, %v1056_v53  ;;  %v7908_v55 = vpop.f32.mrb[19].mxu1  ;;  %v1062_v57 = vadd.f32 %v1060_v51, %v9667_v56  ;;  %7917 = vmatprep.subr.bf16.mxu1 %v9314_v34  ;;  %v8499_v51 = vld [vmem:[%s10779_s16 + $0x8] sm:$0xff]  }
 0x9a2   :  { %v8501_v55 = vld [vmem:[%s10779_s16 + $0x18] sm:$0xff]  }
 0x9a3   :  { %v1064_v58 = vsel %vm656_vm1, %v1062_v57, -inf  ;;  %v1063_v59 = vadd.f32 %v1061_v54, %v9670_v60 }
 0x9a4   :  { %1065 = vmax.xlane.f32.xlu0 %v1064_v58  ;;  %7918 = vmatpush3.bf16.msra.mxu1 %v8499_v51  ;;  %v8510_v51 = vld [vmem:[%s10781_s1 + $0x24] ss:$8 sps:$4 sm:$0xff]  }
 0x9a5   :  { %v1067_v61 = vsel %vm656_vm1, %v1063_v59, -inf  ;;  %7919 = vmatprep.subr.bf16.mxu1 %v9314_v34 }
 0x9a6   :  { %1068 = vmax.xlane.f32.xlu1 %v1067_v61 }
 0x9a8   :  { %7920 = vmatpush3.bf16.msra.mxu1 %v8500_v52  ;;  %v8508_v52 = vld [vmem:[%s10781_s1 + $0x20] ss:$8 sps:$4 sm:$0xff]  }
 0x9a9   :  { %7921 = vmatprep.subr.bf16.mxu1 %v9314_v34 }
 0x9ac   :  { %7922 = vmatpush3.bf16.msra.mxu1 %v8501_v55  ;;  %v8516_v55 = vld [vmem:[%s10781_s1 + $0x44] ss:$8 sps:$4 sm:$0xff]  }
 0xa29   :  { %v946_v62 = vpop.xlane.xlu1 %945 }
 0xa2a   :  { %v950_v63 = vsub.f32 %v942_v40, %v946_v62 }
 0xa2b   :  { %v949_v2 = vpop.xlane.xlu0 %948 }
 0xa2c   :  { %v952_v3 = vmul.f32 1.442695, %v950_v63  ;;  %v951_v6 = vsub.f32 %v943_v43, %v949_v2 }
 0xa2e   :  { %8806 = vpow2.f32 %v952_v3  ;;  %v954_v9 = vmul.f32 1.442695, %v951_v6 }
 0xa30   :  { %8808 = vpow2.f32 %v954_v9 }
 0xa31   :  { %v1066_v10 = vpop.xlane.xlu0 %1065 }
 0xa32   :  { %v1070_v14 = vsub.f32 %v1062_v57, %v1066_v10 }
 0xa33   :  { %v1069_v15 = vpop.xlane.xlu1 %1068 }
 0xa34   :  { %v1072_v17 = vmul.f32 1.442695, %v1070_v14  ;;  %v1071_v19 = vsub.f32 %v1063_v59, %v1069_v15 }
 0xa36   :  { %8810 = vpow2.f32 %v1072_v17  ;;  %v1074_v22 = vmul.f32 1.442695, %v1071_v19 }
 0xa38   :  { %v8807_v23 = vpop.eup %8806  ;;  %8812 = vpow2.f32 %v1074_v22 }
 0xa39   :  { %v956_v25 = vsel %vm656_vm1, %v8807_v23, 0.0 }
 0xa3a   :  { %v8809_v26 = vpop.eup %8808  ;;  %957 = vadd.xlane.f32.xlu0 %v956_v25 }
 0xa3b   :  { %v959_v27 = vsel %vm656_vm1, %v8809_v26, 0.0 }
 0xa3c   :  { %960 = vadd.xlane.f32.xlu1 %v959_v27 }
 0xa40   :  { %v8811_v28 = vpop.eup %8810 }
 0xa41   :  { %v1076_v48 = vsel %vm656_vm1, %v8811_v28, 0.0 }
 0xa42   :  { %v8813_v31 = vpop.eup %8812  ;;  %1077 = vadd.xlane.f32.xlu0 %v1076_v48 }
 0xa43   :  { %v1079_v32 = vsel %vm656_vm1, %v8813_v31, 0.0 }
 0xa44   :  { %1080 = vadd.xlane.f32.xlu1 %v1079_v32 }
 0xa55   :  { %1087 = vrot.lane.b32.xlu1 %v9653_v49, %s9318_s12 }
 0xa58   :  { %967 = vrot.lane.b32.xlu0 %v9653_v49, %s9319_s20 }
 0xa59   :  { %8378 = vrot.lane.b32.xlu1 %v8377_v33, %s9298_s0 }
 0xac7   :  { %v958_v11 = vpop.xlane.xlu0 %957 }
 0xac8   :  { %8814 = vrcp.f32 %v958_v11 }
 0xac9   :  { %v961_v12 = vpop.xlane.xlu1 %960 }
 0xaca   :  { %8816 = vrcp.f32 %v961_v12 }
 0xacf   :  { %v1078_v13 = vpop.xlane.xlu0 %1077 }
 0xad0   :  { %8818 = vrcp.f32 %v1078_v13 }
 0xad1   :  { %v1081_v29 = vpop.xlane.xlu1 %1080 }
 0xad2   :  { %v8815_v30 = vpop.eup %8814  ;;  %8820 = vrcp.f32 %v1081_v29 }
 0xad3   :  { %v968_v35 = vpop.permute.xlu0 %967  ;;  %v964_v37 = vmul.f32 %v8815_v30, %v8807_v23 }
 0xad4   :  { %v8817_v36 = vpop.eup %8816  ;;  %7898 = vmatpush3.bf16.msra.mxu0 %v968_v35 }
 0xad5   :  { %v965_v38 = vmul.f32 %v8817_v36, %v8809_v26  ;;  %7909 = vmatprep.subr.bf16.mxu0 %v9314_v34  ;;  %v1088_v33 = vpop.permute.xlu1 %1087 }
 0xad7   :  { %v966_v49 = vpack.c.bf16 %v965_v38, %v964_v37  ;;  %v8502_v37 = vld [vmem:[%s10781_s1] ss:$8 sps:$4 sm:$0xff]   ;;  %v8504_v38 = vld [vmem:[%s10781_s1 + $0x4] ss:$8 sps:$4 sm:$0xff]  }
 0xad9   :  { %7900 = vmatmul.mubr.msk.bf16.vlgmr.msra.gmra.mrb[8].mxu0 %vm656_vm1, %v966_v49  ;;  %v8379_v6 = vpop.permute.xlu1 %8378  ;;  %v8507_v49 = vld [vmem:[%s10781_s1 + $0x14] ss:$8 sps:$4 sm:$0xff]  }
 0xada   :  { %v8819_v39 = vpop.eup %8818  ;;  %7910 = vmatpush3.bf16.msra.mxu0 %v1088_v33  ;;  %7911 = vmatprep.mubr.msk.bf16.mxu0 %vm9316_vm0, %v9314_v34  ;;  %v8381_v10 = vunpack.i.h.bf16 %v8379_v6  ;;  %v8380_v14 = vunpack.i.l.bf16 %v8379_v6  ;;  %v8505_v33 = vld [vmem:[%s10781_s1 + $0x10] ss:$8 sps:$4 sm:$0xff]   ;;  %v8527_v6 = vld [vmem:[%s10782_s17] sm:$0xff]  }
 0xadb   :  { %v1084_v41 = vmul.f32 %v8819_v39, %v8811_v28  ;;  %1370 = vmatprep.subr.bf16.mxu0 %v8504_v38 }
 0xadc   :  { %v8821_v40 = vpop.eup %8820  ;;  %v1159_v22 = vsel %vm656_vm1, %v9704_v46, %v8381_v10  ;;  %v1158_v23 = vsel %vm656_vm1, %v9702_v42, %v8380_v14  ;;  %v7133_v46 = vld [vmem:[%s10780_s21] ss:$0 sm:$0xff]  ;;  %v8529_v10 = vld [vmem:[%s10782_s17 + $0x8] sm:$0xff]   ;;  %v8530_v14 = vld [vmem:[%s10782_s17 + $0x50] sm:$0xff]  }
 0xadd   :  { %v1085_v43 = vmul.f32 %v8821_v40, %v8813_v31 }
 0xadf   :  { %v1086_v47 = vpack.c.bf16 %v1085_v43, %v1084_v41 }
 0xae1   :  { %7912 = vmatmul.mubr.msk.bf16.vlgmr.msra.gmra.mrb[12].mxu0 %vm656_vm1, %v1086_v47 }
 0xae2   :  { %1402 = vmatprep.mubr.bf16.mxu0 %v9311_v1  ;;  %1371 = vmatpush1.bf16.msra.mxu0 %v8502_v37 }
 0xae3   :  { %1372 = vmatprep.subr.bf16.mxu0 %v8507_v49 }
 0xae6   :  { %1373 = vmatpush1.bf16.msra.mxu0 %v8505_v33 }
 0xae7   :  { %1374 = vmatprep.subr.bf16.mxu0 %v8510_v51 }
 0xaea   :  { %1375 = vmatpush1.bf16.msra.mxu0 %v8508_v52 }
 0xbac   :  { %v1007_v53 = vpop.f32.mrb[8].mxu0 }
 0xbad   :  { %v7901_v54 = vpop.f32.mrb[9].mxu0 }
 0xbae   :  { %v1010_v57 = vpop.f32.mrb[10].mxu0  ;;  %v8511_v54 = vld [vmem:[%s10781_s1 + $0x30] ss:$8 sps:$4 sm:$0xff]  }
 0xbaf   :  { %v8382_v58 = vpack.i.bf16 %v1010_v57, %v1007_v53  ;;  %v7902_v59 = vpop.f32.mrb[11].mxu0  ;;  %v8513_v53 = vld [vmem:[%s10781_s1 + $0x34] ss:$8 sps:$4 sm:$0xff]   ;;  %v8514_v57 = vld [vmem:[%s10781_s1 + $0x40] ss:$8 sps:$4 sm:$0xff]  }
 0xbb0   :  { %1376 = vmatprep.subr.bf16.mxu0 %v8513_v53  ;;  %v8517_v59 = vld [vmem:[%s10781_s1 + $0x50] ss:$8 sps:$4 sm:$0xff]  }
 0xbb1   :  { %8383 = vrot.lane.b32.xlu1 %v8382_v58, %s9304_s22  ;;  %1377 = vmatpush1.bf16.msra.mxu0 %v8511_v54  ;;  %v8519_v58 = vld [vmem:[%s10781_s1 + $0x54] ss:$8 sps:$4 sm:$0xff]  }
 0xbb2   :  { %1378 = vmatprep.subr.bf16.mxu0 %v8516_v55 }
 0xbb4   :  { %v1127_v61 = vpop.f32.mrb[12].mxu0 }
 0xbb5   :  { %v7913_v62 = vpop.f32.mrb[13].mxu0  ;;  %1379 = vmatpush1.bf16.msra.mxu0 %v8514_v57 }
 0xbb6   :  { %v1130_v63 = vpop.f32.mrb[14].mxu0  ;;  %1380 = vmatprep.subr.bf16.mxu0 %v8519_v58  ;;  %v8520_v62 = vld [vmem:[%s10781_s1 + $0x60] ss:$8 sps:$4 sm:$0xff]  }
 0xbb7   :  { %v8387_v2 = vpack.i.bf16 %v1130_v63, %v1127_v61  ;;  %v7914_v3 = vpop.f32.mrb[15].mxu0  ;;  %v8522_v61 = vld [vmem:[%s10781_s1 + $0x64] ss:$8 sps:$4 sm:$0xff]   ;;  %v8525_v63 = vld [vmem:[%s10781_s1 + $0x74] ss:$8 sps:$4 sm:$0xff]  }
 0xbb8   :  { %v8526_v3 = vld [vmem:[%s10782_s17 + $0x40] sm:$0xff]  }
 0xbb9   :  { %8388 = vrot.lane.b32.xlu0 %v8387_v2, %s9320_s28  ;;  %1381 = vmatpush1.bf16.msra.mxu0 %v8517_v59  ;;  %v8523_v2 = vld [vmem:[%s10781_s1 + $0x70] ss:$8 sps:$4 sm:$0xff]  }
 0xbba   :  { %1382 = vmatprep.subr.bf16.mxu0 %v8522_v61  ;;  %7638 = vmatprep.subr.bf16.mxu1 %v8526_v3 }
 0xbbd   :  { %1383 = vmatpush1.bf16.msra.mxu0 %v8520_v62 }
 0xbbe   :  { %1384 = vmatprep.subr.bf16.mxu0 %v8525_v63 }
 0xbc1   :  { %1385 = vmatpush1.bf16.msra.mxu0 %v8523_v2 }
 0xc23   :  { %v8384_v9 = vpop.permute.xlu1 %8383 }
 0xc24   :  { %v8386_v15 = vunpack.i.h.bf16 %v8384_v9  ;;  %v8385_v17 = vunpack.i.l.bf16 %v8384_v9  ;;  %v8528_v9 = vld [vmem:[%s10782_s17 + $0x48] sm:$0xff]  }
 0xc26   :  { %v1161_v27 = vsel %vm1160_vm2, %v1158_v23, %v8385_v17  ;;  %v1162_v28 = vsel %vm1160_vm2, %v1159_v22, %v8386_v15  ;;  %v8531_v15 = vld [vmem:[%s10782_s17 + $0x10] sm:$0xff]   ;;  %v8532_v17 = vld [vmem:[%s10782_s17 + $0x58] sm:$0xff]   ;;  %v8534_v22 = vld [vmem:[%s10782_s17 + $0x60] sm:$0xff]  }
 0xc27   :  { %v8535_v23 = vld [vmem:[%s10782_s17 + $0x20] sm:$0xff]  }
 0xc2b   :  { %v8389_v19 = vpop.permute.xlu0 %8388 }
 0xc2c   :  { %v8391_v25 = vunpack.i.h.bf16 %v8389_v19  ;;  %v8390_v26 = vunpack.i.l.bf16 %v8389_v19  ;;  %v8533_v19 = vld [vmem:[%s10782_s17 + $0x18] sm:$0xff]  }
 0xc2e   :  { %v1164_v48 = vsel %vm1163_vm3, %v1161_v27, %v8390_v26  ;;  %v1165_v31 = vsel %vm1163_vm3, %v1162_v28, %v8391_v25  ;;  %v8536_v25 = vld [vmem:[%s10782_s17 + $0x68] sm:$0xff]  }
 0xc2f   :  { %v1166_v32 = vpack.c.bf16 %v1165_v31, %v1164_v48 }
 0xc31   :  { %7924 = vmatmul.mubr.msk.bf16.vlgmr.msra.gmra.mrb[20].mxu1 %vm1197_vm4, %v1166_v32 }
 0xc32   :  { %7639 = vmatpush3.bf16.msra.mxu1 %v8527_v6  ;;  %v7155_v6 = vld [vmem:[#allocation5] ss:$0 sm:$0xff] }
 0xc33   :  { %7640 = vmatprep.subr.bf16.mxu1 %v8528_v9 }
 0xc36   :  { %7641 = vmatpush3.bf16.msra.mxu1 %v8529_v10 }
 0xc37   :  { %7642 = vmatprep.subr.bf16.mxu1 %v8530_v14 }
 0xc3a   :  { %7643 = vmatpush3.bf16.msra.mxu1 %v8531_v15 }
 0xc3b   :  { %7644 = vmatprep.subr.bf16.mxu1 %v8532_v17 }
 0xc3e   :  { %7645 = vmatpush3.bf16.msra.mxu1 %v8533_v19 }
 0xc3f   :  { %7646 = vmatprep.subr.bf16.mxu1 %v8534_v22 }
 0xc42   :  { %7647 = vmatpush3.bf16.msra.mxu1 %v8535_v23 }
 0xc43   :  { %7648 = vmatprep.subr.bf16.mxu1 %v8536_v25 }
 0xd04   :  { %v1235_v42 = vpop.f32.mrb[20].mxu1 }
 0xd05   :  { %v1236_v11 = vadd.f32 %v7133_v46, %v1235_v42  ;;  %v7925_v12 = vpop.f32.mrb[21].mxu1 }
 0xd06   :  { %v1238_v13 = vpop.f32.mrb[22].mxu1 }
 0xd07   :  { %v9773_v29 = vadd.f32 %v1236_v11, %v9610_v44  ;;  %v1239_v30 = vadd.f32 %v7133_v46, %v1238_v13  ;;  %v7926_v35 = vpop.f32.mrb[23].mxu1  ;;  %v1269_v46 = vrot.slane %v9635_v20, %v9600_v16  ;;  %v1275_v11 = vrot.slane %v9638_v21, %v9600_v16  ;;  %v8537_v20 = vld [vmem:[%s10782_s17 + $0x28] sm:$0xff]   ;;  %v8539_v21 = vld [vmem:[%s10782_s17 + $0x30] sm:$0xff]  }
 0xd08   :  { %7649 = vmatpush3.bf16.msra.mxu1 %v8537_v20  ;;  %v8557_v20 = vld [vmem:[%s9397_s6 + $0xd0] ss:$8 sps:$4 sm:$0xff]  }
 0xd09   :  { %v9776_v36 = vadd.f32 %v1239_v30, %v9612_v45  ;;  %1244 = vadd.xlane.f32.xlu1 %v9773_v29 }
 0xd0b   :  { %1246 = vadd.xlane.f32.xlu0 %v9776_v36 }
 0xd96   :  { %v1245_v44 = vpop.xlane.xlu1 %1244 }
 0xd97   :  { %v1248_v39 = vmul.f32 0.0078125, %v1245_v44  ;;  %v8538_v44 = vld [vmem:[%s10782_s17 + $0x70] sm:$0xff]  }
 0xd98   :  { %v1247_v45 = vpop.xlane.xlu0 %1246  ;;  %7650 = vmatprep.subr.bf16.mxu1 %v8538_v44  ;;  %v8562_v44 = vld [vmem:[%s9397_s6 + $0xe4] ss:$8 sps:$4 sm:$0xff]  }
 0xd99   :  { %v1249_v40 = vmul.f32 0.0078125, %v1247_v45  ;;  %v9785_v41 = vsub.f32 %v9773_v29, %v1248_v39  ;;  %7651 = vmatpush3.bf16.msra.mxu1 %v8539_v21  ;;  %v8540_v39 = vld [vmem:[%s10782_s17 + $0x78] sm:$0xff]   ;;  %v8560_v21 = vld [vmem:[%s9397_s6 + $0xe0] ss:$8 sps:$4 sm:$0xff]  }
 0xd9a   :  { %v8541_v45 = vld [vmem:[%s10782_s17 + $0x38] sm:$0xff]   ;;  %7652 = vmatprep.subr.bf16.mxu1 %v8540_v39 }
 0xd9b   :  { %v1252_v43 = vmul.f32 %v9785_v41, %v9785_v41  ;;  %v9790_v47 = vsub.f32 %v9776_v36, %v1249_v40  ;;  %v406_v40 = vld [vmem:[%s10783_s2] sm:$0x3]  ;;  %v8565_v39 = vld [vmem:[%s9397_s6 + $0xf4] ss:$8 sps:$4 sm:$0xff]  }
 0xd9d   :  { %1254 = vadd.xlane.f32.xlu0 %v1252_v43  ;;  %v1253_v50 = vmul.f32 %v9790_v47, %v9790_v47  ;;  %7653 = vmatpush3.bf16.msra.mxu1 %v8541_v45  ;;  %v1287_v43 = vrot.slane %v406_v40, %v9600_v16  ;;  %v8563_v45 = vld [vmem:[%s9397_s6 + $0xf0] ss:$8 sps:$4 sm:$0xff]  }
 0xd9e   :  { %7927 = vmatprep.subr.bf16.mxu1 %v9314_v34 }
 0xda1   :  { %1256 = vadd.xlane.f32.xlu0 %v1253_v50 }
 0xe2a   :  { %v1255_v26 = vpop.xlane.xlu0 %1254 }
 0xe2b   :  { %v1258_v27 = vmul.f32 0.0078125, %v1255_v26  ;;  %v8542_v26 = vld [vmem:[%s9397_s6 + $0x80] ss:$8 sps:$4 sm:$0xff]  }
 0xe2d   :  { %v1260_v28 = vadd.f32 1e-05, %v1258_v27  ;;  %v8544_v27 = vld [vmem:[%s9397_s6 + $0x84] ss:$8 sps:$4 sm:$0xff]  }
 0xe2e   :  { %v1257_v48 = vpop.xlane.xlu0 %1256  ;;  %1778 = vmatprep.subr.bf16.mxu0 %v8544_v27 }
 0xe2f   :  { %8822 = vrsqrt.f32 %v1260_v28  ;;  %v1259_v31 = vmul.f32 0.0078125, %v1257_v48  ;;  %v8547_v28 = vld [vmem:[%s9397_s6 + $0x94] ss:$8 sps:$4 sm:$0xff]   ;;  %v8545_v48 = vld [vmem:[%s9397_s6 + $0x90] ss:$8 sps:$4 sm:$0xff]  }
 0xe31   :  { %v1261_v32 = vadd.f32 1e-05, %v1259_v31 }
 0xe33   :  { %8824 = vrsqrt.f32 %v1261_v32 }
 0xe39   :  { %v8823_v42 = vpop.eup %8822 }
 0xe3a   :  { %v1264_v12 = vmul.f32 %v8823_v42, %v9785_v41  ;;  %v1283_v41 = vrot.slane %v406_v40, %v9592_v8 }
 0xe3c   :  { %v1270_v13 = vmul.f32 %v1269_v46, %v1264_v12 }
 0xe3d   :  { %v8825_v30 = vpop.eup %8824 }
 0xe3e   :  { %v1265_v35 = vmul.f32 %v8825_v30, %v9790_v47  ;;  %v1276_v37 = vadd.f32 %v1275_v11, %v1270_v13  ;;  %v8550_v13 = vld [vmem:[%s9397_s6 + $0xa4] ss:$8 sps:$4 sm:$0xff]   ;;  %v8548_v30 = vld [vmem:[%s9397_s6 + $0xa0] ss:$8 sps:$4 sm:$0xff]  }
 0xe40   :  { %v1271_v38 = vmul.f32 %v1269_v46, %v1265_v35  ;;  %v8553_v35 = vld [vmem:[%s9397_s6 + $0xb4] ss:$8 sps:$4 sm:$0xff]  }
 0xe42   :  { %v1277_v49 = vadd.f32 %v1275_v11, %v1271_v38  ;;  %v8556_v38 = vld [vmem:[%s9397_s6 + $0xc4] ss:$8 sps:$4 sm:$0xff]  }
 0xe44   :  { %v1278_v33 = vpack.c.bf16 %v1277_v49, %v1276_v37  ;;  %v8551_v37 = vld [vmem:[%s9397_s6 + $0xb0] ss:$8 sps:$4 sm:$0xff]   ;;  %v8554_v49 = vld [vmem:[%s9397_s6 + $0xc0] ss:$8 sps:$4 sm:$0xff]  }
 0xe46   :  { %1403 = vmatmul.mubr.bf16.vlgmr.msra.gmra.mrb[16].mxu0 %v1278_v33  ;;  %v8559_v33 = vld [vmem:[%s9397_s6 + $0xd4] ss:$8 sps:$4 sm:$0xff]   ;;  %s10786_s6 = sld [smem:[#allocation25_spill]] }
 0xe47   :  { %1810 = vmatprep.mubr.bf16.mxu0 %v9311_v1  ;;  %1779 = vmatpush1.bf16.msra.mxu0 %v8542_v26 }
 0xe48   :  { %1780 = vmatprep.subr.bf16.mxu0 %v8547_v28 }
 0xe4b   :  { %1781 = vmatpush1.bf16.msra.mxu0 %v8545_v48 }
 0xe4c   :  { %1782 = vmatprep.subr.bf16.mxu0 %v8550_v13 }
 0xe4f   :  { %1783 = vmatpush1.bf16.msra.mxu0 %v8548_v30 }
 0xe50   :  { %1784 = vmatprep.subr.bf16.mxu0 %v8553_v35 }
 0xe53   :  { %1785 = vmatpush1.bf16.msra.mxu0 %v8551_v37 }
 0xe54   :  { %1786 = vmatprep.subr.bf16.mxu0 %v8556_v38 }
 0xe57   :  { %1787 = vmatpush1.bf16.msra.mxu0 %v8554_v49 }
 0xe58   :  { %1788 = vmatprep.subr.bf16.mxu0 %v8559_v33 }
 0xe5b   :  { %1789 = vmatpush1.bf16.msra.mxu0 %v8557_v20 }
 0xe5c   :  { %1790 = vmatprep.subr.bf16.mxu0 %v8562_v44 }
 0xe5f   :  { %1791 = vmatpush1.bf16.msra.mxu0 %v8560_v21 }
 0xe60   :  { %1792 = vmatprep.subr.bf16.mxu0 %v8565_v39 }
 0xe63   :  { %1793 = vmatpush1.bf16.msra.mxu0 %v8563_v45 }
 0xe64   :  { %7945 = vmatprep.subr.bf16.mxu0 %v9314_v34 }
 0xf19   :  { %v1404_v47 = vpop.f32.mrb[16].mxu0 }
 0xf1a   :  { %v1405_v50 = vadd.f32 %v1404_v47, %v1283_v41  ;;  %v1406_v51 = vpop.f32.mrb[17].mxu0 }
 0xf1b   :  { %v1407_v52 = vadd.f32 %v1406_v51, %v1287_v43  ;;  %v1408_v53 = vpop.f32.mrb[18].mxu0 }
 0xf1c   :  { %v1409_v54 = vadd.f32 %v1408_v53, %v1283_v41  ;;  %v1410_v55 = vpop.f32.mrb[19].mxu0  ;;  %v1413_v58 = vmax.f32 %v1405_v50, 0.0 }
 0xf1d   :  { %v1411_v57 = vadd.f32 %v1410_v55, %v1287_v43  ;;  %v1414_v61 = vmax.f32 %v1407_v52, 0.0  ;;  %v9863_v52 = vld [vmem:[%s9387_s24 + $0x2] sm:$0x3]  ;;  %s10784_s24 = sld [smem:[#allocation24_spill]] }
 0xf1e   :  { %v1415_v59 = vmax.f32 %v1409_v54, 0.0  ;;  %v1677_v53 = vrot.slane %v9863_v52, %v9592_v8  ;;  %v9868_v55 = vld [vmem:[%s9392_s30 + $0x2] sm:$0x3]  ;;  %s10785_s30 = sld [smem:[#allocation29_spill]] }
 0xf1f   :  { %v1416_v62 = vmax.f32 %v1411_v57, 0.0 }
 0xf20   :  { %v1417_v63 = vpack.c.bf16 %v1415_v59, %v1413_v58 }
 0xf21   :  { %v1418_v2 = vpack.c.bf16 %v1416_v62, %v1414_v61  ;;  %v1683_v62 = vrot.slane %v9868_v55, %v9592_v8 }
 0xf23   :  { %1553 = vmatprep.mubr.bf16.mxu1 %v1418_v2 }
 0xf24   :  { %1554 = vmatmul.mubr.bf16.vlgmr.msra.gmra.mrb[24].mxu1 %v1417_v63 }
 0xf25   :  { %7929 = vmatprep.mubr.msk.bf16.mxu1 %vm9316_vm0, %v9314_v34 }
 0xff7   :  { %v7654_v3 = vpop.f32.mrb[24].mxu1 }
 0xff8   :  { %v7655_v9 = vpop.f32.mrb[25].mxu1 }
 0xff9   :  { %v7656_v10 = vadd.f32 %v7655_v9, %v7654_v3  ;;  %v7657_v14 = vpop.f32.mrb[26].mxu1  ;;  %v7190_v9 = vld [vmem:[%s10777_s5 + $0x2] sm:$0x3] }
 0xffa   :  { %v7658_v15 = vpop.f32.mrb[27].mxu1 }
 0xffb   :  { %v1556_v17 = vadd.f32 %v7656_v10, %v7155_v6  ;;  %v7659_v19 = vadd.f32 %v7658_v15, %v7657_v14  ;;  %v1691_v10 = vrot.slane %v7190_v9, %v9592_v8  ;;  %v1695_v15 = vrot.slane %v7190_v9, %v9600_v16 }
 0xffd   :  { %v1559_v22 = vadd.f32 %v7659_v19, %v7155_v6  ;;  %v9836_v23 = vadd.f32 %v1556_v17, %v9773_v29 }
 0xfff   :  { %1652 = vadd.xlane.f32.xlu1 %v9836_v23  ;;  %v9840_v25 = vadd.f32 %v1559_v22, %v9776_v36 }
0x1001   :  { %1654 = vadd.xlane.f32.xlu0 %v9840_v25 }
0x108c   :  { %v1653_v29 = vpop.xlane.xlu1 %1652 }
0x108d   :  { %v1656_v31 = vmul.f32 0.0078125, %v1653_v29 }
0x108e   :  { %v1655_v32 = vpop.xlane.xlu0 %1654 }
0x108f   :  { %v1657_v36 = vmul.f32 0.0078125, %v1655_v32  ;;  %v1658_v46 = vsub.f32 %v9836_v23, %v1656_v31 }
0x1091   :  { %v1659_v42 = vsub.f32 %v9840_v25, %v1657_v36  ;;  %v1660_v11 = vmul.f32 %v1658_v46, %v1658_v46 }
0x1093   :  { %1662 = vadd.xlane.f32.xlu1 %v1660_v11  ;;  %v1661_v12 = vmul.f32 %v1659_v42, %v1659_v42 }
0x1095   :  { %1664 = vadd.xlane.f32.xlu0 %v1661_v12 }
0x1120   :  { %v1663_v40 = vpop.xlane.xlu1 %1662 }
0x1121   :  { %v1666_v41 = vmul.f32 0.0078125, %v1663_v40 }
0x1122   :  { %v1665_v43 = vpop.xlane.xlu0 %1664 }
0x1123   :  { %v1668_v47 = vadd.f32 1e-05, %v1666_v41  ;;  %v1667_v50 = vmul.f32 0.0078125, %v1665_v43 }
0x1125   :  { %8826 = vrsqrt.f32 %v1668_v47  ;;  %v1669_v51 = vadd.f32 1e-05, %v1667_v50 }
0x1127   :  { %8828 = vrsqrt.f32 %v1669_v51 }
0x112f   :  { %v8827_v54 = vpop.eup %8826 }
0x1130   :  { %v1672_v57 = vmul.f32 %v8827_v54, %v1658_v46 }
0x1131   :  { %v8829_v58 = vpop.eup %8828 }
0x1132   :  { %v1673_v59 = vmul.f32 %v8829_v58, %v1659_v42  ;;  %v1678_v61 = vmul.f32 %v1677_v53, %v1672_v57 }
0x1134   :  { %v1679_v63 = vmul.f32 %v1677_v53, %v1673_v59  ;;  %v1684_v2 = vadd.f32 %v1683_v62, %v1678_v61 }
0x1136   :  { %v1685_v3 = vadd.f32 %v1683_v62, %v1679_v63 }
0x1138   :  { %v1686_v6 = vpack.c.bf16 %v1685_v3, %v1684_v2 }
0x113a   :  { %1811 = vmatmul.mubr.bf16.vlgmr.msra.gmra.mrb[20].mxu0 %v1686_v6 }
0x113b   :  { %7947 = vmatprep.mubr.msk.bf16.mxu0 %vm9316_vm0, %v9314_v34 }
0x120d   :  { %v1812_v14 = vpop.f32.mrb[20].mxu0 }
0x120e   :  { %v1813_v17 = vadd.f32 %v1812_v14, %v1691_v10  ;;  %v1814_v19 = vpop.f32.mrb[21].mxu0 }
0x120f   :  { %v1816_v22 = vpop.f32.mrb[22].mxu0  ;;  %v1815_v28 = vadd.f32 %v1814_v19, %v1695_v15 }
0x1210   :  { %v1817_v26 = vadd.f32 %v1816_v22, %v1691_v10  ;;  %v1818_v27 = vpop.f32.mrb[23].mxu0  ;;  %1825 = vrot.lane.b32.xlu1 %v1813_v17, %s9315_s13 }
0x1211   :  { %v1819_v48 = vadd.f32 %v1818_v27, %v1695_v15 }
0x1212   :  { %v1821_v29 = vpack.c.bf16 %v1817_v26, %v1813_v17  ;;  %1827 = vrot.lane.b32.xlu0 %v1817_v26, %s9315_s13 }
0x1213   :  { %v9879_v31 = vpack.c.bf16 %v1819_v48, %v1815_v28 }
0x1282   :  { %v1826_v32 = vpop.permute.xlu1 %1825 }
0x1283   :  { %1831 = vxpose.xlu1.b32.start [1/2] (short) (narrow) %v1826_v32, 64 }
0x1284   :  { %v1828_v36 = vpop.permute.xlu0 %1827 }
0x1287   :  { %1832 = vxpose.xlu1.b32.end [2/2] (short) (narrow) %v1828_v36, 64 }
0x12a5   :  { %8407 = vset.pattern.permute.xlu1 %v9311_v1 }
0x1303   :  { %v1847_v46 = vpop.trf.xlu1 }
0x1307   :  { %v1848_v42 = vpop.trf.xlu1 }
0x1308   :  { %v1863_v11 = vpack.c.bf16 %v1848_v42, %v1847_v46 }
0x130a   :  { %7928 = vmatpush3.bf16.msra.mxu1 %v1863_v11 }
0x130b   :  { %7933 = vmatprep.subr.bf16.mxu1 %v9314_v34 }
0x130d   :  { %7930 = vmatmul.mubr.msk.bf16.vlgmr.msra.gmra.mrb[28].mxu1 %vm656_vm1, %v1821_v29 }
0x130e   :  { %7934 = vmatpush3.bf16.msra.mxu1 %v9879_v31  ;;  %7935 = vmatprep.mubr.msk.bf16.mxu1 %vm9316_vm0, %v9314_v34 }
0x130f   :  { %7939 = vmatprep.subr.bf16.mxu1 %v9314_v34 }
0x13e0   :  { %v1904_v12 = vpop.f32.mrb[28].mxu1 }
0x13e1   :  { %v1911_v13 = vmul.f32 0.25, %v1904_v12  ;;  %v7931_v30 = vpop.f32.mrb[29].mxu1  ;;  %v9018_v12 = vld [vmem:[%s10778_s3] sm:$0xff] }
0x13e2   :  { %v1907_v35 = vpop.f32.mrb[30].mxu1 }
0x13e3   :  { %v1912_v37 = vmul.f32 0.25, %v1907_v35  ;;  %v7932_v38 = vpop.f32.mrb[31].mxu1  ;;  %v1913_v49 = vadd.f32 %v1911_v13, %v9667_v56  ;;  %v9019_v35 = vld [vmem:[%s10778_s3 + $0x8] sm:$0xff] }
0x13e5   :  { %v1915_v33 = vsel %vm656_vm1, %v1913_v49, -inf  ;;  %v1914_v20 = vadd.f32 %v1912_v37, %v9670_v60  ;;  %v1849_v60 = vpop.trf.xlu1 }
0x13e6   :  { %1916 = vmax.xlane.f32.xlu0 %v1915_v33 }
0x13e7   :  { %v1918_v44 = vsel %vm656_vm1, %v1914_v20, -inf }
0x13e9   :  { %v1850_v53 = vpop.trf.xlu1 }
0x13ea   :  { %1919 = vmax.xlane.f32.xlu0 %v1918_v44  ;;  %v1864_v10 = vpack.c.bf16 %v1850_v53, %v1849_v60 }
0x13ed   :  { %v1851_v54 = vpop.trf.xlu1 }
0x13f1   :  { %v1852_v57 = vpop.trf.xlu1 }
0x13f2   :  { %v1865_v14 = vpack.c.bf16 %v1852_v57, %v1851_v54 }
0x13f5   :  { %v1853_v58 = vpop.trf.xlu1 }
0x13f9   :  { %v1854_v59 = vpop.trf.xlu1 }
0x13fa   :  { %v1866_v17 = vpack.c.bf16 %v1854_v59, %v1853_v58 }
0x1473   :  { %v1917_v21 = vpop.xlane.xlu0 %1916 }
0x1474   :  { %v1921_v39 = vsub.f32 %v1913_v49, %v1917_v21 }
0x1476   :  { %v1923_v45 = vmul.f32 1.442695, %v1921_v39 }
0x1477   :  { %v1920_v40 = vpop.xlane.xlu0 %1919 }
0x1478   :  { %8830 = vpow2.f32 %v1923_v45  ;;  %v1922_v41 = vsub.f32 %v1914_v20, %v1920_v40 }
0x147a   :  { %v1925_v43 = vmul.f32 1.442695, %v1922_v41 }
0x147c   :  { %8832 = vpow2.f32 %v1925_v43 }
0x1482   :  { %v8831_v47 = vpop.eup %8830 }
0x1483   :  { %v1927_v50 = vsel %vm656_vm1, %v8831_v47, 0.0 }
0x1484   :  { %1928 = vadd.xlane.f32.xlu0 %v1927_v50 }
0x1486   :  { %v8833_v56 = vpop.eup %8832 }
0x1487   :  { %v1930_v51 = vsel %vm656_vm1, %v8833_v56, 0.0 }
0x1488   :  { %1931 = vadd.xlane.f32.xlu1 %v1930_v51 }
0x149a   :  { %1983 = vrot.lane.b32.xlu0 %v1821_v29, %s9317_s8 }
0x149e   :  { %2104 = vrot.lane.b32.xlu0 %v1821_v29, %s9319_s20 }
0x14a2   :  { %2224 = vrot.lane.b32.xlu0 %v1821_v29, %s9318_s12 }
0x1511   :  { %v1929_v61 = vpop.xlane.xlu0 %1928 }
0x1512   :  { %8834 = vrcp.f32 %v1929_v61 }
0x1515   :  { %v1932_v62 = vpop.xlane.xlu1 %1931  ;;  %v1984_v15 = vpop.permute.xlu0 %1983 }
0x1516   :  { %8836 = vrcp.f32 %v1932_v62 }
0x1519   :  { %v2105_v19 = vpop.permute.xlu0 %2104 }
0x151c   :  { %v8835_v63 = vpop.eup %8834 }
0x151d   :  { %v1935_v3 = vmul.f32 %v8835_v63, %v8831_v47  ;;  %v2225_v22 = vpop.permute.xlu0 %2224 }
0x1520   :  { %v8837_v2 = vpop.eup %8836 }
0x1521   :  { %v1936_v6 = vmul.f32 %v8837_v2, %v8833_v56 }
0x1523   :  { %v1937_v9 = vpack.c.bf16 %v1936_v6, %v1935_v3 }
0x1525   :  { %7936 = vmatmul.mubr.msk.bf16.vlgmr.msra.gmra.mrb[32].mxu1 %vm656_vm1, %v1937_v9 }
0x1526   :  { %7940 = vmatpush3.bf16.msra.mxu1 %v1864_v10  ;;  %7941 = vmatprep.mubr.msk.bf16.mxu1 %vm9316_vm0, %v9314_v34 }
0x1527   :  { %7951 = vmatprep.subr.bf16.mxu1 %v9314_v34 }
0x152d   :  { %7942 = vmatmul.mubr.msk.bf16.vlgmr.msra.gmra.mrb[36].mxu1 %vm656_vm1, %v1984_v15 }
0x152e   :  { %7952 = vmatpush3.bf16.msra.mxu1 %v1865_v14  ;;  %7953 = vmatprep.mubr.msk.bf16.mxu1 %vm9316_vm0, %v9314_v34 }
0x152f   :  { %7963 = vmatprep.subr.bf16.mxu1 %v9314_v34 }
0x1535   :  { %7954 = vmatmul.mubr.msk.bf16.vlgmr.msra.gmra.mrb[40].mxu1 %vm656_vm1, %v2105_v19 }
0x1536   :  { %7964 = vmatpush3.bf16.msra.mxu1 %v1866_v17  ;;  %7965 = vmatprep.mubr.msk.bf16.mxu1 %vm9316_vm0, %v9314_v34 }
0x1537   :  { %7975 = vmatprep.subr.bf16.mxu1 %v9314_v34 }
0x153d   :  { %7966 = vmatmul.mubr.msk.bf16.vlgmr.msra.gmra.mrb[44].mxu1 %vm656_vm1, %v2225_v22 }
0x153e   :  { %7983 = vmatprep.mubr.msk.bf16.mxu1 %vm9316_vm0, %v9314_v34 }
0x15f8   :  { %v9912_v26 = vpop.f32.mrb[32].mxu1 }
0x15f9   :  { %v7937_v27 = vpop.f32.mrb[33].mxu1 }
0x15fa   :  { %v9914_v28 = vpop.f32.mrb[34].mxu1 }
0x15fb   :  { %v7938_v48 = vpop.f32.mrb[35].mxu1 }
0x1600   :  { %v2022_v29 = vpop.f32.mrb[36].mxu1 }
0x1601   :  { %v2029_v32 = vmul.f32 0.25, %v2022_v29  ;;  %v7943_v36 = vpop.f32.mrb[37].mxu1 }
0x1602   :  { %v2025_v46 = vpop.f32.mrb[38].mxu1 }
0x1603   :  { %v2030_v42 = vmul.f32 0.25, %v2025_v46  ;;  %v7944_v11 = vpop.f32.mrb[39].mxu1  ;;  %v2031_v13 = vadd.f32 %v9018_v12, %v2029_v32 }
0x1605   :  { %v2033_v30 = vsel %vm656_vm1, %v2031_v13, -inf  ;;  %v2032_v37 = vadd.f32 %v9019_v35, %v2030_v42 }
0x1606   :  { %2034 = vmax.xlane.f32.xlu0 %v2033_v30 }
0x1607   :  { %v2036_v38 = vsel %vm656_vm1, %v2032_v37, -inf }
0x1608   :  { %2037 = vmax.xlane.f32.xlu1 %v2036_v38  ;;  %v2143_v49 = vpop.f32.mrb[40].mxu1 }
0x1609   :  { %v2150_v33 = vmul.f32 0.25, %v2143_v49  ;;  %v7955_v20 = vpop.f32.mrb[41].mxu1 }
0x160a   :  { %v2146_v44 = vpop.f32.mrb[42].mxu1 }
0x160b   :  { %v2151_v21 = vmul.f32 0.25, %v2146_v44  ;;  %v7956_v39 = vpop.f32.mrb[43].mxu1  ;;  %v2152_v45 = vadd.f32 %v9018_v12, %v2150_v33 }
0x160d   :  { %v2154_v40 = vsel %vm656_vm1, %v2152_v45, -inf  ;;  %v2153_v41 = vadd.f32 %v9019_v35, %v2151_v21 }
0x160e   :  { %2155 = vmax.xlane.f32.xlu0 %v2154_v40 }
0x160f   :  { %v2157_v43 = vsel %vm656_vm1, %v2153_v41, -inf }
0x1610   :  { %2158 = vmax.xlane.f32.xlu1 %v2157_v43  ;;  %v2263_v47 = vpop.f32.mrb[44].mxu1 }
0x1611   :  { %v2270_v50 = vmul.f32 0.25, %v2263_v47  ;;  %v7967_v56 = vpop.f32.mrb[45].mxu1 }
0x1612   :  { %v2266_v51 = vpop.f32.mrb[46].mxu1 }
0x1613   :  { %v2271_v60 = vmul.f32 0.25, %v2266_v51  ;;  %v7968_v53 = vpop.f32.mrb[47].mxu1  ;;  %v2272_v54 = vadd.f32 %v9018_v12, %v2270_v50 }
0x1615   :  { %v2274_v57 = vsel %vm656_vm1, %v2272_v54, -inf  ;;  %v2273_v58 = vadd.f32 %v9019_v35, %v2271_v60 }
0x1616   :  { %2275 = vmax.xlane.f32.xlu0 %v2274_v57 }
0x1617   :  { %v2277_v59 = vsel %vm656_vm1, %v2273_v58, -inf }
0x1618   :  { %2278 = vmax.xlane.f32.xlu1 %v2277_v59 }
0x1693   :  { %v2035_v61 = vpop.xlane.xlu0 %2034 }
0x1694   :  { %v2039_v62 = vsub.f32 %v2031_v13, %v2035_v61 }
0x1695   :  { %v2038_v63 = vpop.xlane.xlu1 %2037 }
0x1696   :  { %v2041_v2 = vmul.f32 1.442695, %v2039_v62  ;;  %v2040_v3 = vsub.f32 %v2032_v37, %v2038_v63 }
0x1698   :  { %8838 = vpow2.f32 %v2041_v2  ;;  %v2043_v6 = vmul.f32 1.442695, %v2040_v3 }
0x169a   :  { %8840 = vpow2.f32 %v2043_v6 }
0x169b   :  { %v2156_v9 = vpop.xlane.xlu0 %2155 }
0x169c   :  { %v2160_v10 = vsub.f32 %v2152_v45, %v2156_v9 }
0x169d   :  { %v2159_v14 = vpop.xlane.xlu1 %2158 }
0x169e   :  { %v2162_v15 = vmul.f32 1.442695, %v2160_v10  ;;  %v2161_v17 = vsub.f32 %v2153_v41, %v2159_v14 }
0x16a0   :  { %8842 = vpow2.f32 %v2162_v15  ;;  %v2164_v19 = vmul.f32 1.442695, %v2161_v17  ;;  %v8566_v15 = vld [vmem:[%s10779_s16 + $0x20] sm:$0xff]  }
0x16a1   :  { %7976 = vmatpush3.bf16.msra.mxu1 %v8566_v15 }
0x16a2   :  { %v8839_v22 = vpop.eup %8838  ;;  %8844 = vpow2.f32 %v2164_v19  ;;  %7977 = vmatprep.subr.bf16.mxu1 %v9314_v34 }
0x16a3   :  { %v2276_v27 = vpop.xlane.xlu0 %2275  ;;  %v2045_v48 = vsel %vm656_vm1, %v8839_v22, 0.0 }
0x16a4   :  { %v8841_v29 = vpop.eup %8840  ;;  %v2280_v32 = vsub.f32 %v2272_v54, %v2276_v27  ;;  %2046 = vadd.xlane.f32.xlu0 %v2045_v48  ;;  %v8568_v48 = vld [vmem:[%s10779_s16 + $0x30] sm:$0xff]  }
0x16a5   :  { %v2048_v36 = vsel %vm656_vm1, %v8841_v29, 0.0  ;;  %v2279_v37 = vpop.xlane.xlu1 %2278 }
0x16a6   :  { %v2282_v46 = vmul.f32 1.442695, %v2280_v32  ;;  %2049 = vadd.xlane.f32.xlu1 %v2048_v36  ;;  %v2281_v38 = vsub.f32 %v2273_v58, %v2279_v37 }
0x16a8   :  { %8846 = vpow2.f32 %v2282_v46  ;;  %v2284_v49 = vmul.f32 1.442695, %v2281_v38  ;;  %v2772_v38 = vld [vmem:[%s10784_s24 + $0x8] sm:$0xff] }
0x16aa   :  { %v8843_v42 = vpop.eup %8842  ;;  %8848 = vpow2.f32 %v2284_v49 }
0x16ab   :  { %v2166_v11 = vsel %vm656_vm1, %v8843_v42, 0.0 }
0x16ac   :  { %v8845_v12 = vpop.eup %8844  ;;  %2167 = vadd.xlane.f32.xlu0 %v2166_v11  ;;  %v2771_v11 = vld [vmem:[%s10784_s24] sm:$0xff] }
0x16ad   :  { %v2169_v13 = vsel %vm656_vm1, %v8845_v12, 0.0 }
0x16ae   :  { %2170 = vadd.xlane.f32.xlu1 %v2169_v13 }
0x16b2   :  { %v8847_v30 = vpop.eup %8846 }
0x16b3   :  { %v2286_v35 = vsel %vm656_vm1, %v8847_v30, 0.0 }
0x16b4   :  { %2287 = vadd.xlane.f32.xlu0 %v2286_v35  ;;  %v8849_v33 = vpop.eup %8848 }
0x16b5   :  { %v2289_v20 = vsel %vm656_vm1, %v8849_v33, 0.0 }
0x16bf   :  { %2177 = vrot.lane.b32.xlu1 %v9879_v31, %s9319_s20 }
0x16ca   :  { %2057 = vrot.lane.b32.xlu0 %v9879_v31, %s9317_s8 }
0x16e3   :  { %2290 = vadd.xlane.f32.xlu1 %v2289_v20 }
0x16f4   :  { %2297 = vrot.lane.b32.xlu1 %v9879_v31, %s9318_s12 }
0x1731   :  { %v2047_v21 = vpop.xlane.xlu0 %2046 }
0x1733   :  { %v2050_v44 = vpop.xlane.xlu1 %2049 }
0x1734   :  { %8850 = vrcp.f32 %v2050_v44 }
0x1735   :  { %8852 = vrcp.f32 %v2047_v21 }
0x1739   :  { %v2168_v45 = vpop.xlane.xlu0 %2167 }
0x173b   :  { %v2171_v39 = vpop.xlane.xlu1 %2170 }
0x173c   :  { %8854 = vrcp.f32 %v2171_v39 }
0x173d   :  { %8856 = vrcp.f32 %v2168_v45 }
0x173e   :  { %v8851_v40 = vpop.eup %8850 }
0x173f   :  { %v8853_v43 = vpop.eup %8852  ;;  %v2054_v47 = vmul.f32 %v8851_v40, %v8841_v29  ;;  %v2178_v31 = vpop.permute.xlu1 %2177 }
0x1740   :  { %v2053_v50 = vmul.f32 %v8853_v43, %v8839_v22  ;;  %v8567_v22 = vld [vmem:[%s10779_s16 + $0x28] sm:$0xff]  }
0x1741   :  { %v2288_v41 = vpop.xlane.xlu0 %2287  ;;  %7978 = vmatpush3.bf16.msra.mxu1 %v8567_v22 }
0x1742   :  { %v2055_v51 = vpack.c.bf16 %v2054_v47, %v2053_v50  ;;  %8858 = vrcp.f32 %v2288_v41  ;;  %7979 = vmatprep.subr.bf16.mxu1 %v9314_v34 }
0x1745   :  { %v2058_v56 = vpop.permute.xlu0 %2057  ;;  %7980 = vmatpush3.bf16.msra.mxu1 %v8568_v48  ;;  %v7273_v48 = vld [vmem:[%s10780_s21 + $0x1] ss:$0 sm:$0xff] }
0x1746   :  { %7946 = vmatpush3.bf16.msra.mxu0 %v2058_v56  ;;  %v8855_v60 = vpop.eup %8854  ;;  %7981 = vmatprep.subr.bf16.mxu1 %v9314_v34 }
0x1747   :  { %7957 = vmatprep.subr.bf16.mxu0 %v9314_v34  ;;  %v8857_v53 = vpop.eup %8856  ;;  %v2175_v54 = vmul.f32 %v8855_v60, %v8845_v12 }
0x1748   :  { %v2174_v57 = vmul.f32 %v8857_v53, %v8843_v42  ;;  %v8569_v42 = vld [vmem:[%s10779_s16 + $0x38] sm:$0xff]   ;;  %v2775_v53 = vld [vmem:[%s10786_s6] sm:$0xff] }
0x1749   :  { %7948 = vmatmul.mubr.msk.bf16.vlgmr.msra.gmra.mrb[24].mxu0 %vm656_vm1, %v2055_v51  ;;  %7982 = vmatpush3.bf16.msra.mxu1 %v8569_v42 }
0x174a   :  { %7958 = vmatpush3.bf16.msra.mxu0 %v2178_v31  ;;  %7959 = vmatprep.mubr.msk.bf16.mxu0 %vm9316_vm0, %v9314_v34  ;;  %v2176_v58 = vpack.c.bf16 %v2175_v54, %v2174_v57  ;;  %v2776_v57 = vld [vmem:[%s10786_s6 + $0x8] sm:$0xff] }
0x174b   :  { %7969 = vmatprep.subr.bf16.mxu0 %v9314_v34 }
0x174c   :  { %v8859_v62 = vpop.eup %8858 }
0x174d   :  { %v2294_v2 = vmul.f32 %v8859_v62, %v8847_v30 }
0x1751   :  { %7960 = vmatmul.mubr.msk.bf16.vlgmr.msra.gmra.mrb[28].mxu0 %vm656_vm1, %v2176_v58 }
0x1752   :  { %7971 = vmatprep.mubr.msk.bf16.mxu0 %vm9316_vm0, %v9314_v34 }
0x1770   :  { %v2291_v59 = vpop.xlane.xlu1 %2290 }
0x1771   :  { %8860 = vrcp.f32 %v2291_v59 }
0x1774   :  { %v2298_v61 = vpop.permute.xlu1 %2297 }
0x1775   :  { %7970 = vmatpush3.bf16.msra.mxu0 %v2298_v61 }
0x177b   :  { %v8861_v63 = vpop.eup %8860 }
0x177c   :  { %v2295_v3 = vmul.f32 %v8861_v63, %v8849_v33 }
0x177e   :  { %v2296_v6 = vpack.c.bf16 %v2295_v3, %v2294_v2 }
0x1780   :  { %7972 = vmatmul.mubr.msk.bf16.vlgmr.msra.gmra.mrb[32].mxu0 %vm656_vm1, %v2296_v6 }
0x1781   :  { %2609 = vmatprep.mubr.bf16.mxu0 %v9311_v1 }
0x181c   :  { %v2097_v9 = vpop.f32.mrb[24].mxu0 }
0x181d   :  { %v7949_v10 = vpop.f32.mrb[25].mxu0 }
0x181e   :  { %v2100_v14 = vpop.f32.mrb[26].mxu0 }
0x181f   :  { %v8392_v17 = vpack.i.bf16 %v2100_v14, %v2097_v9  ;;  %v7950_v19 = vpop.f32.mrb[27].mxu0 }
0x1821   :  { %8393 = vrot.lane.b32.xlu0 %v8392_v17, %s9298_s0 }
0x1824   :  { %v2217_v27 = vpop.f32.mrb[28].mxu0 }
0x1825   :  { %v7961_v29 = vpop.f32.mrb[29].mxu0 }
0x1826   :  { %v2220_v32 = vpop.f32.mrb[30].mxu0 }
0x1827   :  { %v8397_v36 = vpack.i.bf16 %v2220_v32, %v2217_v27  ;;  %v7962_v46 = vpop.f32.mrb[31].mxu0 }
0x1829   :  { %8398 = vrot.lane.b32.xlu1 %v8397_v36, %s9304_s22 }
0x182d   :  { %2787 = vperm.xlu1 %8407, %v2771_v11  }
0x1831   :  { %8409 = vset.pattern.permute.xlu1 %v9310_v0 }
0x1832   :  { %2804 = vperm.xlu1 %8409, %v2771_v11  }
0x1836   :  { %2808 = vperm.xlu1 %8409, %v2772_v38  }
0x183a   :  { %8411 = vset.pattern.permute.xlu1 %v9312_v4 }
0x183b   :  { %2824 = vperm.xlu1 %8411, %v2772_v38  }
0x183f   :  { %8412 = vset.pattern.permute.xlu1 %v9313_v5 }
0x1840   :  { %2836 = vperm.xlu1 %8412, %v2771_v11  }
0x1853   :  { %v2337_v12 = vpop.f32.mrb[32].mxu0 }
0x1854   :  { %v7973_v13 = vpop.f32.mrb[33].mxu0 }
0x1855   :  { %v2340_v30 = vpop.f32.mrb[34].mxu0 }
0x1856   :  { %v8402_v35 = vpack.i.bf16 %v2340_v30, %v2337_v12  ;;  %v7974_v37 = vpop.f32.mrb[35].mxu0 }
0x1858   :  { %8403 = vrot.lane.b32.xlu0 %v8402_v35, %s9320_s28 }
0x185c   :  { %2792 = vperm.xlu0 %8408, %v2772_v38  }
0x1860   :  { %8410 = vset.pattern.permute.xlu0 %v9312_v4 }
0x1861   :  { %2820 = vperm.xlu0 %8410, %v2771_v11  }
0x1865   :  { %8413 = vset.pattern.permute.xlu0 %v9313_v5 }
0x1866   :  { %2840 = vperm.xlu0 %8413, %v2772_v38  }
0x1893   :  { %v8394_v0 = vpop.permute.xlu0 %8393 }
0x1894   :  { %v8396_v33 = vunpack.i.h.bf16 %v8394_v0  ;;  %v8395_v20 = vunpack.i.l.bf16 %v8394_v0 }
0x1896   :  { %v2369_v45 = vsel %vm656_vm1, %v9914_v28, %v8396_v33  ;;  %v2368_v4 = vsel %vm656_vm1, %v9912_v26, %v8395_v20  ;;  %v2773_v28 = vld [vmem:[%s10785_s30] sm:$0xf] }
0x1897   :  { %v2798_v31 = vrot.slane %v2773_v28, %v9592_v8  ;;  %v7312_v26 = vld [vmem:[#allocation2] ss:$0 sm:$0xff]  ;;  %v2814_v62 = vrot.slane %v2773_v28, %v9600_v16  ;;  %v2830_v10 = vrot.slane %v2773_v28, %v9603_v18  ;;  %v2846_v27 = vrot.slane %v2773_v28, %v356_v24 }
0x1898   :  { %v2783_v59 = vadd.f32 %v7312_v26, %v2775_v53  ;;  %v2784_v63 = vadd.f32 %v7312_v26, %v2776_v57  ;;  %v8576_v57 = vld [vmem:[%s10781_s1 + $0xa0] ss:$8 sps:$4 sm:$0xff]  }
0x189b   :  { %v8399_v49 = vpop.permute.xlu1 %8398 }
0x189c   :  { %v8401_v44 = vunpack.i.h.bf16 %v8399_v49  ;;  %v8400_v21 = vunpack.i.l.bf16 %v8399_v49 }
0x189e   :  { %v2371_v5 = vsel %vm1160_vm2, %v2369_v45, %v8401_v44  ;;  %v2370_v43 = vsel %vm1160_vm2, %v2368_v4, %v8400_v21  ;;  %v8572_v44 = vld [vmem:[%s10781_s1 + $0x84] ss:$8 sps:$4 sm:$0xff]   ;;  %v8575_v21 = vld [vmem:[%s10781_s1 + $0x94] ss:$8 sps:$4 sm:$0xff]  }
0x189f   :  { %2577 = vmatprep.subr.bf16.mxu0 %v8572_v44 }
0x18ac   :  { %v2788_v51 = vpop.permute.xlu1 %2787 }
0x18ad   :  { %v2799_v61 = vmul.f32 %v2798_v31, %v2788_v51 }
0x18af   :  { %v2801_v6 = vadd.f32 %v2799_v61, %v2783_v59  ;;  %v8579_v59 = vld [vmem:[%s10781_s1 + $0xb0] ss:$8 sps:$4 sm:$0xff]   ;;  %v8584_v61 = vld [vmem:[%s10781_s1 + $0xc4] ss:$8 sps:$4 sm:$0xff]  }
0x18b1   :  { %v2805_v60 = vpop.permute.xlu1 %2804 }
0x18b2   :  { %v2815_v9 = vmul.f32 %v2814_v62, %v2805_v60 }
0x18b4   :  { %v2817_v19 = vadd.f32 %v2815_v9, %v2801_v6  ;;  %v8588_v6 = vld [vmem:[%s10781_s1 + $0xe0] ss:$8 sps:$4 sm:$0xff]   ;;  %v8591_v9 = vld [vmem:[%s10781_s1 + $0xf0] ss:$8 sps:$4 sm:$0xff]  }
0x18b5   :  { %v2809_v54 = vpop.permute.xlu1 %2808 }
0x18b6   :  { %v2816_v15 = vmul.f32 %v2814_v62, %v2809_v54  ;;  %v8578_v54 = vld [vmem:[%s10781_s1 + $0xa4] ss:$8 sps:$4 sm:$0xff]   ;;  %v8582_v62 = vld [vmem:[%s10781_s1 + $0xc0] ss:$8 sps:$4 sm:$0xff]  }
0x18ba   :  { %v2825_v3 = vpop.permute.xlu1 %2824 }
0x18bb   :  { %v2832_v36 = vmul.f32 %v2830_v10, %v2825_v3  ;;  %v8590_v3 = vld [vmem:[%s10781_s1 + $0xe4] ss:$8 sps:$4 sm:$0xff]  }
0x18bf   :  { %v2837_v29 = vpop.permute.xlu1 %2836 }
0x18c0   :  { %v2847_v30 = vmul.f32 %v2846_v27, %v2837_v29  ;;  %v8624_v29 = vld [vmem:[%s10782_s17 + $0xd8] sm:$0xff]  }
0x18ca   :  { %v8404_v39 = vpop.permute.xlu0 %8403 }
0x18cb   :  { %v8406_v40 = vunpack.i.h.bf16 %v8404_v39  ;;  %v8405_v41 = vunpack.i.l.bf16 %v8404_v39  ;;  %v8573_v39 = vld [vmem:[%s10781_s1 + $0x90] ss:$8 sps:$4 sm:$0xff]  }
0x18cd   :  { %v2372_v47 = vsel %vm1163_vm3, %v2370_v43, %v8405_v41  ;;  %v2373_v50 = vsel %vm1163_vm3, %v2371_v5, %v8406_v40 }
0x18ce   :  { %v2374_v56 = vpack.c.bf16 %v2373_v50, %v2372_v47 }
0x18d0   :  { %7984 = vmatmul.mubr.msk.bf16.vlgmr.msra.gmra.mrb[48].mxu1 %vm1197_vm4, %v2374_v56 }
0x18db   :  { %v2793_v58 = vpop.permute.xlu0 %2792 }
0x18dc   :  { %v2800_v2 = vmul.f32 %v2798_v31, %v2793_v58  ;;  %v8581_v58 = vld [vmem:[%s10781_s1 + $0xb4] ss:$8 sps:$4 sm:$0xff]  }
0x18de   :  { %v2802_v17 = vadd.f32 %v2800_v2, %v2784_v63  ;;  %v8587_v63 = vld [vmem:[%s10781_s1 + $0xd4] ss:$8 sps:$4 sm:$0xff]   ;;  %v8585_v2 = vld [vmem:[%s10781_s1 + $0xd0] ss:$8 sps:$4 sm:$0xff]  }
0x18e0   :  { %v2821_v14 = vpop.permute.xlu0 %2820  ;;  %v2818_v32 = vadd.f32 %v2816_v15, %v2802_v17  ;;  %v8618_v15 = vld [vmem:[%s10782_s17 + $0xc0] sm:$0xff]  }
0x18e1   :  { %v2831_v22 = vmul.f32 %v2830_v10, %v2821_v14  ;;  %v8593_v10 = vld [vmem:[%s10781_s1 + $0xf4] ss:$8 sps:$4 sm:$0xff]   ;;  %v8596_v14 = vld [vmem:[%s10787_s9 + $0x4] ss:$8 sps:$4 sm:$0xff]   ;;  %7681 = vmatprep.subr.bf16.mxu1 %v8618_v15  ;;  %v10071_v15 = vld [vmem:[%s10789_s19] sm:$0x7] }
0x18e2   :  { %v2834_v37 = vadd.f32 %v2832_v36, %v2818_v32  ;;  %v8619_v17 = vld [vmem:[%s10782_s17 + $0x80] sm:$0xff]   ;;  %v8625_v32 = vld [vmem:[%s10782_s17 + $0x98] sm:$0xff]  }
0x18e3   :  { %v2833_v13 = vadd.f32 %v2831_v22, %v2817_v19  ;;  %v8620_v19 = vld [vmem:[%s10782_s17 + $0xc8] sm:$0xff]   ;;  %7682 = vmatpush3.bf16.msra.mxu1 %v8619_v17  ;;  %v8626_v36 = vld [vmem:[%s10782_s17 + $0xe0] sm:$0xff]   ;;  %v8617_v17 = vld [vmem:[%s10787_s9 + $0x74] ss:$8 sps:$4 sm:$0xff]  }
0x18e4   :  { %v8621_v22 = vld [vmem:[%s10782_s17 + $0x88] sm:$0xff]   ;;  %7683 = vmatprep.subr.bf16.mxu1 %v8620_v19 }
0x18e5   :  { %v2841_v42 = vpop.permute.xlu0 %2840  ;;  %v9987_v33 = vadd.f32 %v2847_v30, %v2833_v13 }
0x18e6   :  { %v2848_v0 = vmul.f32 %v2846_v27, %v2841_v42  ;;  %v8622_v27 = vld [vmem:[%s10782_s17 + $0xd0] sm:$0xff]   ;;  %v8628_v42 = vld [vmem:[%s10782_s17 + $0xe8] sm:$0xff]  }
0x18e7   :  { %7684 = vmatpush3.bf16.msra.mxu1 %v8621_v22 }
0x18e8   :  { %v9990_v20 = vadd.f32 %v2848_v0, %v2834_v37  ;;  %7685 = vmatprep.subr.bf16.mxu1 %v8622_v27  ;;  %v3003_v27 = vrot.slane %v10071_v15, %v9592_v8 }
0x19a3   :  { %v2442_v46 = vpop.f32.mrb[48].mxu1 }
0x19a4   :  { %v2443_v11 = vadd.f32 %v7273_v48, %v2442_v46  ;;  %v7985_v12 = vpop.f32.mrb[49].mxu1  ;;  %v8627_v46 = vld [vmem:[%s10782_s17 + $0xa0] sm:$0xff]  }
0x19a5   :  { %v2445_v35 = vpop.f32.mrb[50].mxu1 }
0x19a6   :  { %v9982_v38 = vadd.f32 %v2443_v11, %v9836_v23  ;;  %v2446_v7 = vadd.f32 %v7273_v48, %v2445_v35  ;;  %v7986_v24 = vpop.f32.mrb[51].mxu1  ;;  %v8570_v23 = vld [vmem:[%s10781_s1 + $0x80] ss:$8 sps:$4 sm:$0xff]   ;;  %v8623_v48 = vld [vmem:[%s10782_s17 + $0x90] sm:$0xff]  }
0x19a7   :  { %2578 = vmatpush1.bf16.msra.mxu0 %v8570_v23  ;;  %7686 = vmatpush3.bf16.msra.mxu1 %v8623_v48 }
0x19a8   :  { %v9985_v49 = vadd.f32 %v2446_v7, %v9840_v25  ;;  %2451 = vadd.xlane.f32.xlu1 %v9982_v38  ;;  %2579 = vmatprep.subr.bf16.mxu0 %v8575_v21  ;;  %v2476_v7 = vrot.slane %v9863_v52, %v9600_v16  ;;  %v8594_v52 = vld [vmem:[%s10787_s9] ss:$8 sps:$4 sm:$0xff]  }
0x19a9   :  { %7687 = vmatprep.subr.bf16.mxu1 %v8624_v29 }
0x19aa   :  { %2453 = vadd.xlane.f32.xlu0 %v9985_v49 }
0x19ab   :  { %2580 = vmatpush1.bf16.msra.mxu0 %v8573_v39  ;;  %7688 = vmatpush3.bf16.msra.mxu1 %v8625_v32  ;;  %v2482_v39 = vrot.slane %v9868_v55, %v9600_v16  ;;  %v8602_v55 = vld [vmem:[%s10787_s9 + $0x24] ss:$8 sps:$4 sm:$0xff]  }
0x19ac   :  { %2972 = vadd.xlane.f32.xlu1 %v9987_v33  ;;  %2581 = vmatprep.subr.bf16.mxu0 %v8578_v54  ;;  %v8603_v54 = vld [vmem:[%s10787_s9 + $0x30] ss:$8 sps:$4 sm:$0xff]   ;;  %v8629_v32 = vld [vmem:[%s10782_s17 + $0xa8] sm:$0xff]  }
0x19ad   :  { %7689 = vmatprep.subr.bf16.mxu1 %v8626_v36  ;;  %v8630_v36 = vld [vmem:[%s10782_s17 + $0xf0] sm:$0xff]  }
0x19ae   :  { %2974 = vadd.xlane.f32.xlu0 %v9990_v20 }
0x19af   :  { %2582 = vmatpush1.bf16.msra.mxu0 %v8576_v57  ;;  %7690 = vmatpush3.bf16.msra.mxu1 %v8627_v46  ;;  %v8608_v57 = vld [vmem:[%s10787_s9 + $0x44] ss:$8 sps:$4 sm:$0xff]   ;;  %v8631_v46 = vld [vmem:[%s10782_s17 + $0xb0] sm:$0xff]  }
0x19b0   :  { %2583 = vmatprep.subr.bf16.mxu0 %v8581_v58  ;;  %7691 = vmatprep.subr.bf16.mxu1 %v8628_v42  ;;  %v8606_v58 = vld [vmem:[%s10787_s9 + $0x40] ss:$8 sps:$4 sm:$0xff]   ;;  %v8632_v42 = vld [vmem:[%s10782_s17 + $0xf8] sm:$0xff]  }
0x19b3   :  { %2584 = vmatpush1.bf16.msra.mxu0 %v8579_v59  ;;  %v8611_v59 = vld [vmem:[%s10787_s9 + $0x54] ss:$8 sps:$4 sm:$0xff]   ;;  %7692 = vmatpush3.bf16.msra.mxu1 %v8629_v32 }
0x19b4   :  { %2585 = vmatprep.subr.bf16.mxu0 %v8584_v61  ;;  %7693 = vmatprep.subr.bf16.mxu1 %v8630_v36  ;;  %v10112_v36 = vld [vmem:[%s10790_s10 + $0x8] sm:$0xff] }
0x19b7   :  { %2586 = vmatpush1.bf16.msra.mxu0 %v8582_v62  ;;  %7694 = vmatpush3.bf16.msra.mxu1 %v8631_v46 }
0x19b8   :  { %2587 = vmatprep.subr.bf16.mxu0 %v8587_v63  ;;  %v8609_v63 = vld [vmem:[%s10787_s9 + $0x50] ss:$8 sps:$4 sm:$0xff]   ;;  %7695 = vmatprep.subr.bf16.mxu1 %v8632_v42 }
0x19bb   :  { %2588 = vmatpush1.bf16.msra.mxu0 %v8585_v2  ;;  %v10062_v2 = vld [vmem:[%s10788_s7] sm:$0x7] }
0x19bc   :  { %2589 = vmatprep.subr.bf16.mxu0 %v8590_v3  ;;  %v8614_v3 = vld [vmem:[%s10787_s9 + $0x64] ss:$8 sps:$4 sm:$0xff]  }
0x19bf   :  { %2590 = vmatpush1.bf16.msra.mxu0 %v8588_v6 }
0x19c0   :  { %2591 = vmatprep.subr.bf16.mxu0 %v8593_v10  ;;  %v2997_v10 = vrot.slane %v10062_v2, %v9592_v8 }
0x19c3   :  { %2592 = vmatpush1.bf16.msra.mxu0 %v8591_v9 }
0x19c4   :  { %3098 = vmatprep.subr.bf16.mxu0 %v8596_v14  ;;  %v8612_v14 = vld [vmem:[%s10787_s9 + $0x60] ss:$8 sps:$4 sm:$0xff]  }
0x1a35   :  { %v2452_v25 = vpop.xlane.xlu1 %2451 }
0x1a36   :  { %v2455_v45 = vmul.f32 0.0078125, %v2452_v25 }
0x1a37   :  { %v2454_v4 = vpop.xlane.xlu0 %2453 }
0x1a38   :  { %v10000_v40 = vsub.f32 %v9982_v38, %v2455_v45  ;;  %v2456_v41 = vmul.f32 0.0078125, %v2454_v4 }
0x1a39   :  { %v2973_v5 = vpop.xlane.xlu1 %2972 }
0x1a3a   :  { %v2976_v43 = vmul.f32 0.0078125, %v2973_v5  ;;  %v2459_v47 = vmul.f32 %v10000_v40, %v10000_v40  ;;  %v10005_v50 = vsub.f32 %v9985_v49, %v2456_v41 }
0x1a3b   :  { %v2975_v56 = vpop.xlane.xlu0 %2974 }
0x1a3c   :  { %v10008_v51 = vsub.f32 %v9987_v33, %v2976_v43  ;;  %v2977_v60 = vmul.f32 0.0078125, %v2975_v56  ;;  %2461 = vadd.xlane.f32.xlu1 %v2459_v47  ;;  %v2460_v28 = vmul.f32 %v10005_v50, %v10005_v50 }
0x1a3e   :  { %v10013_v31 = vsub.f32 %v9990_v20, %v2977_v60  ;;  %2463 = vadd.xlane.f32.xlu0 %v2460_v28  ;;  %v2980_v26 = vmul.f32 %v10008_v51, %v10008_v51  ;;  %v8597_v60 = vld [vmem:[%s10787_s9 + $0x10] ss:$8 sps:$4 sm:$0xff]  }
0x1a40   :  { %2982 = vadd.xlane.f32.xlu1 %v2980_v26  ;;  %v2981_v53 = vmul.f32 %v10013_v31, %v10013_v31  ;;  %v8600_v26 = vld [vmem:[%s10787_s9 + $0x20] ss:$8 sps:$4 sm:$0xff]  }
0x1a42   :  { %2984 = vadd.xlane.f32.xlu0 %v2981_v53  ;;  %v8605_v53 = vld [vmem:[%s10787_s9 + $0x34] ss:$8 sps:$4 sm:$0xff]  }
0x1ac9   :  { %v2462_v11 = vpop.xlane.xlu1 %2461 }
0x1aca   :  { %v2465_v12 = vmul.f32 0.0078125, %v2462_v11  ;;  %v8633_v11 = vld [vmem:[%s10782_s17 + $0xb8] sm:$0xff]  }
0x1acb   :  { %v2464_v13 = vpop.xlane.xlu0 %2463  ;;  %7696 = vmatpush3.bf16.msra.mxu1 %v8633_v11 }
0x1acc   :  { %v2467_v30 = vadd.f32 1e-05, %v2465_v12  ;;  %v2466_v35 = vmul.f32 0.0078125, %v2464_v13  ;;  %7987 = vmatprep.subr.bf16.mxu1 %v9314_v34  ;;  %v7216_v12 = vld [vmem:[%s10783_s2 + $0x2] sm:$0x3] }
0x1acd   :  { %v2983_v4 = vpop.xlane.xlu1 %2982  ;;  %v2490_v13 = vrot.slane %v7216_v12, %v9592_v8 }
0x1ace   :  { %8862 = vrsqrt.f32 %v2467_v30  ;;  %v2468_v37 = vadd.f32 1e-05, %v2466_v35  ;;  %v2986_v56 = vmul.f32 0.0078125, %v2983_v4  ;;  %v2494_v30 = vrot.slane %v7216_v12, %v9600_v16 }
0x1acf   :  { %v2985_v25 = vpop.xlane.xlu0 %2984 }
0x1ad0   :  { %8864 = vrsqrt.f32 %v2468_v37  ;;  %v2987_v43 = vmul.f32 0.0078125, %v2985_v25  ;;  %v2988_v28 = vadd.f32 1e-05, %v2986_v56 }
0x1ad8   :  { %v8863_v24 = vpop.eup %8862 }
0x1ad9   :  { %v2471_v0 = vmul.f32 %v8863_v24, %v10000_v40  ;;  %v8599_v40 = vld [vmem:[%s10787_s9 + $0x14] ss:$8 sps:$4 sm:$0xff]  }
0x1ada   :  { %v8865_v23 = vpop.eup %8864 }
0x1adb   :  { %v2472_v44 = vmul.f32 %v8865_v23, %v10005_v50  ;;  %v2477_v21 = vmul.f32 %v2476_v7, %v2471_v0  ;;  %v2989_v50 = vadd.f32 1e-05, %v2987_v43  ;;  %v2869_v43 = vld [vmem:[#allocation7] sm:$0x3] }
0x1add   :  { %v2478_v45 = vmul.f32 %v2476_v7, %v2472_v44  ;;  %v2483_v41 = vadd.f32 %v2482_v39, %v2477_v21  ;;  %8866 = vrsqrt.f32 %v2989_v50 }
0x1ade   :  { %8868 = vrsqrt.f32 %v2988_v28 }
0x1adf   :  { %v2484_v5 = vadd.f32 %v2482_v39, %v2478_v45 }
0x1ae1   :  { %v2485_v47 = vpack.c.bf16 %v2484_v5, %v2483_v41 }
0x1ae3   :  { %2610 = vmatmul.mubr.bf16.vlgmr.msra.gmra.mrb[36].mxu0 %v2485_v47  ;;  %v3015_v47 = vrot.slane %v2869_v43, %v9600_v16 }
0x1ae4   :  { %3099 = vmatpush1.bf16.msra.mxu0 %v8594_v52  ;;  %3130 = vmatprep.mubr.bf16.mxu0 %v9311_v1  ;;  %v3011_v52 = vrot.slane %v2869_v43, %v9592_v8 }
0x1ae5   :  { %3100 = vmatprep.subr.bf16.mxu0 %v8599_v40 }
0x1ae7   :  { %v8867_v61 = vpop.eup %8866 }
0x1ae8   :  { %3101 = vmatpush1.bf16.msra.mxu0 %v8597_v60  ;;  %v8869_v62 = vpop.eup %8868  ;;  %v2993_v6 = vmul.f32 %v8867_v61, %v10013_v31 }
0x1ae9   :  { %3102 = vmatprep.subr.bf16.mxu0 %v8602_v55  ;;  %v2992_v9 = vmul.f32 %v8869_v62, %v10008_v51  ;;  %v8615_v51 = vld [vmem:[%s10787_s9 + $0x70] ss:$8 sps:$4 sm:$0xff]   ;;  %v7295_v62 = vld [vmem:[#allocation5 + $0x1] ss:$0 sm:$0xff] }
0x1aea   :  { %v2999_v19 = vmul.f32 %v2997_v10, %v2993_v6 }
0x1aeb   :  { %v2998_v22 = vmul.f32 %v2997_v10, %v2992_v9 }
0x1aec   :  { %3103 = vmatpush1.bf16.msra.mxu0 %v8600_v26  ;;  %v3005_v31 = vadd.f32 %v3003_v27, %v2999_v19 }
0x1aed   :  { %3104 = vmatprep.subr.bf16.mxu0 %v8605_v53  ;;  %v3004_v48 = vadd.f32 %v3003_v27, %v2998_v22 }
0x1aef   :  { %v3006_v29 = vpack.c.bf16 %v3005_v31, %v3004_v48 }
0x1af0   :  { %3105 = vmatpush1.bf16.msra.mxu0 %v8603_v54 }
0x1af1   :  { %3106 = vmatprep.subr.bf16.mxu0 %v8608_v57 }
0x1af4   :  { %3107 = vmatpush1.bf16.msra.mxu0 %v8606_v58 }
0x1af5   :  { %3108 = vmatprep.subr.bf16.mxu0 %v8611_v59 }
0x1af8   :  { %3109 = vmatpush1.bf16.msra.mxu0 %v8609_v63 }
0x1af9   :  { %3110 = vmatprep.subr.bf16.mxu0 %v8614_v3 }
0x1afc   :  { %3111 = vmatpush1.bf16.msra.mxu0 %v8612_v14 }
0x1afd   :  { %3112 = vmatprep.subr.bf16.mxu0 %v8617_v17 }
0x1b00   :  { %3113 = vmatpush1.bf16.msra.mxu0 %v8615_v51 }
0x1b01   :  { %8005 = vmatprep.subr.bf16.mxu0 %v9314_v34 }
0x1b03   :  { %3131 = vmatmul.mubr.bf16.vlgmr.msra.gmra.mrb[40].mxu0 %v3006_v29 }
0x1b04   :  { %8007 = vmatprep.mubr.msk.bf16.mxu0 %vm9316_vm0, %v9314_v34 }
0x1bb6   :  { %v2611_v35 = vpop.f32.mrb[36].mxu0 }
0x1bb7   :  { %v2612_v37 = vadd.f32 %v2611_v35, %v2490_v13  ;;  %v2613_v7 = vpop.f32.mrb[37].mxu0 }
0x1bb8   :  { %v2614_v24 = vadd.f32 %v2613_v7, %v2494_v30  ;;  %v2615_v0 = vpop.f32.mrb[38].mxu0 }
0x1bb9   :  { %v2616_v23 = vadd.f32 %v2615_v0, %v2490_v13  ;;  %v2617_v44 = vpop.f32.mrb[39].mxu0  ;;  %v2620_v39 = vmax.f32 %v2612_v37, 0.0 }
0x1bba   :  { %v2618_v21 = vadd.f32 %v2617_v44, %v2494_v30  ;;  %v2621_v45 = vmax.f32 %v2614_v24, 0.0 }
0x1bbb   :  { %v2622_v25 = vmax.f32 %v2616_v23, 0.0 }
0x1bbc   :  { %v2623_v4 = vmax.f32 %v2618_v21, 0.0 }
0x1bbd   :  { %v2624_v41 = vpack.c.bf16 %v2622_v25, %v2620_v39 }
0x1bbe   :  { %v2625_v5 = vpack.c.bf16 %v2623_v4, %v2621_v45 }
0x1bc0   :  { %2760 = vmatprep.mubr.bf16.mxu1 %v2625_v5 }
0x1bc1   :  { %2761 = vmatmul.mubr.bf16.vlgmr.msra.gmra.mrb[52].mxu1 %v2624_v41 }
0x1bc2   :  { %7989 = vmatprep.mubr.msk.bf16.mxu1 %vm9316_vm0, %v9314_v34 }
0x1bd6   :  { %v3132_v40 = vpop.f32.mrb[40].mxu0 }
0x1bd7   :  { %v3133_v56 = vadd.f32 %v3132_v40, %v3011_v52  ;;  %v3134_v50 = vpop.f32.mrb[41].mxu0 }
0x1bd8   :  { %v3135_v60 = vadd.f32 %v3134_v50, %v3015_v47  ;;  %v3136_v55 = vpop.f32.mrb[42].mxu0 }
0x1bd9   :  { %v3137_v28 = vadd.f32 %v3136_v55, %v3011_v52  ;;  %v3138_v26 = vpop.f32.mrb[43].mxu0  ;;  %3145 = vrot.lane.b32.xlu1 %v3133_v56, %s9315_s13 }
0x1bda   :  { %v3139_v53 = vadd.f32 %v3138_v26, %v3015_v47 }
0x1bdb   :  { %v3141_v54 = vpack.c.bf16 %v3137_v28, %v3133_v56  ;;  %3147 = vrot.lane.b32.xlu0 %v3137_v28, %s9315_s13 }
0x1bdc   :  { %v10095_v57 = vpack.c.bf16 %v3139_v53, %v3135_v60 }
0x1c4b   :  { %v3146_v58 = vpop.permute.xlu1 %3145 }
0x1c4c   :  { %3151 = vxpose.xlu1.b32.start [1/2] (short) (narrow) %v3146_v58, 64 }
0x1c4d   :  { %v3148_v59 = vpop.permute.xlu0 %3147 }
0x1c50   :  { %3152 = vxpose.xlu1.b32.end [2/2] (short) (narrow) %v3148_v59, 64 }
0x1c86   :  { %3303 = vrot.lane.b32.xlu1 %v3141_v54, %s9317_s8 }
0x1c94   :  { %v7697_v61 = vpop.f32.mrb[52].mxu1 }
0x1c95   :  { %v7698_v63 = vpop.f32.mrb[53].mxu1 }
0x1c96   :  { %v7699_v3 = vadd.f32 %v7698_v63, %v7697_v61  ;;  %v7700_v6 = vpop.f32.mrb[54].mxu1 }
0x1c97   :  { %v7701_v9 = vpop.f32.mrb[55].mxu1 }
0x1c98   :  { %v2763_v10 = vadd.f32 %v7699_v3, %v7295_v62  ;;  %v7702_v14 = vadd.f32 %v7701_v9, %v7700_v6 }
0x1c9a   :  { %v2766_v17 = vadd.f32 %v7702_v14, %v7295_v62  ;;  %v2769_v19 = vadd.f32 %v2763_v10, %v9982_v38  ;;  %v10109_v38 = vld [vmem:[%s10790_s10] sm:$0xff] }
0x1c9c   :  { %v2770_v22 = vadd.f32 %v2766_v17, %v9985_v49 }
0x1c9e   :  { %v10100_v27 = vpack.c.bf16 %v2770_v22, %v2769_v19 }
0x1ccc   :  { %v3167_v51 = vpop.trf.xlu1 }
0x1cd0   :  { %v3168_v31 = vpop.trf.xlu1 }
0x1cd1   :  { %v3183_v48 = vpack.c.bf16 %v3168_v31, %v3167_v51 }
0x1cd3   :  { %7988 = vmatpush3.bf16.msra.mxu1 %v3183_v48 }
0x1cd4   :  { %7993 = vmatprep.subr.bf16.mxu1 %v9314_v34  ;;  %v3169_v4 = vpop.trf.xlu1 }
0x1cd6   :  { %7990 = vmatmul.mubr.msk.bf16.vlgmr.msra.gmra.mrb[56].mxu1 %vm656_vm1, %v3141_v54 }
0x1cd7   :  { %7994 = vmatpush3.bf16.msra.mxu1 %v10095_v57  ;;  %7995 = vmatprep.mubr.msk.bf16.mxu1 %vm9316_vm0, %v9314_v34 }
0x1cd8   :  { %7999 = vmatprep.subr.bf16.mxu1 %v9314_v34  ;;  %v3170_v41 = vpop.trf.xlu1 }
0x1cd9   :  { %v3184_v26 = vpack.c.bf16 %v3170_v41, %v3169_v4 }
0x1cdc   :  { %v3171_v43 = vpop.trf.xlu1 }
0x1ce0   :  { %v3172_v47 = vpop.trf.xlu1 }
0x1ce4   :  { %v3173_v50 = vpop.trf.xlu1 }
0x1ce8   :  { %v3174_v53 = vpop.trf.xlu1 }
0x1ce9   :  { %v3186_v59 = vpack.c.bf16 %v3174_v53, %v3173_v50 }
0x1cf8   :  { %v3304_v58 = vpop.permute.xlu1 %3303 }
0x1da9   :  { %v3224_v49 = vpop.f32.mrb[56].mxu1 }
0x1daa   :  { %v3231_v29 = vmul.f32 0.25, %v3224_v49  ;;  %v7991_v32 = vpop.f32.mrb[57].mxu1 }
0x1dab   :  { %v3227_v46 = vpop.f32.mrb[58].mxu1 }
0x1dac   :  { %v3233_v42 = vadd.f32 %v3231_v29, %v10109_v38  ;;  %v3232_v11 = vmul.f32 0.25, %v3227_v46  ;;  %v7992_v12 = vpop.f32.mrb[59].mxu1 }
0x1dae   :  { %v3234_v13 = vadd.f32 %v3232_v11, %v10112_v36  ;;  %v3235_v30 = vsel %vm656_vm1, %v3233_v42, -inf }
0x1daf   :  { %3236 = vmax.xlane.f32.xlu0 %v3235_v30 }
0x1db0   :  { %v3238_v35 = vsel %vm656_vm1, %v3234_v13, -inf }
0x1db3   :  { %3239 = vmax.xlane.f32.xlu0 %v3238_v35 }
0x1e3c   :  { %v3237_v37 = vpop.xlane.xlu0 %3236 }
0x1e3d   :  { %v3241_v7 = vsub.f32 %v3233_v42, %v3237_v37 }
0x1e3f   :  { %v3243_v24 = vmul.f32 1.442695, %v3241_v7 }
0x1e40   :  { %v3240_v0 = vpop.xlane.xlu0 %3239 }
0x1e41   :  { %8870 = vpow2.f32 %v3243_v24  ;;  %v3242_v23 = vsub.f32 %v3234_v13, %v3240_v0 }
0x1e43   :  { %v3245_v44 = vmul.f32 1.442695, %v3242_v23 }
0x1e45   :  { %8872 = vpow2.f32 %v3245_v44 }
0x1e4b   :  { %v8871_v21 = vpop.eup %8870 }
0x1e4c   :  { %v3247_v39 = vsel %vm656_vm1, %v8871_v21, 0.0 }
0x1e4d   :  { %3248 = vadd.xlane.f32.xlu0 %v3247_v39 }
0x1e4f   :  { %v8873_v25 = vpop.eup %8872 }
0x1e50   :  { %v3250_v45 = vsel %vm656_vm1, %v8873_v25, 0.0 }
0x1e51   :  { %3251 = vadd.xlane.f32.xlu0 %v3250_v45 }
0x1e67   :  { %3424 = vrot.lane.b32.xlu0 %v3141_v54, %s9319_s20 }
0x1e6b   :  { %3544 = vrot.lane.b32.xlu0 %v3141_v54, %s9318_s12  ;;  %v3185_v54 = vpack.c.bf16 %v3172_v47, %v3171_v43 }
0x1eda   :  { %v3249_v5 = vpop.xlane.xlu0 %3248 }
0x1edb   :  { %8874 = vrcp.f32 %v3249_v5 }
0x1ede   :  { %v3252_v52 = vpop.xlane.xlu0 %3251 }
0x1edf   :  { %8876 = vrcp.f32 %v3252_v52 }
0x1ee2   :  { %v3425_v61 = vpop.permute.xlu0 %3424 }
0x1ee5   :  { %v8875_v40 = vpop.eup %8874 }
0x1ee6   :  { %v3255_v60 = vmul.f32 %v8875_v40, %v8871_v21  ;;  %v3545_v62 = vpop.permute.xlu0 %3544 }
0x1ee9   :  { %v8877_v56 = vpop.eup %8876 }
0x1eea   :  { %v3256_v55 = vmul.f32 %v8877_v56, %v8873_v25 }
0x1eec   :  { %v3257_v28 = vpack.c.bf16 %v3256_v55, %v3255_v60 }
0x1eee   :  { %7996 = vmatmul.mubr.msk.bf16.vlgmr.msra.gmra.mrb[60].mxu1 %vm656_vm1, %v3257_v28 }
0x1eef   :  { %8000 = vmatpush3.bf16.msra.mxu1 %v3184_v26  ;;  %8001 = vmatprep.mubr.msk.bf16.mxu1 %vm9316_vm0, %v9314_v34 }
0x1ef0   :  { %8011 = vmatprep.subr.bf16.mxu1 %v9314_v34 }
0x1ef6   :  { %8002 = vmatmul.mubr.msk.bf16.vlgmr.msra.gmra.mrb[64].mxu1 %vm656_vm1, %v3304_v58 }
0x1ef7   :  { %8012 = vmatpush3.bf16.msra.mxu1 %v3185_v54  ;;  %8013 = vmatprep.mubr.msk.bf16.mxu1 %vm9316_vm0, %v9314_v34 }
0x1ef8   :  { %8023 = vmatprep.subr.bf16.mxu1 %v9314_v34 }
0x1efe   :  { %8014 = vmatmul.mubr.msk.bf16.vlgmr.msra.gmra.mrb[68].mxu1 %vm656_vm1, %v3425_v61 }
0x1eff   :  { %8024 = vmatpush3.bf16.msra.mxu1 %v3186_v59  ;;  %8025 = vmatprep.mubr.msk.bf16.mxu1 %vm9316_vm0, %v9314_v34 }
0x1f00   :  { %8035 = vmatprep.subr.bf16.mxu1 %v9314_v34 }
0x1f06   :  { %8026 = vmatmul.mubr.msk.bf16.vlgmr.msra.gmra.mrb[72].mxu1 %vm656_vm1, %v3545_v62 }
0x1f07   :  { %8043 = vmatprep.mubr.msk.bf16.mxu1 %vm9316_vm0, %v9314_v34 }
0x1fc1   :  { %v10137_v63 = vpop.f32.mrb[60].mxu1 }
0x1fc2   :  { %v7997_v3 = vpop.f32.mrb[61].mxu1 }
0x1fc3   :  { %v10139_v6 = vpop.f32.mrb[62].mxu1 }
0x1fc4   :  { %v7998_v9 = vpop.f32.mrb[63].mxu1 }
0x1fc9   :  { %v3342_v10 = vpop.f32.mrb[64].mxu1 }
0x1fca   :  { %v3349_v14 = vmul.f32 0.25, %v3342_v10  ;;  %v8003_v17 = vpop.f32.mrb[65].mxu1 }
0x1fcb   :  { %v3345_v19 = vpop.f32.mrb[66].mxu1 }
0x1fcc   :  { %v3351_v22 = vadd.f32 %v3349_v14, %v10109_v38  ;;  %v3350_v51 = vmul.f32 0.25, %v3345_v19  ;;  %v8004_v31 = vpop.f32.mrb[67].mxu1 }
0x1fce   :  { %v3352_v48 = vadd.f32 %v3350_v51, %v10112_v36  ;;  %v3353_v49 = vsel %vm656_vm1, %v3351_v22, -inf }
0x1fcf   :  { %3354 = vmax.xlane.f32.xlu0 %v3353_v49 }
0x1fd0   :  { %v3356_v29 = vsel %vm656_vm1, %v3352_v48, -inf }
0x1fd1   :  { %3357 = vmax.xlane.f32.xlu1 %v3356_v29  ;;  %v3463_v32 = vpop.f32.mrb[68].mxu1 }
0x1fd2   :  { %v3470_v46 = vmul.f32 0.25, %v3463_v32  ;;  %v8015_v42 = vpop.f32.mrb[69].mxu1 }
0x1fd3   :  { %v3466_v11 = vpop.f32.mrb[70].mxu1 }
0x1fd4   :  { %v3472_v12 = vadd.f32 %v3470_v46, %v10109_v38  ;;  %v3471_v13 = vmul.f32 0.25, %v3466_v11  ;;  %v8016_v30 = vpop.f32.mrb[71].mxu1 }
0x1fd6   :  { %v3473_v35 = vadd.f32 %v3471_v13, %v10112_v36  ;;  %v3474_v37 = vsel %vm656_vm1, %v3472_v12, -inf }
0x1fd7   :  { %3475 = vmax.xlane.f32.xlu0 %v3474_v37 }
0x1fd8   :  { %v3477_v23 = vsel %vm656_vm1, %v3473_v35, -inf }
0x1fd9   :  { %v3583_v7 = vpop.f32.mrb[72].mxu1 }
0x1fda   :  { %v3590_v24 = vmul.f32 0.25, %v3583_v7  ;;  %v8027_v0 = vpop.f32.mrb[73].mxu1 }
0x1fdb   :  { %3478 = vmax.xlane.f32.xlu0 %v3477_v23  ;;  %v3586_v44 = vpop.f32.mrb[74].mxu1 }
0x1fdc   :  { %v3592_v21 = vadd.f32 %v3590_v24, %v10109_v38  ;;  %v3591_v39 = vmul.f32 0.25, %v3586_v44  ;;  %v8028_v25 = vpop.f32.mrb[75].mxu1 }
0x1fde   :  { %v3593_v45 = vadd.f32 %v3591_v39, %v10112_v36  ;;  %v3594_v4 = vsel %vm656_vm1, %v3592_v21, -inf }
0x1fdf   :  { %3595 = vmax.xlane.f32.xlu0 %v3594_v4 }
0x1fe0   :  { %v3597_v41 = vsel %vm656_vm1, %v3593_v45, -inf }
0x1fe2   :  { %3377 = vrot.lane.b32.xlu1 %v10095_v57, %s9317_s8 }
0x1fe3   :  { %3598 = vmax.xlane.f32.xlu0 %v3597_v41 }
0x205c   :  { %v3355_v5 = vpop.xlane.xlu0 %3354 }
0x205d   :  { %v3359_v43 = vsub.f32 %v3351_v22, %v3355_v5 }
0x205e   :  { %v3358_v52 = vpop.xlane.xlu1 %3357 }
0x205f   :  { %v3361_v47 = vmul.f32 1.442695, %v3359_v43  ;;  %v3360_v40 = vsub.f32 %v3352_v48, %v3358_v52  ;;  %v8634_v52 = vld [vmem:[%s10791_s25] sm:$0xff]  }
0x2060   :  { %8036 = vmatpush3.bf16.msra.mxu1 %v8634_v52 }
0x2061   :  { %8878 = vpow2.f32 %v3361_v47  ;;  %v3363_v38 = vmul.f32 1.442695, %v3360_v40  ;;  %8037 = vmatprep.subr.bf16.mxu1 %v9314_v34  ;;  %v8635_v40 = vld [vmem:[%s10791_s25 + $0x8] sm:$0xff]  }
0x2062   :  { %v3378_v56 = vpop.permute.xlu1 %3377 }
0x2063   :  { %8880 = vpow2.f32 %v3363_v38  ;;  %8006 = vmatpush3.bf16.msra.mxu0 %v3378_v56 }
0x2064   :  { %v3476_v36 = vpop.xlane.xlu0 %3475  ;;  %8017 = vmatprep.subr.bf16.mxu0 %v9314_v34  ;;  %8038 = vmatpush3.bf16.msra.mxu1 %v8635_v40  ;;  %v8646_v40 = vld [vmem:[%s10793_s15] sm:$0xff]  }
0x2065   :  { %v3480_v50 = vsub.f32 %v3472_v12, %v3476_v36  ;;  %v8636_v36 = vld [vmem:[%s10791_s25 + $0x10] sm:$0xff]   ;;  %8039 = vmatprep.subr.bf16.mxu1 %v9314_v34 }
0x2067   :  { %v3482_v60 = vmul.f32 1.442695, %v3480_v50 }
0x2068   :  { %v3479_v55 = vpop.xlane.xlu0 %3478  ;;  %8040 = vmatpush3.bf16.msra.mxu1 %v8636_v36 }
0x2069   :  { %8882 = vpow2.f32 %v3482_v60  ;;  %v3481_v28 = vsub.f32 %v3473_v35, %v3479_v55  ;;  %8041 = vmatprep.subr.bf16.mxu1 %v9314_v34 }
0x206b   :  { %v8879_v26 = vpop.eup %8878  ;;  %v3484_v53 = vmul.f32 1.442695, %v3481_v28  ;;  %v8637_v28 = vld [vmem:[%s10791_s25 + $0x18] sm:$0xff]  }
0x206c   :  { %v3596_v54 = vpop.xlane.xlu0 %3595  ;;  %v3365_v58 = vsel %vm656_vm1, %v8879_v26, 0.0  ;;  %8042 = vmatpush3.bf16.msra.mxu1 %v8637_v28  ;;  %v8647_v28 = vld [vmem:[%s10793_s15 + $0x8] sm:$0xff]  }
0x206d   :  { %v8881_v59 = vpop.eup %8880  ;;  %8884 = vpow2.f32 %v3484_v53  ;;  %v3600_v61 = vsub.f32 %v3592_v21, %v3596_v54  ;;  %3366 = vadd.xlane.f32.xlu0 %v3365_v58  ;;  %8067 = vmatprep.subr.bf16.mxu1 %v9314_v34 }
0x206e   :  { %v3368_v9 = vsel %vm656_vm1, %v8881_v59, 0.0 }
0x206f   :  { %v3602_v62 = vmul.f32 1.442695, %v3600_v61 }
0x2070   :  { %v3599_v3 = vpop.xlane.xlu0 %3598 }
0x2071   :  { %8886 = vpow2.f32 %v3602_v62  ;;  %v3601_v10 = vsub.f32 %v3593_v45, %v3599_v3  ;;  %3369 = vadd.xlane.f32.xlu0 %v3368_v9 }
0x2073   :  { %v8883_v14 = vpop.eup %8882  ;;  %v3604_v17 = vmul.f32 1.442695, %v3601_v10 }
0x2074   :  { %v3486_v19 = vsel %vm656_vm1, %v8883_v14, 0.0 }
0x2075   :  { %8888 = vpow2.f32 %v3604_v17  ;;  %3487 = vadd.xlane.f32.xlu0 %v3486_v19 }
0x2077   :  { %v8885_v22 = vpop.eup %8884 }
0x2078   :  { %v3489_v51 = vsel %vm656_vm1, %v8885_v22, 0.0 }
0x2079   :  { %3490 = vadd.xlane.f32.xlu0 %v3489_v51 }
0x207b   :  { %v8887_v31 = vpop.eup %8886 }
0x207c   :  { %v3606_v48 = vsel %vm656_vm1, %v8887_v31, 0.0 }
0x207d   :  { %3607 = vadd.xlane.f32.xlu1 %v3606_v48 }
0x207f   :  { %v8889_v49 = vpop.eup %8888 }
0x2080   :  { %v3609_v29 = vsel %vm656_vm1, %v8889_v49, 0.0 }
0x2081   :  { %3610 = vadd.xlane.f32.xlu0 %v3609_v29 }
0x208e   :  { %3617 = vrot.lane.b32.xlu1 %v10095_v57, %s9318_s12 }
0x2097   :  { %3497 = vrot.lane.b32.xlu0 %v10095_v57, %s9319_s20 }
0x20fa   :  { %v3367_v32 = vpop.xlane.xlu0 %3366 }
0x20fb   :  { %8890 = vrcp.f32 %v3367_v32 }
0x20fe   :  { %v3370_v46 = vpop.xlane.xlu0 %3369 }
0x20ff   :  { %8892 = vrcp.f32 %v3370_v46 }
0x2102   :  { %v3488_v42 = vpop.xlane.xlu0 %3487 }
0x2103   :  { %8894 = vrcp.f32 %v3488_v42 }
0x2105   :  { %v8891_v12 = vpop.eup %8890 }
0x2106   :  { %v3491_v11 = vpop.xlane.xlu0 %3490  ;;  %v3373_v30 = vmul.f32 %v8891_v12, %v8879_v26 }
0x2107   :  { %8896 = vrcp.f32 %v3491_v11 }
0x2109   :  { %v8893_v13 = vpop.eup %8892 }
0x210a   :  { %v3374_v35 = vmul.f32 %v8893_v13, %v8881_v59  ;;  %v3608_v37 = vpop.xlane.xlu1 %3607  ;;  %v8638_v13 = vld [vmem:[%s10792_s11] sm:$0xff]  }
0x210b   :  { %8898 = vrcp.f32 %v3608_v37  ;;  %v8642_v37 = vld [vmem:[%s10792_s11 + $0x20] sm:$0xff]  }
0x210c   :  { %v3375_v7 = vpack.c.bf16 %v3374_v35, %v3373_v30  ;;  %v8641_v35 = vld [vmem:[%s10792_s11 + $0x18] sm:$0xff]  }
0x210d   :  { %v8895_v0 = vpop.eup %8894 }
0x210e   :  { %8008 = vmatmul.mubr.msk.bf16.vlgmr.msra.gmra.mrb[44].mxu0 %vm656_vm1, %v3375_v7  ;;  %v3611_v24 = vpop.xlane.xlu0 %3610  ;;  %v3494_v23 = vmul.f32 %v8895_v0, %v8883_v14  ;;  %v3618_v25 = vpop.permute.xlu1 %3617  ;;  %v8643_v7 = vld [vmem:[%s10792_s11 + $0x28] sm:$0xff]   ;;  %v8645_v0 = vld [vmem:[%s10792_s11 + $0x38] sm:$0xff]  }
0x210f   :  { %8900 = vrcp.f32 %v3611_v24  ;;  %8019 = vmatprep.mubr.msk.bf16.mxu0 %vm9316_vm0, %v9314_v34  ;;  %v8644_v24 = vld [vmem:[%s10792_s11 + $0x30] sm:$0xff]  }
0x2111   :  { %v8897_v57 = vpop.eup %8896 }
0x2112   :  { %v3495_v44 = vmul.f32 %v8897_v57, %v8885_v22  ;;  %v3498_v21 = vpop.permute.xlu0 %3497  ;;  %v7337_v57 = vld [vmem:[#allocation8] ss:$0 sm:$0xff] }
0x2113   :  { %8018 = vmatpush3.bf16.msra.mxu0 %v3498_v21 }
0x2114   :  { %v3496_v39 = vpack.c.bf16 %v3495_v44, %v3494_v23  ;;  %8029 = vmatprep.subr.bf16.mxu0 %v9314_v34 }
0x2115   :  { %v8899_v45 = vpop.eup %8898 }
0x2116   :  { %8020 = vmatmul.mubr.msk.bf16.vlgmr.msra.gmra.mrb[48].mxu0 %vm656_vm1, %v3496_v39  ;;  %v3614_v41 = vmul.f32 %v8899_v45, %v8887_v31 }
0x2117   :  { %8030 = vmatpush3.bf16.msra.mxu0 %v3618_v25  ;;  %8031 = vmatprep.mubr.msk.bf16.mxu0 %vm9316_vm0, %v9314_v34 }
0x2118   :  { %8047 = vmatprep.subr.bf16.mxu0 %v9314_v34 }
0x2119   :  { %v8901_v4 = vpop.eup %8900 }
0x211a   :  { %v3615_v5 = vmul.f32 %v8901_v4, %v8889_v49 }
0x211c   :  { %v3616_v43 = vpack.c.bf16 %v3615_v5, %v3614_v41 }
0x211e   :  { %8032 = vmatmul.mubr.msk.bf16.vlgmr.msra.gmra.mrb[52].mxu0 %vm656_vm1, %v3616_v43 }
0x211f   :  { %8063 = vmatprep.mubr.msk.bf16.mxu0 %vm9316_vm0, %v9314_v34  ;;  %8048 = vmatpush3.bf16.msra.mxu0 %v8646_v40 }
0x2120   :  { %8049 = vmatprep.subr.bf16.mxu0 %v9314_v34 }
0x2123   :  { %8050 = vmatpush3.bf16.msra.mxu0 %v8647_v28 }
0x2124   :  { %8051 = vmatprep.subr.bf16.mxu0 %v9314_v34 }
0x21e1   :  { %v3417_v47 = vpop.f32.mrb[44].mxu0 }
0x21e2   :  { %v8009_v38 = vpop.f32.mrb[45].mxu0 }
0x21e3   :  { %v3420_v56 = vpop.f32.mrb[46].mxu0 }
0x21e4   :  { %v8414_v50 = vpack.i.bf16 %v3420_v56, %v3417_v47  ;;  %v8010_v60 = vpop.f32.mrb[47].mxu0 }
0x21e6   :  { %8415 = vrot.lane.b32.xlu1 %v8414_v50, %s9298_s0 }
0x21e9   :  { %v3537_v55 = vpop.f32.mrb[48].mxu0 }
0x21ea   :  { %v8021_v26 = vpop.f32.mrb[49].mxu0 }
0x21eb   :  { %v3540_v53 = vpop.f32.mrb[50].mxu0  ;;  %v8648_v26 = vld [vmem:[%s10793_s15 + $0x10] sm:$0xff]  }
0x21ec   :  { %v8419_v54 = vpack.i.bf16 %v3540_v53, %v3537_v55  ;;  %v8022_v58 = vpop.f32.mrb[51].mxu0  ;;  %8052 = vmatpush3.bf16.msra.mxu0 %v8648_v26  ;;  %v8649_v53 = vld [vmem:[%s10793_s15 + $0x18] sm:$0xff]  }
0x21ed   :  { %8053 = vmatprep.subr.bf16.mxu0 %v9314_v34  ;;  %v8651_v58 = vld [vmem:[%s10793_s15 + $0x28] sm:$0xff]  }
0x21ee   :  { %8420 = vrot.lane.b32.xlu0 %v8419_v54, %s9304_s22  ;;  %v8650_v54 = vld [vmem:[%s10793_s15 + $0x20] sm:$0xff]  }
0x21f0   :  { %8054 = vmatpush3.bf16.msra.mxu0 %v8649_v53 }
0x21f1   :  { %v3657_v59 = vpop.f32.mrb[52].mxu0  ;;  %8055 = vmatprep.subr.bf16.mxu0 %v9314_v34 }
0x21f2   :  { %v8033_v61 = vpop.f32.mrb[53].mxu0 }
0x21f3   :  { %v3660_v62 = vpop.f32.mrb[54].mxu0  ;;  %v8653_v61 = vld [vmem:[%s10793_s15 + $0x38] sm:$0xff]  }
0x21f4   :  { %v8424_v3 = vpack.i.bf16 %v3660_v62, %v3657_v59  ;;  %v8034_v9 = vpop.f32.mrb[55].mxu0  ;;  %8056 = vmatpush3.bf16.msra.mxu0 %v8650_v54  ;;  %v8652_v59 = vld [vmem:[%s10793_s15 + $0x30] sm:$0xff]   ;;  %v7352_v62 = vld [vmem:[#allocation11] ss:$0 sm:$0xff] }
0x21f5   :  { %8057 = vmatprep.subr.bf16.mxu0 %v9314_v34 }
0x21f6   :  { %8425 = vrot.lane.b32.xlu1 %v8424_v3, %s9320_s28 }
0x21f8   :  { %8058 = vmatpush3.bf16.msra.mxu0 %v8651_v58 }
0x21f9   :  { %8059 = vmatprep.subr.bf16.mxu0 %v9314_v34 }
0x21fc   :  { %8060 = vmatpush3.bf16.msra.mxu0 %v8652_v59 }
0x21fd   :  { %8061 = vmatprep.subr.bf16.mxu0 %v9314_v34 }
0x2200   :  { %8062 = vmatpush3.bf16.msra.mxu0 %v8653_v61 }
0x2201   :  { %8087 = vmatprep.subr.bf16.mxu0 %v9314_v34 }
0x2258   :  { %v8416_v10 = vpop.permute.xlu1 %8415 }
0x2259   :  { %v8418_v17 = vunpack.i.h.bf16 %v8416_v10  ;;  %v8417_v19 = vunpack.i.l.bf16 %v8416_v10 }
0x225b   :  { %v3689_v48 = vsel %vm656_vm1, %v10139_v6, %v8418_v17  ;;  %v3688_v49 = vsel %vm656_vm1, %v10137_v63, %v8417_v19  ;;  %v8639_v6 = vld [vmem:[%s10792_s11 + $0x8] sm:$0xff]   ;;  %v8640_v63 = vld [vmem:[%s10792_s11 + $0x10] sm:$0xff]  }
0x2260   :  { %v8421_v14 = vpop.permute.xlu0 %8420 }
0x2261   :  { %v8423_v22 = vunpack.i.h.bf16 %v8421_v14  ;;  %v8422_v51 = vunpack.i.l.bf16 %v8421_v14 }
0x2263   :  { %v3691_v46 = vsel %vm1160_vm2, %v3689_v48, %v8423_v22  ;;  %v3690_v42 = vsel %vm1160_vm2, %v3688_v49, %v8422_v51  ;;  %v3796_v49 = vrot.slane %v10062_v2, %v9600_v16 }
0x2268   :  { %v8426_v31 = vpop.permute.xlu1 %8425 }
0x2269   :  { %v8428_v29 = vunpack.i.h.bf16 %v8426_v31  ;;  %v8427_v32 = vunpack.i.l.bf16 %v8426_v31 }
0x226b   :  { %v3693_v11 = vsel %vm1163_vm3, %v3691_v46, %v8428_v29  ;;  %v3692_v12 = vsel %vm1163_vm3, %v3690_v42, %v8427_v32  ;;  %v3802_v42 = vrot.slane %v10071_v15, %v9600_v16  ;;  %v7343_v15 = vld [vmem:[#allocation10] ss:$0 sm:$0xff] }
0x226c   :  { %v3694_v30 = vpack.c.bf16 %v3693_v11, %v3692_v12 }
0x226e   :  { %8044 = vmatmul.mubr.msk.bf16.vlgmr.msra.gmra.mrb[76].mxu1 %vm1197_vm4, %v3694_v30 }
0x226f   :  { %8068 = vmatpush3.bf16.msra.mxu1 %v8638_v13  ;;  %8083 = vmatprep.mubr.msk.bf16.mxu1 %vm9316_vm0, %v9314_v34 }
0x2270   :  { %8069 = vmatprep.subr.bf16.mxu1 %v9314_v34 }
0x2273   :  { %8070 = vmatpush3.bf16.msra.mxu1 %v8639_v6 }
0x2274   :  { %8071 = vmatprep.subr.bf16.mxu1 %v9314_v34 }
0x2277   :  { %8072 = vmatpush3.bf16.msra.mxu1 %v8640_v63 }
0x2278   :  { %8073 = vmatprep.subr.bf16.mxu1 %v9314_v34 }
0x227b   :  { %8074 = vmatpush3.bf16.msra.mxu1 %v8641_v35 }
0x227c   :  { %8075 = vmatprep.subr.bf16.mxu1 %v9314_v34 }
0x227f   :  { %8076 = vmatpush3.bf16.msra.mxu1 %v8642_v37 }
0x2280   :  { %8077 = vmatprep.subr.bf16.mxu1 %v9314_v34 }
0x2283   :  { %8078 = vmatpush3.bf16.msra.mxu1 %v8643_v7 }
0x2284   :  { %8079 = vmatprep.subr.bf16.mxu1 %v9314_v34 }
0x2287   :  { %8080 = vmatpush3.bf16.msra.mxu1 %v8644_v24 }
0x2288   :  { %8081 = vmatprep.subr.bf16.mxu1 %v9314_v34 }
0x228b   :  { %8082 = vmatpush3.bf16.msra.mxu1 %v8645_v0 }
0x228c   :  { %8099 = vmatprep.subr.bf16.mxu1 %v9314_v34 }
0x228e   :  { %8084 = vmatmul.mubr.bf16.vlgmr.msra.gmra.mrb[80].mxu1 %v10100_v27 }
0x228f   :  { %8101 = vmatprep.mubr.msk.bf16.mxu1 %vm9316_vm0, %v9314_v34 }
0x2341   :  { %v3762_v23 = vpop.f32.mrb[76].mxu1 }
0x2342   :  { %v3763_v44 = vadd.f32 %v7337_v57, %v3762_v23  ;;  %v8045_v21 = vpop.f32.mrb[77].mxu1 }
0x2343   :  { %v3765_v39 = vpop.f32.mrb[78].mxu1 }
0x2344   :  { %v10219_v25 = vadd.f32 %v3763_v44, %v9987_v33  ;;  %v3766_v45 = vadd.f32 %v7337_v57, %v3765_v39  ;;  %v8046_v4 = vpop.f32.mrb[79].mxu1 }
0x2346   :  { %v10222_v41 = vadd.f32 %v3766_v45, %v9990_v20  ;;  %3771 = vadd.xlane.f32.xlu0 %v10219_v25 }
0x2348   :  { %3773 = vadd.xlane.f32.xlu1 %v10222_v41 }
0x2361   :  { %v3990_v5 = vpop.f32.mrb[80].mxu1 }
0x2362   :  { %v8085_v43 = vpop.f32.mrb[81].mxu1  ;;  %v10244_v3 = vadd.f32 %v7352_v62, %v3990_v5 }
0x2363   :  { %v3993_v52 = vpop.f32.mrb[82].mxu1 }
0x2364   :  { %v8086_v47 = vpop.f32.mrb[83].mxu1  ;;  %v10247_v9 = vadd.f32 %v7352_v62, %v3993_v52 }
0x2366   :  { %v10281_v61 = vpack.c.bf16 %v10247_v9, %v10244_v3 }
0x23d3   :  { %v3772_v33 = vpop.xlane.xlu0 %3771 }
0x23d4   :  { %v3775_v38 = vmul.f32 0.0078125, %v3772_v33 }
0x23d5   :  { %v3774_v56 = vpop.xlane.xlu1 %3773 }
0x23d6   :  { %v3777_v20 = vsub.f32 %v10219_v25, %v3775_v38  ;;  %v3776_v36 = vmul.f32 0.0078125, %v3774_v56  ;;  %v280_v56 = vld [vmem:[%s10794_s18] sm:$0xff] }
0x23d8   :  { %v3778_v50 = vsub.f32 %v10222_v41, %v3776_v36  ;;  %v3779_v60 = vmul.f32 %v3777_v20, %v3777_v20 }
0x23da   :  { %3781 = vadd.xlane.f32.xlu0 %v3779_v60  ;;  %v3780_v55 = vmul.f32 %v3778_v50, %v3778_v50  ;;  %v281_v60 = vld [vmem:[%s10794_s18 + $0x8] sm:$0xff] }
0x23de   :  { %3783 = vadd.xlane.f32.xlu0 %v3780_v55 }
0x240b   :  { %3999 = vxpose.xlu0.b32.start [1/2] (short) (narrow) %v10244_v3, 64 }
0x240f   :  { %4000 = vxpose.xlu0.b32.end [2/2] (short) (narrow) %v10247_v9, 64 }
0x2467   :  { %v3782_v10 = vpop.xlane.xlu0 %3781 }
0x2468   :  { %v3785_v14 = vmul.f32 0.0078125, %v3782_v10 }
0x246a   :  { %v3787_v17 = vadd.f32 1e-05, %v3785_v14 }
0x246b   :  { %v3784_v19 = vpop.xlane.xlu0 %3783 }
0x246c   :  { %8902 = vrsqrt.f32 %v3787_v17  ;;  %v3786_v22 = vmul.f32 0.0078125, %v3784_v19 }
0x246e   :  { %v3788_v51 = vadd.f32 1e-05, %v3786_v22 }
0x2470   :  { %8904 = vrsqrt.f32 %v3788_v51 }
0x2476   :  { %v8903_v31 = vpop.eup %8902 }
0x2477   :  { %v3791_v48 = vmul.f32 %v8903_v31, %v3777_v20 }
0x2479   :  { %v3797_v46 = vmul.f32 %v3796_v49, %v3791_v48 }
0x247a   :  { %v8905_v29 = vpop.eup %8904 }
0x247b   :  { %v3792_v32 = vmul.f32 %v8905_v29, %v3778_v50  ;;  %v3803_v12 = vadd.f32 %v3802_v42, %v3797_v46 }
0x247d   :  { %v3798_v11 = vmul.f32 %v3796_v49, %v3792_v32 }
0x247f   :  { %v3804_v13 = vadd.f32 %v3802_v42, %v3798_v11 }
0x2481   :  { %v3805_v30 = vpack.c.bf16 %v3804_v13, %v3803_v12 }
0x2483   :  { %8064 = vmatmul.mubr.bf16.vlgmr.msra.gmra.mrb[56].mxu0 %v3805_v30 }
0x2484   :  { %8089 = vmatprep.mubr.msk.bf16.mxu0 %vm9316_vm0, %v9314_v34 }
0x248b   :  { %v4015_v6 = vpop.trf.xlu0 }
0x248f   :  { %v4016_v63 = vpop.trf.xlu0 }
0x2490   :  { %v4031_v35 = vpack.c.bf16 %v4016_v63, %v4015_v6 }
0x2492   :  { %8088 = vmatpush3.bf16.msra.mxu0 %v4031_v35 }
0x2493   :  { %8093 = vmatprep.subr.bf16.mxu0 %v9314_v34  ;;  %v4017_v2 = vpop.trf.xlu0 }
0x2497   :  { %v4018_v37 = vpop.trf.xlu0 }
0x2498   :  { %v4032_v7 = vpack.c.bf16 %v4018_v37, %v4017_v2 }
0x249a   :  { %8100 = vmatpush3.bf16.msra.mxu1 %v4032_v7 }
0x249b   :  { %8111 = vmatprep.subr.bf16.mxu1 %v9314_v34  ;;  %v4019_v45 = vpop.trf.xlu0 }
0x249f   :  { %v4020_v4 = vpop.trf.xlu0 }
0x24a0   :  { %v4033_v43 = vpack.c.bf16 %v4020_v4, %v4019_v45 }
0x24a3   :  { %v4021_v5 = vpop.trf.xlu0 }
0x24a7   :  { %v4022_v47 = vpop.trf.xlu0 }
0x24a8   :  { %v4034_v40 = vpack.c.bf16 %v4022_v47, %v4021_v5 }
0x2556   :  { %v3894_v24 = vpop.f32.mrb[56].mxu0 }
0x2557   :  { %v8065_v0 = vpop.f32.mrb[57].mxu0  ;;  %v3895_v23 = vadd.f32 %v7343_v15, %v3894_v24 }
0x2558   :  { %v3897_v57 = vpop.f32.mrb[58].mxu0 }
0x2559   :  { %v3898_v44 = vadd.f32 %v7343_v15, %v3897_v57  ;;  %v8066_v21 = vpop.f32.mrb[59].mxu0 }
0x255b   :  { %v3997_v39 = vpack.c.bf16 %v3898_v44, %v3895_v23 }
0x255d   :  { %4155 = vrot.lane.b32.xlu1 %v3997_v39, %s9317_s8  ;;  %8090 = vmatmul.mubr.msk.bf16.vlgmr.msra.gmra.mrb[60].mxu0 %vm656_vm1, %v3997_v39 }
0x255e   :  { %8095 = vmatprep.mubr.msk.bf16.mxu0 %vm9316_vm0, %v9314_v34 }
0x2561   :  { %4275 = vrot.lane.b32.xlu1 %v3997_v39, %s9319_s20 }
0x2565   :  { %4395 = vrot.lane.b32.xlu1 %v3997_v39, %s9318_s12 }
0x25cf   :  { %v4156_v52 = vpop.permute.xlu1 %4155 }
0x25d0   :  { %8102 = vmatmul.mubr.msk.bf16.vlgmr.msra.gmra.mrb[84].mxu1 %vm656_vm1, %v4156_v52 }
0x25d1   :  { %8112 = vmatpush3.bf16.msra.mxu1 %v4033_v43  ;;  %8113 = vmatprep.mubr.msk.bf16.mxu1 %vm9316_vm0, %v9314_v34 }
0x25d2   :  { %8123 = vmatprep.subr.bf16.mxu1 %v9314_v34 }
0x25d3   :  { %v4276_v33 = vpop.permute.xlu1 %4275 }
0x25d7   :  { %v4396_v38 = vpop.permute.xlu1 %4395 }
0x25d8   :  { %8114 = vmatmul.mubr.msk.bf16.vlgmr.msra.gmra.mrb[88].mxu1 %vm656_vm1, %v4276_v33 }
0x25d9   :  { %8124 = vmatpush3.bf16.msra.mxu1 %v4034_v40  ;;  %8125 = vmatprep.mubr.msk.bf16.mxu1 %vm9316_vm0, %v9314_v34 }
0x25da   :  { %8135 = vmatprep.subr.bf16.mxu1 %v9314_v34 }
0x25e0   :  { %8126 = vmatmul.mubr.msk.bf16.vlgmr.msra.gmra.mrb[92].mxu1 %vm656_vm1, %v4396_v38 }
0x25e1   :  { %8143 = vmatprep.mubr.msk.bf16.mxu1 %vm9316_vm0, %v9314_v34 }
0x2630   :  { %v4072_v20 = vpop.f32.mrb[60].mxu0 }
0x2631   :  { %v4079_v36 = vmul.f32 0.25, %v4072_v20  ;;  %v8091_v50 = vpop.f32.mrb[61].mxu0 }
0x2632   :  { %v4075_v55 = vpop.f32.mrb[62].mxu0 }
0x2633   :  { %v4081_v28 = vadd.f32 %v4079_v36, %v280_v56  ;;  %v4080_v26 = vmul.f32 0.25, %v4075_v55  ;;  %v8092_v53 = vpop.f32.mrb[63].mxu0 }
0x2635   :  { %v4082_v54 = vadd.f32 %v4080_v26, %v281_v60  ;;  %v4083_v58 = vsel %vm656_vm1, %v4081_v28, -inf }
0x2636   :  { %4084 = vmax.xlane.f32.xlu1 %v4083_v58 }
0x2637   :  { %v4086_v59 = vsel %vm656_vm1, %v4082_v54, -inf }
0x2638   :  { %4087 = vmax.xlane.f32.xlu0 %v4086_v59 }
0x2647   :  { %4107 = vrot.lane.b32.xlu1 %v10281_v61, %s9315_s13 }
0x264e   :  { %4228 = vrot.lane.b32.xlu0 %v10281_v61, %s9320_s28 }
0x26a3   :  { %v4194_v62 = vpop.f32.mrb[84].mxu1 }
0x26a4   :  { %v4201_v10 = vmul.f32 0.25, %v4194_v62  ;;  %v8103_v14 = vpop.f32.mrb[85].mxu1 }
0x26a5   :  { %v4197_v17 = vpop.f32.mrb[86].mxu1 }
0x26a6   :  { %v4203_v19 = vadd.f32 %v4201_v10, %v280_v56  ;;  %v4202_v22 = vmul.f32 0.25, %v4197_v17  ;;  %v8104_v51 = vpop.f32.mrb[87].mxu1 }
0x26a8   :  { %v4204_v31 = vadd.f32 %v4202_v22, %v281_v60  ;;  %v4205_v48 = vsel %vm656_vm1, %v4203_v19, -inf }
0x26a9   :  { %4206 = vmax.xlane.f32.xlu1 %v4205_v48 }
0x26aa   :  { %v4208_v29 = vsel %vm656_vm1, %v4204_v31, -inf }
0x26ab   :  { %v4314_v49 = vpop.f32.mrb[88].mxu1 }
0x26ac   :  { %v4321_v3 = vmul.f32 0.25, %v4314_v49  ;;  %v8115_v9 = vpop.f32.mrb[89].mxu1 }
0x26ad   :  { %4209 = vmax.xlane.f32.xlu1 %v4208_v29  ;;  %v4317_v32 = vpop.f32.mrb[90].mxu1 }
0x26ae   :  { %v4323_v46 = vadd.f32 %v4321_v3, %v280_v56  ;;  %v4322_v42 = vmul.f32 0.25, %v4317_v32  ;;  %v8116_v11 = vpop.f32.mrb[91].mxu1 }
0x26b0   :  { %v4324_v12 = vadd.f32 %v4322_v42, %v281_v60  ;;  %v4325_v13 = vsel %vm656_vm1, %v4323_v46, -inf }
0x26b1   :  { %4326 = vmax.xlane.f32.xlu1 %v4325_v13 }
0x26b2   :  { %v4328_v35 = vsel %vm656_vm1, %v4324_v12, -inf }
0x26b3   :  { %v4434_v30 = vpop.f32.mrb[92].mxu1 }
0x26b4   :  { %v4441_v6 = vmul.f32 0.25, %v4434_v30  ;;  %v8127_v63 = vpop.f32.mrb[93].mxu1 }
0x26b5   :  { %4329 = vmax.xlane.f32.xlu1 %v4328_v35  ;;  %v4437_v2 = vpop.f32.mrb[94].mxu1 }
0x26b6   :  { %v4443_v37 = vadd.f32 %v4441_v6, %v280_v56  ;;  %v4442_v7 = vmul.f32 0.25, %v4437_v2  ;;  %v8128_v15 = vpop.f32.mrb[95].mxu1 }
0x26b8   :  { %v4444_v24 = vadd.f32 %v4442_v7, %v281_v60  ;;  %v4445_v0 = vsel %vm656_vm1, %v4443_v37, -inf }
0x26b9   :  { %4446 = vmax.xlane.f32.xlu1 %v4445_v0 }
0x26ba   :  { %v4448_v57 = vsel %vm656_vm1, %v4444_v24, -inf }
0x26bd   :  { %4449 = vmax.xlane.f32.xlu1 %v4448_v57 }
0x26c3   :  { %v4085_v23 = vpop.xlane.xlu1 %4084 }
0x26c4   :  { %v4089_v21 = vsub.f32 %v4081_v28, %v4085_v23 }
0x26c5   :  { %v4088_v39 = vpop.xlane.xlu0 %4087 }
0x26c6   :  { %v4091_v45 = vmul.f32 1.442695, %v4089_v21  ;;  %v4090_v4 = vsub.f32 %v4082_v54, %v4088_v39 }
0x26c7   :  { %v4108_v44 = vpop.permute.xlu1 %4107 }
0x26c8   :  { %8094 = vmatpush3.bf16.msra.mxu0 %v4108_v44  ;;  %8906 = vpow2.f32 %v4091_v45  ;;  %v4093_v5 = vmul.f32 1.442695, %v4090_v4 }
0x26c9   :  { %8105 = vmatprep.subr.bf16.mxu0 %v9314_v34 }
0x26ca   :  { %8908 = vpow2.f32 %v4093_v5 }
0x26ce   :  { %4348 = vrot.lane.b32.xlu1 %v10281_v61, %s9304_s22 }
0x26d2   :  { %v8907_v43 = vpop.eup %8906 }
0x26d3   :  { %v4095_v52 = vsel %vm656_vm1, %v8907_v43, 0.0 }
0x26d4   :  { %v8909_v47 = vpop.eup %8908 }
0x26d5   :  { %v4098_v40 = vsel %vm656_vm1, %v8909_v47, 0.0 }
0x26f2   :  { %4096 = vadd.xlane.f32.xlu1 %v4095_v52 }
0x26f6   :  { %4099 = vadd.xlane.f32.xlu1 %v4098_v40 }
0x2736   :  { %v4207_v33 = vpop.xlane.xlu1 %4206 }
0x2737   :  { %v4211_v38 = vsub.f32 %v4203_v19, %v4207_v33 }
0x2739   :  { %v4213_v56 = vmul.f32 1.442695, %v4211_v38 }
0x273a   :  { %v4210_v20 = vpop.xlane.xlu1 %4209 }
0x273b   :  { %8910 = vpow2.f32 %v4213_v56  ;;  %v4212_v36 = vsub.f32 %v4204_v31, %v4210_v20 }
0x273d   :  { %v4215_v50 = vmul.f32 1.442695, %v4212_v36 }
0x273e   :  { %v4327_v60 = vpop.xlane.xlu1 %4326 }
0x273f   :  { %8912 = vpow2.f32 %v4215_v50  ;;  %v4331_v55 = vsub.f32 %v4323_v46, %v4327_v60 }
0x2741   :  { %v4333_v28 = vmul.f32 1.442695, %v4331_v55 }
0x2742   :  { %v4330_v26 = vpop.xlane.xlu1 %4329 }
0x2743   :  { %8914 = vpow2.f32 %v4333_v28  ;;  %v4332_v53 = vsub.f32 %v4324_v12, %v4330_v26  ;;  %v8654_v26 = vld [vmem:[%s10795_s27] sm:$0xff]  }
0x2744   :  { %8136 = vmatpush3.bf16.msra.mxu1 %v8654_v26  ;;  %v8669_v26 = vld [vmem:[%s10796_s23 + $0x34] ss:$8 sps:$4 sm:$0xff]  }
0x2745   :  { %v8911_v54 = vpop.eup %8910  ;;  %v4335_v58 = vmul.f32 1.442695, %v4332_v53  ;;  %8137 = vmatprep.subr.bf16.mxu1 %v9314_v34 }
0x2746   :  { %v4447_v59 = vpop.xlane.xlu1 %4446  ;;  %v4217_v62 = vsel %vm656_vm1, %v8911_v54, 0.0 }
0x2747   :  { %8916 = vpow2.f32 %v4335_v58  ;;  %v4451_v10 = vsub.f32 %v4443_v37, %v4447_v59  ;;  %4218 = vadd.xlane.f32.xlu1 %v4217_v62  ;;  %v4229_v37 = vpop.permute.xlu0 %4228  ;;  %v8655_v58 = vld [vmem:[%s10795_s27 + $0x8] sm:$0xff]  }
0x2748   :  { %8138 = vmatpush3.bf16.msra.mxu1 %v8655_v58  ;;  %v8670_v58 = vld [vmem:[%s10796_s23 + $0x40] ss:$8 sps:$4 sm:$0xff]  }
0x2749   :  { %v8913_v14 = vpop.eup %8912  ;;  %v4453_v17 = vmul.f32 1.442695, %v4451_v10  ;;  %8139 = vmatprep.subr.bf16.mxu1 %v9314_v34 }
0x274a   :  { %v4450_v19 = vpop.xlane.xlu1 %4449  ;;  %v4220_v22 = vsel %vm656_vm1, %v8913_v14, 0.0 }
0x274b   :  { %8918 = vpow2.f32 %v4453_v17  ;;  %v4452_v51 = vsub.f32 %v4444_v24, %v4450_v19  ;;  %4221 = vadd.xlane.f32.xlu1 %v4220_v22  ;;  %v8657_v22 = vld [vmem:[%s10795_s27 + $0x18] sm:$0xff]  }
0x274d   :  { %v8915_v31 = vpop.eup %8914  ;;  %v4455_v48 = vmul.f32 1.442695, %v4452_v51 }
0x274e   :  { %v4337_v49 = vsel %vm656_vm1, %v8915_v31, 0.0  ;;  %v4349_v11 = vpop.permute.xlu1 %4348 }
0x274f   :  { %8920 = vpow2.f32 %v4455_v48  ;;  %4338 = vadd.xlane.f32.xlu1 %v4337_v49 }
0x2751   :  { %v8917_v3 = vpop.eup %8916 }
0x2752   :  { %v4340_v9 = vsel %vm656_vm1, %v8917_v3, 0.0 }
0x2753   :  { %4341 = vadd.xlane.f32.xlu1 %v4340_v9 }
0x2755   :  { %v8919_v29 = vpop.eup %8918 }
0x2756   :  { %v4457_v32 = vsel %vm656_vm1, %v8919_v29, 0.0 }
0x2757   :  { %4458 = vadd.xlane.f32.xlu1 %v4457_v32 }
0x2759   :  { %v8921_v46 = vpop.eup %8920 }
0x275a   :  { %v4460_v42 = vsel %vm656_vm1, %v8921_v46, 0.0 }
0x275b   :  { %4461 = vadd.xlane.f32.xlu1 %v4460_v42 }
0x276c   :  { %4468 = vrot.lane.b32.xlu1 %v10281_v61, %s9298_s0 }
0x277f   :  { %v4097_v12 = vpop.xlane.xlu1 %4096 }
0x2780   :  { %8922 = vrcp.f32 %v4097_v12 }
0x2783   :  { %v4100_v13 = vpop.xlane.xlu1 %4099 }
0x2784   :  { %8924 = vrcp.f32 %v4100_v13 }
0x278a   :  { %v8923_v30 = vpop.eup %8922 }
0x278b   :  { %v4103_v63 = vmul.f32 %v8923_v30, %v8907_v43 }
0x278e   :  { %v8925_v6 = vpop.eup %8924 }
0x278f   :  { %v4104_v35 = vmul.f32 %v8925_v6, %v8909_v47 }
0x2791   :  { %v4105_v2 = vpack.c.bf16 %v4104_v35, %v4103_v63 }
0x2793   :  { %8096 = vmatmul.mubr.msk.bf16.vlgmr.msra.gmra.mrb[64].mxu0 %vm656_vm1, %v4105_v2 }
0x2794   :  { %8106 = vmatpush3.bf16.msra.mxu0 %v4229_v37  ;;  %8107 = vmatprep.mubr.msk.bf16.mxu0 %vm9316_vm0, %v9314_v34 }
0x2795   :  { %8117 = vmatprep.subr.bf16.mxu0 %v9314_v34 }
0x27d4   :  { %v4219_v61 = vpop.xlane.xlu1 %4218 }
0x27d5   :  { %8926 = vrcp.f32 %v4219_v61 }
0x27d8   :  { %v4222_v7 = vpop.xlane.xlu1 %4221 }
0x27d9   :  { %8928 = vrcp.f32 %v4222_v7 }
0x27dc   :  { %v4339_v15 = vpop.xlane.xlu1 %4338 }
0x27dd   :  { %8930 = vrcp.f32 %v4339_v15 }
0x27df   :  { %v8927_v0 = vpop.eup %8926 }
0x27e0   :  { %v4342_v24 = vpop.xlane.xlu1 %4341  ;;  %v4225_v23 = vmul.f32 %v8927_v0, %v8911_v54 }
0x27e1   :  { %8932 = vrcp.f32 %v4342_v24 }
0x27e3   :  { %v8929_v57 = vpop.eup %8928 }
0x27e4   :  { %v4226_v44 = vmul.f32 %v8929_v57, %v8913_v14  ;;  %v4459_v21 = vpop.xlane.xlu1 %4458  ;;  %v8656_v14 = vld [vmem:[%s10795_s27 + $0x10] sm:$0xff]   ;;  %v7369_v57 = vld [vmem:[#allocation13] ss:$0 sm:$0xff] }
0x27e5   :  { %8934 = vrcp.f32 %v4459_v21  ;;  %8140 = vmatpush3.bf16.msra.mxu1 %v8656_v14  ;;  %v8676_v14 = vld [vmem:[%s10796_s23 + $0x60] ss:$8 sps:$4 sm:$0xff]  }
0x27e6   :  { %v4227_v39 = vpack.c.bf16 %v4226_v44, %v4225_v23  ;;  %8141 = vmatprep.subr.bf16.mxu1 %v9314_v34 }
0x27e7   :  { %v8931_v4 = vpop.eup %8930 }
0x27e8   :  { %8108 = vmatmul.mubr.msk.bf16.vlgmr.msra.gmra.mrb[68].mxu0 %vm656_vm1, %v4227_v39  ;;  %v4462_v45 = vpop.xlane.xlu1 %4461  ;;  %v4345_v43 = vmul.f32 %v8931_v4, %v8915_v31 }
0x27e9   :  { %8118 = vmatpush3.bf16.msra.mxu0 %v4349_v11  ;;  %8936 = vrcp.f32 %v4462_v45  ;;  %8119 = vmatprep.mubr.msk.bf16.mxu0 %vm9316_vm0, %v9314_v34 }
0x27ea   :  { %8129 = vmatprep.subr.bf16.mxu0 %v9314_v34  ;;  %8142 = vmatpush3.bf16.msra.mxu1 %v8657_v22  ;;  %v8682_v22 = vld [vmem:[%s9507_s29 + $0x40] sm:$0xff]  }
0x27eb   :  { %v8933_v5 = vpop.eup %8932  ;;  %7763 = vmatprep.subr.bf16.mxu1 %v8682_v22 }
0x27ec   :  { %v4346_v52 = vmul.f32 %v8933_v5, %v8917_v3  ;;  %v4469_v40 = vpop.permute.xlu1 %4468 }
0x27ee   :  { %v4347_v47 = vpack.c.bf16 %v4346_v52, %v4345_v43  ;;  %v8658_v52 = vld [vmem:[%s10796_s23] ss:$8 sps:$4 sm:$0xff]  }
0x27ef   :  { %v8935_v33 = vpop.eup %8934 }
0x27f0   :  { %8120 = vmatmul.mubr.msk.bf16.vlgmr.msra.gmra.mrb[72].mxu0 %vm656_vm1, %v4347_v47  ;;  %v4465_v56 = vmul.f32 %v8935_v33, %v8919_v29  ;;  %v8660_v47 = vld [vmem:[%s10796_s23 + $0x4] ss:$8 sps:$4 sm:$0xff]   ;;  %v8661_v33 = vld [vmem:[%s10796_s23 + $0x10] ss:$8 sps:$4 sm:$0xff]  }
0x27f1   :  { %8130 = vmatpush3.bf16.msra.mxu0 %v4469_v40  ;;  %8131 = vmatprep.mubr.msk.bf16.mxu0 %vm9316_vm0, %v9314_v34  ;;  %v8663_v40 = vld [vmem:[%s10796_s23 + $0x14] ss:$8 sps:$4 sm:$0xff]  }
0x27f2   :  { %4748 = vmatprep.subr.bf16.mxu0 %v8660_v47  ;;  %v8696_v47 = vld [vmem:[%s9507_s29 + $0x78] sm:$0xff]  }
0x27f3   :  { %v8937_v38 = vpop.eup %8936 }
0x27f4   :  { %v4466_v20 = vmul.f32 %v8937_v38, %v8921_v46 }
0x27f6   :  { %v4467_v36 = vpack.c.bf16 %v4466_v20, %v4465_v56 }
0x27f8   :  { %8132 = vmatmul.mubr.msk.bf16.vlgmr.msra.gmra.mrb[76].mxu0 %vm656_vm1, %v4467_v36 }
0x27f9   :  { %4780 = vmatprep.mubr.bf16.mxu0 %v9311_v1  ;;  %4749 = vmatpush1.bf16.msra.mxu0 %v8658_v52  ;;  %v8695_v52 = vld [vmem:[%s9507_s29 + $0x30] sm:$0xff]  }
0x27fa   :  { %4750 = vmatprep.subr.bf16.mxu0 %v8663_v40  ;;  %v8697_v40 = vld [vmem:[%s9507_s29 + $0x38] sm:$0xff]  }
0x27fd   :  { %4751 = vmatpush1.bf16.msra.mxu0 %v8661_v33  ;;  %v2938_v33 = vld [vmem:[#allocation14] sm:$0x3] }
0x2866   :  { %v4147_v50 = vpop.f32.mrb[64].mxu0 }
0x2867   :  { %v8097_v60 = vpop.f32.mrb[65].mxu0 }
0x2868   :  { %v4150_v55 = vpop.f32.mrb[66].mxu0 }
0x2869   :  { %v8098_v28 = vpop.f32.mrb[67].mxu0 }
0x286a   :  { %v8664_v28 = vld [vmem:[%s10796_s23 + $0x20] ss:$8 sps:$4 sm:$0xff]  }
0x28bb   :  { %v4268_v53 = vpop.f32.mrb[68].mxu0 }
0x28bc   :  { %v8109_v54 = vpop.f32.mrb[69].mxu0 }
0x28bd   :  { %v4271_v59 = vpop.f32.mrb[70].mxu0  ;;  %v8672_v54 = vld [vmem:[%s10796_s23 + $0x44] ss:$8 sps:$4 sm:$0xff]  }
0x28be   :  { %v8429_v62 = vpack.i.bf16 %v4271_v59, %v4268_v53  ;;  %v8110_v10 = vpop.f32.mrb[71].mxu0  ;;  %v8667_v53 = vld [vmem:[%s10796_s23 + $0x30] ss:$8 sps:$4 sm:$0xff]   ;;  %v8675_v59 = vld [vmem:[%s10796_s23 + $0x54] ss:$8 sps:$4 sm:$0xff]  }
0x28bf   :  { %v8678_v10 = vld [vmem:[%s10796_s23 + $0x64] ss:$8 sps:$4 sm:$0xff]  }
0x28c0   :  { %8430 = vrot.lane.b32.xlu1 %v8429_v62, %s9298_s0  ;;  %v8673_v62 = vld [vmem:[%s10796_s23 + $0x50] ss:$8 sps:$4 sm:$0xff]  }
0x28c3   :  { %v4388_v17 = vpop.f32.mrb[72].mxu0 }
0x28c4   :  { %v8121_v19 = vpop.f32.mrb[73].mxu0 }
0x28c5   :  { %v4391_v51 = vpop.f32.mrb[74].mxu0  ;;  %v8679_v19 = vld [vmem:[%s10796_s23 + $0x70] ss:$8 sps:$4 sm:$0xff]  }
0x28c6   :  { %v8434_v31 = vpack.i.bf16 %v4391_v51, %v4388_v17  ;;  %v8122_v48 = vpop.f32.mrb[75].mxu0  ;;  %v8681_v17 = vld [vmem:[%s10796_s23 + $0x74] ss:$8 sps:$4 sm:$0xff]   ;;  %v8683_v51 = vld [vmem:[%s9507_s29] sm:$0xff]  }
0x28c7   :  { %v8685_v48 = vld [vmem:[%s9507_s29 + $0x8] sm:$0xff]  }
0x28c8   :  { %8435 = vrot.lane.b32.xlu0 %v8434_v31, %s9304_s22  ;;  %v8684_v31 = vld [vmem:[%s9507_s29 + $0x48] sm:$0xff]  }
0x28cb   :  { %v4508_v49 = vpop.f32.mrb[76].mxu0 }
0x28cc   :  { %v8133_v3 = vpop.f32.mrb[77].mxu0 }
0x28cd   :  { %v4511_v9 = vpop.f32.mrb[78].mxu0  ;;  %v8687_v3 = vld [vmem:[%s9507_s29 + $0x10] sm:$0xff]  }
0x28ce   :  { %v8439_v29 = vpack.i.bf16 %v4511_v9, %v4508_v49  ;;  %v8134_v32 = vpop.f32.mrb[79].mxu0  ;;  %v8686_v49 = vld [vmem:[%s9507_s29 + $0x50] sm:$0xff]   ;;  %v8688_v9 = vld [vmem:[%s9507_s29 + $0x58] sm:$0xff]  }
0x28cf   :  { %v8690_v32 = vld [vmem:[%s9507_s29 + $0x60] sm:$0xff]  }
0x28d0   :  { %8440 = vrot.lane.b32.xlu1 %v8439_v29, %s9320_s28  ;;  %v8689_v29 = vld [vmem:[%s9507_s29 + $0x18] sm:$0xff]  }
0x2932   :  { %v8431_v46 = vpop.permute.xlu1 %8430 }
0x2933   :  { %v8433_v11 = vunpack.i.h.bf16 %v8431_v46  ;;  %v8432_v12 = vunpack.i.l.bf16 %v8431_v46  ;;  %v8691_v46 = vld [vmem:[%s9507_s29 + $0x20] sm:$0xff]  }
0x2935   :  { %v4540_v63 = vsel %vm656_vm1, %v4150_v55, %v8433_v11  ;;  %v4539_v35 = vsel %vm656_vm1, %v4147_v50, %v8432_v12  ;;  %v8666_v55 = vld [vmem:[%s10796_s23 + $0x24] ss:$8 sps:$4 sm:$0xff]  }
0x2936   :  { %4752 = vmatprep.subr.bf16.mxu0 %v8666_v55 }
0x2937   :  { %4753 = vmatpush1.bf16.msra.mxu0 %v8664_v28 }
0x2938   :  { %4754 = vmatprep.subr.bf16.mxu0 %v8669_v26 }
0x293a   :  { %v8436_v42 = vpop.permute.xlu0 %8435 }
0x293b   :  { %v8438_v13 = vunpack.i.h.bf16 %v8436_v42  ;;  %v8437_v30 = vunpack.i.l.bf16 %v8436_v42  ;;  %4755 = vmatpush1.bf16.msra.mxu0 %v8667_v53  ;;  %v8692_v42 = vld [vmem:[%s9507_s29 + $0x68] sm:$0xff]  }
0x293c   :  { %4756 = vmatprep.subr.bf16.mxu0 %v8672_v54 }
0x293d   :  { %v4541_v61 = vsel %vm1160_vm2, %v4539_v35, %v8437_v30  ;;  %v4542_v7 = vsel %vm1160_vm2, %v4540_v63, %v8438_v13 }
0x293f   :  { %4757 = vmatpush1.bf16.msra.mxu0 %v8670_v58 }
0x2940   :  { %4758 = vmatprep.subr.bf16.mxu0 %v8675_v59 }
0x2942   :  { %v8441_v6 = vpop.permute.xlu1 %8440 }
0x2943   :  { %v8443_v2 = vunpack.i.h.bf16 %v8441_v6  ;;  %v8442_v37 = vunpack.i.l.bf16 %v8441_v6  ;;  %4759 = vmatpush1.bf16.msra.mxu0 %v8673_v62 }
0x2944   :  { %4760 = vmatprep.subr.bf16.mxu0 %v8678_v10 }
0x2945   :  { %v4543_v15 = vsel %vm1163_vm3, %v4541_v61, %v8442_v37  ;;  %v4544_v24 = vsel %vm1163_vm3, %v4542_v7, %v8443_v2  ;;  %v9020_v37 = vld [vmem:[%s10788_s7] sm:$0x7] }
0x2946   :  { %v4545_v0 = vpack.c.bf16 %v4544_v24, %v4543_v15  ;;  %v4647_v61 = vrot.slane %v9020_v37, %v9603_v18  ;;  %v8709_v37 = vld [vmem:[%s10787_s9 + $0xb4] ss:$8 sps:$4 sm:$0xff]  }
0x2947   :  { %4761 = vmatpush1.bf16.msra.mxu0 %v8676_v14  ;;  %v7391_v14 = vld [vmem:[#allocation16] ss:$0 sm:$0xff] }
0x2948   :  { %8144 = vmatmul.mubr.msk.bf16.vlgmr.msra.gmra.mrb[96].mxu1 %vm1197_vm4, %v4545_v0  ;;  %4762 = vmatprep.subr.bf16.mxu0 %v8681_v17  ;;  %v9021_v0 = vld [vmem:[%s10789_s19] sm:$0x7] }
0x2949   :  { %7764 = vmatpush3.bf16.msra.mxu1 %v8683_v51 }
0x294a   :  { %7765 = vmatprep.subr.bf16.mxu1 %v8684_v31 }
0x294b   :  { %4763 = vmatpush1.bf16.msra.mxu0 %v8679_v19 }
0x294d   :  { %7766 = vmatpush3.bf16.msra.mxu1 %v8685_v48 }
0x294e   :  { %7767 = vmatprep.subr.bf16.mxu1 %v8686_v49 }
0x2951   :  { %7768 = vmatpush3.bf16.msra.mxu1 %v8687_v3 }
0x2952   :  { %7769 = vmatprep.subr.bf16.mxu1 %v8688_v9 }
0x2955   :  { %7770 = vmatpush3.bf16.msra.mxu1 %v8689_v29  ;;  %v8698_v29 = vld [vmem:[%s10787_s9 + $0x80] ss:$8 sps:$4 sm:$0xff]  }
0x2956   :  { %7771 = vmatprep.subr.bf16.mxu1 %v8690_v32  ;;  %v8700_v32 = vld [vmem:[%s10787_s9 + $0x84] ss:$8 sps:$4 sm:$0xff]  }
0x2957   :  { %5205 = vmatprep.subr.bf16.mxu0 %v8700_v32 }
0x2959   :  { %7772 = vmatpush3.bf16.msra.mxu1 %v8691_v46  ;;  %v8703_v46 = vld [vmem:[%s10787_s9 + $0x94] ss:$8 sps:$4 sm:$0xff]  }
0x295a   :  { %7773 = vmatprep.subr.bf16.mxu1 %v8692_v42  ;;  %v8701_v42 = vld [vmem:[%s10787_s9 + $0x90] ss:$8 sps:$4 sm:$0xff]  }
0x2a1b   :  { %v4613_v23 = vpop.f32.mrb[96].mxu1 }
0x2a1c   :  { %v4614_v44 = vadd.f32 %v7369_v57, %v4613_v23  ;;  %v8145_v21 = vpop.f32.mrb[97].mxu1 }
0x2a1d   :  { %v4616_v39 = vpop.f32.mrb[98].mxu1 }
0x2a1e   :  { %v10337_v45 = vadd.f32 %v4614_v44, %v10219_v25  ;;  %v4617_v4 = vadd.f32 %v7369_v57, %v4616_v39  ;;  %v8146_v5 = vpop.f32.mrb[99].mxu1  ;;  %v4653_v57 = vrot.slane %v9021_v0, %v9603_v18  ;;  %v8713_v0 = vld [vmem:[%s10787_s9 + $0xd0] ss:$8 sps:$4 sm:$0xff]  }
0x2a1f   :  { %v8694_v5 = vld [vmem:[%s9507_s29 + $0x70] sm:$0xff]  }
0x2a20   :  { %v10340_v43 = vadd.f32 %v4617_v4, %v10222_v41  ;;  %4622 = vadd.xlane.f32.xlu0 %v10337_v45  ;;  %v8693_v4 = vld [vmem:[%s9507_s29 + $0x28] sm:$0xff]  }
0x2a21   :  { %7774 = vmatpush3.bf16.msra.mxu1 %v8693_v4 }
0x2a22   :  { %4624 = vadd.xlane.f32.xlu1 %v10340_v43  ;;  %7775 = vmatprep.subr.bf16.mxu1 %v8694_v5 }
0x2a25   :  { %7776 = vmatpush3.bf16.msra.mxu1 %v8695_v52 }
0x2a26   :  { %7777 = vmatprep.subr.bf16.mxu1 %v8696_v47 }
0x2a29   :  { %7778 = vmatpush3.bf16.msra.mxu1 %v8697_v40 }
0x2a2a   :  { %8147 = vmatprep.subr.bf16.mxu1 %v9314_v34 }
0x2aad   :  { %v4623_v25 = vpop.xlane.xlu0 %4622 }
0x2aae   :  { %v4626_v38 = vmul.f32 0.0078125, %v4623_v25  ;;  %v4661_v25 = vrot.slane %v2938_v33, %v9592_v8 }
0x2aaf   :  { %v4625_v41 = vpop.xlane.xlu1 %4624 }
0x2ab0   :  { %v4628_v56 = vsub.f32 %v10337_v45, %v4626_v38  ;;  %v4627_v20 = vmul.f32 0.0078125, %v4625_v41  ;;  %v4665_v38 = vrot.slane %v2938_v33, %v9600_v16  ;;  %v10421_v33 = vld [vmem:[%s10788_s7 + $0x4] sm:$0x7] }
0x2ab2   :  { %v10350_v36 = vsub.f32 %v10340_v43, %v4627_v20  ;;  %v4630_v50 = vmul.f32 %v4628_v56, %v4628_v56 }
0x2ab4   :  { %4632 = vadd.xlane.f32.xlu0 %v4630_v50  ;;  %v4631_v60 = vmul.f32 %v10350_v36, %v10350_v36 }
0x2ab8   :  { %4634 = vadd.xlane.f32.xlu0 %v4631_v60 }
0x2b41   :  { %v4633_v11 = vpop.xlane.xlu0 %4632 }
0x2b42   :  { %v4636_v12 = vmul.f32 0.0078125, %v4633_v11 }
0x2b44   :  { %v4638_v13 = vadd.f32 1e-05, %v4636_v12 }
0x2b45   :  { %v4635_v30 = vpop.xlane.xlu0 %4634 }
0x2b46   :  { %8938 = vrsqrt.f32 %v4638_v13  ;;  %v4637_v6 = vmul.f32 0.0078125, %v4635_v30 }
0x2b48   :  { %v4639_v63 = vadd.f32 1e-05, %v4637_v6 }
0x2b4a   :  { %8940 = vrsqrt.f32 %v4639_v63 }
0x2b50   :  { %v8939_v35 = vpop.eup %8938 }
0x2b51   :  { %v4642_v2 = vmul.f32 %v8939_v35, %v4628_v56  ;;  %v8706_v35 = vld [vmem:[%s10787_s9 + $0xa4] ss:$8 sps:$4 sm:$0xff]  }
0x2b53   :  { %v4648_v24 = vmul.f32 %v4647_v61, %v4642_v2  ;;  %v8704_v2 = vld [vmem:[%s10787_s9 + $0xa0] ss:$8 sps:$4 sm:$0xff]  }
0x2b54   :  { %v8941_v7 = vpop.eup %8940 }
0x2b55   :  { %v4643_v15 = vmul.f32 %v8941_v7, %v10350_v36  ;;  %v4654_v44 = vadd.f32 %v4653_v57, %v4648_v24  ;;  %v8712_v7 = vld [vmem:[%s10787_s9 + $0xc4] ss:$8 sps:$4 sm:$0xff]   ;;  %v8715_v24 = vld [vmem:[%s10787_s9 + $0xd4] ss:$8 sps:$4 sm:$0xff]  }
0x2b57   :  { %v4649_v23 = vmul.f32 %v4647_v61, %v4643_v15  ;;  %v8707_v61 = vld [vmem:[%s10787_s9 + $0xb0] ss:$8 sps:$4 sm:$0xff]   ;;  %v8710_v15 = vld [vmem:[%s10787_s9 + $0xc0] ss:$8 sps:$4 sm:$0xff]  }
0x2b59   :  { %v4655_v21 = vadd.f32 %v4653_v57, %v4649_v23  ;;  %v8718_v57 = vld [vmem:[%s10787_s9 + $0xe4] ss:$8 sps:$4 sm:$0xff]   ;;  %v8716_v23 = vld [vmem:[%s10787_s9 + $0xe0] ss:$8 sps:$4 sm:$0xff]  }
0x2b5b   :  { %v4656_v39 = vpack.c.bf16 %v4655_v21, %v4654_v44  ;;  %v8721_v44 = vld [vmem:[%s10787_s9 + $0xf4] ss:$8 sps:$4 sm:$0xff]   ;;  %v8719_v21 = vld [vmem:[%s10787_s9 + $0xf0] ss:$8 sps:$4 sm:$0xff]  }
0x2b5d   :  { %4781 = vmatmul.mubr.bf16.vlgmr.msra.gmra.mrb[80].mxu0 %v4656_v39 }
0x2b5e   :  { %5237 = vmatprep.mubr.bf16.mxu0 %v9311_v1  ;;  %5206 = vmatpush1.bf16.msra.mxu0 %v8698_v29 }
0x2b5f   :  { %5207 = vmatprep.subr.bf16.mxu0 %v8703_v46 }
0x2b62   :  { %5208 = vmatpush1.bf16.msra.mxu0 %v8701_v42 }
0x2b63   :  { %5209 = vmatprep.subr.bf16.mxu0 %v8706_v35 }
0x2b66   :  { %5210 = vmatpush1.bf16.msra.mxu0 %v8704_v2  ;;  %v10450_v2 = vld [vmem:[%s10790_s10 + $0x8] sm:$0xff] }
0x2b67   :  { %5211 = vmatprep.subr.bf16.mxu0 %v8709_v37 }
0x2b6a   :  { %5212 = vmatpush1.bf16.msra.mxu0 %v8707_v61 }
0x2b6b   :  { %5213 = vmatprep.subr.bf16.mxu0 %v8712_v7 }
0x2b6e   :  { %5214 = vmatpush1.bf16.msra.mxu0 %v8710_v15 }
0x2b6f   :  { %5215 = vmatprep.subr.bf16.mxu0 %v8715_v24 }
0x2b72   :  { %5216 = vmatpush1.bf16.msra.mxu0 %v8713_v0 }
0x2b73   :  { %5217 = vmatprep.subr.bf16.mxu0 %v8718_v57 }
0x2b76   :  { %5218 = vmatpush1.bf16.msra.mxu0 %v8716_v23 }
0x2b77   :  { %5219 = vmatprep.subr.bf16.mxu0 %v8721_v44 }
0x2b7a   :  { %5220 = vmatpush1.bf16.msra.mxu0 %v8719_v21 }
0x2b7b   :  { %8165 = vmatprep.subr.bf16.mxu0 %v9314_v34 }
0x2c30   :  { %v4782_v41 = vpop.f32.mrb[80].mxu0 }
0x2c31   :  { %v4783_v56 = vadd.f32 %v4782_v41, %v4661_v25  ;;  %v4784_v20 = vpop.f32.mrb[81].mxu0  ;;  %v10426_v41 = vld [vmem:[%s10789_s19 + $0x4] sm:$0x7] }
0x2c32   :  { %v4785_v36 = vadd.f32 %v4784_v20, %v4665_v38  ;;  %v4786_v50 = vpop.f32.mrb[82].mxu0 }
0x2c33   :  { %v4787_v60 = vadd.f32 %v4786_v50, %v4661_v25  ;;  %v4788_v55 = vpop.f32.mrb[83].mxu0  ;;  %v4791_v26 = vmax.f32 %v4783_v56, 0.0  ;;  %v5104_v25 = vrot.slane %v10421_v33, %v9592_v8 }
0x2c34   :  { %v4789_v28 = vadd.f32 %v4788_v55, %v4665_v38  ;;  %v4792_v54 = vmax.f32 %v4785_v36, 0.0 }
0x2c35   :  { %v4793_v53 = vmax.f32 %v4787_v60, 0.0  ;;  %v5110_v60 = vrot.slane %v10426_v41, %v9592_v8 }
0x2c36   :  { %v4794_v58 = vmax.f32 %v4789_v28, 0.0 }
0x2c37   :  { %v4795_v59 = vpack.c.bf16 %v4793_v53, %v4791_v26 }
0x2c38   :  { %v4796_v62 = vpack.c.bf16 %v4794_v58, %v4792_v54  ;;  %v4964_v54 = vld [vmem:[#allocation7 + $0x2] sm:$0x3] }
0x2c39   :  { %v5118_v58 = vrot.slane %v4964_v54, %v9592_v8 }
0x2c3a   :  { %4931 = vmatprep.mubr.bf16.mxu1 %v4796_v62  ;;  %v5122_v62 = vrot.slane %v4964_v54, %v9600_v16 }
0x2c3b   :  { %4932 = vmatmul.mubr.bf16.vlgmr.msra.gmra.mrb[100].mxu1 %v4795_v59 }
0x2c3c   :  { %8149 = vmatprep.mubr.msk.bf16.mxu1 %vm9316_vm0, %v9314_v34 }
0x2d0e   :  { %v7779_v10 = vpop.f32.mrb[100].mxu1 }
0x2d0f   :  { %v7780_v17 = vpop.f32.mrb[101].mxu1 }
0x2d10   :  { %v7781_v19 = vadd.f32 %v7780_v17, %v7779_v10  ;;  %v7782_v22 = vpop.f32.mrb[102].mxu1 }
0x2d11   :  { %v7783_v51 = vpop.f32.mrb[103].mxu1 }
0x2d12   :  { %v4934_v31 = vadd.f32 %v7781_v19, %v7391_v14  ;;  %v7784_v48 = vadd.f32 %v7783_v51, %v7782_v22 }
0x2d14   :  { %v4937_v49 = vadd.f32 %v7784_v48, %v7391_v14  ;;  %v10394_v3 = vadd.f32 %v4934_v31, %v10337_v45 }
0x2d16   :  { %5079 = vadd.xlane.f32.xlu0 %v10394_v3  ;;  %v10398_v9 = vadd.f32 %v4937_v49, %v10340_v43 }
0x2d18   :  { %5081 = vadd.xlane.f32.xlu1 %v10398_v9 }
0x2da3   :  { %v5080_v45 = vpop.xlane.xlu0 %5079 }
0x2da4   :  { %v5083_v11 = vmul.f32 0.0078125, %v5080_v45 }
0x2da5   :  { %v5082_v12 = vpop.xlane.xlu1 %5081 }
0x2da6   :  { %v5085_v43 = vsub.f32 %v10394_v3, %v5083_v11  ;;  %v5084_v13 = vmul.f32 0.0078125, %v5082_v12 }
0x2da8   :  { %v5086_v30 = vsub.f32 %v10398_v9, %v5084_v13  ;;  %v5087_v6 = vmul.f32 %v5085_v43, %v5085_v43 }
0x2daa   :  { %5089 = vadd.xlane.f32.xlu0 %v5087_v6  ;;  %v5088_v63 = vmul.f32 %v5086_v30, %v5086_v30 }
0x2dac   :  { %5091 = vadd.xlane.f32.xlu1 %v5088_v63 }
0x2e37   :  { %v5090_v39 = vpop.xlane.xlu0 %5089 }
0x2e38   :  { %v5093_v4 = vmul.f32 0.0078125, %v5090_v39 }
0x2e39   :  { %v5092_v5 = vpop.xlane.xlu1 %5091 }
0x2e3a   :  { %v5095_v52 = vadd.f32 1e-05, %v5093_v4  ;;  %v5094_v47 = vmul.f32 0.0078125, %v5092_v5 }
0x2e3c   :  { %8942 = vrsqrt.f32 %v5095_v52  ;;  %v5096_v40 = vadd.f32 1e-05, %v5094_v47 }
0x2e3e   :  { %8944 = vrsqrt.f32 %v5096_v40 }
0x2e46   :  { %v8943_v38 = vpop.eup %8942 }
0x2e47   :  { %v5099_v56 = vmul.f32 %v8943_v38, %v5085_v43 }
0x2e48   :  { %v8945_v20 = vpop.eup %8944 }
0x2e49   :  { %v5100_v36 = vmul.f32 %v8945_v20, %v5086_v30  ;;  %v5105_v50 = vmul.f32 %v5104_v25, %v5099_v56  ;;  %v10446_v30 = vld [vmem:[%s10790_s10] sm:$0xff] }
0x2e4b   :  { %v5106_v55 = vmul.f32 %v5104_v25, %v5100_v36  ;;  %v5111_v28 = vadd.f32 %v5110_v60, %v5105_v50 }
0x2e4d   :  { %v5112_v26 = vadd.f32 %v5110_v60, %v5106_v55 }
0x2e4f   :  { %v5113_v53 = vpack.c.bf16 %v5112_v26, %v5111_v28 }
0x2e51   :  { %5238 = vmatmul.mubr.bf16.vlgmr.msra.gmra.mrb[84].mxu0 %v5113_v53 }
0x2e52   :  { %8167 = vmatprep.mubr.msk.bf16.mxu0 %vm9316_vm0, %v9314_v34 }
0x2f24   :  { %v5239_v59 = vpop.f32.mrb[84].mxu0 }
0x2f25   :  { %v5240_v10 = vadd.f32 %v5239_v59, %v5118_v58  ;;  %v5241_v14 = vpop.f32.mrb[85].mxu0 }
0x2f26   :  { %v5243_v17 = vpop.f32.mrb[86].mxu0  ;;  %v5242_v51 = vadd.f32 %v5241_v14, %v5122_v62 }
0x2f27   :  { %v5244_v19 = vadd.f32 %v5243_v17, %v5118_v58  ;;  %v5245_v22 = vpop.f32.mrb[87].mxu0  ;;  %5252 = vrot.lane.b32.xlu0 %v5240_v10, %s9315_s13 }
0x2f28   :  { %v5246_v31 = vadd.f32 %v5245_v22, %v5122_v62 }
0x2f29   :  { %v5248_v48 = vpack.c.bf16 %v5244_v19, %v5240_v10  ;;  %5254 = vrot.lane.b32.xlu1 %v5244_v19, %s9315_s13 }
0x2f2a   :  { %v10436_v49 = vpack.c.bf16 %v5246_v31, %v5242_v51 }
0x2f99   :  { %v5253_v29 = vpop.permute.xlu0 %5252 }
0x2f9a   :  { %5258 = vxpose.xlu1.b32.start [1/2] (short) (narrow) %v5253_v29, 64 }
0x2f9b   :  { %v5255_v32 = vpop.permute.xlu1 %5254 }
0x2f9e   :  { %5259 = vxpose.xlu1.b32.end [2/2] (short) (narrow) %v5255_v32, 64 }
0x2fd4   :  { %5410 = vrot.lane.b32.xlu1 %v5248_v48, %s9317_s8 }
0x301a   :  { %v5274_v46 = vpop.trf.xlu1 }
0x301e   :  { %v5275_v42 = vpop.trf.xlu1 }
0x301f   :  { %v5290_v45 = vpack.c.bf16 %v5275_v42, %v5274_v46 }
0x3021   :  { %8148 = vmatpush3.bf16.msra.mxu1 %v5290_v45 }
0x3022   :  { %8153 = vmatprep.subr.bf16.mxu1 %v9314_v34  ;;  %v5276_v52 = vpop.trf.xlu1 }
0x3024   :  { %8150 = vmatmul.mubr.msk.bf16.vlgmr.msra.gmra.mrb[104].mxu1 %vm656_vm1, %v5248_v48 }
0x3025   :  { %8154 = vmatpush3.bf16.msra.mxu1 %v10436_v49  ;;  %8155 = vmatprep.mubr.msk.bf16.mxu1 %vm9316_vm0, %v9314_v34 }
0x3026   :  { %8159 = vmatprep.subr.bf16.mxu1 %v9314_v34  ;;  %v5277_v47 = vpop.trf.xlu1 }
0x3027   :  { %v5291_v26 = vpack.c.bf16 %v5277_v47, %v5276_v52 }
0x302a   :  { %v5278_v25 = vpop.trf.xlu1 }
0x302e   :  { %v5279_v56 = vpop.trf.xlu1 }
0x302f   :  { %v5292_v54 = vpack.c.bf16 %v5279_v56, %v5278_v25 }
0x3032   :  { %v5280_v50 = vpop.trf.xlu1 }
0x3036   :  { %v5281_v53 = vpop.trf.xlu1 }
0x3037   :  { %v5293_v59 = vpack.c.bf16 %v5281_v53, %v5280_v50 }
0x3046   :  { %v5411_v58 = vpop.permute.xlu1 %5410 }
0x30f7   :  { %v5331_v11 = vpop.f32.mrb[104].mxu1 }
0x30f8   :  { %v5338_v12 = vmul.f32 0.25, %v5331_v11  ;;  %v8151_v43 = vpop.f32.mrb[105].mxu1 }
0x30f9   :  { %v5334_v13 = vpop.f32.mrb[106].mxu1 }
0x30fa   :  { %v5340_v6 = vadd.f32 %v10446_v30, %v5338_v12  ;;  %v5339_v63 = vmul.f32 0.25, %v5334_v13  ;;  %v8152_v35 = vpop.f32.mrb[107].mxu1 }
0x30fc   :  { %v5341_v37 = vadd.f32 %v10450_v2, %v5339_v63  ;;  %v5342_v61 = vsel %vm656_vm1, %v5340_v6, -inf }
0x30fd   :  { %5343 = vmax.xlane.f32.xlu0 %v5342_v61 }
0x30fe   :  { %v5345_v7 = vsel %vm656_vm1, %v5341_v37, -inf }
0x3101   :  { %5346 = vmax.xlane.f32.xlu0 %v5345_v7 }
0x318a   :  { %v5344_v15 = vpop.xlane.xlu0 %5343 }
0x318b   :  { %v5348_v24 = vsub.f32 %v5340_v6, %v5344_v15 }
0x318d   :  { %v5350_v0 = vmul.f32 1.442695, %v5348_v24 }
0x318e   :  { %v5347_v57 = vpop.xlane.xlu0 %5346 }
0x318f   :  { %8946 = vpow2.f32 %v5350_v0  ;;  %v5349_v23 = vsub.f32 %v5341_v37, %v5347_v57 }
0x3191   :  { %v5352_v44 = vmul.f32 1.442695, %v5349_v23 }
0x3193   :  { %8948 = vpow2.f32 %v5352_v44 }
0x3199   :  { %v8947_v21 = vpop.eup %8946 }
0x319a   :  { %v5354_v39 = vsel %vm656_vm1, %v8947_v21, 0.0 }
0x319b   :  { %5355 = vadd.xlane.f32.xlu0 %v5354_v39 }
0x319d   :  { %v8949_v4 = vpop.eup %8948 }
0x319e   :  { %v5357_v5 = vsel %vm656_vm1, %v8949_v4, 0.0 }
0x319f   :  { %5358 = vadd.xlane.f32.xlu0 %v5357_v5 }
0x31b5   :  { %5531 = vrot.lane.b32.xlu0 %v5248_v48, %s9319_s20 }
0x31b9   :  { %5651 = vrot.lane.b32.xlu0 %v5248_v48, %s9318_s12 }
0x3228   :  { %v5356_v40 = vpop.xlane.xlu0 %5355 }
0x3229   :  { %8950 = vrcp.f32 %v5356_v40 }
0x322c   :  { %v5359_v38 = vpop.xlane.xlu0 %5358 }
0x322d   :  { %8952 = vrcp.f32 %v5359_v38 }
0x3230   :  { %v5532_v62 = vpop.permute.xlu0 %5531 }
0x3233   :  { %v8951_v20 = vpop.eup %8950 }
0x3234   :  { %v5362_v60 = vmul.f32 %v8951_v20, %v8947_v21  ;;  %v5652_v10 = vpop.permute.xlu0 %5651 }
0x3237   :  { %v8953_v36 = vpop.eup %8952 }
0x3238   :  { %v5363_v55 = vmul.f32 %v8953_v36, %v8949_v4 }
0x323a   :  { %v5364_v28 = vpack.c.bf16 %v5363_v55, %v5362_v60 }
0x323c   :  { %8156 = vmatmul.mubr.msk.bf16.vlgmr.msra.gmra.mrb[108].mxu1 %vm656_vm1, %v5364_v28 }
0x323d   :  { %8160 = vmatpush3.bf16.msra.mxu1 %v5291_v26  ;;  %8161 = vmatprep.mubr.msk.bf16.mxu1 %vm9316_vm0, %v9314_v34 }
0x323e   :  { %8171 = vmatprep.subr.bf16.mxu1 %v9314_v34 }
0x3244   :  { %8162 = vmatmul.mubr.msk.bf16.vlgmr.msra.gmra.mrb[112].mxu1 %vm656_vm1, %v5411_v58 }
0x3245   :  { %8172 = vmatpush3.bf16.msra.mxu1 %v5292_v54  ;;  %8173 = vmatprep.mubr.msk.bf16.mxu1 %vm9316_vm0, %v9314_v34 }
0x3246   :  { %8183 = vmatprep.subr.bf16.mxu1 %v9314_v34 }
0x324c   :  { %8174 = vmatmul.mubr.msk.bf16.vlgmr.msra.gmra.mrb[116].mxu1 %vm656_vm1, %v5532_v62 }
0x324d   :  { %8184 = vmatpush3.bf16.msra.mxu1 %v5293_v59  ;;  %8185 = vmatprep.mubr.msk.bf16.mxu1 %vm9316_vm0, %v9314_v34 }
0x324e   :  { %8195 = vmatprep.subr.bf16.mxu1 %v9314_v34 }
0x3254   :  { %8186 = vmatmul.mubr.msk.bf16.vlgmr.msra.gmra.mrb[120].mxu1 %vm656_vm1, %v5652_v10 }
0x3255   :  { %8203 = vmatprep.mubr.msk.bf16.mxu1 %vm9316_vm0, %v9314_v34 }
0x330f   :  { %v10474_v14 = vpop.f32.mrb[108].mxu1 }
0x3310   :  { %v8157_v17 = vpop.f32.mrb[109].mxu1 }
0x3311   :  { %v10476_v19 = vpop.f32.mrb[110].mxu1 }
0x3312   :  { %v8158_v22 = vpop.f32.mrb[111].mxu1 }
0x3317   :  { %v5449_v51 = vpop.f32.mrb[112].mxu1 }
0x3318   :  { %v5456_v31 = vmul.f32 0.25, %v5449_v51  ;;  %v8163_v48 = vpop.f32.mrb[113].mxu1 }
0x3319   :  { %v5452_v29 = vpop.f32.mrb[114].mxu1 }
0x331a   :  { %v5458_v32 = vadd.f32 %v10446_v30, %v5456_v31  ;;  %v5457_v46 = vmul.f32 0.25, %v5452_v29  ;;  %v8164_v42 = vpop.f32.mrb[115].mxu1 }
0x331c   :  { %v5459_v45 = vadd.f32 %v10450_v2, %v5457_v46  ;;  %v5460_v11 = vsel %vm656_vm1, %v5458_v32, -inf }
0x331d   :  { %5461 = vmax.xlane.f32.xlu0 %v5460_v11 }
0x331e   :  { %v5463_v12 = vsel %vm656_vm1, %v5459_v45, -inf }
0x331f   :  { %5464 = vmax.xlane.f32.xlu1 %v5463_v12  ;;  %v5570_v43 = vpop.f32.mrb[116].mxu1 }
0x3320   :  { %v5577_v13 = vmul.f32 0.25, %v5570_v43  ;;  %v8175_v6 = vpop.f32.mrb[117].mxu1 }
0x3321   :  { %v5573_v63 = vpop.f32.mrb[118].mxu1 }
0x3322   :  { %v5579_v35 = vadd.f32 %v10446_v30, %v5577_v13  ;;  %v5578_v37 = vmul.f32 0.25, %v5573_v63  ;;  %v8176_v61 = vpop.f32.mrb[119].mxu1 }
0x3324   :  { %v5580_v7 = vadd.f32 %v10450_v2, %v5578_v37  ;;  %v5581_v15 = vsel %vm656_vm1, %v5579_v35, -inf }
0x3325   :  { %5582 = vmax.xlane.f32.xlu0 %v5581_v15 }
0x3326   :  { %v5584_v23 = vsel %vm656_vm1, %v5580_v7, -inf }
0x3327   :  { %v5690_v24 = vpop.f32.mrb[120].mxu1 }
0x3328   :  { %v5697_v0 = vmul.f32 0.25, %v5690_v24  ;;  %v8187_v57 = vpop.f32.mrb[121].mxu1 }
0x3329   :  { %5585 = vmax.xlane.f32.xlu0 %v5584_v23  ;;  %v5693_v44 = vpop.f32.mrb[122].mxu1 }
0x332a   :  { %v5699_v21 = vadd.f32 %v10446_v30, %v5697_v0  ;;  %v5698_v39 = vmul.f32 0.25, %v5693_v44  ;;  %v8188_v4 = vpop.f32.mrb[123].mxu1 }
0x332c   :  { %v5700_v5 = vadd.f32 %v10450_v2, %v5698_v39  ;;  %v5701_v52 = vsel %vm656_vm1, %v5699_v21, -inf }
0x332d   :  { %5702 = vmax.xlane.f32.xlu0 %v5701_v52 }
0x332e   :  { %v5704_v47 = vsel %vm656_vm1, %v5700_v5, -inf }
0x3330   :  { %5484 = vrot.lane.b32.xlu1 %v10436_v49, %s9317_s8 }
0x3331   :  { %5705 = vmax.xlane.f32.xlu0 %v5704_v47 }
0x33aa   :  { %v5462_v40 = vpop.xlane.xlu0 %5461 }
0x33ab   :  { %v5466_v25 = vsub.f32 %v5458_v32, %v5462_v40 }
0x33ac   :  { %v5465_v38 = vpop.xlane.xlu1 %5464 }
0x33ad   :  { %v5468_v56 = vmul.f32 1.442695, %v5466_v25  ;;  %v5467_v20 = vsub.f32 %v5459_v45, %v5465_v38  ;;  %v8722_v38 = vld [vmem:[%s10791_s25 + $0x20] sm:$0xff]  }
0x33ae   :  { %8196 = vmatpush3.bf16.msra.mxu1 %v8722_v38 }
0x33af   :  { %8954 = vpow2.f32 %v5468_v56  ;;  %v5470_v30 = vmul.f32 1.442695, %v5467_v20  ;;  %8197 = vmatprep.subr.bf16.mxu1 %v9314_v34  ;;  %v8723_v20 = vld [vmem:[%s10791_s25 + $0x28] sm:$0xff]  }
0x33b0   :  { %v5485_v36 = vpop.permute.xlu1 %5484 }
0x33b1   :  { %8956 = vpow2.f32 %v5470_v30  ;;  %8166 = vmatpush3.bf16.msra.mxu0 %v5485_v36 }
0x33b2   :  { %v5583_v2 = vpop.xlane.xlu0 %5582  ;;  %8177 = vmatprep.subr.bf16.mxu0 %v9314_v34  ;;  %8198 = vmatpush3.bf16.msra.mxu1 %v8723_v20 }
0x33b3   :  { %v5587_v50 = vsub.f32 %v5579_v35, %v5583_v2  ;;  %v8724_v2 = vld [vmem:[%s10791_s25 + $0x30] sm:$0xff]   ;;  %8199 = vmatprep.subr.bf16.mxu1 %v9314_v34 }
0x33b5   :  { %v5589_v60 = vmul.f32 1.442695, %v5587_v50 }
0x33b6   :  { %v5586_v55 = vpop.xlane.xlu0 %5585  ;;  %8200 = vmatpush3.bf16.msra.mxu1 %v8724_v2 }
0x33b7   :  { %8958 = vpow2.f32 %v5589_v60  ;;  %v5588_v28 = vsub.f32 %v5580_v7, %v5586_v55  ;;  %8201 = vmatprep.subr.bf16.mxu1 %v9314_v34 }
0x33b9   :  { %v8955_v26 = vpop.eup %8954  ;;  %v5591_v53 = vmul.f32 1.442695, %v5588_v28  ;;  %v8725_v28 = vld [vmem:[%s10791_s25 + $0x38] sm:$0xff]  }
0x33ba   :  { %v5703_v54 = vpop.xlane.xlu0 %5702  ;;  %v5472_v58 = vsel %vm656_vm1, %v8955_v26, 0.0  ;;  %8202 = vmatpush3.bf16.msra.mxu1 %v8725_v28  ;;  %v8736_v28 = vld [vmem:[%s10793_s15 + $0x50] sm:$0xff]  }
0x33bb   :  { %v8957_v59 = vpop.eup %8956  ;;  %8960 = vpow2.f32 %v5591_v53  ;;  %v5707_v62 = vsub.f32 %v5699_v21, %v5703_v54  ;;  %5473 = vadd.xlane.f32.xlu0 %v5472_v58  ;;  %8227 = vmatprep.subr.bf16.mxu1 %v9314_v34 }
0x33bc   :  { %v5475_v22 = vsel %vm656_vm1, %v8957_v59, 0.0 }
0x33bd   :  { %v5709_v10 = vmul.f32 1.442695, %v5707_v62 }
0x33be   :  { %v5706_v17 = vpop.xlane.xlu0 %5705 }
0x33bf   :  { %8962 = vpow2.f32 %v5709_v10  ;;  %v5708_v51 = vsub.f32 %v5700_v5, %v5706_v17  ;;  %5476 = vadd.xlane.f32.xlu0 %v5475_v22 }
0x33c1   :  { %v8959_v31 = vpop.eup %8958  ;;  %v5711_v48 = vmul.f32 1.442695, %v5708_v51 }
0x33c2   :  { %v5593_v29 = vsel %vm656_vm1, %v8959_v31, 0.0 }
0x33c3   :  { %8964 = vpow2.f32 %v5711_v48  ;;  %5594 = vadd.xlane.f32.xlu0 %v5593_v29 }
0x33c5   :  { %v8961_v32 = vpop.eup %8960 }
0x33c6   :  { %v5596_v46 = vsel %vm656_vm1, %v8961_v32, 0.0 }
0x33c7   :  { %5597 = vadd.xlane.f32.xlu0 %v5596_v46 }
0x33c9   :  { %v8963_v42 = vpop.eup %8962 }
0x33ca   :  { %v5713_v45 = vsel %vm656_vm1, %v8963_v42, 0.0 }
0x33cb   :  { %5714 = vadd.xlane.f32.xlu1 %v5713_v45 }
0x33cd   :  { %v8965_v11 = vpop.eup %8964 }
0x33ce   :  { %v5716_v12 = vsel %vm656_vm1, %v8965_v11, 0.0 }
0x33cf   :  { %5717 = vadd.xlane.f32.xlu0 %v5716_v12 }
0x33dc   :  { %5724 = vrot.lane.b32.xlu1 %v10436_v49, %s9318_s12 }
0x33e5   :  { %5604 = vrot.lane.b32.xlu0 %v10436_v49, %s9319_s20 }
0x3448   :  { %v5474_v43 = vpop.xlane.xlu0 %5473 }
0x3449   :  { %8966 = vrcp.f32 %v5474_v43 }
0x344c   :  { %v5477_v13 = vpop.xlane.xlu0 %5476 }
0x344d   :  { %8968 = vrcp.f32 %v5477_v13 }
0x3450   :  { %v5595_v6 = vpop.xlane.xlu0 %5594 }
0x3451   :  { %8970 = vrcp.f32 %v5595_v6 }
0x3453   :  { %v8967_v35 = vpop.eup %8966 }
0x3454   :  { %v5598_v63 = vpop.xlane.xlu0 %5597  ;;  %v5480_v61 = vmul.f32 %v8967_v35, %v8955_v26 }
0x3455   :  { %8972 = vrcp.f32 %v5598_v63 }
0x3457   :  { %v8969_v37 = vpop.eup %8968 }
0x3458   :  { %v5481_v7 = vmul.f32 %v8969_v37, %v8957_v59  ;;  %v5715_v15 = vpop.xlane.xlu1 %5714  ;;  %v8726_v37 = vld [vmem:[%s10792_s11 + $0x40] sm:$0xff]  }
0x3459   :  { %8974 = vrcp.f32 %v5715_v15  ;;  %v8730_v15 = vld [vmem:[%s10792_s11 + $0x60] sm:$0xff]  }
0x345a   :  { %v5482_v24 = vpack.c.bf16 %v5481_v7, %v5480_v61  ;;  %v8729_v7 = vld [vmem:[%s10792_s11 + $0x58] sm:$0xff]  }
0x345b   :  { %v8971_v57 = vpop.eup %8970 }
0x345c   :  { %8168 = vmatmul.mubr.msk.bf16.vlgmr.msra.gmra.mrb[88].mxu0 %vm656_vm1, %v5482_v24  ;;  %v5718_v0 = vpop.xlane.xlu0 %5717  ;;  %v5601_v23 = vmul.f32 %v8971_v57, %v8959_v31  ;;  %v5725_v4 = vpop.permute.xlu1 %5724  ;;  %v8731_v24 = vld [vmem:[%s10792_s11 + $0x68] sm:$0xff]   ;;  %v8733_v57 = vld [vmem:[%s10792_s11 + $0x78] sm:$0xff]  }
0x345d   :  { %8976 = vrcp.f32 %v5718_v0  ;;  %8179 = vmatprep.mubr.msk.bf16.mxu0 %vm9316_vm0, %v9314_v34  ;;  %v8732_v0 = vld [vmem:[%s10792_s11 + $0x70] sm:$0xff]  }
0x345f   :  { %v8973_v49 = vpop.eup %8972 }
0x3460   :  { %v5602_v44 = vmul.f32 %v8973_v49, %v8961_v32  ;;  %v5605_v21 = vpop.permute.xlu0 %5604  ;;  %v7546_v49 = vld [vmem:[#allocation8 + $0x1] ss:$0 sm:$0xff] }
0x3461   :  { %8178 = vmatpush3.bf16.msra.mxu0 %v5605_v21 }
0x3462   :  { %v5603_v39 = vpack.c.bf16 %v5602_v44, %v5601_v23  ;;  %8189 = vmatprep.subr.bf16.mxu0 %v9314_v34 }
0x3463   :  { %v8975_v5 = vpop.eup %8974 }
0x3464   :  { %8180 = vmatmul.mubr.msk.bf16.vlgmr.msra.gmra.mrb[92].mxu0 %vm656_vm1, %v5603_v39  ;;  %v5721_v47 = vmul.f32 %v8975_v5, %v8963_v42 }
0x3465   :  { %8190 = vmatpush3.bf16.msra.mxu0 %v5725_v4  ;;  %8191 = vmatprep.mubr.msk.bf16.mxu0 %vm9316_vm0, %v9314_v34 }
0x3466   :  { %8207 = vmatprep.subr.bf16.mxu0 %v9314_v34 }
0x3467   :  { %v8977_v52 = vpop.eup %8976 }
0x3468   :  { %v5722_v40 = vmul.f32 %v8977_v52, %v8965_v11 }
0x346a   :  { %v5723_v25 = vpack.c.bf16 %v5722_v40, %v5721_v47 }
0x346c   :  { %8192 = vmatmul.mubr.msk.bf16.vlgmr.msra.gmra.mrb[96].mxu0 %vm656_vm1, %v5723_v25 }
0x346d   :  { %8223 = vmatprep.mubr.msk.bf16.mxu0 %vm9316_vm0, %v9314_v34 }
0x352f   :  { %v5524_v56 = vpop.f32.mrb[88].mxu0 }
0x3530   :  { %v8169_v30 = vpop.f32.mrb[89].mxu0 }
0x3531   :  { %v5527_v36 = vpop.f32.mrb[90].mxu0 }
0x3532   :  { %v8444_v50 = vpack.i.bf16 %v5527_v36, %v5524_v56  ;;  %v8170_v60 = vpop.f32.mrb[91].mxu0  ;;  %v8734_v56 = vld [vmem:[%s10793_s15 + $0x40] sm:$0xff]  }
0x3533   :  { %8208 = vmatpush3.bf16.msra.mxu0 %v8734_v56 }
0x3534   :  { %8445 = vrot.lane.b32.xlu1 %v8444_v50, %s9298_s0  ;;  %8209 = vmatprep.subr.bf16.mxu0 %v9314_v34 }
0x3537   :  { %v5644_v55 = vpop.f32.mrb[92].mxu0 }
0x3538   :  { %v8181_v26 = vpop.f32.mrb[93].mxu0 }
0x3539   :  { %v5647_v53 = vpop.f32.mrb[94].mxu0  ;;  %v8737_v26 = vld [vmem:[%s10793_s15 + $0x58] sm:$0xff]  }
0x353a   :  { %v8449_v54 = vpack.i.bf16 %v5647_v53, %v5644_v55  ;;  %v8182_v58 = vpop.f32.mrb[95].mxu0  ;;  %v8735_v55 = vld [vmem:[%s10793_s15 + $0x48] sm:$0xff]   ;;  %v8738_v53 = vld [vmem:[%s10793_s15 + $0x60] sm:$0xff]  }
0x353b   :  { %8210 = vmatpush3.bf16.msra.mxu0 %v8735_v55  ;;  %v8740_v58 = vld [vmem:[%s10793_s15 + $0x70] sm:$0xff]  }
0x353c   :  { %8450 = vrot.lane.b32.xlu0 %v8449_v54, %s9304_s22  ;;  %8211 = vmatprep.subr.bf16.mxu0 %v9314_v34  ;;  %v8739_v54 = vld [vmem:[%s10793_s15 + $0x68] sm:$0xff]  }
0x353f   :  { %v5764_v59 = vpop.f32.mrb[96].mxu0  ;;  %8212 = vmatpush3.bf16.msra.mxu0 %v8736_v28  ;;  %v9025_v28 = vld [vmem:[%s10794_s18 + $0x8] sm:$0xff] }
0x3540   :  { %v8193_v62 = vpop.f32.mrb[97].mxu0  ;;  %8213 = vmatprep.subr.bf16.mxu0 %v9314_v34 }
0x3541   :  { %v5767_v10 = vpop.f32.mrb[98].mxu0  ;;  %v7561_v62 = vld [vmem:[#allocation11 + $0x1] ss:$0 sm:$0xff] }
0x3542   :  { %v8454_v17 = vpack.i.bf16 %v5767_v10, %v5764_v59  ;;  %v8194_v22 = vpop.f32.mrb[99].mxu0  ;;  %v8741_v59 = vld [vmem:[%s10793_s15 + $0x78] sm:$0xff]  }
0x3543   :  { %8214 = vmatpush3.bf16.msra.mxu0 %v8737_v26 }
0x3544   :  { %8455 = vrot.lane.b32.xlu1 %v8454_v17, %s9320_s28  ;;  %8215 = vmatprep.subr.bf16.mxu0 %v9314_v34 }
0x3547   :  { %8216 = vmatpush3.bf16.msra.mxu0 %v8738_v53 }
0x3548   :  { %8217 = vmatprep.subr.bf16.mxu0 %v9314_v34 }
0x354b   :  { %8218 = vmatpush3.bf16.msra.mxu0 %v8739_v54 }
0x354c   :  { %8219 = vmatprep.subr.bf16.mxu0 %v9314_v34 }
0x354f   :  { %8220 = vmatpush3.bf16.msra.mxu0 %v8740_v58 }
0x3550   :  { %8221 = vmatprep.subr.bf16.mxu0 %v9314_v34 }
0x3553   :  { %8222 = vmatpush3.bf16.msra.mxu0 %v8741_v59 }
0x3554   :  { %8247 = vmatprep.subr.bf16.mxu0 %v9314_v34 }
0x35a6   :  { %v8446_v51 = vpop.permute.xlu1 %8445 }
0x35a7   :  { %v8448_v48 = vunpack.i.h.bf16 %v8446_v51  ;;  %v8447_v29 = vunpack.i.l.bf16 %v8446_v51 }
0x35a9   :  { %v5796_v45 = vsel %vm656_vm1, %v10476_v19, %v8448_v48  ;;  %v5795_v11 = vsel %vm656_vm1, %v10474_v14, %v8447_v29  ;;  %v8727_v19 = vld [vmem:[%s10792_s11 + $0x48] sm:$0xff]   ;;  %v8728_v14 = vld [vmem:[%s10792_s11 + $0x50] sm:$0xff]  }
0x35ae   :  { %v8451_v31 = vpop.permute.xlu0 %8450 }
0x35af   :  { %v8453_v32 = vunpack.i.h.bf16 %v8451_v31  ;;  %v8452_v46 = vunpack.i.l.bf16 %v8451_v31 }
0x35b1   :  { %v5798_v13 = vsel %vm1160_vm2, %v5796_v45, %v8453_v32  ;;  %v5797_v6 = vsel %vm1160_vm2, %v5795_v11, %v8452_v46  ;;  %v5903_v45 = vrot.slane %v10421_v33, %v9600_v16 }
0x35b6   :  { %v8456_v42 = vpop.permute.xlu1 %8455 }
0x35b7   :  { %v8458_v12 = vunpack.i.h.bf16 %v8456_v42  ;;  %v8457_v43 = vunpack.i.l.bf16 %v8456_v42 }
0x35b9   :  { %v5800_v63 = vsel %vm1163_vm3, %v5798_v13, %v8458_v12  ;;  %v5799_v35 = vsel %vm1163_vm3, %v5797_v6, %v8457_v43  ;;  %v5909_v13 = vrot.slane %v10426_v41, %v9600_v16  ;;  %v7552_v41 = vld [vmem:[#allocation10 + $0x1] ss:$0 sm:$0xff] }
0x35ba   :  { %v5801_v61 = vpack.c.bf16 %v5800_v63, %v5799_v35 }
0x35bc   :  { %8204 = vmatmul.mubr.msk.bf16.vlgmr.msra.gmra.mrb[124].mxu1 %vm1197_vm4, %v5801_v61 }
0x35bd   :  { %8228 = vmatpush3.bf16.msra.mxu1 %v8726_v37  ;;  %8243 = vmatprep.mubr.msk.bf16.mxu1 %vm9316_vm0, %v9314_v34 }
0x35be   :  { %8229 = vmatprep.subr.bf16.mxu1 %v9314_v34 }
0x35c1   :  { %8230 = vmatpush3.bf16.msra.mxu1 %v8727_v19 }
0x35c2   :  { %8231 = vmatprep.subr.bf16.mxu1 %v9314_v34 }
0x35c5   :  { %8232 = vmatpush3.bf16.msra.mxu1 %v8728_v14 }
0x35c6   :  { %8233 = vmatprep.subr.bf16.mxu1 %v9314_v34 }
0x35c9   :  { %8234 = vmatpush3.bf16.msra.mxu1 %v8729_v7 }
0x35ca   :  { %8235 = vmatprep.subr.bf16.mxu1 %v9314_v34 }
0x35cd   :  { %8236 = vmatpush3.bf16.msra.mxu1 %v8730_v15 }
0x35ce   :  { %8237 = vmatprep.subr.bf16.mxu1 %v9314_v34 }
0x35d1   :  { %8238 = vmatpush3.bf16.msra.mxu1 %v8731_v24 }
0x35d2   :  { %8239 = vmatprep.subr.bf16.mxu1 %v9314_v34 }
0x35d5   :  { %8240 = vmatpush3.bf16.msra.mxu1 %v8732_v0 }
0x35d6   :  { %8241 = vmatprep.subr.bf16.mxu1 %v9314_v34 }
0x35d9   :  { %8242 = vmatpush3.bf16.msra.mxu1 %v8733_v57 }
0x35da   :  { %8259 = vmatprep.subr.bf16.mxu1 %v9314_v34 }
0x35dc   :  { %8244 = vmatmul.mubr.bf16.vlgmr.msra.gmra.mrb[128].mxu1 %v10100_v27 }
0x35dd   :  { %8261 = vmatprep.mubr.msk.bf16.mxu1 %vm9316_vm0, %v9314_v34 }
0x368f   :  { %v5869_v23 = vpop.f32.mrb[124].mxu1 }
0x3690   :  { %v5870_v44 = vadd.f32 %v7546_v49, %v5869_v23  ;;  %v8205_v21 = vpop.f32.mrb[125].mxu1 }
0x3691   :  { %v5872_v39 = vpop.f32.mrb[126].mxu1 }
0x3692   :  { %v10556_v4 = vadd.f32 %v5870_v44, %v10394_v3  ;;  %v5873_v5 = vadd.f32 %v7546_v49, %v5872_v39  ;;  %v8206_v52 = vpop.f32.mrb[127].mxu1 }
0x3694   :  { %v10559_v47 = vadd.f32 %v5873_v5, %v10398_v9  ;;  %5878 = vadd.xlane.f32.xlu0 %v10556_v4 }
0x3696   :  { %5880 = vadd.xlane.f32.xlu1 %v10559_v47 }
0x36af   :  { %v6096_v27 = vpop.f32.mrb[128].mxu1 }
0x36b0   :  { %v8245_v40 = vpop.f32.mrb[129].mxu1  ;;  %v10581_v10 = vadd.f32 %v7561_v62, %v6096_v27 }
0x36b1   :  { %v6099_v25 = vpop.f32.mrb[130].mxu1 }
0x36b2   :  { %v8246_v38 = vpop.f32.mrb[131].mxu1  ;;  %v10584_v17 = vadd.f32 %v7561_v62, %v6099_v25 }
0x36b4   :  { %v10618_v58 = vpack.c.bf16 %v10584_v17, %v10581_v10 }
0x3721   :  { %v5879_v3 = vpop.xlane.xlu0 %5878 }
0x3722   :  { %v5882_v20 = vmul.f32 0.0078125, %v5879_v3 }
0x3723   :  { %v5881_v30 = vpop.xlane.xlu1 %5880 }
0x3724   :  { %v5884_v9 = vsub.f32 %v10556_v4, %v5882_v20  ;;  %v5883_v36 = vmul.f32 0.0078125, %v5881_v30 }
0x3726   :  { %v5885_v2 = vsub.f32 %v10559_v47, %v5883_v36  ;;  %v5886_v50 = vmul.f32 %v5884_v9, %v5884_v9 }
0x3728   :  { %5888 = vadd.xlane.f32.xlu0 %v5886_v50  ;;  %v5887_v60 = vmul.f32 %v5885_v2, %v5885_v2 }
0x372c   :  { %5890 = vadd.xlane.f32.xlu0 %v5887_v60 }
0x3759   :  { %6105 = vxpose.xlu0.b32.start [1/2] (short) (narrow) %v10581_v10, 64 }
0x375d   :  { %6106 = vxpose.xlu0.b32.end [2/2] (short) (narrow) %v10584_v17, 64 }
0x37b5   :  { %v5889_v22 = vpop.xlane.xlu0 %5888 }
0x37b6   :  { %v5892_v51 = vmul.f32 0.0078125, %v5889_v22 }
0x37b8   :  { %v5894_v31 = vadd.f32 1e-05, %v5892_v51 }
0x37b9   :  { %v5891_v48 = vpop.xlane.xlu0 %5890 }
0x37ba   :  { %8978 = vrsqrt.f32 %v5894_v31  ;;  %v5893_v29 = vmul.f32 0.0078125, %v5891_v48 }
0x37bc   :  { %v5895_v32 = vadd.f32 1e-05, %v5893_v29 }
0x37be   :  { %8980 = vrsqrt.f32 %v5895_v32 }
0x37c4   :  { %v8979_v46 = vpop.eup %8978 }
0x37c5   :  { %v5898_v42 = vmul.f32 %v8979_v46, %v5884_v9 }
0x37c7   :  { %v5904_v43 = vmul.f32 %v5903_v45, %v5898_v42 }
0x37c8   :  { %v8981_v11 = vpop.eup %8980 }
0x37c9   :  { %v5899_v12 = vmul.f32 %v8981_v11, %v5885_v2  ;;  %v5910_v63 = vadd.f32 %v5909_v13, %v5904_v43  ;;  %v9024_v2 = vld [vmem:[%s10794_s18] sm:$0xff] }
0x37cb   :  { %v5905_v6 = vmul.f32 %v5903_v45, %v5899_v12 }
0x37cd   :  { %v5911_v35 = vadd.f32 %v5909_v13, %v5905_v6 }
0x37cf   :  { %v5912_v37 = vpack.c.bf16 %v5911_v35, %v5910_v63 }
0x37d1   :  { %8224 = vmatmul.mubr.bf16.vlgmr.msra.gmra.mrb[100].mxu0 %v5912_v37 }
0x37d2   :  { %8249 = vmatprep.mubr.msk.bf16.mxu0 %vm9316_vm0, %v9314_v34 }
0x37d9   :  { %v6121_v61 = vpop.trf.xlu0 }
0x37dd   :  { %v6122_v19 = vpop.trf.xlu0 }
0x37de   :  { %v6137_v14 = vpack.c.bf16 %v6122_v19, %v6121_v61 }
0x37e0   :  { %8248 = vmatpush3.bf16.msra.mxu0 %v6137_v14 }
0x37e1   :  { %8253 = vmatprep.subr.bf16.mxu0 %v9314_v34  ;;  %v6123_v33 = vpop.trf.xlu0 }
0x37e5   :  { %v6124_v7 = vpop.trf.xlu0 }
0x37e6   :  { %v6138_v15 = vpack.c.bf16 %v6124_v7, %v6123_v33 }
0x37e8   :  { %8260 = vmatpush3.bf16.msra.mxu1 %v6138_v15 }
0x37e9   :  { %8271 = vmatprep.subr.bf16.mxu1 %v9314_v34  ;;  %v6125_v39 = vpop.trf.xlu0 }
0x37ed   :  { %v6126_v5 = vpop.trf.xlu0 }
0x37ee   :  { %v6139_v27 = vpack.c.bf16 %v6126_v5, %v6125_v39 }
0x37f1   :  { %v6127_v52 = vpop.trf.xlu0 }
0x37f5   :  { %v6128_v25 = vpop.trf.xlu0 }
0x37f6   :  { %v6140_v38 = vpack.c.bf16 %v6128_v25, %v6127_v52 }
0x38a4   :  { %v6001_v24 = vpop.f32.mrb[100].mxu0 }
0x38a5   :  { %v8225_v0 = vpop.f32.mrb[101].mxu0  ;;  %v6002_v49 = vadd.f32 %v7552_v41, %v6001_v24 }
0x38a6   :  { %v6004_v57 = vpop.f32.mrb[102].mxu0 }
0x38a7   :  { %v6005_v23 = vadd.f32 %v7552_v41, %v6004_v57  ;;  %v8226_v44 = vpop.f32.mrb[103].mxu0 }
0x38a9   :  { %v6103_v21 = vpack.c.bf16 %v6005_v23, %v6002_v49 }
0x38ab   :  { %6261 = vrot.lane.b32.xlu1 %v6103_v21, %s9317_s8  ;;  %8250 = vmatmul.mubr.msk.bf16.vlgmr.msra.gmra.mrb[104].mxu0 %vm656_vm1, %v6103_v21 }
0x38ac   :  { %8255 = vmatprep.mubr.msk.bf16.mxu0 %vm9316_vm0, %v9314_v34 }
0x38af   :  { %6381 = vrot.lane.b32.xlu1 %v6103_v21, %s9319_s20 }
0x38b3   :  { %6501 = vrot.lane.b32.xlu1 %v6103_v21, %s9318_s12 }
0x391d   :  { %v6262_v40 = vpop.permute.xlu1 %6261 }
0x391e   :  { %8262 = vmatmul.mubr.msk.bf16.vlgmr.msra.gmra.mrb[132].mxu1 %vm656_vm1, %v6262_v40 }
0x391f   :  { %8272 = vmatpush3.bf16.msra.mxu1 %v6139_v27  ;;  %8273 = vmatprep.mubr.msk.bf16.mxu1 %vm9316_vm0, %v9314_v34 }
0x3920   :  { %8283 = vmatprep.subr.bf16.mxu1 %v9314_v34 }
0x3921   :  { %v6382_v56 = vpop.permute.xlu1 %6381 }
0x3925   :  { %v6502_v3 = vpop.permute.xlu1 %6501 }
0x3926   :  { %8274 = vmatmul.mubr.msk.bf16.vlgmr.msra.gmra.mrb[136].mxu1 %vm656_vm1, %v6382_v56 }
0x3927   :  { %8284 = vmatpush3.bf16.msra.mxu1 %v6140_v38  ;;  %8285 = vmatprep.mubr.msk.bf16.mxu1 %vm9316_vm0, %v9314_v34 }
0x3928   :  { %8295 = vmatprep.subr.bf16.mxu1 %v9314_v34 }
0x392e   :  { %8286 = vmatmul.mubr.msk.bf16.vlgmr.msra.gmra.mrb[140].mxu1 %vm656_vm1, %v6502_v3 }
0x392f   :  { %8303 = vmatprep.mubr.msk.bf16.mxu1 %vm9316_vm0, %v9314_v34 }
0x397e   :  { %v6178_v20 = vpop.f32.mrb[104].mxu0 }
0x397f   :  { %v6185_v30 = vmul.f32 0.25, %v6178_v20  ;;  %v8251_v9 = vpop.f32.mrb[105].mxu0 }
0x3980   :  { %v6181_v36 = vpop.f32.mrb[106].mxu0 }
0x3981   :  { %v6187_v50 = vadd.f32 %v9024_v2, %v6185_v30  ;;  %v6186_v60 = vmul.f32 0.25, %v6181_v36  ;;  %v8252_v55 = vpop.f32.mrb[107].mxu0 }
0x3983   :  { %v6188_v26 = vadd.f32 %v9025_v28, %v6186_v60  ;;  %v6189_v53 = vsel %vm656_vm1, %v6187_v50, -inf }
0x3984   :  { %6190 = vmax.xlane.f32.xlu1 %v6189_v53 }
0x3985   :  { %v6192_v54 = vsel %vm656_vm1, %v6188_v26, -inf }
0x3986   :  { %6193 = vmax.xlane.f32.xlu0 %v6192_v54 }
0x3995   :  { %6213 = vrot.lane.b32.xlu1 %v10618_v58, %s9315_s13 }
0x399c   :  { %6334 = vrot.lane.b32.xlu0 %v10618_v58, %s9320_s28 }
0x39f1   :  { %v6300_v59 = vpop.f32.mrb[132].mxu1 }
0x39f2   :  { %v6307_v62 = vmul.f32 0.25, %v6300_v59  ;;  %v8263_v22 = vpop.f32.mrb[133].mxu1 }
0x39f3   :  { %v6303_v51 = vpop.f32.mrb[134].mxu1 }
0x39f4   :  { %v6309_v31 = vadd.f32 %v9024_v2, %v6307_v62  ;;  %v6308_v48 = vmul.f32 0.25, %v6303_v51  ;;  %v8264_v29 = vpop.f32.mrb[135].mxu1 }
0x39f6   :  { %v6310_v32 = vadd.f32 %v9025_v28, %v6308_v48  ;;  %v6311_v46 = vsel %vm656_vm1, %v6309_v31, -inf }
0x39f7   :  { %6312 = vmax.xlane.f32.xlu1 %v6311_v46 }
0x39f8   :  { %v6314_v45 = vsel %vm656_vm1, %v6310_v32, -inf }
0x39f9   :  { %v6420_v42 = vpop.f32.mrb[136].mxu1 }
0x39fa   :  { %v6427_v10 = vmul.f32 0.25, %v6420_v42  ;;  %v8275_v17 = vpop.f32.mrb[137].mxu1 }
0x39fb   :  { %6315 = vmax.xlane.f32.xlu1 %v6314_v45  ;;  %v6423_v11 = vpop.f32.mrb[138].mxu1 }
0x39fc   :  { %v6429_v12 = vadd.f32 %v9024_v2, %v6427_v10  ;;  %v6428_v43 = vmul.f32 0.25, %v6423_v11  ;;  %v8276_v13 = vpop.f32.mrb[139].mxu1 }
0x39fe   :  { %v6430_v6 = vadd.f32 %v9025_v28, %v6428_v43  ;;  %v6431_v63 = vsel %vm656_vm1, %v6429_v12, -inf }
0x39ff   :  { %6432 = vmax.xlane.f32.xlu1 %v6431_v63 }
0x3a00   :  { %v6434_v19 = vsel %vm656_vm1, %v6430_v6, -inf }
0x3a01   :  { %v6540_v35 = vpop.f32.mrb[140].mxu1 }
0x3a02   :  { %v6547_v37 = vmul.f32 0.25, %v6540_v35  ;;  %v8287_v61 = vpop.f32.mrb[141].mxu1 }
0x3a03   :  { %6435 = vmax.xlane.f32.xlu1 %v6434_v19  ;;  %v6543_v14 = vpop.f32.mrb[142].mxu1 }
0x3a04   :  { %v6549_v33 = vadd.f32 %v9024_v2, %v6547_v37  ;;  %v6548_v7 = vmul.f32 0.25, %v6543_v14  ;;  %v8288_v15 = vpop.f32.mrb[143].mxu1 }
0x3a06   :  { %v6550_v41 = vadd.f32 %v9025_v28, %v6548_v7  ;;  %v6551_v24 = vsel %vm656_vm1, %v6549_v33, -inf }
0x3a07   :  { %6552 = vmax.xlane.f32.xlu1 %v6551_v24 }
0x3a08   :  { %v6554_v0 = vsel %vm656_vm1, %v6550_v41, -inf }
0x3a0b   :  { %6555 = vmax.xlane.f32.xlu1 %v6554_v0 }
0x3a11   :  { %v6191_v57 = vpop.xlane.xlu1 %6190 }
0x3a12   :  { %v6195_v23 = vsub.f32 %v6187_v50, %v6191_v57 }
0x3a13   :  { %v6194_v44 = vpop.xlane.xlu0 %6193 }
0x3a14   :  { %v6197_v21 = vmul.f32 1.442695, %v6195_v23  ;;  %v6196_v39 = vsub.f32 %v6188_v26, %v6194_v44 }
0x3a15   :  { %v6214_v49 = vpop.permute.xlu1 %6213 }
0x3a16   :  { %8254 = vmatpush3.bf16.msra.mxu0 %v6214_v49  ;;  %8982 = vpow2.f32 %v6197_v21  ;;  %v6199_v5 = vmul.f32 1.442695, %v6196_v39 }
0x3a17   :  { %8265 = vmatprep.subr.bf16.mxu0 %v9314_v34  ;;  %v6335_v14 = vpop.permute.xlu0 %6334 }
0x3a18   :  { %8984 = vpow2.f32 %v6199_v5 }
0x3a1c   :  { %6454 = vrot.lane.b32.xlu1 %v10618_v58, %s9304_s22 }
0x3a20   :  { %v8983_v52 = vpop.eup %8982 }
0x3a21   :  { %v6201_v27 = vsel %vm656_vm1, %v8983_v52, 0.0 }
0x3a22   :  { %v8985_v40 = vpop.eup %8984 }
0x3a23   :  { %v6204_v25 = vsel %vm656_vm1, %v8985_v40, 0.0 }
0x3a40   :  { %6202 = vadd.xlane.f32.xlu1 %v6201_v27 }
0x3a44   :  { %6205 = vadd.xlane.f32.xlu1 %v6204_v25 }
0x3a84   :  { %v6313_v38 = vpop.xlane.xlu1 %6312 }
0x3a85   :  { %v6317_v56 = vsub.f32 %v6309_v31, %v6313_v38 }
0x3a87   :  { %v6319_v3 = vmul.f32 1.442695, %v6317_v56 }
0x3a88   :  { %v6316_v20 = vpop.xlane.xlu1 %6315 }
0x3a89   :  { %8986 = vpow2.f32 %v6319_v3  ;;  %v6318_v30 = vsub.f32 %v6310_v32, %v6316_v20 }
0x3a8b   :  { %v6321_v9 = vmul.f32 1.442695, %v6318_v30 }
0x3a8c   :  { %v6433_v36 = vpop.xlane.xlu1 %6432 }
0x3a8d   :  { %8988 = vpow2.f32 %v6321_v9  ;;  %v6437_v2 = vsub.f32 %v6429_v12, %v6433_v36 }
0x3a8f   :  { %v6439_v50 = vmul.f32 1.442695, %v6437_v2 }
0x3a90   :  { %v6436_v60 = vpop.xlane.xlu1 %6435 }
0x3a91   :  { %8990 = vpow2.f32 %v6439_v50  ;;  %v6438_v55 = vsub.f32 %v6430_v6, %v6436_v60  ;;  %v8742_v50 = vld [vmem:[%s10795_s27 + $0x20] sm:$0xff]  }
0x3a92   :  { %8296 = vmatpush3.bf16.msra.mxu1 %v8742_v50  ;;  %v8758_v50 = vld [vmem:[%s10796_s23 + $0xc0] ss:$8 sps:$4 sm:$0xff]  }
0x3a93   :  { %v8987_v28 = vpop.eup %8986  ;;  %v6441_v26 = vmul.f32 1.442695, %v6438_v55  ;;  %8297 = vmatprep.subr.bf16.mxu1 %v9314_v34 }
0x3a94   :  { %v6553_v53 = vpop.xlane.xlu1 %6552  ;;  %v6323_v54 = vsel %vm656_vm1, %v8987_v28, 0.0 }
0x3a95   :  { %8992 = vpow2.f32 %v6441_v26  ;;  %v6557_v59 = vsub.f32 %v6549_v33, %v6553_v53  ;;  %6324 = vadd.xlane.f32.xlu1 %v6323_v54 }
0x3a97   :  { %v8989_v62 = vpop.eup %8988  ;;  %v6559_v22 = vmul.f32 1.442695, %v6557_v59  ;;  %v8744_v59 = vld [vmem:[%s10795_s27 + $0x30] sm:$0xff]  }
0x3a98   :  { %v6556_v51 = vpop.xlane.xlu1 %6555  ;;  %v6326_v31 = vsel %vm656_vm1, %v8989_v62, 0.0 }
0x3a99   :  { %8994 = vpow2.f32 %v6559_v22  ;;  %v6558_v48 = vsub.f32 %v6550_v41, %v6556_v51  ;;  %6327 = vadd.xlane.f32.xlu1 %v6326_v31  ;;  %v8745_v22 = vld [vmem:[%s10795_s27 + $0x38] sm:$0xff]  }
0x3a9b   :  { %v8991_v29 = vpop.eup %8990  ;;  %v6561_v32 = vmul.f32 1.442695, %v6558_v48 }
0x3a9c   :  { %v6443_v46 = vsel %vm656_vm1, %v8991_v29, 0.0  ;;  %v6455_v43 = vpop.permute.xlu1 %6454 }
0x3a9d   :  { %8996 = vpow2.f32 %v6561_v32  ;;  %6444 = vadd.xlane.f32.xlu1 %v6443_v46 }
0x3a9f   :  { %v8993_v42 = vpop.eup %8992 }
0x3aa0   :  { %v6446_v10 = vsel %vm656_vm1, %v8993_v42, 0.0 }
0x3aa1   :  { %6447 = vadd.xlane.f32.xlu1 %v6446_v10 }
0x3aa3   :  { %v8995_v17 = vpop.eup %8994 }
0x3aa4   :  { %v6563_v45 = vsel %vm656_vm1, %v8995_v17, 0.0 }
0x3aa5   :  { %6564 = vadd.xlane.f32.xlu1 %v6563_v45 }
0x3aa7   :  { %v8997_v11 = vpop.eup %8996 }
0x3aa8   :  { %v6566_v12 = vsel %vm656_vm1, %v8997_v11, 0.0 }
0x3aa9   :  { %6567 = vadd.xlane.f32.xlu1 %v6566_v12 }
0x3aba   :  { %6574 = vrot.lane.b32.xlu1 %v10618_v58, %s9298_s0 }
0x3acd   :  { %v6203_v13 = vpop.xlane.xlu1 %6202 }
0x3ace   :  { %8998 = vrcp.f32 %v6203_v13 }
0x3ad1   :  { %v6206_v6 = vpop.xlane.xlu1 %6205 }
0x3ad2   :  { %9000 = vrcp.f32 %v6206_v6 }
0x3ad8   :  { %v8999_v63 = vpop.eup %8998 }
0x3ad9   :  { %v6209_v37 = vmul.f32 %v8999_v63, %v8983_v52 }
0x3adc   :  { %v9001_v35 = vpop.eup %9000 }
0x3add   :  { %v6210_v61 = vmul.f32 %v9001_v35, %v8985_v40 }
0x3adf   :  { %v6211_v19 = vpack.c.bf16 %v6210_v61, %v6209_v37 }
0x3ae1   :  { %8256 = vmatmul.mubr.msk.bf16.vlgmr.msra.gmra.mrb[108].mxu0 %vm656_vm1, %v6211_v19 }
0x3ae2   :  { %8266 = vmatpush3.bf16.msra.mxu0 %v6335_v14  ;;  %8267 = vmatprep.mubr.msk.bf16.mxu0 %vm9316_vm0, %v9314_v34 }
0x3ae3   :  { %8277 = vmatprep.subr.bf16.mxu0 %v9314_v34 }
0x3b22   :  { %v6325_v58 = vpop.xlane.xlu1 %6324 }
0x3b23   :  { %9002 = vrcp.f32 %v6325_v58 }
0x3b26   :  { %v6328_v33 = vpop.xlane.xlu1 %6327 }
0x3b27   :  { %9004 = vrcp.f32 %v6328_v33 }
0x3b2a   :  { %v6445_v7 = vpop.xlane.xlu1 %6444 }
0x3b2b   :  { %9006 = vrcp.f32 %v6445_v7  ;;  %v7578_v7 = vld [vmem:[#allocation13 + $0x1] ss:$0 sm:$0xff] }
0x3b2d   :  { %v9003_v41 = vpop.eup %9002 }
0x3b2e   :  { %v6448_v15 = vpop.xlane.xlu1 %6447  ;;  %v6331_v0 = vmul.f32 %v9003_v41, %v8987_v28  ;;  %v8743_v28 = vld [vmem:[%s10795_s27 + $0x28] sm:$0xff]  }
0x3b2f   :  { %9008 = vrcp.f32 %v6448_v15  ;;  %8298 = vmatpush3.bf16.msra.mxu1 %v8743_v28  ;;  %v8766_v28 = vld [vmem:[%s10796_s23 + $0xe4] ss:$8 sps:$4 sm:$0xff]  }
0x3b30   :  { %8299 = vmatprep.subr.bf16.mxu1 %v9314_v34 }
0x3b31   :  { %v9005_v24 = vpop.eup %9004 }
0x3b32   :  { %v6332_v57 = vmul.f32 %v9005_v24, %v8989_v62  ;;  %v6565_v49 = vpop.xlane.xlu1 %6564 }
0x3b33   :  { %9010 = vrcp.f32 %v6565_v49  ;;  %8300 = vmatpush3.bf16.msra.mxu1 %v8744_v59  ;;  %v8770_v59 = vld [vmem:[%s9507_s29 + $0xc0] sm:$0xff]  }
0x3b34   :  { %v6333_v23 = vpack.c.bf16 %v6332_v57, %v6331_v0  ;;  %8301 = vmatprep.subr.bf16.mxu1 %v9314_v34 }
0x3b35   :  { %v9007_v21 = vpop.eup %9006 }
0x3b36   :  { %8268 = vmatmul.mubr.msk.bf16.vlgmr.msra.gmra.mrb[112].mxu0 %vm656_vm1, %v6333_v23  ;;  %v6568_v44 = vpop.xlane.xlu1 %6567  ;;  %v6451_v5 = vmul.f32 %v9007_v21, %v8991_v29  ;;  %v8746_v21 = vld [vmem:[%s10796_s23 + $0x80] ss:$8 sps:$4 sm:$0xff]  }
0x3b37   :  { %8278 = vmatpush3.bf16.msra.mxu0 %v6455_v43  ;;  %9012 = vrcp.f32 %v6568_v44  ;;  %8279 = vmatprep.mubr.msk.bf16.mxu0 %vm9316_vm0, %v9314_v34 }
0x3b38   :  { %8289 = vmatprep.subr.bf16.mxu0 %v9314_v34  ;;  %8302 = vmatpush3.bf16.msra.mxu1 %v8745_v22  ;;  %v8773_v22 = vld [vmem:[%s9507_s29 + $0x88] sm:$0xff]  }
0x3b39   :  { %v9009_v39 = vpop.eup %9008  ;;  %7845 = vmatprep.subr.bf16.mxu1 %v8770_v59 }
0x3b3a   :  { %v6452_v52 = vmul.f32 %v9009_v39, %v8993_v42  ;;  %v6575_v40 = vpop.permute.xlu1 %6574  ;;  %v8748_v39 = vld [vmem:[%s10796_s23 + $0x84] ss:$8 sps:$4 sm:$0xff]  }
0x3b3c   :  { %v6453_v27 = vpack.c.bf16 %v6452_v52, %v6451_v5  ;;  %v8751_v5 = vld [vmem:[%s10796_s23 + $0x94] ss:$8 sps:$4 sm:$0xff]   ;;  %v8749_v52 = vld [vmem:[%s10796_s23 + $0x90] ss:$8 sps:$4 sm:$0xff]  }
0x3b3d   :  { %v9011_v25 = vpop.eup %9010 }
0x3b3e   :  { %8280 = vmatmul.mubr.msk.bf16.vlgmr.msra.gmra.mrb[116].mxu0 %vm656_vm1, %v6453_v27  ;;  %v6571_v56 = vmul.f32 %v9011_v25, %v8995_v17 }
0x3b3f   :  { %8290 = vmatpush3.bf16.msra.mxu0 %v6575_v40  ;;  %8291 = vmatprep.mubr.msk.bf16.mxu0 %vm9316_vm0, %v9314_v34 }
0x3b40   :  { %6854 = vmatprep.subr.bf16.mxu0 %v8748_v39 }
0x3b41   :  { %v9013_v38 = vpop.eup %9012 }
0x3b42   :  { %v6572_v3 = vmul.f32 %v9013_v38, %v8997_v11 }
0x3b44   :  { %v6573_v20 = vpack.c.bf16 %v6572_v3, %v6571_v56 }
0x3b46   :  { %8292 = vmatmul.mubr.msk.bf16.vlgmr.msra.gmra.mrb[120].mxu0 %vm656_vm1, %v6573_v20  ;;  %v8754_v20 = vld [vmem:[%s10796_s23 + $0xa4] ss:$8 sps:$4 sm:$0xff]  }
0x3b47   :  { %6886 = vmatprep.mubr.bf16.mxu0 %v9311_v1  ;;  %6855 = vmatpush1.bf16.msra.mxu0 %v8746_v21  ;;  %v5043_v21 = vld [vmem:[#allocation14 + $0x2] sm:$0x3] }
0x3b48   :  { %6856 = vmatprep.subr.bf16.mxu0 %v8751_v5  ;;  %v6767_v39 = vrot.slane %v5043_v21, %v9592_v8  ;;  %v7600_v8 = vld [vmem:[#allocation16 + $0x1] ss:$0 sm:$0xff] }
0x3b4b   :  { %6857 = vmatpush1.bf16.msra.mxu0 %v8749_v52 }
0x3b4c   :  { %6858 = vmatprep.subr.bf16.mxu0 %v8754_v20 }
0x3bb4   :  { %v6253_v30 = vpop.f32.mrb[108].mxu0 }
0x3bb5   :  { %v8257_v9 = vpop.f32.mrb[109].mxu0 }
0x3bb6   :  { %v6256_v36 = vpop.f32.mrb[110].mxu0  ;;  %v8757_v9 = vld [vmem:[%s10796_s23 + $0xb4] ss:$8 sps:$4 sm:$0xff]  }
0x3bb7   :  { %v8258_v2 = vpop.f32.mrb[111].mxu0 }
0x3bb8   :  { %v8760_v2 = vld [vmem:[%s10796_s23 + $0xc4] ss:$8 sps:$4 sm:$0xff]  }
0x3c09   :  { %v6374_v60 = vpop.f32.mrb[112].mxu0 }
0x3c0a   :  { %v8269_v55 = vpop.f32.mrb[113].mxu0 }
0x3c0b   :  { %v6377_v26 = vpop.f32.mrb[114].mxu0  ;;  %v8761_v55 = vld [vmem:[%s10796_s23 + $0xd0] ss:$8 sps:$4 sm:$0xff]  }
0x3c0c   :  { %v8459_v53 = vpack.i.bf16 %v6377_v26, %v6374_v60  ;;  %v8270_v54 = vpop.f32.mrb[115].mxu0  ;;  %v8763_v60 = vld [vmem:[%s10796_s23 + $0xd4] ss:$8 sps:$4 sm:$0xff]   ;;  %v8764_v26 = vld [vmem:[%s10796_s23 + $0xe0] ss:$8 sps:$4 sm:$0xff]  }
0x3c0d   :  { %v8767_v54 = vld [vmem:[%s10796_s23 + $0xf0] ss:$8 sps:$4 sm:$0xff]  }
0x3c0e   :  { %8460 = vrot.lane.b32.xlu0 %v8459_v53, %s9298_s0  ;;  %v8769_v53 = vld [vmem:[%s10796_s23 + $0xf4] ss:$8 sps:$4 sm:$0xff]  }
0x3c11   :  { %v6494_v1 = vpop.f32.mrb[116].mxu0 }
0x3c12   :  { %v8281_v62 = vpop.f32.mrb[117].mxu0 }
0x3c13   :  { %v6497_v51 = vpop.f32.mrb[118].mxu0  ;;  %v8772_v62 = vld [vmem:[%s9507_s29 + $0xc8] sm:$0xff]  }
0x3c14   :  { %v8464_v31 = vpack.i.bf16 %v6497_v51, %v6494_v1  ;;  %v8282_v48 = vpop.f32.mrb[119].mxu0  ;;  %v8771_v1 = vld [vmem:[%s9507_s29 + $0x80] sm:$0xff]   ;;  %v8774_v51 = vld [vmem:[%s9507_s29 + $0xd0] sm:$0xff]  }
0x3c15   :  { %v8776_v48 = vld [vmem:[%s9507_s29 + $0xd8] sm:$0xff]  }
0x3c16   :  { %8465 = vrot.lane.b32.xlu1 %v8464_v31, %s9304_s22  ;;  %v8775_v31 = vld [vmem:[%s9507_s29 + $0x90] sm:$0xff]  }
0x3c19   :  { %v6614_v29 = vpop.f32.mrb[120].mxu0 }
0x3c1a   :  { %v8293_v32 = vpop.f32.mrb[121].mxu0 }
0x3c1b   :  { %v6617_v46 = vpop.f32.mrb[122].mxu0  ;;  %v8778_v32 = vld [vmem:[%s9507_s29 + $0xe0] sm:$0xff]  }
0x3c1c   :  { %v8469_v42 = vpack.i.bf16 %v6617_v46, %v6614_v29  ;;  %v8294_v10 = vpop.f32.mrb[123].mxu0  ;;  %v8777_v29 = vld [vmem:[%s9507_s29 + $0x98] sm:$0xff]   ;;  %v8779_v46 = vld [vmem:[%s9507_s29 + $0xa0] sm:$0xff]  }
0x3c1e   :  { %8470 = vrot.lane.b32.xlu0 %v8469_v42, %s9320_s28  ;;  %v8780_v42 = vld [vmem:[%s9507_s29 + $0xe8] sm:$0xff]  }
0x3c80   :  { %v8461_v17 = vpop.permute.xlu0 %8460 }
0x3c81   :  { %v8463_v11 = vunpack.i.h.bf16 %v8461_v17  ;;  %v8462_v12 = vunpack.i.l.bf16 %v8461_v17 }
0x3c83   :  { %v6646_v6 = vsel %vm656_vm1, %v6256_v36, %v8463_v11  ;;  %v6645_v63 = vsel %vm656_vm1, %v6253_v30, %v8462_v12  ;;  %v8752_v30 = vld [vmem:[%s10796_s23 + $0xa0] ss:$8 sps:$4 sm:$0xff]   ;;  %v8755_v36 = vld [vmem:[%s10796_s23 + $0xb0] ss:$8 sps:$4 sm:$0xff]  }
0x3c84   :  { %6859 = vmatpush1.bf16.msra.mxu0 %v8752_v30 }
0x3c85   :  { %6860 = vmatprep.subr.bf16.mxu0 %v8757_v9 }
0x3c88   :  { %v8466_v45 = vpop.permute.xlu1 %8465  ;;  %6861 = vmatpush1.bf16.msra.mxu0 %v8755_v36 }
0x3c89   :  { %v8468_v34 = vunpack.i.h.bf16 %v8466_v45  ;;  %v8467_v43 = vunpack.i.l.bf16 %v8466_v45  ;;  %6862 = vmatprep.subr.bf16.mxu0 %v8760_v2 }
0x3c8b   :  { %v6648_v61 = vsel %vm1160_vm2, %v6646_v6, %v8468_v34  ;;  %v6647_v19 = vsel %vm1160_vm2, %v6645_v63, %v8467_v43  ;;  %v9026_v43 = vld [vmem:[%s10788_s7 + $0x4] sm:$0x7] }
0x3c8c   :  { %6863 = vmatpush1.bf16.msra.mxu0 %v8758_v50 }
0x3c8d   :  { %6864 = vmatprep.subr.bf16.mxu0 %v8763_v60 }
0x3c90   :  { %v8471_v13 = vpop.permute.xlu0 %8470  ;;  %6865 = vmatpush1.bf16.msra.mxu0 %v8761_v55 }
0x3c91   :  { %v8473_v35 = vunpack.i.h.bf16 %v8471_v13  ;;  %v8472_v37 = vunpack.i.l.bf16 %v8471_v13  ;;  %6866 = vmatprep.subr.bf16.mxu0 %v8766_v28  ;;  %v6753_v13 = vrot.slane %v9026_v43, %v9603_v18 }
0x3c93   :  { %v6649_v14 = vsel %vm1163_vm3, %v6647_v19, %v8472_v37  ;;  %v6650_v58 = vsel %vm1163_vm3, %v6648_v61, %v8473_v35  ;;  %v9027_v19 = vld [vmem:[%s10789_s19 + $0x4] sm:$0x7] }
0x3c94   :  { %v6651_v33 = vpack.c.bf16 %v6650_v58, %v6649_v14  ;;  %6867 = vmatpush1.bf16.msra.mxu0 %v8764_v26  ;;  %v6759_v14 = vrot.slane %v9027_v19, %v9603_v18  ;;  %v6771_v18 = vrot.slane %v5043_v21, %v9600_v16 }
0x3c95   :  { %6868 = vmatprep.subr.bf16.mxu0 %v8769_v53 }
0x3c96   :  { %8304 = vmatmul.mubr.msk.bf16.vlgmr.msra.gmra.mrb[144].mxu1 %vm1197_vm4, %v6651_v33 }
0x3c97   :  { %7846 = vmatpush3.bf16.msra.mxu1 %v8771_v1 }
0x3c98   :  { %6869 = vmatpush1.bf16.msra.mxu0 %v8767_v54  ;;  %7847 = vmatprep.subr.bf16.mxu1 %v8772_v62 }
0x3c9b   :  { %7848 = vmatpush3.bf16.msra.mxu1 %v8773_v22 }
0x3c9c   :  { %7849 = vmatprep.subr.bf16.mxu1 %v8774_v51 }
0x3c9f   :  { %7850 = vmatpush3.bf16.msra.mxu1 %v8775_v31 }
0x3ca0   :  { %7851 = vmatprep.subr.bf16.mxu1 %v8776_v48 }
0x3ca3   :  { %7852 = vmatpush3.bf16.msra.mxu1 %v8777_v29 }
0x3ca4   :  { %7853 = vmatprep.subr.bf16.mxu1 %v8778_v32 }
0x3ca7   :  { %7854 = vmatpush3.bf16.msra.mxu1 %v8779_v46 }
0x3ca8   :  { %7855 = vmatprep.subr.bf16.mxu1 %v8780_v42 }
0x3d69   :  { %v6719_v15 = vpop.f32.mrb[144].mxu1 }
0x3d6a   :  { %v6720_v41 = vadd.f32 %v7578_v7, %v6719_v15  ;;  %v8305_v24 = vpop.f32.mrb[145].mxu1 }
0x3d6b   :  { %v6722_v0 = vpop.f32.mrb[146].mxu1  ;;  %v8782_v24 = vld [vmem:[%s9507_s29 + $0xf0] sm:$0xff]  }
0x3d6c   :  { %v10674_v57 = vadd.f32 %v6720_v41, %v10556_v4  ;;  %v6723_v49 = vadd.f32 %v7578_v7, %v6722_v0  ;;  %v8306_v23 = vpop.f32.mrb[147].mxu1  ;;  %v8781_v41 = vld [vmem:[%s9507_s29 + $0xa8] sm:$0xff]   ;;  %v8783_v0 = vld [vmem:[%s9507_s29 + $0xb0] sm:$0xff]  }
0x3d6d   :  { %7856 = vmatpush3.bf16.msra.mxu1 %v8781_v41  ;;  %v8785_v23 = vld [vmem:[%s9507_s29 + $0xb8] sm:$0xff]  }
0x3d6e   :  { %v10677_v44 = vadd.f32 %v6723_v49, %v10559_v47  ;;  %6728 = vadd.xlane.f32.xlu1 %v10674_v57  ;;  %7857 = vmatprep.subr.bf16.mxu1 %v8782_v24  ;;  %v8784_v49 = vld [vmem:[%s9507_s29 + $0xf8] sm:$0xff]   ;;  %s9321_s29 = smov [#allocation17]  }
0x3d6f   :  { %s7055_s0 = sshll.u32 %s9321_s29, 4  ;;  %s7056_s0 = int_to_ptr.vmem [resolvable:$true] %s7055_s0 }
0x3d70   :  { %6730 = vadd.xlane.f32.xlu0 %v10677_v44  ;;  %s9226_s22 = scalar_lea.vmem %s7056_s0, 256  ;;  %p9231_p3 = scmp.lt.s32.totalorder %s7056_s0, %s7056_s0 }
0x3d71   :  { %7858 = vmatpush3.bf16.msra.mxu1 %v8783_v0  ;;  %p9227_p2 = scmp.ne.s32.totalorder %s7056_s0, %s9226_s22  ;;  %p9232_p4 = scmp.lt.s32.totalorder %s9226_s22, %s9226_s22 }
0x3d72   :  { %7859 = vmatprep.subr.bf16.mxu1 %v8784_v49 }
0x3d73   :  { %p9233_p5 = por %p9232_p4, %p9231_p3 }
0x3d75   :  { %7860 = vmatpush3.bf16.msra.mxu1 %v8785_v23  ;;  %p9234_p6 = pnand %p9233_p5, %p9227_p2 }
0x3dfb   :  { %v6729_v4 = vpop.xlane.xlu1 %6728 }
0x3dfc   :  { %v6732_v27 = vmul.f32 0.0078125, %v6729_v4 }
0x3dfd   :  { %v6731_v47 = vpop.xlane.xlu0 %6730 }
0x3dfe   :  { %v10686_v40 = vsub.f32 %v10674_v57, %v6732_v27  ;;  %v6733_v25 = vmul.f32 0.0078125, %v6731_v47 }
0x3e00   :  { %v10689_v38 = vsub.f32 %v10677_v44, %v6733_v25  ;;  %v6736_v56 = vmul.f32 %v10686_v40, %v10686_v40 }
0x3e02   :  { %6738 = vadd.xlane.f32.xlu0 %v6736_v56  ;;  %v6737_v3 = vmul.f32 %v10689_v38, %v10689_v38 }
0x3e04   :  { %6740 = vadd.xlane.f32.xlu1 %v6737_v3 }
0x3e8f   :  { %v6739_v10 = vpop.xlane.xlu0 %6738 }
0x3e90   :  { %v6742_v17 = vmul.f32 0.0078125, %v6739_v10 }
0x3e91   :  { %v6741_v45 = vpop.xlane.xlu1 %6740 }
0x3e92   :  { %v6744_v11 = vadd.f32 1e-05, %v6742_v17  ;;  %v6743_v12 = vmul.f32 0.0078125, %v6741_v45 }
0x3e94   :  { %9014 = vrsqrt.f32 %v6744_v11  ;;  %v6745_v34 = vadd.f32 1e-05, %v6743_v12 }
0x3e96   :  { %9016 = vrsqrt.f32 %v6745_v34 }
0x3e9e   :  { %v9015_v6 = vpop.eup %9014 }
0x3e9f   :  { %v6748_v63 = vmul.f32 %v9015_v6, %v10686_v40 }
0x3ea0   :  { %v9017_v35 = vpop.eup %9016 }
0x3ea1   :  { %v6749_v37 = vmul.f32 %v9017_v35, %v10689_v38  ;;  %v6754_v61 = vmul.f32 %v6753_v13, %v6748_v63 }
0x3ea3   :  { %v6755_v58 = vmul.f32 %v6753_v13, %v6749_v37  ;;  %v6760_v33 = vadd.f32 %v6759_v14, %v6754_v61 }
0x3ea5   :  { %v6761_v7 = vadd.f32 %v6759_v14, %v6755_v58 }
0x3ea7   :  { %v6762_v15 = vpack.c.bf16 %v6761_v7, %v6760_v33 }
0x3ea9   :  { %6887 = vmatmul.mubr.bf16.vlgmr.msra.gmra.mrb[124].mxu0 %v6762_v15 }
0x3f7c   :  { %v6888_v5 = vpop.f32.mrb[124].mxu0 }
0x3f7d   :  { %v6889_v52 = vadd.f32 %v6888_v5, %v6767_v39  ;;  %v6890_v4 = vpop.f32.mrb[125].mxu0 }
0x3f7e   :  { %v6891_v27 = vadd.f32 %v6890_v4, %v6771_v18  ;;  %v6892_v47 = vpop.f32.mrb[126].mxu0 }
0x3f7f   :  { %v6893_v40 = vadd.f32 %v6892_v47, %v6767_v39  ;;  %v6894_v25 = vpop.f32.mrb[127].mxu0  ;;  %v6897_v56 = vmax.f32 %v6889_v52, 0.0 }
0x3f80   :  { %v6895_v38 = vadd.f32 %v6894_v25, %v6771_v18  ;;  %v6898_v20 = vmax.f32 %v6891_v27, 0.0 }
0x3f81   :  { %v6899_v3 = vmax.f32 %v6893_v40, 0.0 }
0x3f82   :  { %v6900_v30 = vmax.f32 %v6895_v38, 0.0 }
0x3f83   :  { %v6901_v9 = vpack.c.bf16 %v6899_v3, %v6897_v56 }
0x3f84   :  { %v6902_v36 = vpack.c.bf16 %v6900_v30, %v6898_v20 }
0x3f86   :  { %7037 = vmatprep.mubr.bf16.mxu1 %v6902_v36 }
0x3f87   :  { %7038 = vmatmul.mubr.bf16.vlgmr.msra.gmra.mrb[148].mxu1 %v6901_v9 }
0x405a   :  { %v7861_v2 = vpop.f32.mrb[148].mxu1 }
0x405b   :  { %v7862_v50 = vpop.f32.mrb[149].mxu1 }
0x405c   :  { %v7863_v16 = vadd.f32 %v7862_v50, %v7861_v2  ;;  %v7864_v60 = vpop.f32.mrb[150].mxu1 }
0x405d   :  { %v7865_v55 = vpop.f32.mrb[151].mxu1 }
0x405e   :  { %v7040_v28 = vadd.f32 %v7863_v16, %v7600_v8  ;;  %v7866_v26 = vadd.f32 %v7865_v55, %v7864_v60 }
0x4060   :  { %v7046_v53 = vadd.f32 %v7040_v28, %v10674_v57  ;;  %v7043_v54 = vadd.f32 %v7866_v26, %v7600_v8 }
0x4062   :  { %7048 = vst [vmem:[#allocation17] sm:$0xff] %v7046_v53  ;;  %v7047_v59 = vadd.f32 %v7043_v54, %v10677_v44 }
0x4064   :  { %7049 = vst [vmem:[#allocation17 + $0x8] sm:$0xff] %v7047_v59 }
0x4065   :  { %9237 = shalt.err (!%p9234_p6)
}
0x4066   :  { %s9238_s4 = scalar_lea.hbm %s9517_s14, 256 }
0x4067   :  { %p9239_p7 = scmp.ne.s32.totalorder %s9517_s14, %s9238_s4  ;;  %p9242_p8 = scmp.lt.u32.totalorder %s9238_s4, %s9517_s14 }
0x4069   :  { %p9244_p9 = pnand %p9242_p8, %p9239_p7 }
0x406b   :  { %9247 = shalt.err (!%p9244_p9)
}
0x406c   :  { %s9322_s26 = smov 128   ;;  %s9323_s5 = smov 8  }
0x406d   :  { %7061 = dma.vmem_to_hbm [thread:$0]  %s7056_s0, 256, %s9517_s14, [#allocation4], %s9322_s26, %s9322_s26, %s9323_s5  }
0x406e   :  { %9258 = dma.done.wait [#allocation4], 256  }
0x406f   :  { %9259 = vsyncadd [#allocation4], 4294967040 }
0x4070   :  { %7065 = vsyncpa [#allocation3], 1 }
0x4071   :  { %7066 = vsyncpa [#allocation6], 1 }
0x4072   :  { %7067 = vsyncpa [#allocation9], 1 }
0x4073   :  { %7068 = vsyncpa [#allocation12], 1 }
0x4074   :  { %7069 = vsyncpa [#allocation15], 1 }
0x4075   :  { %7070 = vsyncpa [#allocation4], 1 }

</bundles_post_ra>
